<compile_context>
chip_gen: v6e
topology: v6e:2x2x1
jax: 0.10.0
libtpu: 0.0.40
codegen_flags: <defaults>
</compile_context>

<pallas_src>
import jax
import jax.numpy as jnp
from jax import lax
from jax.experimental import pallas as pl
from jax.experimental.pallas import tpu as pltpu

C_IN, C_MID, C_OUT = 2, 2, 1
K = 3
KK = 2 * K - 1  # composite kernel size (5)


def _fold_params(params):
    """Fold BN into conv1 and conv1 into conv2 -> composite 5x5 weights + border terms."""
    w1, b1, gamma, beta, rmean, rvar, w2 = params
    eps = 1e-5
    scale = gamma.astype(jnp.float32) / jnp.sqrt(rvar.astype(jnp.float32) + eps)
    w1f = w1.astype(jnp.float32) * scale[:, None, None, None]            # [C_MID, C_IN, 3, 3]
    b1f = (b1.astype(jnp.float32) - rmean.astype(jnp.float32)) * scale + beta.astype(jnp.float32)
    w2s = w2.astype(jnp.float32)[0]                                      # [C_MID, 3, 3]
    w2t = w2s.at[:, 0, :].set(0.0)                                       # drop conv2 dy2==0 taps (top row)

    def conv_full_2d(a, b):  # [3,3] (*) [3,3] -> [5,5], out[t,s] = sum_{p+q=t, r+u=s} a[p,r]*b[q,u]
        out = jnp.zeros((KK, KK), jnp.float32)
        for p in range(K):
            for q in range(K):
                out = out.at[p:p + K, q:q + K].add(a[p, q] * b)
        return out

    def conv_full_1d(a, b):  # [3] (*) [3] -> [5]
        out = jnp.zeros((KK,), jnp.float32)
        for p in range(K):
            out = out.at[p:p + K].add(a[p] * b)
        return out

    def eff_2d(w2x):          # composite 5x5 kernel per input channel
        return jnp.stack([sum(conv_full_2d(w2x[c], w1f[c, ci]) for c in range(C_MID))
                          for ci in range(C_IN)])                         # [C_IN, 5, 5]

    def eff_left_1d(w2x):     # x==0 over-count kernel: conv2 dx2==0 taps * conv1 dx1==2 taps
        return jnp.stack([sum(conv_full_1d(w2x[c, :, 0], w1f[c, ci, :, K - 1]) for c in range(C_MID))
                          for ci in range(C_IN)])                         # [C_IN, 5]

    we_full = eff_2d(w2s).reshape(-1)
    we_top = eff_2d(w2t).reshape(-1)
    wl_full = eff_left_1d(w2s).reshape(-1)
    wl_top = eff_left_1d(w2t).reshape(-1)

    # Bias scalars: sum_c b1f[c] * (sum of conv2 taps that land inside the image).
    s_full = jnp.sum(b1f * jnp.sum(w2s, axis=(1, 2)))
    s_top = jnp.sum(b1f * jnp.sum(w2s[:, 1:, :], axis=(1, 2)))
    s_left = jnp.sum(b1f * jnp.sum(w2s[:, :, 1:], axis=(1, 2)))
    s_corner = jnp.sum(b1f * jnp.sum(w2s[:, 1:, 1:], axis=(1, 2)))
    bsc = jnp.stack([s_full, s_top, s_left, s_corner])
    return we_full, we_top, wl_full, wl_top, bsc


def _pick_b_blk(n_pad):
    """Largest 128-multiple batch block (<=1024) dividing n_pad with >=2 grid steps
    (so v7x's two TensorCores both get work); falls back to a single step."""
    for cand in (1024, 512, 384, 256, 128):
        if n_pad % cand == 0 and n_pad // cand >= 2:
            return cand
    return n_pad


def _make_kernel(H, W, b_blk):
    OH, OW = H // 2, W // 2

    def kernel(wef_ref, wet_ref, wlf_ref, wlt_ref, bsc_ref, xs_ref, o_ref):
        # wef/wet: SMEM f32[C_IN*5*5] composite 5x5 weights (full / top-row variant)
        # wlf/wlt: SMEM f32[C_IN*5]   left-column (x==0) correction kernels
        # bsc:     SMEM f32[4]        bias scalars [interior, top, left, corner]
        # xs_ref:  VMEM f32[C_IN*2, H, OW+2, b_blk]  even/odd column planes, batch in lanes
        # o_ref:   VMEM f32[C_OUT, OH, OW, b_blk]
        col0 = lax.broadcasted_iota(jnp.int32, (OW, b_blk), 0) == 0  # hoisted out of the y loop

        for y in range(OH):
            top = (y == 0)
            we = wet_ref if top else wef_ref
            wl = wlt_ref if top else wlf_ref
            base = bsc_ref[1] if top else bsc_ref[0]
            dbias = (bsc_ref[3] - bsc_ref[1]) if top else (bsc_ref[2] - bsc_ref[0])

            acc = jnp.full((OW, b_blk), base, dtype=jnp.float32)       # one output row, all lanes
            corr = jnp.full((1, b_blk), dbias, dtype=jnp.float32)      # x==0 column fix-up
            for ci in range(C_IN):
                for t in range(KK):
                    r = 2 * y + t - 2                                  # input row (trace-time int)
                    if r < 0 or r >= H:
                        continue                                       # zero row padding: skip tap
                    # x==0 over-count: only input column 0 (even plane, sublane 1) contributes.
                    corr -= wl[ci * KK + t] * xs_ref[2 * ci, r, 1:2, :]
                    for s in range(KK):
                        w = we[(ci * KK + t) * KK + s]
                        # column 2x+s-2  ->  plane parity s%2, dense sublane slice starting at s//2
                        acc += w * xs_ref[2 * ci + (s & 1), r, s // 2:s // 2 + OW, :]
            acc = jnp.where(col0, acc + corr, acc)
            o_ref[0, y, :, :] = jnp.maximum(acc, 0.0)

    return kernel


def dummy_forward(x, params):
    """x: f32[N, 2, H, W] (NCHW). Returns f32[N, 1, H//2, W//2]."""
    N, C, H, W = x.shape
    assert C == C_IN and H % 2 == 0 and W % 2 == 0
    OH, OW = H // 2, W // 2
    PW = OW + 2

    we_full, we_top, wl_full, wl_top, bsc = _fold_params(params)

    n_pad = ((N + 127) // 128) * 128
    b_blk = _pick_b_blk(n_pad)

    # NCHW -> batch-in-lanes CHWN; pad batch to a lane multiple.
    # TODO(synk): these relayout passes live in XLA outside the kernel; if adjacent ops
    #             also used the CHWN layout they could be elided entirely.
    xt = jnp.transpose(x.astype(jnp.float32), (1, 2, 3, 0))              # [C, H, W, N]
    xt = jnp.pad(xt, ((0, 0), (0, 0), (0, 0), (0, n_pad - N)))           # [C, H, W, n_pad]
    # De-interleave W into even/odd column planes (+1 zero column each side) so every
    # stride-2 tap of the composite conv is a dense, unit-stride sublane read.
    xe = jnp.pad(xt[:, :, 0::2, :], ((0, 0), (0, 0), (1, 1), (0, 0)))    # [C, H, OW+2, n_pad]
    xo = jnp.pad(xt[:, :, 1::2, :], ((0, 0), (0, 0), (1, 1), (0, 0)))    # [C, H, OW+2, n_pad]
    xs = jnp.stack([xe, xo], axis=1).reshape(C_IN * 2, H, PW, n_pad)     # [(ci,parity), H, OW+2, n_pad]

    smem = pl.BlockSpec(memory_space=pltpu.MemorySpace.SMEM)
    yt = pl.pallas_call(
        _make_kernel(H, W, b_blk),
        out_shape=jax.ShapeDtypeStruct((C_OUT, OH, OW, n_pad), jnp.float32),
        grid=(n_pad // b_blk,),
        in_specs=[smem, smem, smem, smem, smem,
                  pl.BlockSpec((C_IN * 2, H, PW, b_blk), lambda n: (0, 0, 0, n))],
        out_specs=pl.BlockSpec((C_OUT, OH, OW, b_blk), lambda n: (0, 0, 0, n)),
        compiler_params=pltpu.CompilerParams(dimension_semantics=("parallel",)),
    )(we_full, we_top, wl_full, wl_top, bsc, xs)

    # [C_OUT, OH, OW, N_pad] -> [N, C_OUT, OH, OW]
    return jnp.transpose(yt, (3, 0, 1, 2))[:N]


def reference_forward(x, params):
    """Pure-JAX reference (matches the PyTorch eval-mode forward)."""
    w1, b1, gamma, beta, rmean, rvar, w2 = params
    eps = 1e-5
    y = lax.conv_general_dilated(x, w1, (1, 1), ((1, 1), (1, 1)),
                                 dimension_numbers=("NCHW", "OIHW", "NCHW"),
                                 precision=lax.Precision.HIGHEST)
    y = y + b1[None, :, None, None]
    scale = gamma / jnp.sqrt(rvar + eps)
    shift = beta - rmean * scale
    y = y * scale[None, :, None, None] + shift[None, :, None, None]
    y = lax.conv_general_dilated(y, w2, (2, 2), ((1, 1), (1, 1)),
                                 dimension_numbers=("NCHW", "OIHW", "NCHW"),
                                 precision=lax.Precision.HIGHEST)
    return jnp.maximum(y, 0.0)


if __name__ == "__main__":
    H = W = 16
    key = jax.random.PRNGKey(0)
    kx, k1, kb1, k2, kg, kb, km, kv = jax.random.split(key, 8)

    # Deterministic synthetic parameters (shapes from DummyModel.__init__).
    w1 = 0.2 * jax.random.normal(k1, (C_MID, C_IN, K, K), jnp.float32)   # conv1.weight
    b1 = 0.1 * jax.random.normal(kb1, (C_MID,), jnp.float32)             # conv1.bias
    gamma = 1.0 + 0.1 * jax.random.normal(kg, (C_MID,), jnp.float32)     # bn.weight
    beta = 0.1 * jax.random.normal(kb, (C_MID,), jnp.float32)            # bn.bias
    rmean = 0.1 * jax.random.normal(km, (C_MID,), jnp.float32)           # bn.running_mean
    rvar = 0.5 + jax.random.uniform(kv, (C_MID,), jnp.float32)           # bn.running_var
    w2 = 0.2 * jax.random.normal(k2, (C_OUT, C_MID, K, K), jnp.float32)  # conv2.weight
    params = (w1, b1, gamma, beta, rmean, rvar, w2)

    # Example input: batch=2, channels=2 (required by conv1), spatial 16x16.
    x = jax.random.normal(kx, (2, C_IN, H, W), jnp.float32)

    fwd = jax.jit(dummy_forward)
    y = jax.block_until_ready(fwd(x, params))

    y_ref = reference_forward(x, params)
    assert y.shape == (2, C_OUT, H // 2, W // 2), y.shape
    assert jnp.allclose(y, y_ref, atol=3e-5, rtol=1e-4), float(jnp.max(jnp.abs(y - y_ref)))

    print("KERNEL_OK")
</pallas_src>

<mosaic_0001>
module attributes {stable_mosaic.version = 11 : i64} {
  func.func @kernel(%arg0: i32, %arg1: memref<50xf32, #tpu.memory_space<smem>>, %arg2: memref<50xf32, #tpu.memory_space<smem>>, %arg3: memref<10xf32, #tpu.memory_space<smem>>, %arg4: memref<10xf32, #tpu.memory_space<smem>>, %arg5: memref<4xf32, #tpu.memory_space<smem>>, %arg6: memref<4x16x10x128xf32, #tpu.memory_space<vmem>>, %arg7: memref<1x8x8x128xf32, #tpu.memory_space<vmem>>) attributes {dimension_semantics = [#tpu.dimension_semantics<parallel>], iteration_bounds = array<i64: 1>, scalar_prefetch = 0 : i64, scratch_operands = 0 : i64, tpu.core_type = #tpu.core_type<tc>, window_params = [{transform_indices = @transform_0, window_bounds = array<i64: 50>}, {transform_indices = @transform_1, window_bounds = array<i64: 50>}, {transform_indices = @transform_2, window_bounds = array<i64: 10>}, {transform_indices = @transform_3, window_bounds = array<i64: 10>}, {transform_indices = @transform_4, window_bounds = array<i64: 4>}, {transform_indices = @transform_5, window_bounds = array<i64: 4, 16, 10, 128>}, {transform_indices = @transform_6, window_bounds = array<i64: 1, 8, 8, 128>}]} {
    %0 = tpu.iota {dimensions = array<i32: 0>} : vector<8x128xi32>
    %c0_i32 = arith.constant 0 : i32
    %1 = vector.broadcast %c0_i32 : i32 to vector<8x128xi32>
    %2 = arith.cmpi eq, %0, %1 : vector<8x128xi32>
    %c1 = arith.constant 1 : index
    %3 = memref.load %arg5[%c1] : memref<4xf32, #tpu.memory_space<smem>>
    %c3 = arith.constant 3 : index
    %4 = memref.load %arg5[%c3] : memref<4xf32, #tpu.memory_space<smem>>
    %c1_0 = arith.constant 1 : index
    %5 = memref.load %arg5[%c1_0] : memref<4xf32, #tpu.memory_space<smem>>
    %6 = arith.subf %4, %5 : f32
    %7 = vector.broadcast %3 : f32 to vector<8x128xf32>
    %8 = vector.broadcast %6 : f32 to vector<1x128xf32>
    %c2 = arith.constant 2 : index
    %9 = memref.load %arg4[%c2] : memref<10xf32, #tpu.memory_space<smem>>
    %c0 = arith.constant 0 : index
    %c0_1 = arith.constant 0 : index
    %c1_2 = arith.constant 1 : index
    %c0_3 = arith.constant 0 : index
    %10 = vector.load %arg6[%c0, %c0_1, %c1_2, %c0_3] : memref<4x16x10x128xf32, #tpu.memory_space<vmem>>, vector<1x1x1x128xf32>
    %11 = vector.shape_cast %10 : vector<1x1x1x128xf32> to vector<1x128xf32>
    %12 = vector.broadcast %9 : f32 to vector<1x128xf32>
    %13 = arith.mulf %12, %11 : vector<1x128xf32>
    %14 = arith.subf %8, %13 : vector<1x128xf32>
    %c10 = arith.constant 10 : index
    %15 = memref.load %arg2[%c10] : memref<50xf32, #tpu.memory_space<smem>>
    %c0_4 = arith.constant 0 : index
    %c0_5 = arith.constant 0 : index
    %c0_6 = arith.constant 0 : index
    %c0_7 = arith.constant 0 : index
    %16 = vector.load %arg6[%c0_4, %c0_5, %c0_6, %c0_7] : memref<4x16x10x128xf32, #tpu.memory_space<vmem>>, vector<1x1x8x128xf32>
    %17 = vector.shape_cast %16 : vector<1x1x8x128xf32> to vector<8x128xf32>
    %18 = vector.broadcast %15 : f32 to vector<8x128xf32>
    %19 = arith.mulf %18, %17 : vector<8x128xf32>
    %20 = arith.addf %7, %19 : vector<8x128xf32>
    %c11 = arith.constant 11 : index
    %21 = memref.load %arg2[%c11] : memref<50xf32, #tpu.memory_space<smem>>
    %c1_8 = arith.constant 1 : index
    %c0_9 = arith.constant 0 : index
    %c0_10 = arith.constant 0 : index
    %c0_11 = arith.constant 0 : index
    %22 = vector.load %arg6[%c1_8, %c0_9, %c0_10, %c0_11] : memref<4x16x10x128xf32, #tpu.memory_space<vmem>>, vector<1x1x8x128xf32>
    %23 = vector.shape_cast %22 : vector<1x1x8x128xf32> to vector<8x128xf32>
    %24 = vector.broadcast %21 : f32 to vector<8x128xf32>
    %25 = arith.mulf %24, %23 : vector<8x128xf32>
    %26 = arith.addf %20, %25 : vector<8x128xf32>
    %c12 = arith.constant 12 : index
    %27 = memref.load %arg2[%c12] : memref<50xf32, #tpu.memory_space<smem>>
    %c0_12 = arith.constant 0 : index
    %c0_13 = arith.constant 0 : index
    %c1_14 = arith.constant 1 : index
    %c0_15 = arith.constant 0 : index
    %28 = vector.load %arg6[%c0_12, %c0_13, %c1_14, %c0_15] : memref<4x16x10x128xf32, #tpu.memory_space<vmem>>, vector<1x1x8x128xf32>
    %29 = vector.shape_cast %28 : vector<1x1x8x128xf32> to vector<8x128xf32>
    %30 = vector.broadcast %27 : f32 to vector<8x128xf32>
    %31 = arith.mulf %30, %29 : vector<8x128xf32>
    %32 = arith.addf %26, %31 : vector<8x128xf32>
    %c13 = arith.constant 13 : index
    %33 = memref.load %arg2[%c13] : memref<50xf32, #tpu.memory_space<smem>>
    %c1_16 = arith.constant 1 : index
    %c0_17 = arith.constant 0 : index
    %c1_18 = arith.constant 1 : index
    %c0_19 = arith.constant 0 : index
    %34 = vector.load %arg6[%c1_16, %c0_17, %c1_18, %c0_19] : memref<4x16x10x128xf32, #tpu.memory_space<vmem>>, vector<1x1x8x128xf32>
    %35 = vector.shape_cast %34 : vector<1x1x8x128xf32> to vector<8x128xf32>
    %36 = vector.broadcast %33 : f32 to vector<8x128xf32>
    %37 = arith.mulf %36, %35 : vector<8x128xf32>
    %38 = arith.addf %32, %37 : vector<8x128xf32>
    %c14 = arith.constant 14 : index
    %39 = memref.load %arg2[%c14] : memref<50xf32, #tpu.memory_space<smem>>
    %c0_20 = arith.constant 0 : index
    %c0_21 = arith.constant 0 : index
    %c2_22 = arith.constant 2 : index
    %c0_23 = arith.constant 0 : index
    %40 = vector.load %arg6[%c0_20, %c0_21, %c2_22, %c0_23] : memref<4x16x10x128xf32, #tpu.memory_space<vmem>>, vector<1x1x8x128xf32>
    %41 = vector.shape_cast %40 : vector<1x1x8x128xf32> to vector<8x128xf32>
    %42 = vector.broadcast %39 : f32 to vector<8x128xf32>
    %43 = arith.mulf %42, %41 : vector<8x128xf32>
    %44 = arith.addf %38, %43 : vector<8x128xf32>
    %c3_24 = arith.constant 3 : index
    %45 = memref.load %arg4[%c3_24] : memref<10xf32, #tpu.memory_space<smem>>
    %c0_25 = arith.constant 0 : index
    %c1_26 = arith.constant 1 : index
    %c1_27 = arith.constant 1 : index
    %c0_28 = arith.constant 0 : index
    %46 = vector.load %arg6[%c0_25, %c1_26, %c1_27, %c0_28] : memref<4x16x10x128xf32, #tpu.memory_space<vmem>>, vector<1x1x1x128xf32>
    %47 = vector.shape_cast %46 : vector<1x1x1x128xf32> to vector<1x128xf32>
    %48 = vector.broadcast %45 : f32 to vector<1x128xf32>
    %49 = arith.mulf %48, %47 : vector<1x128xf32>
    %50 = arith.subf %14, %49 : vector<1x128xf32>
    %c15 = arith.constant 15 : index
    %51 = memref.load %arg2[%c15] : memref<50xf32, #tpu.memory_space<smem>>
    %c0_29 = arith.constant 0 : index
    %c1_30 = arith.constant 1 : index
    %c0_31 = arith.constant 0 : index
    %c0_32 = arith.constant 0 : index
    %52 = vector.load %arg6[%c0_29, %c1_30, %c0_31, %c0_32] : memref<4x16x10x128xf32, #tpu.memory_space<vmem>>, vector<1x1x8x128xf32>
    %53 = vector.shape_cast %52 : vector<1x1x8x128xf32> to vector<8x128xf32>
    %54 = vector.broadcast %51 : f32 to vector<8x128xf32>
    %55 = arith.mulf %54, %53 : vector<8x128xf32>
    %56 = arith.addf %44, %55 : vector<8x128xf32>
    %c16 = arith.constant 16 : index
    %57 = memref.load %arg2[%c16] : memref<50xf32, #tpu.memory_space<smem>>
    %c1_33 = arith.constant 1 : index
    %c1_34 = arith.constant 1 : index
    %c0_35 = arith.constant 0 : index
    %c0_36 = arith.constant 0 : index
    %58 = vector.load %arg6[%c1_33, %c1_34, %c0_35, %c0_36] : memref<4x16x10x128xf32, #tpu.memory_space<vmem>>, vector<1x1x8x128xf32>
    %59 = vector.shape_cast %58 : vector<1x1x8x128xf32> to vector<8x128xf32>
    %60 = vector.broadcast %57 : f32 to vector<8x128xf32>
    %61 = arith.mulf %60, %59 : vector<8x128xf32>
    %62 = arith.addf %56, %61 : vector<8x128xf32>
    %c17 = arith.constant 17 : index
    %63 = memref.load %arg2[%c17] : memref<50xf32, #tpu.memory_space<smem>>
    %c0_37 = arith.constant 0 : index
    %c1_38 = arith.constant 1 : index
    %c1_39 = arith.constant 1 : index
    %c0_40 = arith.constant 0 : index
    %64 = vector.load %arg6[%c0_37, %c1_38, %c1_39, %c0_40] : memref<4x16x10x128xf32, #tpu.memory_space<vmem>>, vector<1x1x8x128xf32>
    %65 = vector.shape_cast %64 : vector<1x1x8x128xf32> to vector<8x128xf32>
    %66 = vector.broadcast %63 : f32 to vector<8x128xf32>
    %67 = arith.mulf %66, %65 : vector<8x128xf32>
    %68 = arith.addf %62, %67 : vector<8x128xf32>
    %c18 = arith.constant 18 : index
    %69 = memref.load %arg2[%c18] : memref<50xf32, #tpu.memory_space<smem>>
    %c1_41 = arith.constant 1 : index
    %c1_42 = arith.constant 1 : index
    %c1_43 = arith.constant 1 : index
    %c0_44 = arith.constant 0 : index
    %70 = vector.load %arg6[%c1_41, %c1_42, %c1_43, %c0_44] : memref<4x16x10x128xf32, #tpu.memory_space<vmem>>, vector<1x1x8x128xf32>
    %71 = vector.shape_cast %70 : vector<1x1x8x128xf32> to vector<8x128xf32>
    %72 = vector.broadcast %69 : f32 to vector<8x128xf32>
    %73 = arith.mulf %72, %71 : vector<8x128xf32>
    %74 = arith.addf %68, %73 : vector<8x128xf32>
    %c19 = arith.constant 19 : index
    %75 = memref.load %arg2[%c19] : memref<50xf32, #tpu.memory_space<smem>>
    %c0_45 = arith.constant 0 : index
    %c1_46 = arith.constant 1 : index
    %c2_47 = arith.constant 2 : index
    %c0_48 = arith.constant 0 : index
    %76 = vector.load %arg6[%c0_45, %c1_46, %c2_47, %c0_48] : memref<4x16x10x128xf32, #tpu.memory_space<vmem>>, vector<1x1x8x128xf32>
    %77 = vector.shape_cast %76 : vector<1x1x8x128xf32> to vector<8x128xf32>
    %78 = vector.broadcast %75 : f32 to vector<8x128xf32>
    %79 = arith.mulf %78, %77 : vector<8x128xf32>
    %80 = arith.addf %74, %79 : vector<8x128xf32>
    %c4 = arith.constant 4 : index
    %81 = memref.load %arg4[%c4] : memref<10xf32, #tpu.memory_space<smem>>
    %c0_49 = arith.constant 0 : index
    %c2_50 = arith.constant 2 : index
    %c1_51 = arith.constant 1 : index
    %c0_52 = arith.constant 0 : index
    %82 = vector.load %arg6[%c0_49, %c2_50, %c1_51, %c0_52] : memref<4x16x10x128xf32, #tpu.memory_space<vmem>>, vector<1x1x1x128xf32>
    %83 = vector.shape_cast %82 : vector<1x1x1x128xf32> to vector<1x128xf32>
    %84 = vector.broadcast %81 : f32 to vector<1x128xf32>
    %85 = arith.mulf %84, %83 : vector<1x128xf32>
    %86 = arith.subf %50, %85 : vector<1x128xf32>
    %c20 = arith.constant 20 : index
    %87 = memref.load %arg2[%c20] : memref<50xf32, #tpu.memory_space<smem>>
    %c0_53 = arith.constant 0 : index
    %c2_54 = arith.constant 2 : index
    %c0_55 = arith.constant 0 : index
    %c0_56 = arith.constant 0 : index
    %88 = vector.load %arg6[%c0_53, %c2_54, %c0_55, %c0_56] : memref<4x16x10x128xf32, #tpu.memory_space<vmem>>, vector<1x1x8x128xf32>
    %89 = vector.shape_cast %88 : vector<1x1x8x128xf32> to vector<8x128xf32>
    %90 = vector.broadcast %87 : f32 to vector<8x128xf32>
    %91 = arith.mulf %90, %89 : vector<8x128xf32>
    %92 = arith.addf %80, %91 : vector<8x128xf32>
    %c21 = arith.constant 21 : index
    %93 = memref.load %arg2[%c21] : memref<50xf32, #tpu.memory_space<smem>>
    %c1_57 = arith.constant 1 : index
    %c2_58 = arith.constant 2 : index
    %c0_59 = arith.constant 0 : index
    %c0_60 = arith.constant 0 : index
    %94 = vector.load %arg6[%c1_57, %c2_58, %c0_59, %c0_60] : memref<4x16x10x128xf32, #tpu.memory_space<vmem>>, vector<1x1x8x128xf32>
    %95 = vector.shape_cast %94 : vector<1x1x8x128xf32> to vector<8x128xf32>
    %96 = vector.broadcast %93 : f32 to vector<8x128xf32>
    %97 = arith.mulf %96, %95 : vector<8x128xf32>
    %98 = arith.addf %92, %97 : vector<8x128xf32>
    %c22 = arith.constant 22 : index
    %99 = memref.load %arg2[%c22] : memref<50xf32, #tpu.memory_space<smem>>
    %c0_61 = arith.constant 0 : index
    %c2_62 = arith.constant 2 : index
    %c1_63 = arith.constant 1 : index
    %c0_64 = arith.constant 0 : index
    %100 = vector.load %arg6[%c0_61, %c2_62, %c1_63, %c0_64] : memref<4x16x10x128xf32, #tpu.memory_space<vmem>>, vector<1x1x8x128xf32>
    %101 = vector.shape_cast %100 : vector<1x1x8x128xf32> to vector<8x128xf32>
    %102 = vector.broadcast %99 : f32 to vector<8x128xf32>
    %103 = arith.mulf %102, %101 : vector<8x128xf32>
    %104 = arith.addf %98, %103 : vector<8x128xf32>
    %c23 = arith.constant 23 : index
    %105 = memref.load %arg2[%c23] : memref<50xf32, #tpu.memory_space<smem>>
    %c1_65 = arith.constant 1 : index
    %c2_66 = arith.constant 2 : index
    %c1_67 = arith.constant 1 : index
    %c0_68 = arith.constant 0 : index
    %106 = vector.load %arg6[%c1_65, %c2_66, %c1_67, %c0_68] : memref<4x16x10x128xf32, #tpu.memory_space<vmem>>, vector<1x1x8x128xf32>
    %107 = vector.shape_cast %106 : vector<1x1x8x128xf32> to vector<8x128xf32>
    %108 = vector.broadcast %105 : f32 to vector<8x128xf32>
    %109 = arith.mulf %108, %107 : vector<8x128xf32>
    %110 = arith.addf %104, %109 : vector<8x128xf32>
    %c24 = arith.constant 24 : index
    %111 = memref.load %arg2[%c24] : memref<50xf32, #tpu.memory_space<smem>>
    %c0_69 = arith.constant 0 : index
    %c2_70 = arith.constant 2 : index
    %c2_71 = arith.constant 2 : index
    %c0_72 = arith.constant 0 : index
    %112 = vector.load %arg6[%c0_69, %c2_70, %c2_71, %c0_72] : memref<4x16x10x128xf32, #tpu.memory_space<vmem>>, vector<1x1x8x128xf32>
    %113 = vector.shape_cast %112 : vector<1x1x8x128xf32> to vector<8x128xf32>
    %114 = vector.broadcast %111 : f32 to vector<8x128xf32>
    %115 = arith.mulf %114, %113 : vector<8x128xf32>
    %116 = arith.addf %110, %115 : vector<8x128xf32>
    %c7 = arith.constant 7 : index
    %117 = memref.load %arg4[%c7] : memref<10xf32, #tpu.memory_space<smem>>
    %c2_73 = arith.constant 2 : index
    %c0_74 = arith.constant 0 : index
    %c1_75 = arith.constant 1 : index
    %c0_76 = arith.constant 0 : index
    %118 = vector.load %arg6[%c2_73, %c0_74, %c1_75, %c0_76] : memref<4x16x10x128xf32, #tpu.memory_space<vmem>>, vector<1x1x1x128xf32>
    %119 = vector.shape_cast %118 : vector<1x1x1x128xf32> to vector<1x128xf32>
    %120 = vector.broadcast %117 : f32 to vector<1x128xf32>
    %121 = arith.mulf %120, %119 : vector<1x128xf32>
    %122 = arith.subf %86, %121 : vector<1x128xf32>
    %c35 = arith.constant 35 : index
    %123 = memref.load %arg2[%c35] : memref<50xf32, #tpu.memory_space<smem>>
    %c2_77 = arith.constant 2 : index
    %c0_78 = arith.constant 0 : index
    %c0_79 = arith.constant 0 : index
    %c0_80 = arith.constant 0 : index
    %124 = vector.load %arg6[%c2_77, %c0_78, %c0_79, %c0_80] : memref<4x16x10x128xf32, #tpu.memory_space<vmem>>, vector<1x1x8x128xf32>
    %125 = vector.shape_cast %124 : vector<1x1x8x128xf32> to vector<8x128xf32>
    %126 = vector.broadcast %123 : f32 to vector<8x128xf32>
    %127 = arith.mulf %126, %125 : vector<8x128xf32>
    %128 = arith.addf %116, %127 : vector<8x128xf32>
    %c36 = arith.constant 36 : index
    %129 = memref.load %arg2[%c36] : memref<50xf32, #tpu.memory_space<smem>>
    %c3_81 = arith.constant 3 : index
    %c0_82 = arith.constant 0 : index
    %c0_83 = arith.constant 0 : index
    %c0_84 = arith.constant 0 : index
    %130 = vector.load %arg6[%c3_81, %c0_82, %c0_83, %c0_84] : memref<4x16x10x128xf32, #tpu.memory_space<vmem>>, vector<1x1x8x128xf32>
    %131 = vector.shape_cast %130 : vector<1x1x8x128xf32> to vector<8x128xf32>
    %132 = vector.broadcast %129 : f32 to vector<8x128xf32>
    %133 = arith.mulf %132, %131 : vector<8x128xf32>
    %134 = arith.addf %128, %133 : vector<8x128xf32>
    %c37 = arith.constant 37 : index
    %135 = memref.load %arg2[%c37] : memref<50xf32, #tpu.memory_space<smem>>
    %c2_85 = arith.constant 2 : index
    %c0_86 = arith.constant 0 : index
    %c1_87 = arith.constant 1 : index
    %c0_88 = arith.constant 0 : index
    %136 = vector.load %arg6[%c2_85, %c0_86, %c1_87, %c0_88] : memref<4x16x10x128xf32, #tpu.memory_space<vmem>>, vector<1x1x8x128xf32>
    %137 = vector.shape_cast %136 : vector<1x1x8x128xf32> to vector<8x128xf32>
    %138 = vector.broadcast %135 : f32 to vector<8x128xf32>
    %139 = arith.mulf %138, %137 : vector<8x128xf32>
    %140 = arith.addf %134, %139 : vector<8x128xf32>
    %c38 = arith.constant 38 : index
    %141 = memref.load %arg2[%c38] : memref<50xf32, #tpu.memory_space<smem>>
    %c3_89 = arith.constant 3 : index
    %c0_90 = arith.constant 0 : index
    %c1_91 = arith.constant 1 : index
    %c0_92 = arith.constant 0 : index
    %142 = vector.load %arg6[%c3_89, %c0_90, %c1_91, %c0_92] : memref<4x16x10x128xf32, #tpu.memory_space<vmem>>, vector<1x1x8x128xf32>
    %143 = vector.shape_cast %142 : vector<1x1x8x128xf32> to vector<8x128xf32>
    %144 = vector.broadcast %141 : f32 to vector<8x128xf32>
    %145 = arith.mulf %144, %143 : vector<8x128xf32>
    %146 = arith.addf %140, %145 : vector<8x128xf32>
    %c39 = arith.constant 39 : index
    %147 = memref.load %arg2[%c39] : memref<50xf32, #tpu.memory_space<smem>>
    %c2_93 = arith.constant 2 : index
    %c0_94 = arith.constant 0 : index
    %c2_95 = arith.constant 2 : index
    %c0_96 = arith.constant 0 : index
    %148 = vector.load %arg6[%c2_93, %c0_94, %c2_95, %c0_96] : memref<4x16x10x128xf32, #tpu.memory_space<vmem>>, vector<1x1x8x128xf32>
    %149 = vector.shape_cast %148 : vector<1x1x8x128xf32> to vector<8x128xf32>
    %150 = vector.broadcast %147 : f32 to vector<8x128xf32>
    %151 = arith.mulf %150, %149 : vector<8x128xf32>
    %152 = arith.addf %146, %151 : vector<8x128xf32>
    %c8 = arith.constant 8 : index
    %153 = memref.load %arg4[%c8] : memref<10xf32, #tpu.memory_space<smem>>
    %c2_97 = arith.constant 2 : index
    %c1_98 = arith.constant 1 : index
    %c1_99 = arith.constant 1 : index
    %c0_100 = arith.constant 0 : index
    %154 = vector.load %arg6[%c2_97, %c1_98, %c1_99, %c0_100] : memref<4x16x10x128xf32, #tpu.memory_space<vmem>>, vector<1x1x1x128xf32>
    %155 = vector.shape_cast %154 : vector<1x1x1x128xf32> to vector<1x128xf32>
    %156 = vector.broadcast %153 : f32 to vector<1x128xf32>
    %157 = arith.mulf %156, %155 : vector<1x128xf32>
    %158 = arith.subf %122, %157 : vector<1x128xf32>
    %c40 = arith.constant 40 : index
    %159 = memref.load %arg2[%c40] : memref<50xf32, #tpu.memory_space<smem>>
    %c2_101 = arith.constant 2 : index
    %c1_102 = arith.constant 1 : index
    %c0_103 = arith.constant 0 : index
    %c0_104 = arith.constant 0 : index
    %160 = vector.load %arg6[%c2_101, %c1_102, %c0_103, %c0_104] : memref<4x16x10x128xf32, #tpu.memory_space<vmem>>, vector<1x1x8x128xf32>
    %161 = vector.shape_cast %160 : vector<1x1x8x128xf32> to vector<8x128xf32>
    %162 = vector.broadcast %159 : f32 to vector<8x128xf32>
    %163 = arith.mulf %162, %161 : vector<8x128xf32>
    %164 = arith.addf %152, %163 : vector<8x128xf32>
    %c41 = arith.constant 41 : index
    %165 = memref.load %arg2[%c41] : memref<50xf32, #tpu.memory_space<smem>>
    %c3_105 = arith.constant 3 : index
    %c1_106 = arith.constant 1 : index
    %c0_107 = arith.constant 0 : index
    %c0_108 = arith.constant 0 : index
    %166 = vector.load %arg6[%c3_105, %c1_106, %c0_107, %c0_108] : memref<4x16x10x128xf32, #tpu.memory_space<vmem>>, vector<1x1x8x128xf32>
    %167 = vector.shape_cast %166 : vector<1x1x8x128xf32> to vector<8x128xf32>
    %168 = vector.broadcast %165 : f32 to vector<8x128xf32>
    %169 = arith.mulf %168, %167 : vector<8x128xf32>
    %170 = arith.addf %164, %169 : vector<8x128xf32>
    %c42 = arith.constant 42 : index
    %171 = memref.load %arg2[%c42] : memref<50xf32, #tpu.memory_space<smem>>
    %c2_109 = arith.constant 2 : index
    %c1_110 = arith.constant 1 : index
    %c1_111 = arith.constant 1 : index
    %c0_112 = arith.constant 0 : index
    %172 = vector.load %arg6[%c2_109, %c1_110, %c1_111, %c0_112] : memref<4x16x10x128xf32, #tpu.memory_space<vmem>>, vector<1x1x8x128xf32>
    %173 = vector.shape_cast %172 : vector<1x1x8x128xf32> to vector<8x128xf32>
    %174 = vector.broadcast %171 : f32 to vector<8x128xf32>
    %175 = arith.mulf %174, %173 : vector<8x128xf32>
    %176 = arith.addf %170, %175 : vector<8x128xf32>
    %c43 = arith.constant 43 : index
    %177 = memref.load %arg2[%c43] : memref<50xf32, #tpu.memory_space<smem>>
    %c3_113 = arith.constant 3 : index
    %c1_114 = arith.constant 1 : index
    %c1_115 = arith.constant 1 : index
    %c0_116 = arith.constant 0 : index
    %178 = vector.load %arg6[%c3_113, %c1_114, %c1_115, %c0_116] : memref<4x16x10x128xf32, #tpu.memory_space<vmem>>, vector<1x1x8x128xf32>
    %179 = vector.shape_cast %178 : vector<1x1x8x128xf32> to vector<8x128xf32>
    %180 = vector.broadcast %177 : f32 to vector<8x128xf32>
    %181 = arith.mulf %180, %179 : vector<8x128xf32>
    %182 = arith.addf %176, %181 : vector<8x128xf32>
    %c44 = arith.constant 44 : index
    %183 = memref.load %arg2[%c44] : memref<50xf32, #tpu.memory_space<smem>>
    %c2_117 = arith.constant 2 : index
    %c1_118 = arith.constant 1 : index
    %c2_119 = arith.constant 2 : index
    %c0_120 = arith.constant 0 : index
    %184 = vector.load %arg6[%c2_117, %c1_118, %c2_119, %c0_120] : memref<4x16x10x128xf32, #tpu.memory_space<vmem>>, vector<1x1x8x128xf32>
    %185 = vector.shape_cast %184 : vector<1x1x8x128xf32> to vector<8x128xf32>
    %186 = vector.broadcast %183 : f32 to vector<8x128xf32>
    %187 = arith.mulf %186, %185 : vector<8x128xf32>
    %188 = arith.addf %182, %187 : vector<8x128xf32>
    %c9 = arith.constant 9 : index
    %189 = memref.load %arg4[%c9] : memref<10xf32, #tpu.memory_space<smem>>
    %c2_121 = arith.constant 2 : index
    %c2_122 = arith.constant 2 : index
    %c1_123 = arith.constant 1 : index
    %c0_124 = arith.constant 0 : index
    %190 = vector.load %arg6[%c2_121, %c2_122, %c1_123, %c0_124] : memref<4x16x10x128xf32, #tpu.memory_space<vmem>>, vector<1x1x1x128xf32>
    %191 = vector.shape_cast %190 : vector<1x1x1x128xf32> to vector<1x128xf32>
    %192 = vector.broadcast %189 : f32 to vector<1x128xf32>
    %193 = arith.mulf %192, %191 : vector<1x128xf32>
    %194 = arith.subf %158, %193 : vector<1x128xf32>
    %c45 = arith.constant 45 : index
    %195 = memref.load %arg2[%c45] : memref<50xf32, #tpu.memory_space<smem>>
    %c2_125 = arith.constant 2 : index
    %c2_126 = arith.constant 2 : index
    %c0_127 = arith.constant 0 : index
    %c0_128 = arith.constant 0 : index
    %196 = vector.load %arg6[%c2_125, %c2_126, %c0_127, %c0_128] : memref<4x16x10x128xf32, #tpu.memory_space<vmem>>, vector<1x1x8x128xf32>
    %197 = vector.shape_cast %196 : vector<1x1x8x128xf32> to vector<8x128xf32>
    %198 = vector.broadcast %195 : f32 to vector<8x128xf32>
    %199 = arith.mulf %198, %197 : vector<8x128xf32>
    %200 = arith.addf %188, %199 : vector<8x128xf32>
    %c46 = arith.constant 46 : index
    %201 = memref.load %arg2[%c46] : memref<50xf32, #tpu.memory_space<smem>>
    %c3_129 = arith.constant 3 : index
    %c2_130 = arith.constant 2 : index
    %c0_131 = arith.constant 0 : index
    %c0_132 = arith.constant 0 : index
    %202 = vector.load %arg6[%c3_129, %c2_130, %c0_131, %c0_132] : memref<4x16x10x128xf32, #tpu.memory_space<vmem>>, vector<1x1x8x128xf32>
    %203 = vector.shape_cast %202 : vector<1x1x8x128xf32> to vector<8x128xf32>
    %204 = vector.broadcast %201 : f32 to vector<8x128xf32>
    %205 = arith.mulf %204, %203 : vector<8x128xf32>
    %206 = arith.addf %200, %205 : vector<8x128xf32>
    %c47 = arith.constant 47 : index
    %207 = memref.load %arg2[%c47] : memref<50xf32, #tpu.memory_space<smem>>
    %c2_133 = arith.constant 2 : index
    %c2_134 = arith.constant 2 : index
    %c1_135 = arith.constant 1 : index
    %c0_136 = arith.constant 0 : index
    %208 = vector.load %arg6[%c2_133, %c2_134, %c1_135, %c0_136] : memref<4x16x10x128xf32, #tpu.memory_space<vmem>>, vector<1x1x8x128xf32>
    %209 = vector.shape_cast %208 : vector<1x1x8x128xf32> to vector<8x128xf32>
    %210 = vector.broadcast %207 : f32 to vector<8x128xf32>
    %211 = arith.mulf %210, %209 : vector<8x128xf32>
    %212 = arith.addf %206, %211 : vector<8x128xf32>
    %c48 = arith.constant 48 : index
    %213 = memref.load %arg2[%c48] : memref<50xf32, #tpu.memory_space<smem>>
    %c3_137 = arith.constant 3 : index
    %c2_138 = arith.constant 2 : index
    %c1_139 = arith.constant 1 : index
    %c0_140 = arith.constant 0 : index
    %214 = vector.load %arg6[%c3_137, %c2_138, %c1_139, %c0_140] : memref<4x16x10x128xf32, #tpu.memory_space<vmem>>, vector<1x1x8x128xf32>
    %215 = vector.shape_cast %214 : vector<1x1x8x128xf32> to vector<8x128xf32>
    %216 = vector.broadcast %213 : f32 to vector<8x128xf32>
    %217 = arith.mulf %216, %215 : vector<8x128xf32>
    %218 = arith.addf %212, %217 : vector<8x128xf32>
    %c49 = arith.constant 49 : index
    %219 = memref.load %arg2[%c49] : memref<50xf32, #tpu.memory_space<smem>>
    %c2_141 = arith.constant 2 : index
    %c2_142 = arith.constant 2 : index
    %c2_143 = arith.constant 2 : index
    %c0_144 = arith.constant 0 : index
    %220 = vector.load %arg6[%c2_141, %c2_142, %c2_143, %c0_144] : memref<4x16x10x128xf32, #tpu.memory_space<vmem>>, vector<1x1x8x128xf32>
    %221 = vector.shape_cast %220 : vector<1x1x8x128xf32> to vector<8x128xf32>
    %222 = vector.broadcast %219 : f32 to vector<8x128xf32>
    %223 = arith.mulf %222, %221 : vector<8x128xf32>
    %224 = arith.addf %218, %223 : vector<8x128xf32>
    %225 = vector.broadcast %194 : vector<1x128xf32> to vector<8x128xf32>
    %226 = arith.addf %224, %225 : vector<8x128xf32>
    %227 = arith.select %2, %226, %224 : vector<8x128xi1>, vector<8x128xf32>
    %cst = arith.constant 0.000000e+00 : f32
    %228 = vector.broadcast %cst : f32 to vector<8x128xf32>
    %229 = arith.maximumf %227, %228 : vector<8x128xf32>
    %c0_145 = arith.constant 0 : index
    %c0_146 = arith.constant 0 : index
    %c0_147 = arith.constant 0 : index
    %c0_148 = arith.constant 0 : index
    %230 = vector.load %arg7[%c0_145, %c0_146, %c0_147, %c0_148] : memref<1x8x8x128xf32, #tpu.memory_space<vmem>>, vector<1x1x8x128xf32>
    %231 = vector.shape_cast %230 : vector<1x1x8x128xf32> to vector<8x128xf32>
    %232 = vector.shape_cast %229 : vector<8x128xf32> to vector<1x1x8x128xf32>
    tpu.vector_store %arg7[%c0_145, %c0_146, %c0_147, %c0_148], %232 {strides = array<i32>} : memref<1x8x8x128xf32, #tpu.memory_space<vmem>>, vector<1x1x8x128xf32>,
    %c0_149 = arith.constant 0 : index
    %233 = memref.load %arg5[%c0_149] : memref<4xf32, #tpu.memory_space<smem>>
    %c2_150 = arith.constant 2 : index
    %234 = memref.load %arg5[%c2_150] : memref<4xf32, #tpu.memory_space<smem>>
    %c0_151 = arith.constant 0 : index
    %235 = memref.load %arg5[%c0_151] : memref<4xf32, #tpu.memory_space<smem>>
    %236 = arith.subf %234, %235 : f32
    %237 = vector.broadcast %233 : f32 to vector<8x128xf32>
    %238 = vector.broadcast %236 : f32 to vector<1x128xf32>
    %c0_152 = arith.constant 0 : index
    %239 = memref.load %arg3[%c0_152] : memref<10xf32, #tpu.memory_space<smem>>
    %c0_153 = arith.constant 0 : index
    %c0_154 = arith.constant 0 : index
    %c1_155 = arith.constant 1 : index
    %c0_156 = arith.constant 0 : index
    %240 = vector.load %arg6[%c0_153, %c0_154, %c1_155, %c0_156] : memref<4x16x10x128xf32, #tpu.memory_space<vmem>>, vector<1x1x1x128xf32>
    %241 = vector.shape_cast %240 : vector<1x1x1x128xf32> to vector<1x128xf32>
    %242 = vector.broadcast %239 : f32 to vector<1x128xf32>
    %243 = arith.mulf %242, %241 : vector<1x128xf32>
    %244 = arith.subf %238, %243 : vector<1x128xf32>
    %c0_157 = arith.constant 0 : index
    %245 = memref.load %arg1[%c0_157] : memref<50xf32, #tpu.memory_space<smem>>
    %c0_158 = arith.constant 0 : index
    %c0_159 = arith.constant 0 : index
    %c0_160 = arith.constant 0 : index
    %c0_161 = arith.constant 0 : index
    %246 = vector.load %arg6[%c0_158, %c0_159, %c0_160, %c0_161] : memref<4x16x10x128xf32, #tpu.memory_space<vmem>>, vector<1x1x8x128xf32>
    %247 = vector.shape_cast %246 : vector<1x1x8x128xf32> to vector<8x128xf32>
    %248 = vector.broadcast %245 : f32 to vector<8x128xf32>
    %249 = arith.mulf %248, %247 : vector<8x128xf32>
    %250 = arith.addf %237, %249 : vector<8x128xf32>
    %c1_162 = arith.constant 1 : index
    %251 = memref.load %arg1[%c1_162] : memref<50xf32, #tpu.memory_space<smem>>
    %c1_163 = arith.constant 1 : index
    %c0_164 = arith.constant 0 : index
    %c0_165 = arith.constant 0 : index
    %c0_166 = arith.constant 0 : index
    %252 = vector.load %arg6[%c1_163, %c0_164, %c0_165, %c0_166] : memref<4x16x10x128xf32, #tpu.memory_space<vmem>>, vector<1x1x8x128xf32>
    %253 = vector.shape_cast %252 : vector<1x1x8x128xf32> to vector<8x128xf32>
    %254 = vector.broadcast %251 : f32 to vector<8x128xf32>
    %255 = arith.mulf %254, %253 : vector<8x128xf32>
    %256 = arith.addf %250, %255 : vector<8x128xf32>
    %c2_167 = arith.constant 2 : index
    %257 = memref.load %arg1[%c2_167] : memref<50xf32, #tpu.memory_space<smem>>
    %c0_168 = arith.constant 0 : index
    %c0_169 = arith.constant 0 : index
    %c1_170 = arith.constant 1 : index
    %c0_171 = arith.constant 0 : index
    %258 = vector.load %arg6[%c0_168, %c0_169, %c1_170, %c0_171] : memref<4x16x10x128xf32, #tpu.memory_space<vmem>>, vector<1x1x8x128xf32>
    %259 = vector.shape_cast %258 : vector<1x1x8x128xf32> to vector<8x128xf32>
    %260 = vector.broadcast %257 : f32 to vector<8x128xf32>
    %261 = arith.mulf %260, %259 : vector<8x128xf32>
    %262 = arith.addf %256, %261 : vector<8x128xf32>
    %c3_172 = arith.constant 3 : index
    %263 = memref.load %arg1[%c3_172] : memref<50xf32, #tpu.memory_space<smem>>
    %c1_173 = arith.constant 1 : index
    %c0_174 = arith.constant 0 : index
    %c1_175 = arith.constant 1 : index
    %c0_176 = arith.constant 0 : index
    %264 = vector.load %arg6[%c1_173, %c0_174, %c1_175, %c0_176] : memref<4x16x10x128xf32, #tpu.memory_space<vmem>>, vector<1x1x8x128xf32>
    %265 = vector.shape_cast %264 : vector<1x1x8x128xf32> to vector<8x128xf32>
    %266 = vector.broadcast %263 : f32 to vector<8x128xf32>
    %267 = arith.mulf %266, %265 : vector<8x128xf32>
    %268 = arith.addf %262, %267 : vector<8x128xf32>
    %c4_177 = arith.constant 4 : index
    %269 = memref.load %arg1[%c4_177] : memref<50xf32, #tpu.memory_space<smem>>
    %c0_178 = arith.constant 0 : index
    %c0_179 = arith.constant 0 : index
    %c2_180 = arith.constant 2 : index
    %c0_181 = arith.constant 0 : index
    %270 = vector.load %arg6[%c0_178, %c0_179, %c2_180, %c0_181] : memref<4x16x10x128xf32, #tpu.memory_space<vmem>>, vector<1x1x8x128xf32>
    %271 = vector.shape_cast %270 : vector<1x1x8x128xf32> to vector<8x128xf32>
    %272 = vector.broadcast %269 : f32 to vector<8x128xf32>
    %273 = arith.mulf %272, %271 : vector<8x128xf32>
    %274 = arith.addf %268, %273 : vector<8x128xf32>
    %c1_182 = arith.constant 1 : index
    %275 = memref.load %arg3[%c1_182] : memref<10xf32, #tpu.memory_space<smem>>
    %c0_183 = arith.constant 0 : index
    %c1_184 = arith.constant 1 : index
    %c1_185 = arith.constant 1 : index
    %c0_186 = arith.constant 0 : index
    %276 = vector.load %arg6[%c0_183, %c1_184, %c1_185, %c0_186] : memref<4x16x10x128xf32, #tpu.memory_space<vmem>>, vector<1x1x1x128xf32>
    %277 = vector.shape_cast %276 : vector<1x1x1x128xf32> to vector<1x128xf32>
    %278 = vector.broadcast %275 : f32 to vector<1x128xf32>
    %279 = arith.mulf %278, %277 : vector<1x128xf32>
    %280 = arith.subf %244, %279 : vector<1x128xf32>
    %c5 = arith.constant 5 : index
    %281 = memref.load %arg1[%c5] : memref<50xf32, #tpu.memory_space<smem>>
    %c0_187 = arith.constant 0 : index
    %c1_188 = arith.constant 1 : index
    %c0_189 = arith.constant 0 : index
    %c0_190 = arith.constant 0 : index
    %282 = vector.load %arg6[%c0_187, %c1_188, %c0_189, %c0_190] : memref<4x16x10x128xf32, #tpu.memory_space<vmem>>, vector<1x1x8x128xf32>
    %283 = vector.shape_cast %282 : vector<1x1x8x128xf32> to vector<8x128xf32>
    %284 = vector.broadcast %281 : f32 to vector<8x128xf32>
    %285 = arith.mulf %284, %283 : vector<8x128xf32>
    %286 = arith.addf %274, %285 : vector<8x128xf32>
    %c6 = arith.constant 6 : index
    %287 = memref.load %arg1[%c6] : memref<50xf32, #tpu.memory_space<smem>>
    %c1_191 = arith.constant 1 : index
    %c1_192 = arith.constant 1 : index
    %c0_193 = arith.constant 0 : index
    %c0_194 = arith.constant 0 : index
    %288 = vector.load %arg6[%c1_191, %c1_192, %c0_193, %c0_194] : memref<4x16x10x128xf32, #tpu.memory_space<vmem>>, vector<1x1x8x128xf32>
    %289 = vector.shape_cast %288 : vector<1x1x8x128xf32> to vector<8x128xf32>
    %290 = vector.broadcast %287 : f32 to vector<8x128xf32>
    %291 = arith.mulf %290, %289 : vector<8x128xf32>
    %292 = arith.addf %286, %291 : vector<8x128xf32>
    %c7_195 = arith.constant 7 : index
    %293 = memref.load %arg1[%c7_195] : memref<50xf32, #tpu.memory_space<smem>>
    %c0_196 = arith.constant 0 : index
    %c1_197 = arith.constant 1 : index
    %c1_198 = arith.constant 1 : index
    %c0_199 = arith.constant 0 : index
    %294 = vector.load %arg6[%c0_196, %c1_197, %c1_198, %c0_199] : memref<4x16x10x128xf32, #tpu.memory_space<vmem>>, vector<1x1x8x128xf32>
    %295 = vector.shape_cast %294 : vector<1x1x8x128xf32> to vector<8x128xf32>
    %296 = vector.broadcast %293 : f32 to vector<8x128xf32>
    %297 = arith.mulf %296, %295 : vector<8x128xf32>
    %298 = arith.addf %292, %297 : vector<8x128xf32>
    %c8_200 = arith.constant 8 : index
    %299 = memref.load %arg1[%c8_200] : memref<50xf32, #tpu.memory_space<smem>>
    %c1_201 = arith.constant 1 : index
    %c1_202 = arith.constant 1 : index
    %c1_203 = arith.constant 1 : index
    %c0_204 = arith.constant 0 : index
    %300 = vector.load %arg6[%c1_201, %c1_202, %c1_203, %c0_204] : memref<4x16x10x128xf32, #tpu.memory_space<vmem>>, vector<1x1x8x128xf32>
    %301 = vector.shape_cast %300 : vector<1x1x8x128xf32> to vector<8x128xf32>
    %302 = vector.broadcast %299 : f32 to vector<8x128xf32>
    %303 = arith.mulf %302, %301 : vector<8x128xf32>
    %304 = arith.addf %298, %303 : vector<8x128xf32>
    %c9_205 = arith.constant 9 : index
    %305 = memref.load %arg1[%c9_205] : memref<50xf32, #tpu.memory_space<smem>>
    %c0_206 = arith.constant 0 : index
    %c1_207 = arith.constant 1 : index
    %c2_208 = arith.constant 2 : index
    %c0_209 = arith.constant 0 : index
    %306 = vector.load %arg6[%c0_206, %c1_207, %c2_208, %c0_209] : memref<4x16x10x128xf32, #tpu.memory_space<vmem>>, vector<1x1x8x128xf32>
    %307 = vector.shape_cast %306 : vector<1x1x8x128xf32> to vector<8x128xf32>
    %308 = vector.broadcast %305 : f32 to vector<8x128xf32>
    %309 = arith.mulf %308, %307 : vector<8x128xf32>
    %310 = arith.addf %304, %309 : vector<8x128xf32>
    %c2_210 = arith.constant 2 : index
    %311 = memref.load %arg3[%c2_210] : memref<10xf32, #tpu.memory_space<smem>>
    %c0_211 = arith.constant 0 : index
    %c2_212 = arith.constant 2 : index
    %c1_213 = arith.constant 1 : index
    %c0_214 = arith.constant 0 : index
    %312 = vector.load %arg6[%c0_211, %c2_212, %c1_213, %c0_214] : memref<4x16x10x128xf32, #tpu.memory_space<vmem>>, vector<1x1x1x128xf32>
    %313 = vector.shape_cast %312 : vector<1x1x1x128xf32> to vector<1x128xf32>
    %314 = vector.broadcast %311 : f32 to vector<1x128xf32>
    %315 = arith.mulf %314, %313 : vector<1x128xf32>
    %316 = arith.subf %280, %315 : vector<1x128xf32>
    %c10_215 = arith.constant 10 : index
    %317 = memref.load %arg1[%c10_215] : memref<50xf32, #tpu.memory_space<smem>>
    %c0_216 = arith.constant 0 : index
    %c2_217 = arith.constant 2 : index
    %c0_218 = arith.constant 0 : index
    %c0_219 = arith.constant 0 : index
    %318 = vector.load %arg6[%c0_216, %c2_217, %c0_218, %c0_219] : memref<4x16x10x128xf32, #tpu.memory_space<vmem>>, vector<1x1x8x128xf32>
    %319 = vector.shape_cast %318 : vector<1x1x8x128xf32> to vector<8x128xf32>
    %320 = vector.broadcast %317 : f32 to vector<8x128xf32>
    %321 = arith.mulf %320, %319 : vector<8x128xf32>
    %322 = arith.addf %310, %321 : vector<8x128xf32>
    %c11_220 = arith.constant 11 : index
    %323 = memref.load %arg1[%c11_220] : memref<50xf32, #tpu.memory_space<smem>>
    %c1_221 = arith.constant 1 : index
    %c2_222 = arith.constant 2 : index
    %c0_223 = arith.constant 0 : index
    %c0_224 = arith.constant 0 : index
    %324 = vector.load %arg6[%c1_221, %c2_222, %c0_223, %c0_224] : memref<4x16x10x128xf32, #tpu.memory_space<vmem>>, vector<1x1x8x128xf32>
    %325 = vector.shape_cast %324 : vector<1x1x8x128xf32> to vector<8x128xf32>
    %326 = vector.broadcast %323 : f32 to vector<8x128xf32>
    %327 = arith.mulf %326, %325 : vector<8x128xf32>
    %328 = arith.addf %322, %327 : vector<8x128xf32>
    %c12_225 = arith.constant 12 : index
    %329 = memref.load %arg1[%c12_225] : memref<50xf32, #tpu.memory_space<smem>>
    %c0_226 = arith.constant 0 : index
    %c2_227 = arith.constant 2 : index
    %c1_228 = arith.constant 1 : index
    %c0_229 = arith.constant 0 : index
    %330 = vector.load %arg6[%c0_226, %c2_227, %c1_228, %c0_229] : memref<4x16x10x128xf32, #tpu.memory_space<vmem>>, vector<1x1x8x128xf32>
    %331 = vector.shape_cast %330 : vector<1x1x8x128xf32> to vector<8x128xf32>
    %332 = vector.broadcast %329 : f32 to vector<8x128xf32>
    %333 = arith.mulf %332, %331 : vector<8x128xf32>
    %334 = arith.addf %328, %333 : vector<8x128xf32>
    %c13_230 = arith.constant 13 : index
    %335 = memref.load %arg1[%c13_230] : memref<50xf32, #tpu.memory_space<smem>>
    %c1_231 = arith.constant 1 : index
    %c2_232 = arith.constant 2 : index
    %c1_233 = arith.constant 1 : index
    %c0_234 = arith.constant 0 : index
    %336 = vector.load %arg6[%c1_231, %c2_232, %c1_233, %c0_234] : memref<4x16x10x128xf32, #tpu.memory_space<vmem>>, vector<1x1x8x128xf32>
    %337 = vector.shape_cast %336 : vector<1x1x8x128xf32> to vector<8x128xf32>
    %338 = vector.broadcast %335 : f32 to vector<8x128xf32>
    %339 = arith.mulf %338, %337 : vector<8x128xf32>
    %340 = arith.addf %334, %339 : vector<8x128xf32>
    %c14_235 = arith.constant 14 : index
    %341 = memref.load %arg1[%c14_235] : memref<50xf32, #tpu.memory_space<smem>>
    %c0_236 = arith.constant 0 : index
    %c2_237 = arith.constant 2 : index
    %c2_238 = arith.constant 2 : index
    %c0_239 = arith.constant 0 : index
    %342 = vector.load %arg6[%c0_236, %c2_237, %c2_238, %c0_239] : memref<4x16x10x128xf32, #tpu.memory_space<vmem>>, vector<1x1x8x128xf32>
    %343 = vector.shape_cast %342 : vector<1x1x8x128xf32> to vector<8x128xf32>
    %344 = vector.broadcast %341 : f32 to vector<8x128xf32>
    %345 = arith.mulf %344, %343 : vector<8x128xf32>
    %346 = arith.addf %340, %345 : vector<8x128xf32>
    %c3_240 = arith.constant 3 : index
    %347 = memref.load %arg3[%c3_240] : memref<10xf32, #tpu.memory_space<smem>>
    %c0_241 = arith.constant 0 : index
    %c3_242 = arith.constant 3 : index
    %c1_243 = arith.constant 1 : index
    %c0_244 = arith.constant 0 : index
    %348 = vector.load %arg6[%c0_241, %c3_242, %c1_243, %c0_244] : memref<4x16x10x128xf32, #tpu.memory_space<vmem>>, vector<1x1x1x128xf32>
    %349 = vector.shape_cast %348 : vector<1x1x1x128xf32> to vector<1x128xf32>
    %350 = vector.broadcast %347 : f32 to vector<1x128xf32>
    %351 = arith.mulf %350, %349 : vector<1x128xf32>
    %352 = arith.subf %316, %351 : vector<1x128xf32>
    %c15_245 = arith.constant 15 : index
    %353 = memref.load %arg1[%c15_245] : memref<50xf32, #tpu.memory_space<smem>>
    %c0_246 = arith.constant 0 : index
    %c3_247 = arith.constant 3 : index
    %c0_248 = arith.constant 0 : index
    %c0_249 = arith.constant 0 : index
    %354 = vector.load %arg6[%c0_246, %c3_247, %c0_248, %c0_249] : memref<4x16x10x128xf32, #tpu.memory_space<vmem>>, vector<1x1x8x128xf32>
    %355 = vector.shape_cast %354 : vector<1x1x8x128xf32> to vector<8x128xf32>
    %356 = vector.broadcast %353 : f32 to vector<8x128xf32>
    %357 = arith.mulf %356, %355 : vector<8x128xf32>
    %358 = arith.addf %346, %357 : vector<8x128xf32>
    %c16_250 = arith.constant 16 : index
    %359 = memref.load %arg1[%c16_250] : memref<50xf32, #tpu.memory_space<smem>>
    %c1_251 = arith.constant 1 : index
    %c3_252 = arith.constant 3 : index
    %c0_253 = arith.constant 0 : index
    %c0_254 = arith.constant 0 : index
    %360 = vector.load %arg6[%c1_251, %c3_252, %c0_253, %c0_254] : memref<4x16x10x128xf32, #tpu.memory_space<vmem>>, vector<1x1x8x128xf32>
    %361 = vector.shape_cast %360 : vector<1x1x8x128xf32> to vector<8x128xf32>
    %362 = vector.broadcast %359 : f32 to vector<8x128xf32>
    %363 = arith.mulf %362, %361 : vector<8x128xf32>
    %364 = arith.addf %358, %363 : vector<8x128xf32>
    %c17_255 = arith.constant 17 : index
    %365 = memref.load %arg1[%c17_255] : memref<50xf32, #tpu.memory_space<smem>>
    %c0_256 = arith.constant 0 : index
    %c3_257 = arith.constant 3 : index
    %c1_258 = arith.constant 1 : index
    %c0_259 = arith.constant 0 : index
    %366 = vector.load %arg6[%c0_256, %c3_257, %c1_258, %c0_259] : memref<4x16x10x128xf32, #tpu.memory_space<vmem>>, vector<1x1x8x128xf32>
    %367 = vector.shape_cast %366 : vector<1x1x8x128xf32> to vector<8x128xf32>
    %368 = vector.broadcast %365 : f32 to vector<8x128xf32>
    %369 = arith.mulf %368, %367 : vector<8x128xf32>
    %370 = arith.addf %364, %369 : vector<8x128xf32>
    %c18_260 = arith.constant 18 : index
    %371 = memref.load %arg1[%c18_260] : memref<50xf32, #tpu.memory_space<smem>>
    %c1_261 = arith.constant 1 : index
    %c3_262 = arith.constant 3 : index
    %c1_263 = arith.constant 1 : index
    %c0_264 = arith.constant 0 : index
    %372 = vector.load %arg6[%c1_261, %c3_262, %c1_263, %c0_264] : memref<4x16x10x128xf32, #tpu.memory_space<vmem>>, vector<1x1x8x128xf32>
    %373 = vector.shape_cast %372 : vector<1x1x8x128xf32> to vector<8x128xf32>
    %374 = vector.broadcast %371 : f32 to vector<8x128xf32>
    %375 = arith.mulf %374, %373 : vector<8x128xf32>
    %376 = arith.addf %370, %375 : vector<8x128xf32>
    %c19_265 = arith.constant 19 : index
    %377 = memref.load %arg1[%c19_265] : memref<50xf32, #tpu.memory_space<smem>>
    %c0_266 = arith.constant 0 : index
    %c3_267 = arith.constant 3 : index
    %c2_268 = arith.constant 2 : index
    %c0_269 = arith.constant 0 : index
    %378 = vector.load %arg6[%c0_266, %c3_267, %c2_268, %c0_269] : memref<4x16x10x128xf32, #tpu.memory_space<vmem>>, vector<1x1x8x128xf32>
    %379 = vector.shape_cast %378 : vector<1x1x8x128xf32> to vector<8x128xf32>
    %380 = vector.broadcast %377 : f32 to vector<8x128xf32>
    %381 = arith.mulf %380, %379 : vector<8x128xf32>
    %382 = arith.addf %376, %381 : vector<8x128xf32>
    %c4_270 = arith.constant 4 : index
    %383 = memref.load %arg3[%c4_270] : memref<10xf32, #tpu.memory_space<smem>>
    %c0_271 = arith.constant 0 : index
    %c4_272 = arith.constant 4 : index
    %c1_273 = arith.constant 1 : index
    %c0_274 = arith.constant 0 : index
    %384 = vector.load %arg6[%c0_271, %c4_272, %c1_273, %c0_274] : memref<4x16x10x128xf32, #tpu.memory_space<vmem>>, vector<1x1x1x128xf32>
    %385 = vector.shape_cast %384 : vector<1x1x1x128xf32> to vector<1x128xf32>
    %386 = vector.broadcast %383 : f32 to vector<1x128xf32>
    %387 = arith.mulf %386, %385 : vector<1x128xf32>
    %388 = arith.subf %352, %387 : vector<1x128xf32>
    %c20_275 = arith.constant 20 : index
    %389 = memref.load %arg1[%c20_275] : memref<50xf32, #tpu.memory_space<smem>>
    %c0_276 = arith.constant 0 : index
    %c4_277 = arith.constant 4 : index
    %c0_278 = arith.constant 0 : index
    %c0_279 = arith.constant 0 : index
    %390 = vector.load %arg6[%c0_276, %c4_277, %c0_278, %c0_279] : memref<4x16x10x128xf32, #tpu.memory_space<vmem>>, vector<1x1x8x128xf32>
    %391 = vector.shape_cast %390 : vector<1x1x8x128xf32> to vector<8x128xf32>
    %392 = vector.broadcast %389 : f32 to vector<8x128xf32>
    %393 = arith.mulf %392, %391 : vector<8x128xf32>
    %394 = arith.addf %382, %393 : vector<8x128xf32>
    %c21_280 = arith.constant 21 : index
    %395 = memref.load %arg1[%c21_280] : memref<50xf32, #tpu.memory_space<smem>>
    %c1_281 = arith.constant 1 : index
    %c4_282 = arith.constant 4 : index
    %c0_283 = arith.constant 0 : index
    %c0_284 = arith.constant 0 : index
    %396 = vector.load %arg6[%c1_281, %c4_282, %c0_283, %c0_284] : memref<4x16x10x128xf32, #tpu.memory_space<vmem>>, vector<1x1x8x128xf32>
    %397 = vector.shape_cast %396 : vector<1x1x8x128xf32> to vector<8x128xf32>
    %398 = vector.broadcast %395 : f32 to vector<8x128xf32>
    %399 = arith.mulf %398, %397 : vector<8x128xf32>
    %400 = arith.addf %394, %399 : vector<8x128xf32>
    %c22_285 = arith.constant 22 : index
    %401 = memref.load %arg1[%c22_285] : memref<50xf32, #tpu.memory_space<smem>>
    %c0_286 = arith.constant 0 : index
    %c4_287 = arith.constant 4 : index
    %c1_288 = arith.constant 1 : index
    %c0_289 = arith.constant 0 : index
    %402 = vector.load %arg6[%c0_286, %c4_287, %c1_288, %c0_289] : memref<4x16x10x128xf32, #tpu.memory_space<vmem>>, vector<1x1x8x128xf32>
    %403 = vector.shape_cast %402 : vector<1x1x8x128xf32> to vector<8x128xf32>
    %404 = vector.broadcast %401 : f32 to vector<8x128xf32>
    %405 = arith.mulf %404, %403 : vector<8x128xf32>
    %406 = arith.addf %400, %405 : vector<8x128xf32>
    %c23_290 = arith.constant 23 : index
    %407 = memref.load %arg1[%c23_290] : memref<50xf32, #tpu.memory_space<smem>>
    %c1_291 = arith.constant 1 : index
    %c4_292 = arith.constant 4 : index
    %c1_293 = arith.constant 1 : index
    %c0_294 = arith.constant 0 : index
    %408 = vector.load %arg6[%c1_291, %c4_292, %c1_293, %c0_294] : memref<4x16x10x128xf32, #tpu.memory_space<vmem>>, vector<1x1x8x128xf32>
    %409 = vector.shape_cast %408 : vector<1x1x8x128xf32> to vector<8x128xf32>
    %410 = vector.broadcast %407 : f32 to vector<8x128xf32>
    %411 = arith.mulf %410, %409 : vector<8x128xf32>
    %412 = arith.addf %406, %411 : vector<8x128xf32>
    %c24_295 = arith.constant 24 : index
    %413 = memref.load %arg1[%c24_295] : memref<50xf32, #tpu.memory_space<smem>>
    %c0_296 = arith.constant 0 : index
    %c4_297 = arith.constant 4 : index
    %c2_298 = arith.constant 2 : index
    %c0_299 = arith.constant 0 : index
    %414 = vector.load %arg6[%c0_296, %c4_297, %c2_298, %c0_299] : memref<4x16x10x128xf32, #tpu.memory_space<vmem>>, vector<1x1x8x128xf32>
    %415 = vector.shape_cast %414 : vector<1x1x8x128xf32> to vector<8x128xf32>
    %416 = vector.broadcast %413 : f32 to vector<8x128xf32>
    %417 = arith.mulf %416, %415 : vector<8x128xf32>
    %418 = arith.addf %412, %417 : vector<8x128xf32>
    %c5_300 = arith.constant 5 : index
    %419 = memref.load %arg3[%c5_300] : memref<10xf32, #tpu.memory_space<smem>>
    %c2_301 = arith.constant 2 : index
    %c0_302 = arith.constant 0 : index
    %c1_303 = arith.constant 1 : index
    %c0_304 = arith.constant 0 : index
    %420 = vector.load %arg6[%c2_301, %c0_302, %c1_303, %c0_304] : memref<4x16x10x128xf32, #tpu.memory_space<vmem>>, vector<1x1x1x128xf32>
    %421 = vector.shape_cast %420 : vector<1x1x1x128xf32> to vector<1x128xf32>
    %422 = vector.broadcast %419 : f32 to vector<1x128xf32>
    %423 = arith.mulf %422, %421 : vector<1x128xf32>
    %424 = arith.subf %388, %423 : vector<1x128xf32>
    %c25 = arith.constant 25 : index
    %425 = memref.load %arg1[%c25] : memref<50xf32, #tpu.memory_space<smem>>
    %c2_305 = arith.constant 2 : index
    %c0_306 = arith.constant 0 : index
    %c0_307 = arith.constant 0 : index
    %c0_308 = arith.constant 0 : index
    %426 = vector.load %arg6[%c2_305, %c0_306, %c0_307, %c0_308] : memref<4x16x10x128xf32, #tpu.memory_space<vmem>>, vector<1x1x8x128xf32>
    %427 = vector.shape_cast %426 : vector<1x1x8x128xf32> to vector<8x128xf32>
    %428 = vector.broadcast %425 : f32 to vector<8x128xf32>
    %429 = arith.mulf %428, %427 : vector<8x128xf32>
    %430 = arith.addf %418, %429 : vector<8x128xf32>
    %c26 = arith.constant 26 : index
    %431 = memref.load %arg1[%c26] : memref<50xf32, #tpu.memory_space<smem>>
    %c3_309 = arith.constant 3 : index
    %c0_310 = arith.constant 0 : index
    %c0_311 = arith.constant 0 : index
    %c0_312 = arith.constant 0 : index
    %432 = vector.load %arg6[%c3_309, %c0_310, %c0_311, %c0_312] : memref<4x16x10x128xf32, #tpu.memory_space<vmem>>, vector<1x1x8x128xf32>
    %433 = vector.shape_cast %432 : vector<1x1x8x128xf32> to vector<8x128xf32>
    %434 = vector.broadcast %431 : f32 to vector<8x128xf32>
    %435 = arith.mulf %434, %433 : vector<8x128xf32>
    %436 = arith.addf %430, %435 : vector<8x128xf32>
    %c27 = arith.constant 27 : index
    %437 = memref.load %arg1[%c27] : memref<50xf32, #tpu.memory_space<smem>>
    %c2_313 = arith.constant 2 : index
    %c0_314 = arith.constant 0 : index
    %c1_315 = arith.constant 1 : index
    %c0_316 = arith.constant 0 : index
    %438 = vector.load %arg6[%c2_313, %c0_314, %c1_315, %c0_316] : memref<4x16x10x128xf32, #tpu.memory_space<vmem>>, vector<1x1x8x128xf32>
    %439 = vector.shape_cast %438 : vector<1x1x8x128xf32> to vector<8x128xf32>
    %440 = vector.broadcast %437 : f32 to vector<8x128xf32>
    %441 = arith.mulf %440, %439 : vector<8x128xf32>
    %442 = arith.addf %436, %441 : vector<8x128xf32>
    %c28 = arith.constant 28 : index
    %443 = memref.load %arg1[%c28] : memref<50xf32, #tpu.memory_space<smem>>
    %c3_317 = arith.constant 3 : index
    %c0_318 = arith.constant 0 : index
    %c1_319 = arith.constant 1 : index
    %c0_320 = arith.constant 0 : index
    %444 = vector.load %arg6[%c3_317, %c0_318, %c1_319, %c0_320] : memref<4x16x10x128xf32, #tpu.memory_space<vmem>>, vector<1x1x8x128xf32>
    %445 = vector.shape_cast %444 : vector<1x1x8x128xf32> to vector<8x128xf32>
    %446 = vector.broadcast %443 : f32 to vector<8x128xf32>
    %447 = arith.mulf %446, %445 : vector<8x128xf32>
    %448 = arith.addf %442, %447 : vector<8x128xf32>
    %c29 = arith.constant 29 : index
    %449 = memref.load %arg1[%c29] : memref<50xf32, #tpu.memory_space<smem>>
    %c2_321 = arith.constant 2 : index
    %c0_322 = arith.constant 0 : index
    %c2_323 = arith.constant 2 : index
    %c0_324 = arith.constant 0 : index
    %450 = vector.load %arg6[%c2_321, %c0_322, %c2_323, %c0_324] : memref<4x16x10x128xf32, #tpu.memory_space<vmem>>, vector<1x1x8x128xf32>
    %451 = vector.shape_cast %450 : vector<1x1x8x128xf32> to vector<8x128xf32>
    %452 = vector.broadcast %449 : f32 to vector<8x128xf32>
    %453 = arith.mulf %452, %451 : vector<8x128xf32>
    %454 = arith.addf %448, %453 : vector<8x128xf32>
    %c6_325 = arith.constant 6 : index
    %455 = memref.load %arg3[%c6_325] : memref<10xf32, #tpu.memory_space<smem>>
    %c2_326 = arith.constant 2 : index
    %c1_327 = arith.constant 1 : index
    %c1_328 = arith.constant 1 : index
    %c0_329 = arith.constant 0 : index
    %456 = vector.load %arg6[%c2_326, %c1_327, %c1_328, %c0_329] : memref<4x16x10x128xf32, #tpu.memory_space<vmem>>, vector<1x1x1x128xf32>
    %457 = vector.shape_cast %456 : vector<1x1x1x128xf32> to vector<1x128xf32>
    %458 = vector.broadcast %455 : f32 to vector<1x128xf32>
    %459 = arith.mulf %458, %457 : vector<1x128xf32>
    %460 = arith.subf %424, %459 : vector<1x128xf32>
    %c30 = arith.constant 30 : index
    %461 = memref.load %arg1[%c30] : memref<50xf32, #tpu.memory_space<smem>>
    %c2_330 = arith.constant 2 : index
    %c1_331 = arith.constant 1 : index
    %c0_332 = arith.constant 0 : index
    %c0_333 = arith.constant 0 : index
    %462 = vector.load %arg6[%c2_330, %c1_331, %c0_332, %c0_333] : memref<4x16x10x128xf32, #tpu.memory_space<vmem>>, vector<1x1x8x128xf32>
    %463 = vector.shape_cast %462 : vector<1x1x8x128xf32> to vector<8x128xf32>
    %464 = vector.broadcast %461 : f32 to vector<8x128xf32>
    %465 = arith.mulf %464, %463 : vector<8x128xf32>
    %466 = arith.addf %454, %465 : vector<8x128xf32>
    %c31 = arith.constant 31 : index
    %467 = memref.load %arg1[%c31] : memref<50xf32, #tpu.memory_space<smem>>
    %c3_334 = arith.constant 3 : index
    %c1_335 = arith.constant 1 : index
    %c0_336 = arith.constant 0 : index
    %c0_337 = arith.constant 0 : index
    %468 = vector.load %arg6[%c3_334, %c1_335, %c0_336, %c0_337] : memref<4x16x10x128xf32, #tpu.memory_space<vmem>>, vector<1x1x8x128xf32>
    %469 = vector.shape_cast %468 : vector<1x1x8x128xf32> to vector<8x128xf32>
    %470 = vector.broadcast %467 : f32 to vector<8x128xf32>
    %471 = arith.mulf %470, %469 : vector<8x128xf32>
    %472 = arith.addf %466, %471 : vector<8x128xf32>
    %c32 = arith.constant 32 : index
    %473 = memref.load %arg1[%c32] : memref<50xf32, #tpu.memory_space<smem>>
    %c2_338 = arith.constant 2 : index
    %c1_339 = arith.constant 1 : index
    %c1_340 = arith.constant 1 : index
    %c0_341 = arith.constant 0 : index
    %474 = vector.load %arg6[%c2_338, %c1_339, %c1_340, %c0_341] : memref<4x16x10x128xf32, #tpu.memory_space<vmem>>, vector<1x1x8x128xf32>
    %475 = vector.shape_cast %474 : vector<1x1x8x128xf32> to vector<8x128xf32>
    %476 = vector.broadcast %473 : f32 to vector<8x128xf32>
    %477 = arith.mulf %476, %475 : vector<8x128xf32>
    %478 = arith.addf %472, %477 : vector<8x128xf32>
    %c33 = arith.constant 33 : index
    %479 = memref.load %arg1[%c33] : memref<50xf32, #tpu.memory_space<smem>>
    %c3_342 = arith.constant 3 : index
    %c1_343 = arith.constant 1 : index
    %c1_344 = arith.constant 1 : index
    %c0_345 = arith.constant 0 : index
    %480 = vector.load %arg6[%c3_342, %c1_343, %c1_344, %c0_345] : memref<4x16x10x128xf32, #tpu.memory_space<vmem>>, vector<1x1x8x128xf32>
    %481 = vector.shape_cast %480 : vector<1x1x8x128xf32> to vector<8x128xf32>
    %482 = vector.broadcast %479 : f32 to vector<8x128xf32>
    %483 = arith.mulf %482, %481 : vector<8x128xf32>
    %484 = arith.addf %478, %483 : vector<8x128xf32>
    %c34 = arith.constant 34 : index
    %485 = memref.load %arg1[%c34] : memref<50xf32, #tpu.memory_space<smem>>
    %c2_346 = arith.constant 2 : index
    %c1_347 = arith.constant 1 : index
    %c2_348 = arith.constant 2 : index
    %c0_349 = arith.constant 0 : index
    %486 = vector.load %arg6[%c2_346, %c1_347, %c2_348, %c0_349] : memref<4x16x10x128xf32, #tpu.memory_space<vmem>>, vector<1x1x8x128xf32>
    %487 = vector.shape_cast %486 : vector<1x1x8x128xf32> to vector<8x128xf32>
    %488 = vector.broadcast %485 : f32 to vector<8x128xf32>
    %489 = arith.mulf %488, %487 : vector<8x128xf32>
    %490 = arith.addf %484, %489 : vector<8x128xf32>
    %c7_350 = arith.constant 7 : index
    %491 = memref.load %arg3[%c7_350] : memref<10xf32, #tpu.memory_space<smem>>
    %c2_351 = arith.constant 2 : index
    %c2_352 = arith.constant 2 : index
    %c1_353 = arith.constant 1 : index
    %c0_354 = arith.constant 0 : index
    %492 = vector.load %arg6[%c2_351, %c2_352, %c1_353, %c0_354] : memref<4x16x10x128xf32, #tpu.memory_space<vmem>>, vector<1x1x1x128xf32>
    %493 = vector.shape_cast %492 : vector<1x1x1x128xf32> to vector<1x128xf32>
    %494 = vector.broadcast %491 : f32 to vector<1x128xf32>
    %495 = arith.mulf %494, %493 : vector<1x128xf32>
    %496 = arith.subf %460, %495 : vector<1x128xf32>
    %c35_355 = arith.constant 35 : index
    %497 = memref.load %arg1[%c35_355] : memref<50xf32, #tpu.memory_space<smem>>
    %c2_356 = arith.constant 2 : index
    %c2_357 = arith.constant 2 : index
    %c0_358 = arith.constant 0 : index
    %c0_359 = arith.constant 0 : index
    %498 = vector.load %arg6[%c2_356, %c2_357, %c0_358, %c0_359] : memref<4x16x10x128xf32, #tpu.memory_space<vmem>>, vector<1x1x8x128xf32>
    %499 = vector.shape_cast %498 : vector<1x1x8x128xf32> to vector<8x128xf32>
    %500 = vector.broadcast %497 : f32 to vector<8x128xf32>
    %501 = arith.mulf %500, %499 : vector<8x128xf32>
    %502 = arith.addf %490, %501 : vector<8x128xf32>
    %c36_360 = arith.constant 36 : index
    %503 = memref.load %arg1[%c36_360] : memref<50xf32, #tpu.memory_space<smem>>
    %c3_361 = arith.constant 3 : index
    %c2_362 = arith.constant 2 : index
    %c0_363 = arith.constant 0 : index
    %c0_364 = arith.constant 0 : index
    %504 = vector.load %arg6[%c3_361, %c2_362, %c0_363, %c0_364] : memref<4x16x10x128xf32, #tpu.memory_space<vmem>>, vector<1x1x8x128xf32>
    %505 = vector.shape_cast %504 : vector<1x1x8x128xf32> to vector<8x128xf32>
    %506 = vector.broadcast %503 : f32 to vector<8x128xf32>
    %507 = arith.mulf %506, %505 : vector<8x128xf32>
    %508 = arith.addf %502, %507 : vector<8x128xf32>
    %c37_365 = arith.constant 37 : index
    %509 = memref.load %arg1[%c37_365] : memref<50xf32, #tpu.memory_space<smem>>
    %c2_366 = arith.constant 2 : index
    %c2_367 = arith.constant 2 : index
    %c1_368 = arith.constant 1 : index
    %c0_369 = arith.constant 0 : index
    %510 = vector.load %arg6[%c2_366, %c2_367, %c1_368, %c0_369] : memref<4x16x10x128xf32, #tpu.memory_space<vmem>>, vector<1x1x8x128xf32>
    %511 = vector.shape_cast %510 : vector<1x1x8x128xf32> to vector<8x128xf32>
    %512 = vector.broadcast %509 : f32 to vector<8x128xf32>
    %513 = arith.mulf %512, %511 : vector<8x128xf32>
    %514 = arith.addf %508, %513 : vector<8x128xf32>
    %c38_370 = arith.constant 38 : index
    %515 = memref.load %arg1[%c38_370] : memref<50xf32, #tpu.memory_space<smem>>
    %c3_371 = arith.constant 3 : index
    %c2_372 = arith.constant 2 : index
    %c1_373 = arith.constant 1 : index
    %c0_374 = arith.constant 0 : index
    %516 = vector.load %arg6[%c3_371, %c2_372, %c1_373, %c0_374] : memref<4x16x10x128xf32, #tpu.memory_space<vmem>>, vector<1x1x8x128xf32>
    %517 = vector.shape_cast %516 : vector<1x1x8x128xf32> to vector<8x128xf32>
    %518 = vector.broadcast %515 : f32 to vector<8x128xf32>
    %519 = arith.mulf %518, %517 : vector<8x128xf32>
    %520 = arith.addf %514, %519 : vector<8x128xf32>
    %c39_375 = arith.constant 39 : index
    %521 = memref.load %arg1[%c39_375] : memref<50xf32, #tpu.memory_space<smem>>
    %c2_376 = arith.constant 2 : index
    %c2_377 = arith.constant 2 : index
    %c2_378 = arith.constant 2 : index
    %c0_379 = arith.constant 0 : index
    %522 = vector.load %arg6[%c2_376, %c2_377, %c2_378, %c0_379] : memref<4x16x10x128xf32, #tpu.memory_space<vmem>>, vector<1x1x8x128xf32>
    %523 = vector.shape_cast %522 : vector<1x1x8x128xf32> to vector<8x128xf32>
    %524 = vector.broadcast %521 : f32 to vector<8x128xf32>
    %525 = arith.mulf %524, %523 : vector<8x128xf32>
    %526 = arith.addf %520, %525 : vector<8x128xf32>
    %c8_380 = arith.constant 8 : index
    %527 = memref.load %arg3[%c8_380] : memref<10xf32, #tpu.memory_space<smem>>
    %c2_381 = arith.constant 2 : index
    %c3_382 = arith.constant 3 : index
    %c1_383 = arith.constant 1 : index
    %c0_384 = arith.constant 0 : index
    %528 = vector.load %arg6[%c2_381, %c3_382, %c1_383, %c0_384] : memref<4x16x10x128xf32, #tpu.memory_space<vmem>>, vector<1x1x1x128xf32>
    %529 = vector.shape_cast %528 : vector<1x1x1x128xf32> to vector<1x128xf32>
    %530 = vector.broadcast %527 : f32 to vector<1x128xf32>
    %531 = arith.mulf %530, %529 : vector<1x128xf32>
    %532 = arith.subf %496, %531 : vector<1x128xf32>
    %c40_385 = arith.constant 40 : index
    %533 = memref.load %arg1[%c40_385] : memref<50xf32, #tpu.memory_space<smem>>
    %c2_386 = arith.constant 2 : index
    %c3_387 = arith.constant 3 : index
    %c0_388 = arith.constant 0 : index
    %c0_389 = arith.constant 0 : index
    %534 = vector.load %arg6[%c2_386, %c3_387, %c0_388, %c0_389] : memref<4x16x10x128xf32, #tpu.memory_space<vmem>>, vector<1x1x8x128xf32>
    %535 = vector.shape_cast %534 : vector<1x1x8x128xf32> to vector<8x128xf32>
    %536 = vector.broadcast %533 : f32 to vector<8x128xf32>
    %537 = arith.mulf %536, %535 : vector<8x128xf32>
    %538 = arith.addf %526, %537 : vector<8x128xf32>
    %c41_390 = arith.constant 41 : index
    %539 = memref.load %arg1[%c41_390] : memref<50xf32, #tpu.memory_space<smem>>
    %c3_391 = arith.constant 3 : index
    %c3_392 = arith.constant 3 : index
    %c0_393 = arith.constant 0 : index
    %c0_394 = arith.constant 0 : index
    %540 = vector.load %arg6[%c3_391, %c3_392, %c0_393, %c0_394] : memref<4x16x10x128xf32, #tpu.memory_space<vmem>>, vector<1x1x8x128xf32>
    %541 = vector.shape_cast %540 : vector<1x1x8x128xf32> to vector<8x128xf32>
    %542 = vector.broadcast %539 : f32 to vector<8x128xf32>
    %543 = arith.mulf %542, %541 : vector<8x128xf32>
    %544 = arith.addf %538, %543 : vector<8x128xf32>
    %c42_395 = arith.constant 42 : index
    %545 = memref.load %arg1[%c42_395] : memref<50xf32, #tpu.memory_space<smem>>
    %c2_396 = arith.constant 2 : index
    %c3_397 = arith.constant 3 : index
    %c1_398 = arith.constant 1 : index
    %c0_399 = arith.constant 0 : index
    %546 = vector.load %arg6[%c2_396, %c3_397, %c1_398, %c0_399] : memref<4x16x10x128xf32, #tpu.memory_space<vmem>>, vector<1x1x8x128xf32>
    %547 = vector.shape_cast %546 : vector<1x1x8x128xf32> to vector<8x128xf32>
    %548 = vector.broadcast %545 : f32 to vector<8x128xf32>
    %549 = arith.mulf %548, %547 : vector<8x128xf32>
    %550 = arith.addf %544, %549 : vector<8x128xf32>
    %c43_400 = arith.constant 43 : index
    %551 = memref.load %arg1[%c43_400] : memref<50xf32, #tpu.memory_space<smem>>
    %c3_401 = arith.constant 3 : index
    %c3_402 = arith.constant 3 : index
    %c1_403 = arith.constant 1 : index
    %c0_404 = arith.constant 0 : index
    %552 = vector.load %arg6[%c3_401, %c3_402, %c1_403, %c0_404] : memref<4x16x10x128xf32, #tpu.memory_space<vmem>>, vector<1x1x8x128xf32>
    %553 = vector.shape_cast %552 : vector<1x1x8x128xf32> to vector<8x128xf32>
    %554 = vector.broadcast %551 : f32 to vector<8x128xf32>
    %555 = arith.mulf %554, %553 : vector<8x128xf32>
    %556 = arith.addf %550, %555 : vector<8x128xf32>
    %c44_405 = arith.constant 44 : index
    %557 = memref.load %arg1[%c44_405] : memref<50xf32, #tpu.memory_space<smem>>
    %c2_406 = arith.constant 2 : index
    %c3_407 = arith.constant 3 : index
    %c2_408 = arith.constant 2 : index
    %c0_409 = arith.constant 0 : index
    %558 = vector.load %arg6[%c2_406, %c3_407, %c2_408, %c0_409] : memref<4x16x10x128xf32, #tpu.memory_space<vmem>>, vector<1x1x8x128xf32>
    %559 = vector.shape_cast %558 : vector<1x1x8x128xf32> to vector<8x128xf32>
    %560 = vector.broadcast %557 : f32 to vector<8x128xf32>
    %561 = arith.mulf %560, %559 : vector<8x128xf32>
    %562 = arith.addf %556, %561 : vector<8x128xf32>
    %c9_410 = arith.constant 9 : index
    %563 = memref.load %arg3[%c9_410] : memref<10xf32, #tpu.memory_space<smem>>
    %c2_411 = arith.constant 2 : index
    %c4_412 = arith.constant 4 : index
    %c1_413 = arith.constant 1 : index
    %c0_414 = arith.constant 0 : index
    %564 = vector.load %arg6[%c2_411, %c4_412, %c1_413, %c0_414] : memref<4x16x10x128xf32, #tpu.memory_space<vmem>>, vector<1x1x1x128xf32>
    %565 = vector.shape_cast %564 : vector<1x1x1x128xf32> to vector<1x128xf32>
    %566 = vector.broadcast %563 : f32 to vector<1x128xf32>
    %567 = arith.mulf %566, %565 : vector<1x128xf32>
    %568 = arith.subf %532, %567 : vector<1x128xf32>
    %c45_415 = arith.constant 45 : index
    %569 = memref.load %arg1[%c45_415] : memref<50xf32, #tpu.memory_space<smem>>
    %c2_416 = arith.constant 2 : index
    %c4_417 = arith.constant 4 : index
    %c0_418 = arith.constant 0 : index
    %c0_419 = arith.constant 0 : index
    %570 = vector.load %arg6[%c2_416, %c4_417, %c0_418, %c0_419] : memref<4x16x10x128xf32, #tpu.memory_space<vmem>>, vector<1x1x8x128xf32>
    %571 = vector.shape_cast %570 : vector<1x1x8x128xf32> to vector<8x128xf32>
    %572 = vector.broadcast %569 : f32 to vector<8x128xf32>
    %573 = arith.mulf %572, %571 : vector<8x128xf32>
    %574 = arith.addf %562, %573 : vector<8x128xf32>
    %c46_420 = arith.constant 46 : index
    %575 = memref.load %arg1[%c46_420] : memref<50xf32, #tpu.memory_space<smem>>
    %c3_421 = arith.constant 3 : index
    %c4_422 = arith.constant 4 : index
    %c0_423 = arith.constant 0 : index
    %c0_424 = arith.constant 0 : index
    %576 = vector.load %arg6[%c3_421, %c4_422, %c0_423, %c0_424] : memref<4x16x10x128xf32, #tpu.memory_space<vmem>>, vector<1x1x8x128xf32>
    %577 = vector.shape_cast %576 : vector<1x1x8x128xf32> to vector<8x128xf32>
    %578 = vector.broadcast %575 : f32 to vector<8x128xf32>
    %579 = arith.mulf %578, %577 : vector<8x128xf32>
    %580 = arith.addf %574, %579 : vector<8x128xf32>
    %c47_425 = arith.constant 47 : index
    %581 = memref.load %arg1[%c47_425] : memref<50xf32, #tpu.memory_space<smem>>
    %c2_426 = arith.constant 2 : index
    %c4_427 = arith.constant 4 : index
    %c1_428 = arith.constant 1 : index
    %c0_429 = arith.constant 0 : index
    %582 = vector.load %arg6[%c2_426, %c4_427, %c1_428, %c0_429] : memref<4x16x10x128xf32, #tpu.memory_space<vmem>>, vector<1x1x8x128xf32>
    %583 = vector.shape_cast %582 : vector<1x1x8x128xf32> to vector<8x128xf32>
    %584 = vector.broadcast %581 : f32 to vector<8x128xf32>
    %585 = arith.mulf %584, %583 : vector<8x128xf32>
    %586 = arith.addf %580, %585 : vector<8x128xf32>
    %c48_430 = arith.constant 48 : index
    %587 = memref.load %arg1[%c48_430] : memref<50xf32, #tpu.memory_space<smem>>
    %c3_431 = arith.constant 3 : index
    %c4_432 = arith.constant 4 : index
    %c1_433 = arith.constant 1 : index
    %c0_434 = arith.constant 0 : index
    %588 = vector.load %arg6[%c3_431, %c4_432, %c1_433, %c0_434] : memref<4x16x10x128xf32, #tpu.memory_space<vmem>>, vector<1x1x8x128xf32>
    %589 = vector.shape_cast %588 : vector<1x1x8x128xf32> to vector<8x128xf32>
    %590 = vector.broadcast %587 : f32 to vector<8x128xf32>
    %591 = arith.mulf %590, %589 : vector<8x128xf32>
    %592 = arith.addf %586, %591 : vector<8x128xf32>
    %c49_435 = arith.constant 49 : index
    %593 = memref.load %arg1[%c49_435] : memref<50xf32, #tpu.memory_space<smem>>
    %c2_436 = arith.constant 2 : index
    %c4_437 = arith.constant 4 : index
    %c2_438 = arith.constant 2 : index
    %c0_439 = arith.constant 0 : index
    %594 = vector.load %arg6[%c2_436, %c4_437, %c2_438, %c0_439] : memref<4x16x10x128xf32, #tpu.memory_space<vmem>>, vector<1x1x8x128xf32>
    %595 = vector.shape_cast %594 : vector<1x1x8x128xf32> to vector<8x128xf32>
    %596 = vector.broadcast %593 : f32 to vector<8x128xf32>
    %597 = arith.mulf %596, %595 : vector<8x128xf32>
    %598 = arith.addf %592, %597 : vector<8x128xf32>
    %599 = vector.broadcast %568 : vector<1x128xf32> to vector<8x128xf32>
    %600 = arith.addf %598, %599 : vector<8x128xf32>
    %601 = arith.select %2, %600, %598 : vector<8x128xi1>, vector<8x128xf32>
    %cst_440 = arith.constant 0.000000e+00 : f32
    %602 = vector.broadcast %cst_440 : f32 to vector<8x128xf32>
    %603 = arith.maximumf %601, %602 : vector<8x128xf32>
    %c0_441 = arith.constant 0 : index
    %c1_442 = arith.constant 1 : index
    %c0_443 = arith.constant 0 : index
    %c0_444 = arith.constant 0 : index
    %604 = vector.load %arg7[%c0_441, %c1_442, %c0_443, %c0_444] : memref<1x8x8x128xf32, #tpu.memory_space<vmem>>, vector<1x1x8x128xf32>
    %605 = vector.shape_cast %604 : vector<1x1x8x128xf32> to vector<8x128xf32>
    %606 = vector.shape_cast %603 : vector<8x128xf32> to vector<1x1x8x128xf32>
    tpu.vector_store %arg7[%c0_441, %c1_442, %c0_443, %c0_444], %606 {strides = array<i32>} : memref<1x8x8x128xf32, #tpu.memory_space<vmem>>, vector<1x1x8x128xf32>,
    %c0_445 = arith.constant 0 : index
    %607 = memref.load %arg5[%c0_445] : memref<4xf32, #tpu.memory_space<smem>>
    %c2_446 = arith.constant 2 : index
    %608 = memref.load %arg5[%c2_446] : memref<4xf32, #tpu.memory_space<smem>>
    %c0_447 = arith.constant 0 : index
    %609 = memref.load %arg5[%c0_447] : memref<4xf32, #tpu.memory_space<smem>>
    %610 = arith.subf %608, %609 : f32
    %611 = vector.broadcast %607 : f32 to vector<8x128xf32>
    %612 = vector.broadcast %610 : f32 to vector<1x128xf32>
    %c0_448 = arith.constant 0 : index
    %613 = memref.load %arg3[%c0_448] : memref<10xf32, #tpu.memory_space<smem>>
    %c0_449 = arith.constant 0 : index
    %c2_450 = arith.constant 2 : index
    %c1_451 = arith.constant 1 : index
    %c0_452 = arith.constant 0 : index
    %614 = vector.load %arg6[%c0_449, %c2_450, %c1_451, %c0_452] : memref<4x16x10x128xf32, #tpu.memory_space<vmem>>, vector<1x1x1x128xf32>
    %615 = vector.shape_cast %614 : vector<1x1x1x128xf32> to vector<1x128xf32>
    %616 = vector.broadcast %613 : f32 to vector<1x128xf32>
    %617 = arith.mulf %616, %615 : vector<1x128xf32>
    %618 = arith.subf %612, %617 : vector<1x128xf32>
    %c0_453 = arith.constant 0 : index
    %619 = memref.load %arg1[%c0_453] : memref<50xf32, #tpu.memory_space<smem>>
    %c0_454 = arith.constant 0 : index
    %c2_455 = arith.constant 2 : index
    %c0_456 = arith.constant 0 : index
    %c0_457 = arith.constant 0 : index
    %620 = vector.load %arg6[%c0_454, %c2_455, %c0_456, %c0_457] : memref<4x16x10x128xf32, #tpu.memory_space<vmem>>, vector<1x1x8x128xf32>
    %621 = vector.shape_cast %620 : vector<1x1x8x128xf32> to vector<8x128xf32>
    %622 = vector.broadcast %619 : f32 to vector<8x128xf32>
    %623 = arith.mulf %622, %621 : vector<8x128xf32>
    %624 = arith.addf %611, %623 : vector<8x128xf32>
    %c1_458 = arith.constant 1 : index
    %625 = memref.load %arg1[%c1_458] : memref<50xf32, #tpu.memory_space<smem>>
    %c1_459 = arith.constant 1 : index
    %c2_460 = arith.constant 2 : index
    %c0_461 = arith.constant 0 : index
    %c0_462 = arith.constant 0 : index
    %626 = vector.load %arg6[%c1_459, %c2_460, %c0_461, %c0_462] : memref<4x16x10x128xf32, #tpu.memory_space<vmem>>, vector<1x1x8x128xf32>
    %627 = vector.shape_cast %626 : vector<1x1x8x128xf32> to vector<8x128xf32>
    %628 = vector.broadcast %625 : f32 to vector<8x128xf32>
    %629 = arith.mulf %628, %627 : vector<8x128xf32>
    %630 = arith.addf %624, %629 : vector<8x128xf32>
    %c2_463 = arith.constant 2 : index
    %631 = memref.load %arg1[%c2_463] : memref<50xf32, #tpu.memory_space<smem>>
    %c0_464 = arith.constant 0 : index
    %c2_465 = arith.constant 2 : index
    %c1_466 = arith.constant 1 : index
    %c0_467 = arith.constant 0 : index
    %632 = vector.load %arg6[%c0_464, %c2_465, %c1_466, %c0_467] : memref<4x16x10x128xf32, #tpu.memory_space<vmem>>, vector<1x1x8x128xf32>
    %633 = vector.shape_cast %632 : vector<1x1x8x128xf32> to vector<8x128xf32>
    %634 = vector.broadcast %631 : f32 to vector<8x128xf32>
    %635 = arith.mulf %634, %633 : vector<8x128xf32>
    %636 = arith.addf %630, %635 : vector<8x128xf32>
    %c3_468 = arith.constant 3 : index
    %637 = memref.load %arg1[%c3_468] : memref<50xf32, #tpu.memory_space<smem>>
    %c1_469 = arith.constant 1 : index
    %c2_470 = arith.constant 2 : index
    %c1_471 = arith.constant 1 : index
    %c0_472 = arith.constant 0 : index
    %638 = vector.load %arg6[%c1_469, %c2_470, %c1_471, %c0_472] : memref<4x16x10x128xf32, #tpu.memory_space<vmem>>, vector<1x1x8x128xf32>
    %639 = vector.shape_cast %638 : vector<1x1x8x128xf32> to vector<8x128xf32>
    %640 = vector.broadcast %637 : f32 to vector<8x128xf32>
    %641 = arith.mulf %640, %639 : vector<8x128xf32>
    %642 = arith.addf %636, %641 : vector<8x128xf32>
    %c4_473 = arith.constant 4 : index
    %643 = memref.load %arg1[%c4_473] : memref<50xf32, #tpu.memory_space<smem>>
    %c0_474 = arith.constant 0 : index
    %c2_475 = arith.constant 2 : index
    %c2_476 = arith.constant 2 : index
    %c0_477 = arith.constant 0 : index
    %644 = vector.load %arg6[%c0_474, %c2_475, %c2_476, %c0_477] : memref<4x16x10x128xf32, #tpu.memory_space<vmem>>, vector<1x1x8x128xf32>
    %645 = vector.shape_cast %644 : vector<1x1x8x128xf32> to vector<8x128xf32>
    %646 = vector.broadcast %643 : f32 to vector<8x128xf32>
    %647 = arith.mulf %646, %645 : vector<8x128xf32>
    %648 = arith.addf %642, %647 : vector<8x128xf32>
    %c1_478 = arith.constant 1 : index
    %649 = memref.load %arg3[%c1_478] : memref<10xf32, #tpu.memory_space<smem>>
    %c0_479 = arith.constant 0 : index
    %c3_480 = arith.constant 3 : index
    %c1_481 = arith.constant 1 : index
    %c0_482 = arith.constant 0 : index
    %650 = vector.load %arg6[%c0_479, %c3_480, %c1_481, %c0_482] : memref<4x16x10x128xf32, #tpu.memory_space<vmem>>, vector<1x1x1x128xf32>
    %651 = vector.shape_cast %650 : vector<1x1x1x128xf32> to vector<1x128xf32>
    %652 = vector.broadcast %649 : f32 to vector<1x128xf32>
    %653 = arith.mulf %652, %651 : vector<1x128xf32>
    %654 = arith.subf %618, %653 : vector<1x128xf32>
    %c5_483 = arith.constant 5 : index
    %655 = memref.load %arg1[%c5_483] : memref<50xf32, #tpu.memory_space<smem>>
    %c0_484 = arith.constant 0 : index
    %c3_485 = arith.constant 3 : index
    %c0_486 = arith.constant 0 : index
    %c0_487 = arith.constant 0 : index
    %656 = vector.load %arg6[%c0_484, %c3_485, %c0_486, %c0_487] : memref<4x16x10x128xf32, #tpu.memory_space<vmem>>, vector<1x1x8x128xf32>
    %657 = vector.shape_cast %656 : vector<1x1x8x128xf32> to vector<8x128xf32>
    %658 = vector.broadcast %655 : f32 to vector<8x128xf32>
    %659 = arith.mulf %658, %657 : vector<8x128xf32>
    %660 = arith.addf %648, %659 : vector<8x128xf32>
    %c6_488 = arith.constant 6 : index
    %661 = memref.load %arg1[%c6_488] : memref<50xf32, #tpu.memory_space<smem>>
    %c1_489 = arith.constant 1 : index
    %c3_490 = arith.constant 3 : index
    %c0_491 = arith.constant 0 : index
    %c0_492 = arith.constant 0 : index
    %662 = vector.load %arg6[%c1_489, %c3_490, %c0_491, %c0_492] : memref<4x16x10x128xf32, #tpu.memory_space<vmem>>, vector<1x1x8x128xf32>
    %663 = vector.shape_cast %662 : vector<1x1x8x128xf32> to vector<8x128xf32>
    %664 = vector.broadcast %661 : f32 to vector<8x128xf32>
    %665 = arith.mulf %664, %663 : vector<8x128xf32>
    %666 = arith.addf %660, %665 : vector<8x128xf32>
    %c7_493 = arith.constant 7 : index
    %667 = memref.load %arg1[%c7_493] : memref<50xf32, #tpu.memory_space<smem>>
    %c0_494 = arith.constant 0 : index
    %c3_495 = arith.constant 3 : index
    %c1_496 = arith.constant 1 : index
    %c0_497 = arith.constant 0 : index
    %668 = vector.load %arg6[%c0_494, %c3_495, %c1_496, %c0_497] : memref<4x16x10x128xf32, #tpu.memory_space<vmem>>, vector<1x1x8x128xf32>
    %669 = vector.shape_cast %668 : vector<1x1x8x128xf32> to vector<8x128xf32>
    %670 = vector.broadcast %667 : f32 to vector<8x128xf32>
    %671 = arith.mulf %670, %669 : vector<8x128xf32>
    %672 = arith.addf %666, %671 : vector<8x128xf32>
    %c8_498 = arith.constant 8 : index
    %673 = memref.load %arg1[%c8_498] : memref<50xf32, #tpu.memory_space<smem>>
    %c1_499 = arith.constant 1 : index
    %c3_500 = arith.constant 3 : index
    %c1_501 = arith.constant 1 : index
    %c0_502 = arith.constant 0 : index
    %674 = vector.load %arg6[%c1_499, %c3_500, %c1_501, %c0_502] : memref<4x16x10x128xf32, #tpu.memory_space<vmem>>, vector<1x1x8x128xf32>
    %675 = vector.shape_cast %674 : vector<1x1x8x128xf32> to vector<8x128xf32>
    %676 = vector.broadcast %673 : f32 to vector<8x128xf32>
    %677 = arith.mulf %676, %675 : vector<8x128xf32>
    %678 = arith.addf %672, %677 : vector<8x128xf32>
    %c9_503 = arith.constant 9 : index
    %679 = memref.load %arg1[%c9_503] : memref<50xf32, #tpu.memory_space<smem>>
    %c0_504 = arith.constant 0 : index
    %c3_505 = arith.constant 3 : index
    %c2_506 = arith.constant 2 : index
    %c0_507 = arith.constant 0 : index
    %680 = vector.load %arg6[%c0_504, %c3_505, %c2_506, %c0_507] : memref<4x16x10x128xf32, #tpu.memory_space<vmem>>, vector<1x1x8x128xf32>
    %681 = vector.shape_cast %680 : vector<1x1x8x128xf32> to vector<8x128xf32>
    %682 = vector.broadcast %679 : f32 to vector<8x128xf32>
    %683 = arith.mulf %682, %681 : vector<8x128xf32>
    %684 = arith.addf %678, %683 : vector<8x128xf32>
    %c2_508 = arith.constant 2 : index
    %685 = memref.load %arg3[%c2_508] : memref<10xf32, #tpu.memory_space<smem>>
    %c0_509 = arith.constant 0 : index
    %c4_510 = arith.constant 4 : index
    %c1_511 = arith.constant 1 : index
    %c0_512 = arith.constant 0 : index
    %686 = vector.load %arg6[%c0_509, %c4_510, %c1_511, %c0_512] : memref<4x16x10x128xf32, #tpu.memory_space<vmem>>, vector<1x1x1x128xf32>
    %687 = vector.shape_cast %686 : vector<1x1x1x128xf32> to vector<1x128xf32>
    %688 = vector.broadcast %685 : f32 to vector<1x128xf32>
    %689 = arith.mulf %688, %687 : vector<1x128xf32>
    %690 = arith.subf %654, %689 : vector<1x128xf32>
    %c10_513 = arith.constant 10 : index
    %691 = memref.load %arg1[%c10_513] : memref<50xf32, #tpu.memory_space<smem>>
    %c0_514 = arith.constant 0 : index
    %c4_515 = arith.constant 4 : index
    %c0_516 = arith.constant 0 : index
    %c0_517 = arith.constant 0 : index
    %692 = vector.load %arg6[%c0_514, %c4_515, %c0_516, %c0_517] : memref<4x16x10x128xf32, #tpu.memory_space<vmem>>, vector<1x1x8x128xf32>
    %693 = vector.shape_cast %692 : vector<1x1x8x128xf32> to vector<8x128xf32>
    %694 = vector.broadcast %691 : f32 to vector<8x128xf32>
    %695 = arith.mulf %694, %693 : vector<8x128xf32>
    %696 = arith.addf %684, %695 : vector<8x128xf32>
    %c11_518 = arith.constant 11 : index
    %697 = memref.load %arg1[%c11_518] : memref<50xf32, #tpu.memory_space<smem>>
    %c1_519 = arith.constant 1 : index
    %c4_520 = arith.constant 4 : index
    %c0_521 = arith.constant 0 : index
    %c0_522 = arith.constant 0 : index
    %698 = vector.load %arg6[%c1_519, %c4_520, %c0_521, %c0_522] : memref<4x16x10x128xf32, #tpu.memory_space<vmem>>, vector<1x1x8x128xf32>
    %699 = vector.shape_cast %698 : vector<1x1x8x128xf32> to vector<8x128xf32>
    %700 = vector.broadcast %697 : f32 to vector<8x128xf32>
    %701 = arith.mulf %700, %699 : vector<8x128xf32>
    %702 = arith.addf %696, %701 : vector<8x128xf32>
    %c12_523 = arith.constant 12 : index
    %703 = memref.load %arg1[%c12_523] : memref<50xf32, #tpu.memory_space<smem>>
    %c0_524 = arith.constant 0 : index
    %c4_525 = arith.constant 4 : index
    %c1_526 = arith.constant 1 : index
    %c0_527 = arith.constant 0 : index
    %704 = vector.load %arg6[%c0_524, %c4_525, %c1_526, %c0_527] : memref<4x16x10x128xf32, #tpu.memory_space<vmem>>, vector<1x1x8x128xf32>
    %705 = vector.shape_cast %704 : vector<1x1x8x128xf32> to vector<8x128xf32>
    %706 = vector.broadcast %703 : f32 to vector<8x128xf32>
    %707 = arith.mulf %706, %705 : vector<8x128xf32>
    %708 = arith.addf %702, %707 : vector<8x128xf32>
    %c13_528 = arith.constant 13 : index
    %709 = memref.load %arg1[%c13_528] : memref<50xf32, #tpu.memory_space<smem>>
    %c1_529 = arith.constant 1 : index
    %c4_530 = arith.constant 4 : index
    %c1_531 = arith.constant 1 : index
    %c0_532 = arith.constant 0 : index
    %710 = vector.load %arg6[%c1_529, %c4_530, %c1_531, %c0_532] : memref<4x16x10x128xf32, #tpu.memory_space<vmem>>, vector<1x1x8x128xf32>
    %711 = vector.shape_cast %710 : vector<1x1x8x128xf32> to vector<8x128xf32>
    %712 = vector.broadcast %709 : f32 to vector<8x128xf32>
    %713 = arith.mulf %712, %711 : vector<8x128xf32>
    %714 = arith.addf %708, %713 : vector<8x128xf32>
    %c14_533 = arith.constant 14 : index
    %715 = memref.load %arg1[%c14_533] : memref<50xf32, #tpu.memory_space<smem>>
    %c0_534 = arith.constant 0 : index
    %c4_535 = arith.constant 4 : index
    %c2_536 = arith.constant 2 : index
    %c0_537 = arith.constant 0 : index
    %716 = vector.load %arg6[%c0_534, %c4_535, %c2_536, %c0_537] : memref<4x16x10x128xf32, #tpu.memory_space<vmem>>, vector<1x1x8x128xf32>
    %717 = vector.shape_cast %716 : vector<1x1x8x128xf32> to vector<8x128xf32>
    %718 = vector.broadcast %715 : f32 to vector<8x128xf32>
    %719 = arith.mulf %718, %717 : vector<8x128xf32>
    %720 = arith.addf %714, %719 : vector<8x128xf32>
    %c3_538 = arith.constant 3 : index
    %721 = memref.load %arg3[%c3_538] : memref<10xf32, #tpu.memory_space<smem>>
    %c0_539 = arith.constant 0 : index
    %c5_540 = arith.constant 5 : index
    %c1_541 = arith.constant 1 : index
    %c0_542 = arith.constant 0 : index
    %722 = vector.load %arg6[%c0_539, %c5_540, %c1_541, %c0_542] : memref<4x16x10x128xf32, #tpu.memory_space<vmem>>, vector<1x1x1x128xf32>
    %723 = vector.shape_cast %722 : vector<1x1x1x128xf32> to vector<1x128xf32>
    %724 = vector.broadcast %721 : f32 to vector<1x128xf32>
    %725 = arith.mulf %724, %723 : vector<1x128xf32>
    %726 = arith.subf %690, %725 : vector<1x128xf32>
    %c15_543 = arith.constant 15 : index
    %727 = memref.load %arg1[%c15_543] : memref<50xf32, #tpu.memory_space<smem>>
    %c0_544 = arith.constant 0 : index
    %c5_545 = arith.constant 5 : index
    %c0_546 = arith.constant 0 : index
    %c0_547 = arith.constant 0 : index
    %728 = vector.load %arg6[%c0_544, %c5_545, %c0_546, %c0_547] : memref<4x16x10x128xf32, #tpu.memory_space<vmem>>, vector<1x1x8x128xf32>
    %729 = vector.shape_cast %728 : vector<1x1x8x128xf32> to vector<8x128xf32>
    %730 = vector.broadcast %727 : f32 to vector<8x128xf32>
    %731 = arith.mulf %730, %729 : vector<8x128xf32>
    %732 = arith.addf %720, %731 : vector<8x128xf32>
    %c16_548 = arith.constant 16 : index
    %733 = memref.load %arg1[%c16_548] : memref<50xf32, #tpu.memory_space<smem>>
    %c1_549 = arith.constant 1 : index
    %c5_550 = arith.constant 5 : index
    %c0_551 = arith.constant 0 : index
    %c0_552 = arith.constant 0 : index
    %734 = vector.load %arg6[%c1_549, %c5_550, %c0_551, %c0_552] : memref<4x16x10x128xf32, #tpu.memory_space<vmem>>, vector<1x1x8x128xf32>
    %735 = vector.shape_cast %734 : vector<1x1x8x128xf32> to vector<8x128xf32>
    %736 = vector.broadcast %733 : f32 to vector<8x128xf32>
    %737 = arith.mulf %736, %735 : vector<8x128xf32>
    %738 = arith.addf %732, %737 : vector<8x128xf32>
    %c17_553 = arith.constant 17 : index
    %739 = memref.load %arg1[%c17_553] : memref<50xf32, #tpu.memory_space<smem>>
    %c0_554 = arith.constant 0 : index
    %c5_555 = arith.constant 5 : index
    %c1_556 = arith.constant 1 : index
    %c0_557 = arith.constant 0 : index
    %740 = vector.load %arg6[%c0_554, %c5_555, %c1_556, %c0_557] : memref<4x16x10x128xf32, #tpu.memory_space<vmem>>, vector<1x1x8x128xf32>
    %741 = vector.shape_cast %740 : vector<1x1x8x128xf32> to vector<8x128xf32>
    %742 = vector.broadcast %739 : f32 to vector<8x128xf32>
    %743 = arith.mulf %742, %741 : vector<8x128xf32>
    %744 = arith.addf %738, %743 : vector<8x128xf32>
    %c18_558 = arith.constant 18 : index
    %745 = memref.load %arg1[%c18_558] : memref<50xf32, #tpu.memory_space<smem>>
    %c1_559 = arith.constant 1 : index
    %c5_560 = arith.constant 5 : index
    %c1_561 = arith.constant 1 : index
    %c0_562 = arith.constant 0 : index
    %746 = vector.load %arg6[%c1_559, %c5_560, %c1_561, %c0_562] : memref<4x16x10x128xf32, #tpu.memory_space<vmem>>, vector<1x1x8x128xf32>
    %747 = vector.shape_cast %746 : vector<1x1x8x128xf32> to vector<8x128xf32>
    %748 = vector.broadcast %745 : f32 to vector<8x128xf32>
    %749 = arith.mulf %748, %747 : vector<8x128xf32>
    %750 = arith.addf %744, %749 : vector<8x128xf32>
    %c19_563 = arith.constant 19 : index
    %751 = memref.load %arg1[%c19_563] : memref<50xf32, #tpu.memory_space<smem>>
    %c0_564 = arith.constant 0 : index
    %c5_565 = arith.constant 5 : index
    %c2_566 = arith.constant 2 : index
    %c0_567 = arith.constant 0 : index
    %752 = vector.load %arg6[%c0_564, %c5_565, %c2_566, %c0_567] : memref<4x16x10x128xf32, #tpu.memory_space<vmem>>, vector<1x1x8x128xf32>
    %753 = vector.shape_cast %752 : vector<1x1x8x128xf32> to vector<8x128xf32>
    %754 = vector.broadcast %751 : f32 to vector<8x128xf32>
    %755 = arith.mulf %754, %753 : vector<8x128xf32>
    %756 = arith.addf %750, %755 : vector<8x128xf32>
    %c4_568 = arith.constant 4 : index
    %757 = memref.load %arg3[%c4_568] : memref<10xf32, #tpu.memory_space<smem>>
    %c0_569 = arith.constant 0 : index
    %c6_570 = arith.constant 6 : index
    %c1_571 = arith.constant 1 : index
    %c0_572 = arith.constant 0 : index
    %758 = vector.load %arg6[%c0_569, %c6_570, %c1_571, %c0_572] : memref<4x16x10x128xf32, #tpu.memory_space<vmem>>, vector<1x1x1x128xf32>
    %759 = vector.shape_cast %758 : vector<1x1x1x128xf32> to vector<1x128xf32>
    %760 = vector.broadcast %757 : f32 to vector<1x128xf32>
    %761 = arith.mulf %760, %759 : vector<1x128xf32>
    %762 = arith.subf %726, %761 : vector<1x128xf32>
    %c20_573 = arith.constant 20 : index
    %763 = memref.load %arg1[%c20_573] : memref<50xf32, #tpu.memory_space<smem>>
    %c0_574 = arith.constant 0 : index
    %c6_575 = arith.constant 6 : index
    %c0_576 = arith.constant 0 : index
    %c0_577 = arith.constant 0 : index
    %764 = vector.load %arg6[%c0_574, %c6_575, %c0_576, %c0_577] : memref<4x16x10x128xf32, #tpu.memory_space<vmem>>, vector<1x1x8x128xf32>
    %765 = vector.shape_cast %764 : vector<1x1x8x128xf32> to vector<8x128xf32>
    %766 = vector.broadcast %763 : f32 to vector<8x128xf32>
    %767 = arith.mulf %766, %765 : vector<8x128xf32>
    %768 = arith.addf %756, %767 : vector<8x128xf32>
    %c21_578 = arith.constant 21 : index
    %769 = memref.load %arg1[%c21_578] : memref<50xf32, #tpu.memory_space<smem>>
    %c1_579 = arith.constant 1 : index
    %c6_580 = arith.constant 6 : index
    %c0_581 = arith.constant 0 : index
    %c0_582 = arith.constant 0 : index
    %770 = vector.load %arg6[%c1_579, %c6_580, %c0_581, %c0_582] : memref<4x16x10x128xf32, #tpu.memory_space<vmem>>, vector<1x1x8x128xf32>
    %771 = vector.shape_cast %770 : vector<1x1x8x128xf32> to vector<8x128xf32>
    %772 = vector.broadcast %769 : f32 to vector<8x128xf32>
    %773 = arith.mulf %772, %771 : vector<8x128xf32>
    %774 = arith.addf %768, %773 : vector<8x128xf32>
    %c22_583 = arith.constant 22 : index
    %775 = memref.load %arg1[%c22_583] : memref<50xf32, #tpu.memory_space<smem>>
    %c0_584 = arith.constant 0 : index
    %c6_585 = arith.constant 6 : index
    %c1_586 = arith.constant 1 : index
    %c0_587 = arith.constant 0 : index
    %776 = vector.load %arg6[%c0_584, %c6_585, %c1_586, %c0_587] : memref<4x16x10x128xf32, #tpu.memory_space<vmem>>, vector<1x1x8x128xf32>
    %777 = vector.shape_cast %776 : vector<1x1x8x128xf32> to vector<8x128xf32>
    %778 = vector.broadcast %775 : f32 to vector<8x128xf32>
    %779 = arith.mulf %778, %777 : vector<8x128xf32>
    %780 = arith.addf %774, %779 : vector<8x128xf32>
    %c23_588 = arith.constant 23 : index
    %781 = memref.load %arg1[%c23_588] : memref<50xf32, #tpu.memory_space<smem>>
    %c1_589 = arith.constant 1 : index
    %c6_590 = arith.constant 6 : index
    %c1_591 = arith.constant 1 : index
    %c0_592 = arith.constant 0 : index
    %782 = vector.load %arg6[%c1_589, %c6_590, %c1_591, %c0_592] : memref<4x16x10x128xf32, #tpu.memory_space<vmem>>, vector<1x1x8x128xf32>
    %783 = vector.shape_cast %782 : vector<1x1x8x128xf32> to vector<8x128xf32>
    %784 = vector.broadcast %781 : f32 to vector<8x128xf32>
    %785 = arith.mulf %784, %783 : vector<8x128xf32>
    %786 = arith.addf %780, %785 : vector<8x128xf32>
    %c24_593 = arith.constant 24 : index
    %787 = memref.load %arg1[%c24_593] : memref<50xf32, #tpu.memory_space<smem>>
    %c0_594 = arith.constant 0 : index
    %c6_595 = arith.constant 6 : index
    %c2_596 = arith.constant 2 : index
    %c0_597 = arith.constant 0 : index
    %788 = vector.load %arg6[%c0_594, %c6_595, %c2_596, %c0_597] : memref<4x16x10x128xf32, #tpu.memory_space<vmem>>, vector<1x1x8x128xf32>
    %789 = vector.shape_cast %788 : vector<1x1x8x128xf32> to vector<8x128xf32>
    %790 = vector.broadcast %787 : f32 to vector<8x128xf32>
    %791 = arith.mulf %790, %789 : vector<8x128xf32>
    %792 = arith.addf %786, %791 : vector<8x128xf32>
    %c5_598 = arith.constant 5 : index
    %793 = memref.load %arg3[%c5_598] : memref<10xf32, #tpu.memory_space<smem>>
    %c2_599 = arith.constant 2 : index
    %c2_600 = arith.constant 2 : index
    %c1_601 = arith.constant 1 : index
    %c0_602 = arith.constant 0 : index
    %794 = vector.load %arg6[%c2_599, %c2_600, %c1_601, %c0_602] : memref<4x16x10x128xf32, #tpu.memory_space<vmem>>, vector<1x1x1x128xf32>
    %795 = vector.shape_cast %794 : vector<1x1x1x128xf32> to vector<1x128xf32>
    %796 = vector.broadcast %793 : f32 to vector<1x128xf32>
    %797 = arith.mulf %796, %795 : vector<1x128xf32>
    %798 = arith.subf %762, %797 : vector<1x128xf32>
    %c25_603 = arith.constant 25 : index
    %799 = memref.load %arg1[%c25_603] : memref<50xf32, #tpu.memory_space<smem>>
    %c2_604 = arith.constant 2 : index
    %c2_605 = arith.constant 2 : index
    %c0_606 = arith.constant 0 : index
    %c0_607 = arith.constant 0 : index
    %800 = vector.load %arg6[%c2_604, %c2_605, %c0_606, %c0_607] : memref<4x16x10x128xf32, #tpu.memory_space<vmem>>, vector<1x1x8x128xf32>
    %801 = vector.shape_cast %800 : vector<1x1x8x128xf32> to vector<8x128xf32>
    %802 = vector.broadcast %799 : f32 to vector<8x128xf32>
    %803 = arith.mulf %802, %801 : vector<8x128xf32>
    %804 = arith.addf %792, %803 : vector<8x128xf32>
    %c26_608 = arith.constant 26 : index
    %805 = memref.load %arg1[%c26_608] : memref<50xf32, #tpu.memory_space<smem>>
    %c3_609 = arith.constant 3 : index
    %c2_610 = arith.constant 2 : index
    %c0_611 = arith.constant 0 : index
    %c0_612 = arith.constant 0 : index
    %806 = vector.load %arg6[%c3_609, %c2_610, %c0_611, %c0_612] : memref<4x16x10x128xf32, #tpu.memory_space<vmem>>, vector<1x1x8x128xf32>
    %807 = vector.shape_cast %806 : vector<1x1x8x128xf32> to vector<8x128xf32>
    %808 = vector.broadcast %805 : f32 to vector<8x128xf32>
    %809 = arith.mulf %808, %807 : vector<8x128xf32>
    %810 = arith.addf %804, %809 : vector<8x128xf32>
    %c27_613 = arith.constant 27 : index
    %811 = memref.load %arg1[%c27_613] : memref<50xf32, #tpu.memory_space<smem>>
    %c2_614 = arith.constant 2 : index
    %c2_615 = arith.constant 2 : index
    %c1_616 = arith.constant 1 : index
    %c0_617 = arith.constant 0 : index
    %812 = vector.load %arg6[%c2_614, %c2_615, %c1_616, %c0_617] : memref<4x16x10x128xf32, #tpu.memory_space<vmem>>, vector<1x1x8x128xf32>
    %813 = vector.shape_cast %812 : vector<1x1x8x128xf32> to vector<8x128xf32>
    %814 = vector.broadcast %811 : f32 to vector<8x128xf32>
    %815 = arith.mulf %814, %813 : vector<8x128xf32>
    %816 = arith.addf %810, %815 : vector<8x128xf32>
    %c28_618 = arith.constant 28 : index
    %817 = memref.load %arg1[%c28_618] : memref<50xf32, #tpu.memory_space<smem>>
    %c3_619 = arith.constant 3 : index
    %c2_620 = arith.constant 2 : index
    %c1_621 = arith.constant 1 : index
    %c0_622 = arith.constant 0 : index
    %818 = vector.load %arg6[%c3_619, %c2_620, %c1_621, %c0_622] : memref<4x16x10x128xf32, #tpu.memory_space<vmem>>, vector<1x1x8x128xf32>
    %819 = vector.shape_cast %818 : vector<1x1x8x128xf32> to vector<8x128xf32>
    %820 = vector.broadcast %817 : f32 to vector<8x128xf32>
    %821 = arith.mulf %820, %819 : vector<8x128xf32>
    %822 = arith.addf %816, %821 : vector<8x128xf32>
    %c29_623 = arith.constant 29 : index
    %823 = memref.load %arg1[%c29_623] : memref<50xf32, #tpu.memory_space<smem>>
    %c2_624 = arith.constant 2 : index
    %c2_625 = arith.constant 2 : index
    %c2_626 = arith.constant 2 : index
    %c0_627 = arith.constant 0 : index
    %824 = vector.load %arg6[%c2_624, %c2_625, %c2_626, %c0_627] : memref<4x16x10x128xf32, #tpu.memory_space<vmem>>, vector<1x1x8x128xf32>
    %825 = vector.shape_cast %824 : vector<1x1x8x128xf32> to vector<8x128xf32>
    %826 = vector.broadcast %823 : f32 to vector<8x128xf32>
    %827 = arith.mulf %826, %825 : vector<8x128xf32>
    %828 = arith.addf %822, %827 : vector<8x128xf32>
    %c6_628 = arith.constant 6 : index
    %829 = memref.load %arg3[%c6_628] : memref<10xf32, #tpu.memory_space<smem>>
    %c2_629 = arith.constant 2 : index
    %c3_630 = arith.constant 3 : index
    %c1_631 = arith.constant 1 : index
    %c0_632 = arith.constant 0 : index
    %830 = vector.load %arg6[%c2_629, %c3_630, %c1_631, %c0_632] : memref<4x16x10x128xf32, #tpu.memory_space<vmem>>, vector<1x1x1x128xf32>
    %831 = vector.shape_cast %830 : vector<1x1x1x128xf32> to vector<1x128xf32>
    %832 = vector.broadcast %829 : f32 to vector<1x128xf32>
    %833 = arith.mulf %832, %831 : vector<1x128xf32>
    %834 = arith.subf %798, %833 : vector<1x128xf32>
    %c30_633 = arith.constant 30 : index
    %835 = memref.load %arg1[%c30_633] : memref<50xf32, #tpu.memory_space<smem>>
    %c2_634 = arith.constant 2 : index
    %c3_635 = arith.constant 3 : index
    %c0_636 = arith.constant 0 : index
    %c0_637 = arith.constant 0 : index
    %836 = vector.load %arg6[%c2_634, %c3_635, %c0_636, %c0_637] : memref<4x16x10x128xf32, #tpu.memory_space<vmem>>, vector<1x1x8x128xf32>
    %837 = vector.shape_cast %836 : vector<1x1x8x128xf32> to vector<8x128xf32>
    %838 = vector.broadcast %835 : f32 to vector<8x128xf32>
    %839 = arith.mulf %838, %837 : vector<8x128xf32>
    %840 = arith.addf %828, %839 : vector<8x128xf32>
    %c31_638 = arith.constant 31 : index
    %841 = memref.load %arg1[%c31_638] : memref<50xf32, #tpu.memory_space<smem>>
    %c3_639 = arith.constant 3 : index
    %c3_640 = arith.constant 3 : index
    %c0_641 = arith.constant 0 : index
    %c0_642 = arith.constant 0 : index
    %842 = vector.load %arg6[%c3_639, %c3_640, %c0_641, %c0_642] : memref<4x16x10x128xf32, #tpu.memory_space<vmem>>, vector<1x1x8x128xf32>
    %843 = vector.shape_cast %842 : vector<1x1x8x128xf32> to vector<8x128xf32>
    %844 = vector.broadcast %841 : f32 to vector<8x128xf32>
    %845 = arith.mulf %844, %843 : vector<8x128xf32>
    %846 = arith.addf %840, %845 : vector<8x128xf32>
    %c32_643 = arith.constant 32 : index
    %847 = memref.load %arg1[%c32_643] : memref<50xf32, #tpu.memory_space<smem>>
    %c2_644 = arith.constant 2 : index
    %c3_645 = arith.constant 3 : index
    %c1_646 = arith.constant 1 : index
    %c0_647 = arith.constant 0 : index
    %848 = vector.load %arg6[%c2_644, %c3_645, %c1_646, %c0_647] : memref<4x16x10x128xf32, #tpu.memory_space<vmem>>, vector<1x1x8x128xf32>
    %849 = vector.shape_cast %848 : vector<1x1x8x128xf32> to vector<8x128xf32>
    %850 = vector.broadcast %847 : f32 to vector<8x128xf32>
    %851 = arith.mulf %850, %849 : vector<8x128xf32>
    %852 = arith.addf %846, %851 : vector<8x128xf32>
    %c33_648 = arith.constant 33 : index
    %853 = memref.load %arg1[%c33_648] : memref<50xf32, #tpu.memory_space<smem>>
    %c3_649 = arith.constant 3 : index
    %c3_650 = arith.constant 3 : index
    %c1_651 = arith.constant 1 : index
    %c0_652 = arith.constant 0 : index
    %854 = vector.load %arg6[%c3_649, %c3_650, %c1_651, %c0_652] : memref<4x16x10x128xf32, #tpu.memory_space<vmem>>, vector<1x1x8x128xf32>
    %855 = vector.shape_cast %854 : vector<1x1x8x128xf32> to vector<8x128xf32>
    %856 = vector.broadcast %853 : f32 to vector<8x128xf32>
    %857 = arith.mulf %856, %855 : vector<8x128xf32>
    %858 = arith.addf %852, %857 : vector<8x128xf32>
    %c34_653 = arith.constant 34 : index
    %859 = memref.load %arg1[%c34_653] : memref<50xf32, #tpu.memory_space<smem>>
    %c2_654 = arith.constant 2 : index
    %c3_655 = arith.constant 3 : index
    %c2_656 = arith.constant 2 : index
    %c0_657 = arith.constant 0 : index
    %860 = vector.load %arg6[%c2_654, %c3_655, %c2_656, %c0_657] : memref<4x16x10x128xf32, #tpu.memory_space<vmem>>, vector<1x1x8x128xf32>
    %861 = vector.shape_cast %860 : vector<1x1x8x128xf32> to vector<8x128xf32>
    %862 = vector.broadcast %859 : f32 to vector<8x128xf32>
    %863 = arith.mulf %862, %861 : vector<8x128xf32>
    %864 = arith.addf %858, %863 : vector<8x128xf32>
    %c7_658 = arith.constant 7 : index
    %865 = memref.load %arg3[%c7_658] : memref<10xf32, #tpu.memory_space<smem>>
    %c2_659 = arith.constant 2 : index
    %c4_660 = arith.constant 4 : index
    %c1_661 = arith.constant 1 : index
    %c0_662 = arith.constant 0 : index
    %866 = vector.load %arg6[%c2_659, %c4_660, %c1_661, %c0_662] : memref<4x16x10x128xf32, #tpu.memory_space<vmem>>, vector<1x1x1x128xf32>
    %867 = vector.shape_cast %866 : vector<1x1x1x128xf32> to vector<1x128xf32>
    %868 = vector.broadcast %865 : f32 to vector<1x128xf32>
    %869 = arith.mulf %868, %867 : vector<1x128xf32>
    %870 = arith.subf %834, %869 : vector<1x128xf32>
    %c35_663 = arith.constant 35 : index
    %871 = memref.load %arg1[%c35_663] : memref<50xf32, #tpu.memory_space<smem>>
    %c2_664 = arith.constant 2 : index
    %c4_665 = arith.constant 4 : index
    %c0_666 = arith.constant 0 : index
    %c0_667 = arith.constant 0 : index
    %872 = vector.load %arg6[%c2_664, %c4_665, %c0_666, %c0_667] : memref<4x16x10x128xf32, #tpu.memory_space<vmem>>, vector<1x1x8x128xf32>
    %873 = vector.shape_cast %872 : vector<1x1x8x128xf32> to vector<8x128xf32>
    %874 = vector.broadcast %871 : f32 to vector<8x128xf32>
    %875 = arith.mulf %874, %873 : vector<8x128xf32>
    %876 = arith.addf %864, %875 : vector<8x128xf32>
    %c36_668 = arith.constant 36 : index
    %877 = memref.load %arg1[%c36_668] : memref<50xf32, #tpu.memory_space<smem>>
    %c3_669 = arith.constant 3 : index
    %c4_670 = arith.constant 4 : index
    %c0_671 = arith.constant 0 : index
    %c0_672 = arith.constant 0 : index
    %878 = vector.load %arg6[%c3_669, %c4_670, %c0_671, %c0_672] : memref<4x16x10x128xf32, #tpu.memory_space<vmem>>, vector<1x1x8x128xf32>
    %879 = vector.shape_cast %878 : vector<1x1x8x128xf32> to vector<8x128xf32>
    %880 = vector.broadcast %877 : f32 to vector<8x128xf32>
    %881 = arith.mulf %880, %879 : vector<8x128xf32>
    %882 = arith.addf %876, %881 : vector<8x128xf32>
    %c37_673 = arith.constant 37 : index
    %883 = memref.load %arg1[%c37_673] : memref<50xf32, #tpu.memory_space<smem>>
    %c2_674 = arith.constant 2 : index
    %c4_675 = arith.constant 4 : index
    %c1_676 = arith.constant 1 : index
    %c0_677 = arith.constant 0 : index
    %884 = vector.load %arg6[%c2_674, %c4_675, %c1_676, %c0_677] : memref<4x16x10x128xf32, #tpu.memory_space<vmem>>, vector<1x1x8x128xf32>
    %885 = vector.shape_cast %884 : vector<1x1x8x128xf32> to vector<8x128xf32>
    %886 = vector.broadcast %883 : f32 to vector<8x128xf32>
    %887 = arith.mulf %886, %885 : vector<8x128xf32>
    %888 = arith.addf %882, %887 : vector<8x128xf32>
    %c38_678 = arith.constant 38 : index
    %889 = memref.load %arg1[%c38_678] : memref<50xf32, #tpu.memory_space<smem>>
    %c3_679 = arith.constant 3 : index
    %c4_680 = arith.constant 4 : index
    %c1_681 = arith.constant 1 : index
    %c0_682 = arith.constant 0 : index
    %890 = vector.load %arg6[%c3_679, %c4_680, %c1_681, %c0_682] : memref<4x16x10x128xf32, #tpu.memory_space<vmem>>, vector<1x1x8x128xf32>
    %891 = vector.shape_cast %890 : vector<1x1x8x128xf32> to vector<8x128xf32>
    %892 = vector.broadcast %889 : f32 to vector<8x128xf32>
    %893 = arith.mulf %892, %891 : vector<8x128xf32>
    %894 = arith.addf %888, %893 : vector<8x128xf32>
    %c39_683 = arith.constant 39 : index
    %895 = memref.load %arg1[%c39_683] : memref<50xf32, #tpu.memory_space<smem>>
    %c2_684 = arith.constant 2 : index
    %c4_685 = arith.constant 4 : index
    %c2_686 = arith.constant 2 : index
    %c0_687 = arith.constant 0 : index
    %896 = vector.load %arg6[%c2_684, %c4_685, %c2_686, %c0_687] : memref<4x16x10x128xf32, #tpu.memory_space<vmem>>, vector<1x1x8x128xf32>
    %897 = vector.shape_cast %896 : vector<1x1x8x128xf32> to vector<8x128xf32>
    %898 = vector.broadcast %895 : f32 to vector<8x128xf32>
    %899 = arith.mulf %898, %897 : vector<8x128xf32>
    %900 = arith.addf %894, %899 : vector<8x128xf32>
    %c8_688 = arith.constant 8 : index
    %901 = memref.load %arg3[%c8_688] : memref<10xf32, #tpu.memory_space<smem>>
    %c2_689 = arith.constant 2 : index
    %c5_690 = arith.constant 5 : index
    %c1_691 = arith.constant 1 : index
    %c0_692 = arith.constant 0 : index
    %902 = vector.load %arg6[%c2_689, %c5_690, %c1_691, %c0_692] : memref<4x16x10x128xf32, #tpu.memory_space<vmem>>, vector<1x1x1x128xf32>
    %903 = vector.shape_cast %902 : vector<1x1x1x128xf32> to vector<1x128xf32>
    %904 = vector.broadcast %901 : f32 to vector<1x128xf32>
    %905 = arith.mulf %904, %903 : vector<1x128xf32>
    %906 = arith.subf %870, %905 : vector<1x128xf32>
    %c40_693 = arith.constant 40 : index
    %907 = memref.load %arg1[%c40_693] : memref<50xf32, #tpu.memory_space<smem>>
    %c2_694 = arith.constant 2 : index
    %c5_695 = arith.constant 5 : index
    %c0_696 = arith.constant 0 : index
    %c0_697 = arith.constant 0 : index
    %908 = vector.load %arg6[%c2_694, %c5_695, %c0_696, %c0_697] : memref<4x16x10x128xf32, #tpu.memory_space<vmem>>, vector<1x1x8x128xf32>
    %909 = vector.shape_cast %908 : vector<1x1x8x128xf32> to vector<8x128xf32>
    %910 = vector.broadcast %907 : f32 to vector<8x128xf32>
    %911 = arith.mulf %910, %909 : vector<8x128xf32>
    %912 = arith.addf %900, %911 : vector<8x128xf32>
    %c41_698 = arith.constant 41 : index
    %913 = memref.load %arg1[%c41_698] : memref<50xf32, #tpu.memory_space<smem>>
    %c3_699 = arith.constant 3 : index
    %c5_700 = arith.constant 5 : index
    %c0_701 = arith.constant 0 : index
    %c0_702 = arith.constant 0 : index
    %914 = vector.load %arg6[%c3_699, %c5_700, %c0_701, %c0_702] : memref<4x16x10x128xf32, #tpu.memory_space<vmem>>, vector<1x1x8x128xf32>
    %915 = vector.shape_cast %914 : vector<1x1x8x128xf32> to vector<8x128xf32>
    %916 = vector.broadcast %913 : f32 to vector<8x128xf32>
    %917 = arith.mulf %916, %915 : vector<8x128xf32>
    %918 = arith.addf %912, %917 : vector<8x128xf32>
    %c42_703 = arith.constant 42 : index
    %919 = memref.load %arg1[%c42_703] : memref<50xf32, #tpu.memory_space<smem>>
    %c2_704 = arith.constant 2 : index
    %c5_705 = arith.constant 5 : index
    %c1_706 = arith.constant 1 : index
    %c0_707 = arith.constant 0 : index
    %920 = vector.load %arg6[%c2_704, %c5_705, %c1_706, %c0_707] : memref<4x16x10x128xf32, #tpu.memory_space<vmem>>, vector<1x1x8x128xf32>
    %921 = vector.shape_cast %920 : vector<1x1x8x128xf32> to vector<8x128xf32>
    %922 = vector.broadcast %919 : f32 to vector<8x128xf32>
    %923 = arith.mulf %922, %921 : vector<8x128xf32>
    %924 = arith.addf %918, %923 : vector<8x128xf32>
    %c43_708 = arith.constant 43 : index
    %925 = memref.load %arg1[%c43_708] : memref<50xf32, #tpu.memory_space<smem>>
    %c3_709 = arith.constant 3 : index
    %c5_710 = arith.constant 5 : index
    %c1_711 = arith.constant 1 : index
    %c0_712 = arith.constant 0 : index
    %926 = vector.load %arg6[%c3_709, %c5_710, %c1_711, %c0_712] : memref<4x16x10x128xf32, #tpu.memory_space<vmem>>, vector<1x1x8x128xf32>
    %927 = vector.shape_cast %926 : vector<1x1x8x128xf32> to vector<8x128xf32>
    %928 = vector.broadcast %925 : f32 to vector<8x128xf32>
    %929 = arith.mulf %928, %927 : vector<8x128xf32>
    %930 = arith.addf %924, %929 : vector<8x128xf32>
    %c44_713 = arith.constant 44 : index
    %931 = memref.load %arg1[%c44_713] : memref<50xf32, #tpu.memory_space<smem>>
    %c2_714 = arith.constant 2 : index
    %c5_715 = arith.constant 5 : index
    %c2_716 = arith.constant 2 : index
    %c0_717 = arith.constant 0 : index
    %932 = vector.load %arg6[%c2_714, %c5_715, %c2_716, %c0_717] : memref<4x16x10x128xf32, #tpu.memory_space<vmem>>, vector<1x1x8x128xf32>
    %933 = vector.shape_cast %932 : vector<1x1x8x128xf32> to vector<8x128xf32>
    %934 = vector.broadcast %931 : f32 to vector<8x128xf32>
    %935 = arith.mulf %934, %933 : vector<8x128xf32>
    %936 = arith.addf %930, %935 : vector<8x128xf32>
    %c9_718 = arith.constant 9 : index
    %937 = memref.load %arg3[%c9_718] : memref<10xf32, #tpu.memory_space<smem>>
    %c2_719 = arith.constant 2 : index
    %c6_720 = arith.constant 6 : index
    %c1_721 = arith.constant 1 : index
    %c0_722 = arith.constant 0 : index
    %938 = vector.load %arg6[%c2_719, %c6_720, %c1_721, %c0_722] : memref<4x16x10x128xf32, #tpu.memory_space<vmem>>, vector<1x1x1x128xf32>
    %939 = vector.shape_cast %938 : vector<1x1x1x128xf32> to vector<1x128xf32>
    %940 = vector.broadcast %937 : f32 to vector<1x128xf32>
    %941 = arith.mulf %940, %939 : vector<1x128xf32>
    %942 = arith.subf %906, %941 : vector<1x128xf32>
    %c45_723 = arith.constant 45 : index
    %943 = memref.load %arg1[%c45_723] : memref<50xf32, #tpu.memory_space<smem>>
    %c2_724 = arith.constant 2 : index
    %c6_725 = arith.constant 6 : index
    %c0_726 = arith.constant 0 : index
    %c0_727 = arith.constant 0 : index
    %944 = vector.load %arg6[%c2_724, %c6_725, %c0_726, %c0_727] : memref<4x16x10x128xf32, #tpu.memory_space<vmem>>, vector<1x1x8x128xf32>
    %945 = vector.shape_cast %944 : vector<1x1x8x128xf32> to vector<8x128xf32>
    %946 = vector.broadcast %943 : f32 to vector<8x128xf32>
    %947 = arith.mulf %946, %945 : vector<8x128xf32>
    %948 = arith.addf %936, %947 : vector<8x128xf32>
    %c46_728 = arith.constant 46 : index
    %949 = memref.load %arg1[%c46_728] : memref<50xf32, #tpu.memory_space<smem>>
    %c3_729 = arith.constant 3 : index
    %c6_730 = arith.constant 6 : index
    %c0_731 = arith.constant 0 : index
    %c0_732 = arith.constant 0 : index
    %950 = vector.load %arg6[%c3_729, %c6_730, %c0_731, %c0_732] : memref<4x16x10x128xf32, #tpu.memory_space<vmem>>, vector<1x1x8x128xf32>
    %951 = vector.shape_cast %950 : vector<1x1x8x128xf32> to vector<8x128xf32>
    %952 = vector.broadcast %949 : f32 to vector<8x128xf32>
    %953 = arith.mulf %952, %951 : vector<8x128xf32>
    %954 = arith.addf %948, %953 : vector<8x128xf32>
    %c47_733 = arith.constant 47 : index
    %955 = memref.load %arg1[%c47_733] : memref<50xf32, #tpu.memory_space<smem>>
    %c2_734 = arith.constant 2 : index
    %c6_735 = arith.constant 6 : index
    %c1_736 = arith.constant 1 : index
    %c0_737 = arith.constant 0 : index
    %956 = vector.load %arg6[%c2_734, %c6_735, %c1_736, %c0_737] : memref<4x16x10x128xf32, #tpu.memory_space<vmem>>, vector<1x1x8x128xf32>
    %957 = vector.shape_cast %956 : vector<1x1x8x128xf32> to vector<8x128xf32>
    %958 = vector.broadcast %955 : f32 to vector<8x128xf32>
    %959 = arith.mulf %958, %957 : vector<8x128xf32>
    %960 = arith.addf %954, %959 : vector<8x128xf32>
    %c48_738 = arith.constant 48 : index
    %961 = memref.load %arg1[%c48_738] : memref<50xf32, #tpu.memory_space<smem>>
    %c3_739 = arith.constant 3 : index
    %c6_740 = arith.constant 6 : index
    %c1_741 = arith.constant 1 : index
    %c0_742 = arith.constant 0 : index
    %962 = vector.load %arg6[%c3_739, %c6_740, %c1_741, %c0_742] : memref<4x16x10x128xf32, #tpu.memory_space<vmem>>, vector<1x1x8x128xf32>
    %963 = vector.shape_cast %962 : vector<1x1x8x128xf32> to vector<8x128xf32>
    %964 = vector.broadcast %961 : f32 to vector<8x128xf32>
    %965 = arith.mulf %964, %963 : vector<8x128xf32>
    %966 = arith.addf %960, %965 : vector<8x128xf32>
    %c49_743 = arith.constant 49 : index
    %967 = memref.load %arg1[%c49_743] : memref<50xf32, #tpu.memory_space<smem>>
    %c2_744 = arith.constant 2 : index
    %c6_745 = arith.constant 6 : index
    %c2_746 = arith.constant 2 : index
    %c0_747 = arith.constant 0 : index
    %968 = vector.load %arg6[%c2_744, %c6_745, %c2_746, %c0_747] : memref<4x16x10x128xf32, #tpu.memory_space<vmem>>, vector<1x1x8x128xf32>
    %969 = vector.shape_cast %968 : vector<1x1x8x128xf32> to vector<8x128xf32>
    %970 = vector.broadcast %967 : f32 to vector<8x128xf32>
    %971 = arith.mulf %970, %969 : vector<8x128xf32>
    %972 = arith.addf %966, %971 : vector<8x128xf32>
    %973 = vector.broadcast %942 : vector<1x128xf32> to vector<8x128xf32>
    %974 = arith.addf %972, %973 : vector<8x128xf32>
    %975 = arith.select %2, %974, %972 : vector<8x128xi1>, vector<8x128xf32>
    %cst_748 = arith.constant 0.000000e+00 : f32
    %976 = vector.broadcast %cst_748 : f32 to vector<8x128xf32>
    %977 = arith.maximumf %975, %976 : vector<8x128xf32>
    %c0_749 = arith.constant 0 : index
    %c2_750 = arith.constant 2 : index
    %c0_751 = arith.constant 0 : index
    %c0_752 = arith.constant 0 : index
    %978 = vector.load %arg7[%c0_749, %c2_750, %c0_751, %c0_752] : memref<1x8x8x128xf32, #tpu.memory_space<vmem>>, vector<1x1x8x128xf32>
    %979 = vector.shape_cast %978 : vector<1x1x8x128xf32> to vector<8x128xf32>
    %980 = vector.shape_cast %977 : vector<8x128xf32> to vector<1x1x8x128xf32>
    tpu.vector_store %arg7[%c0_749, %c2_750, %c0_751, %c0_752], %980 {strides = array<i32>} : memref<1x8x8x128xf32, #tpu.memory_space<vmem>>, vector<1x1x8x128xf32>,
    %c0_753 = arith.constant 0 : index
    %981 = memref.load %arg5[%c0_753] : memref<4xf32, #tpu.memory_space<smem>>
    %c2_754 = arith.constant 2 : index
    %982 = memref.load %arg5[%c2_754] : memref<4xf32, #tpu.memory_space<smem>>
    %c0_755 = arith.constant 0 : index
    %983 = memref.load %arg5[%c0_755] : memref<4xf32, #tpu.memory_space<smem>>
    %984 = arith.subf %982, %983 : f32
    %985 = vector.broadcast %981 : f32 to vector<8x128xf32>
    %986 = vector.broadcast %984 : f32 to vector<1x128xf32>
    %c0_756 = arith.constant 0 : index
    %987 = memref.load %arg3[%c0_756] : memref<10xf32, #tpu.memory_space<smem>>
    %c0_757 = arith.constant 0 : index
    %c4_758 = arith.constant 4 : index
    %c1_759 = arith.constant 1 : index
    %c0_760 = arith.constant 0 : index
    %988 = vector.load %arg6[%c0_757, %c4_758, %c1_759, %c0_760] : memref<4x16x10x128xf32, #tpu.memory_space<vmem>>, vector<1x1x1x128xf32>
    %989 = vector.shape_cast %988 : vector<1x1x1x128xf32> to vector<1x128xf32>
    %990 = vector.broadcast %987 : f32 to vector<1x128xf32>
    %991 = arith.mulf %990, %989 : vector<1x128xf32>
    %992 = arith.subf %986, %991 : vector<1x128xf32>
    %c0_761 = arith.constant 0 : index
    %993 = memref.load %arg1[%c0_761] : memref<50xf32, #tpu.memory_space<smem>>
    %c0_762 = arith.constant 0 : index
    %c4_763 = arith.constant 4 : index
    %c0_764 = arith.constant 0 : index
    %c0_765 = arith.constant 0 : index
    %994 = vector.load %arg6[%c0_762, %c4_763, %c0_764, %c0_765] : memref<4x16x10x128xf32, #tpu.memory_space<vmem>>, vector<1x1x8x128xf32>
    %995 = vector.shape_cast %994 : vector<1x1x8x128xf32> to vector<8x128xf32>
    %996 = vector.broadcast %993 : f32 to vector<8x128xf32>
    %997 = arith.mulf %996, %995 : vector<8x128xf32>
    %998 = arith.addf %985, %997 : vector<8x128xf32>
    %c1_766 = arith.constant 1 : index
    %999 = memref.load %arg1[%c1_766] : memref<50xf32, #tpu.memory_space<smem>>
    %c1_767 = arith.constant 1 : index
    %c4_768 = arith.constant 4 : index
    %c0_769 = arith.constant 0 : index
    %c0_770 = arith.constant 0 : index
    %1000 = vector.load %arg6[%c1_767, %c4_768, %c0_769, %c0_770] : memref<4x16x10x128xf32, #tpu.memory_space<vmem>>, vector<1x1x8x128xf32>
    %1001 = vector.shape_cast %1000 : vector<1x1x8x128xf32> to vector<8x128xf32>
    %1002 = vector.broadcast %999 : f32 to vector<8x128xf32>
    %1003 = arith.mulf %1002, %1001 : vector<8x128xf32>
    %1004 = arith.addf %998, %1003 : vector<8x128xf32>
    %c2_771 = arith.constant 2 : index
    %1005 = memref.load %arg1[%c2_771] : memref<50xf32, #tpu.memory_space<smem>>
    %c0_772 = arith.constant 0 : index
    %c4_773 = arith.constant 4 : index
    %c1_774 = arith.constant 1 : index
    %c0_775 = arith.constant 0 : index
    %1006 = vector.load %arg6[%c0_772, %c4_773, %c1_774, %c0_775] : memref<4x16x10x128xf32, #tpu.memory_space<vmem>>, vector<1x1x8x128xf32>
    %1007 = vector.shape_cast %1006 : vector<1x1x8x128xf32> to vector<8x128xf32>
    %1008 = vector.broadcast %1005 : f32 to vector<8x128xf32>
    %1009 = arith.mulf %1008, %1007 : vector<8x128xf32>
    %1010 = arith.addf %1004, %1009 : vector<8x128xf32>
    %c3_776 = arith.constant 3 : index
    %1011 = memref.load %arg1[%c3_776] : memref<50xf32, #tpu.memory_space<smem>>
    %c1_777 = arith.constant 1 : index
    %c4_778 = arith.constant 4 : index
    %c1_779 = arith.constant 1 : index
    %c0_780 = arith.constant 0 : index
    %1012 = vector.load %arg6[%c1_777, %c4_778, %c1_779, %c0_780] : memref<4x16x10x128xf32, #tpu.memory_space<vmem>>, vector<1x1x8x128xf32>
    %1013 = vector.shape_cast %1012 : vector<1x1x8x128xf32> to vector<8x128xf32>
    %1014 = vector.broadcast %1011 : f32 to vector<8x128xf32>
    %1015 = arith.mulf %1014, %1013 : vector<8x128xf32>
    %1016 = arith.addf %1010, %1015 : vector<8x128xf32>
    %c4_781 = arith.constant 4 : index
    %1017 = memref.load %arg1[%c4_781] : memref<50xf32, #tpu.memory_space<smem>>
    %c0_782 = arith.constant 0 : index
    %c4_783 = arith.constant 4 : index
    %c2_784 = arith.constant 2 : index
    %c0_785 = arith.constant 0 : index
    %1018 = vector.load %arg6[%c0_782, %c4_783, %c2_784, %c0_785] : memref<4x16x10x128xf32, #tpu.memory_space<vmem>>, vector<1x1x8x128xf32>
    %1019 = vector.shape_cast %1018 : vector<1x1x8x128xf32> to vector<8x128xf32>
    %1020 = vector.broadcast %1017 : f32 to vector<8x128xf32>
    %1021 = arith.mulf %1020, %1019 : vector<8x128xf32>
    %1022 = arith.addf %1016, %1021 : vector<8x128xf32>
    %c1_786 = arith.constant 1 : index
    %1023 = memref.load %arg3[%c1_786] : memref<10xf32, #tpu.memory_space<smem>>
    %c0_787 = arith.constant 0 : index
    %c5_788 = arith.constant 5 : index
    %c1_789 = arith.constant 1 : index
    %c0_790 = arith.constant 0 : index
    %1024 = vector.load %arg6[%c0_787, %c5_788, %c1_789, %c0_790] : memref<4x16x10x128xf32, #tpu.memory_space<vmem>>, vector<1x1x1x128xf32>
    %1025 = vector.shape_cast %1024 : vector<1x1x1x128xf32> to vector<1x128xf32>
    %1026 = vector.broadcast %1023 : f32 to vector<1x128xf32>
    %1027 = arith.mulf %1026, %1025 : vector<1x128xf32>
    %1028 = arith.subf %992, %1027 : vector<1x128xf32>
    %c5_791 = arith.constant 5 : index
    %1029 = memref.load %arg1[%c5_791] : memref<50xf32, #tpu.memory_space<smem>>
    %c0_792 = arith.constant 0 : index
    %c5_793 = arith.constant 5 : index
    %c0_794 = arith.constant 0 : index
    %c0_795 = arith.constant 0 : index
    %1030 = vector.load %arg6[%c0_792, %c5_793, %c0_794, %c0_795] : memref<4x16x10x128xf32, #tpu.memory_space<vmem>>, vector<1x1x8x128xf32>
    %1031 = vector.shape_cast %1030 : vector<1x1x8x128xf32> to vector<8x128xf32>
    %1032 = vector.broadcast %1029 : f32 to vector<8x128xf32>
    %1033 = arith.mulf %1032, %1031 : vector<8x128xf32>
    %1034 = arith.addf %1022, %1033 : vector<8x128xf32>
    %c6_796 = arith.constant 6 : index
    %1035 = memref.load %arg1[%c6_796] : memref<50xf32, #tpu.memory_space<smem>>
    %c1_797 = arith.constant 1 : index
    %c5_798 = arith.constant 5 : index
    %c0_799 = arith.constant 0 : index
    %c0_800 = arith.constant 0 : index
    %1036 = vector.load %arg6[%c1_797, %c5_798, %c0_799, %c0_800] : memref<4x16x10x128xf32, #tpu.memory_space<vmem>>, vector<1x1x8x128xf32>
    %1037 = vector.shape_cast %1036 : vector<1x1x8x128xf32> to vector<8x128xf32>
    %1038 = vector.broadcast %1035 : f32 to vector<8x128xf32>
    %1039 = arith.mulf %1038, %1037 : vector<8x128xf32>
    %1040 = arith.addf %1034, %1039 : vector<8x128xf32>
    %c7_801 = arith.constant 7 : index
    %1041 = memref.load %arg1[%c7_801] : memref<50xf32, #tpu.memory_space<smem>>
    %c0_802 = arith.constant 0 : index
    %c5_803 = arith.constant 5 : index
    %c1_804 = arith.constant 1 : index
    %c0_805 = arith.constant 0 : index
    %1042 = vector.load %arg6[%c0_802, %c5_803, %c1_804, %c0_805] : memref<4x16x10x128xf32, #tpu.memory_space<vmem>>, vector<1x1x8x128xf32>
    %1043 = vector.shape_cast %1042 : vector<1x1x8x128xf32> to vector<8x128xf32>
    %1044 = vector.broadcast %1041 : f32 to vector<8x128xf32>
    %1045 = arith.mulf %1044, %1043 : vector<8x128xf32>
    %1046 = arith.addf %1040, %1045 : vector<8x128xf32>
    %c8_806 = arith.constant 8 : index
    %1047 = memref.load %arg1[%c8_806] : memref<50xf32, #tpu.memory_space<smem>>
    %c1_807 = arith.constant 1 : index
    %c5_808 = arith.constant 5 : index
    %c1_809 = arith.constant 1 : index
    %c0_810 = arith.constant 0 : index
    %1048 = vector.load %arg6[%c1_807, %c5_808, %c1_809, %c0_810] : memref<4x16x10x128xf32, #tpu.memory_space<vmem>>, vector<1x1x8x128xf32>
    %1049 = vector.shape_cast %1048 : vector<1x1x8x128xf32> to vector<8x128xf32>
    %1050 = vector.broadcast %1047 : f32 to vector<8x128xf32>
    %1051 = arith.mulf %1050, %1049 : vector<8x128xf32>
    %1052 = arith.addf %1046, %1051 : vector<8x128xf32>
    %c9_811 = arith.constant 9 : index
    %1053 = memref.load %arg1[%c9_811] : memref<50xf32, #tpu.memory_space<smem>>
    %c0_812 = arith.constant 0 : index
    %c5_813 = arith.constant 5 : index
    %c2_814 = arith.constant 2 : index
    %c0_815 = arith.constant 0 : index
    %1054 = vector.load %arg6[%c0_812, %c5_813, %c2_814, %c0_815] : memref<4x16x10x128xf32, #tpu.memory_space<vmem>>, vector<1x1x8x128xf32>
    %1055 = vector.shape_cast %1054 : vector<1x1x8x128xf32> to vector<8x128xf32>
    %1056 = vector.broadcast %1053 : f32 to vector<8x128xf32>
    %1057 = arith.mulf %1056, %1055 : vector<8x128xf32>
    %1058 = arith.addf %1052, %1057 : vector<8x128xf32>
    %c2_816 = arith.constant 2 : index
    %1059 = memref.load %arg3[%c2_816] : memref<10xf32, #tpu.memory_space<smem>>
    %c0_817 = arith.constant 0 : index
    %c6_818 = arith.constant 6 : index
    %c1_819 = arith.constant 1 : index
    %c0_820 = arith.constant 0 : index
    %1060 = vector.load %arg6[%c0_817, %c6_818, %c1_819, %c0_820] : memref<4x16x10x128xf32, #tpu.memory_space<vmem>>, vector<1x1x1x128xf32>
    %1061 = vector.shape_cast %1060 : vector<1x1x1x128xf32> to vector<1x128xf32>
    %1062 = vector.broadcast %1059 : f32 to vector<1x128xf32>
    %1063 = arith.mulf %1062, %1061 : vector<1x128xf32>
    %1064 = arith.subf %1028, %1063 : vector<1x128xf32>
    %c10_821 = arith.constant 10 : index
    %1065 = memref.load %arg1[%c10_821] : memref<50xf32, #tpu.memory_space<smem>>
    %c0_822 = arith.constant 0 : index
    %c6_823 = arith.constant 6 : index
    %c0_824 = arith.constant 0 : index
    %c0_825 = arith.constant 0 : index
    %1066 = vector.load %arg6[%c0_822, %c6_823, %c0_824, %c0_825] : memref<4x16x10x128xf32, #tpu.memory_space<vmem>>, vector<1x1x8x128xf32>
    %1067 = vector.shape_cast %1066 : vector<1x1x8x128xf32> to vector<8x128xf32>
    %1068 = vector.broadcast %1065 : f32 to vector<8x128xf32>
    %1069 = arith.mulf %1068, %1067 : vector<8x128xf32>
    %1070 = arith.addf %1058, %1069 : vector<8x128xf32>
    %c11_826 = arith.constant 11 : index
    %1071 = memref.load %arg1[%c11_826] : memref<50xf32, #tpu.memory_space<smem>>
    %c1_827 = arith.constant 1 : index
    %c6_828 = arith.constant 6 : index
    %c0_829 = arith.constant 0 : index
    %c0_830 = arith.constant 0 : index
    %1072 = vector.load %arg6[%c1_827, %c6_828, %c0_829, %c0_830] : memref<4x16x10x128xf32, #tpu.memory_space<vmem>>, vector<1x1x8x128xf32>
    %1073 = vector.shape_cast %1072 : vector<1x1x8x128xf32> to vector<8x128xf32>
    %1074 = vector.broadcast %1071 : f32 to vector<8x128xf32>
    %1075 = arith.mulf %1074, %1073 : vector<8x128xf32>
    %1076 = arith.addf %1070, %1075 : vector<8x128xf32>
    %c12_831 = arith.constant 12 : index
    %1077 = memref.load %arg1[%c12_831] : memref<50xf32, #tpu.memory_space<smem>>
    %c0_832 = arith.constant 0 : index
    %c6_833 = arith.constant 6 : index
    %c1_834 = arith.constant 1 : index
    %c0_835 = arith.constant 0 : index
    %1078 = vector.load %arg6[%c0_832, %c6_833, %c1_834, %c0_835] : memref<4x16x10x128xf32, #tpu.memory_space<vmem>>, vector<1x1x8x128xf32>
    %1079 = vector.shape_cast %1078 : vector<1x1x8x128xf32> to vector<8x128xf32>
    %1080 = vector.broadcast %1077 : f32 to vector<8x128xf32>
    %1081 = arith.mulf %1080, %1079 : vector<8x128xf32>
    %1082 = arith.addf %1076, %1081 : vector<8x128xf32>
    %c13_836 = arith.constant 13 : index
    %1083 = memref.load %arg1[%c13_836] : memref<50xf32, #tpu.memory_space<smem>>
    %c1_837 = arith.constant 1 : index
    %c6_838 = arith.constant 6 : index
    %c1_839 = arith.constant 1 : index
    %c0_840 = arith.constant 0 : index
    %1084 = vector.load %arg6[%c1_837, %c6_838, %c1_839, %c0_840] : memref<4x16x10x128xf32, #tpu.memory_space<vmem>>, vector<1x1x8x128xf32>
    %1085 = vector.shape_cast %1084 : vector<1x1x8x128xf32> to vector<8x128xf32>
    %1086 = vector.broadcast %1083 : f32 to vector<8x128xf32>
    %1087 = arith.mulf %1086, %1085 : vector<8x128xf32>
    %1088 = arith.addf %1082, %1087 : vector<8x128xf32>
    %c14_841 = arith.constant 14 : index
    %1089 = memref.load %arg1[%c14_841] : memref<50xf32, #tpu.memory_space<smem>>
    %c0_842 = arith.constant 0 : index
    %c6_843 = arith.constant 6 : index
    %c2_844 = arith.constant 2 : index
    %c0_845 = arith.constant 0 : index
    %1090 = vector.load %arg6[%c0_842, %c6_843, %c2_844, %c0_845] : memref<4x16x10x128xf32, #tpu.memory_space<vmem>>, vector<1x1x8x128xf32>
    %1091 = vector.shape_cast %1090 : vector<1x1x8x128xf32> to vector<8x128xf32>
    %1092 = vector.broadcast %1089 : f32 to vector<8x128xf32>
    %1093 = arith.mulf %1092, %1091 : vector<8x128xf32>
    %1094 = arith.addf %1088, %1093 : vector<8x128xf32>
    %c3_846 = arith.constant 3 : index
    %1095 = memref.load %arg3[%c3_846] : memref<10xf32, #tpu.memory_space<smem>>
    %c0_847 = arith.constant 0 : index
    %c7_848 = arith.constant 7 : index
    %c1_849 = arith.constant 1 : index
    %c0_850 = arith.constant 0 : index
    %1096 = vector.load %arg6[%c0_847, %c7_848, %c1_849, %c0_850] : memref<4x16x10x128xf32, #tpu.memory_space<vmem>>, vector<1x1x1x128xf32>
    %1097 = vector.shape_cast %1096 : vector<1x1x1x128xf32> to vector<1x128xf32>
    %1098 = vector.broadcast %1095 : f32 to vector<1x128xf32>
    %1099 = arith.mulf %1098, %1097 : vector<1x128xf32>
    %1100 = arith.subf %1064, %1099 : vector<1x128xf32>
    %c15_851 = arith.constant 15 : index
    %1101 = memref.load %arg1[%c15_851] : memref<50xf32, #tpu.memory_space<smem>>
    %c0_852 = arith.constant 0 : index
    %c7_853 = arith.constant 7 : index
    %c0_854 = arith.constant 0 : index
    %c0_855 = arith.constant 0 : index
    %1102 = vector.load %arg6[%c0_852, %c7_853, %c0_854, %c0_855] : memref<4x16x10x128xf32, #tpu.memory_space<vmem>>, vector<1x1x8x128xf32>
    %1103 = vector.shape_cast %1102 : vector<1x1x8x128xf32> to vector<8x128xf32>
    %1104 = vector.broadcast %1101 : f32 to vector<8x128xf32>
    %1105 = arith.mulf %1104, %1103 : vector<8x128xf32>
    %1106 = arith.addf %1094, %1105 : vector<8x128xf32>
    %c16_856 = arith.constant 16 : index
    %1107 = memref.load %arg1[%c16_856] : memref<50xf32, #tpu.memory_space<smem>>
    %c1_857 = arith.constant 1 : index
    %c7_858 = arith.constant 7 : index
    %c0_859 = arith.constant 0 : index
    %c0_860 = arith.constant 0 : index
    %1108 = vector.load %arg6[%c1_857, %c7_858, %c0_859, %c0_860] : memref<4x16x10x128xf32, #tpu.memory_space<vmem>>, vector<1x1x8x128xf32>
    %1109 = vector.shape_cast %1108 : vector<1x1x8x128xf32> to vector<8x128xf32>
    %1110 = vector.broadcast %1107 : f32 to vector<8x128xf32>
    %1111 = arith.mulf %1110, %1109 : vector<8x128xf32>
    %1112 = arith.addf %1106, %1111 : vector<8x128xf32>
    %c17_861 = arith.constant 17 : index
    %1113 = memref.load %arg1[%c17_861] : memref<50xf32, #tpu.memory_space<smem>>
    %c0_862 = arith.constant 0 : index
    %c7_863 = arith.constant 7 : index
    %c1_864 = arith.constant 1 : index
    %c0_865 = arith.constant 0 : index
    %1114 = vector.load %arg6[%c0_862, %c7_863, %c1_864, %c0_865] : memref<4x16x10x128xf32, #tpu.memory_space<vmem>>, vector<1x1x8x128xf32>
    %1115 = vector.shape_cast %1114 : vector<1x1x8x128xf32> to vector<8x128xf32>
    %1116 = vector.broadcast %1113 : f32 to vector<8x128xf32>
    %1117 = arith.mulf %1116, %1115 : vector<8x128xf32>
    %1118 = arith.addf %1112, %1117 : vector<8x128xf32>
    %c18_866 = arith.constant 18 : index
    %1119 = memref.load %arg1[%c18_866] : memref<50xf32, #tpu.memory_space<smem>>
    %c1_867 = arith.constant 1 : index
    %c7_868 = arith.constant 7 : index
    %c1_869 = arith.constant 1 : index
    %c0_870 = arith.constant 0 : index
    %1120 = vector.load %arg6[%c1_867, %c7_868, %c1_869, %c0_870] : memref<4x16x10x128xf32, #tpu.memory_space<vmem>>, vector<1x1x8x128xf32>
    %1121 = vector.shape_cast %1120 : vector<1x1x8x128xf32> to vector<8x128xf32>
    %1122 = vector.broadcast %1119 : f32 to vector<8x128xf32>
    %1123 = arith.mulf %1122, %1121 : vector<8x128xf32>
    %1124 = arith.addf %1118, %1123 : vector<8x128xf32>
    %c19_871 = arith.constant 19 : index
    %1125 = memref.load %arg1[%c19_871] : memref<50xf32, #tpu.memory_space<smem>>
    %c0_872 = arith.constant 0 : index
    %c7_873 = arith.constant 7 : index
    %c2_874 = arith.constant 2 : index
    %c0_875 = arith.constant 0 : index
    %1126 = vector.load %arg6[%c0_872, %c7_873, %c2_874, %c0_875] : memref<4x16x10x128xf32, #tpu.memory_space<vmem>>, vector<1x1x8x128xf32>
    %1127 = vector.shape_cast %1126 : vector<1x1x8x128xf32> to vector<8x128xf32>
    %1128 = vector.broadcast %1125 : f32 to vector<8x128xf32>
    %1129 = arith.mulf %1128, %1127 : vector<8x128xf32>
    %1130 = arith.addf %1124, %1129 : vector<8x128xf32>
    %c4_876 = arith.constant 4 : index
    %1131 = memref.load %arg3[%c4_876] : memref<10xf32, #tpu.memory_space<smem>>
    %c0_877 = arith.constant 0 : index
    %c8_878 = arith.constant 8 : index
    %c1_879 = arith.constant 1 : index
    %c0_880 = arith.constant 0 : index
    %1132 = vector.load %arg6[%c0_877, %c8_878, %c1_879, %c0_880] : memref<4x16x10x128xf32, #tpu.memory_space<vmem>>, vector<1x1x1x128xf32>
    %1133 = vector.shape_cast %1132 : vector<1x1x1x128xf32> to vector<1x128xf32>
    %1134 = vector.broadcast %1131 : f32 to vector<1x128xf32>
    %1135 = arith.mulf %1134, %1133 : vector<1x128xf32>
    %1136 = arith.subf %1100, %1135 : vector<1x128xf32>
    %c20_881 = arith.constant 20 : index
    %1137 = memref.load %arg1[%c20_881] : memref<50xf32, #tpu.memory_space<smem>>
    %c0_882 = arith.constant 0 : index
    %c8_883 = arith.constant 8 : index
    %c0_884 = arith.constant 0 : index
    %c0_885 = arith.constant 0 : index
    %1138 = vector.load %arg6[%c0_882, %c8_883, %c0_884, %c0_885] : memref<4x16x10x128xf32, #tpu.memory_space<vmem>>, vector<1x1x8x128xf32>
    %1139 = vector.shape_cast %1138 : vector<1x1x8x128xf32> to vector<8x128xf32>
    %1140 = vector.broadcast %1137 : f32 to vector<8x128xf32>
    %1141 = arith.mulf %1140, %1139 : vector<8x128xf32>
    %1142 = arith.addf %1130, %1141 : vector<8x128xf32>
    %c21_886 = arith.constant 21 : index
    %1143 = memref.load %arg1[%c21_886] : memref<50xf32, #tpu.memory_space<smem>>
    %c1_887 = arith.constant 1 : index
    %c8_888 = arith.constant 8 : index
    %c0_889 = arith.constant 0 : index
    %c0_890 = arith.constant 0 : index
    %1144 = vector.load %arg6[%c1_887, %c8_888, %c0_889, %c0_890] : memref<4x16x10x128xf32, #tpu.memory_space<vmem>>, vector<1x1x8x128xf32>
    %1145 = vector.shape_cast %1144 : vector<1x1x8x128xf32> to vector<8x128xf32>
    %1146 = vector.broadcast %1143 : f32 to vector<8x128xf32>
    %1147 = arith.mulf %1146, %1145 : vector<8x128xf32>
    %1148 = arith.addf %1142, %1147 : vector<8x128xf32>
    %c22_891 = arith.constant 22 : index
    %1149 = memref.load %arg1[%c22_891] : memref<50xf32, #tpu.memory_space<smem>>
    %c0_892 = arith.constant 0 : index
    %c8_893 = arith.constant 8 : index
    %c1_894 = arith.constant 1 : index
    %c0_895 = arith.constant 0 : index
    %1150 = vector.load %arg6[%c0_892, %c8_893, %c1_894, %c0_895] : memref<4x16x10x128xf32, #tpu.memory_space<vmem>>, vector<1x1x8x128xf32>
    %1151 = vector.shape_cast %1150 : vector<1x1x8x128xf32> to vector<8x128xf32>
    %1152 = vector.broadcast %1149 : f32 to vector<8x128xf32>
    %1153 = arith.mulf %1152, %1151 : vector<8x128xf32>
    %1154 = arith.addf %1148, %1153 : vector<8x128xf32>
    %c23_896 = arith.constant 23 : index
    %1155 = memref.load %arg1[%c23_896] : memref<50xf32, #tpu.memory_space<smem>>
    %c1_897 = arith.constant 1 : index
    %c8_898 = arith.constant 8 : index
    %c1_899 = arith.constant 1 : index
    %c0_900 = arith.constant 0 : index
    %1156 = vector.load %arg6[%c1_897, %c8_898, %c1_899, %c0_900] : memref<4x16x10x128xf32, #tpu.memory_space<vmem>>, vector<1x1x8x128xf32>
    %1157 = vector.shape_cast %1156 : vector<1x1x8x128xf32> to vector<8x128xf32>
    %1158 = vector.broadcast %1155 : f32 to vector<8x128xf32>
    %1159 = arith.mulf %1158, %1157 : vector<8x128xf32>
    %1160 = arith.addf %1154, %1159 : vector<8x128xf32>
    %c24_901 = arith.constant 24 : index
    %1161 = memref.load %arg1[%c24_901] : memref<50xf32, #tpu.memory_space<smem>>
    %c0_902 = arith.constant 0 : index
    %c8_903 = arith.constant 8 : index
    %c2_904 = arith.constant 2 : index
    %c0_905 = arith.constant 0 : index
    %1162 = vector.load %arg6[%c0_902, %c8_903, %c2_904, %c0_905] : memref<4x16x10x128xf32, #tpu.memory_space<vmem>>, vector<1x1x8x128xf32>
    %1163 = vector.shape_cast %1162 : vector<1x1x8x128xf32> to vector<8x128xf32>
    %1164 = vector.broadcast %1161 : f32 to vector<8x128xf32>
    %1165 = arith.mulf %1164, %1163 : vector<8x128xf32>
    %1166 = arith.addf %1160, %1165 : vector<8x128xf32>
    %c5_906 = arith.constant 5 : index
    %1167 = memref.load %arg3[%c5_906] : memref<10xf32, #tpu.memory_space<smem>>
    %c2_907 = arith.constant 2 : index
    %c4_908 = arith.constant 4 : index
    %c1_909 = arith.constant 1 : index
    %c0_910 = arith.constant 0 : index
    %1168 = vector.load %arg6[%c2_907, %c4_908, %c1_909, %c0_910] : memref<4x16x10x128xf32, #tpu.memory_space<vmem>>, vector<1x1x1x128xf32>
    %1169 = vector.shape_cast %1168 : vector<1x1x1x128xf32> to vector<1x128xf32>
    %1170 = vector.broadcast %1167 : f32 to vector<1x128xf32>
    %1171 = arith.mulf %1170, %1169 : vector<1x128xf32>
    %1172 = arith.subf %1136, %1171 : vector<1x128xf32>
    %c25_911 = arith.constant 25 : index
    %1173 = memref.load %arg1[%c25_911] : memref<50xf32, #tpu.memory_space<smem>>
    %c2_912 = arith.constant 2 : index
    %c4_913 = arith.constant 4 : index
    %c0_914 = arith.constant 0 : index
    %c0_915 = arith.constant 0 : index
    %1174 = vector.load %arg6[%c2_912, %c4_913, %c0_914, %c0_915] : memref<4x16x10x128xf32, #tpu.memory_space<vmem>>, vector<1x1x8x128xf32>
    %1175 = vector.shape_cast %1174 : vector<1x1x8x128xf32> to vector<8x128xf32>
    %1176 = vector.broadcast %1173 : f32 to vector<8x128xf32>
    %1177 = arith.mulf %1176, %1175 : vector<8x128xf32>
    %1178 = arith.addf %1166, %1177 : vector<8x128xf32>
    %c26_916 = arith.constant 26 : index
    %1179 = memref.load %arg1[%c26_916] : memref<50xf32, #tpu.memory_space<smem>>
    %c3_917 = arith.constant 3 : index
    %c4_918 = arith.constant 4 : index
    %c0_919 = arith.constant 0 : index
    %c0_920 = arith.constant 0 : index
    %1180 = vector.load %arg6[%c3_917, %c4_918, %c0_919, %c0_920] : memref<4x16x10x128xf32, #tpu.memory_space<vmem>>, vector<1x1x8x128xf32>
    %1181 = vector.shape_cast %1180 : vector<1x1x8x128xf32> to vector<8x128xf32>
    %1182 = vector.broadcast %1179 : f32 to vector<8x128xf32>
    %1183 = arith.mulf %1182, %1181 : vector<8x128xf32>
    %1184 = arith.addf %1178, %1183 : vector<8x128xf32>
    %c27_921 = arith.constant 27 : index
    %1185 = memref.load %arg1[%c27_921] : memref<50xf32, #tpu.memory_space<smem>>
    %c2_922 = arith.constant 2 : index
    %c4_923 = arith.constant 4 : index
    %c1_924 = arith.constant 1 : index
    %c0_925 = arith.constant 0 : index
    %1186 = vector.load %arg6[%c2_922, %c4_923, %c1_924, %c0_925] : memref<4x16x10x128xf32, #tpu.memory_space<vmem>>, vector<1x1x8x128xf32>
    %1187 = vector.shape_cast %1186 : vector<1x1x8x128xf32> to vector<8x128xf32>
    %1188 = vector.broadcast %1185 : f32 to vector<8x128xf32>
    %1189 = arith.mulf %1188, %1187 : vector<8x128xf32>
    %1190 = arith.addf %1184, %1189 : vector<8x128xf32>
    %c28_926 = arith.constant 28 : index
    %1191 = memref.load %arg1[%c28_926] : memref<50xf32, #tpu.memory_space<smem>>
    %c3_927 = arith.constant 3 : index
    %c4_928 = arith.constant 4 : index
    %c1_929 = arith.constant 1 : index
    %c0_930 = arith.constant 0 : index
    %1192 = vector.load %arg6[%c3_927, %c4_928, %c1_929, %c0_930] : memref<4x16x10x128xf32, #tpu.memory_space<vmem>>, vector<1x1x8x128xf32>
    %1193 = vector.shape_cast %1192 : vector<1x1x8x128xf32> to vector<8x128xf32>
    %1194 = vector.broadcast %1191 : f32 to vector<8x128xf32>
    %1195 = arith.mulf %1194, %1193 : vector<8x128xf32>
    %1196 = arith.addf %1190, %1195 : vector<8x128xf32>
    %c29_931 = arith.constant 29 : index
    %1197 = memref.load %arg1[%c29_931] : memref<50xf32, #tpu.memory_space<smem>>
    %c2_932 = arith.constant 2 : index
    %c4_933 = arith.constant 4 : index
    %c2_934 = arith.constant 2 : index
    %c0_935 = arith.constant 0 : index
    %1198 = vector.load %arg6[%c2_932, %c4_933, %c2_934, %c0_935] : memref<4x16x10x128xf32, #tpu.memory_space<vmem>>, vector<1x1x8x128xf32>
    %1199 = vector.shape_cast %1198 : vector<1x1x8x128xf32> to vector<8x128xf32>
    %1200 = vector.broadcast %1197 : f32 to vector<8x128xf32>
    %1201 = arith.mulf %1200, %1199 : vector<8x128xf32>
    %1202 = arith.addf %1196, %1201 : vector<8x128xf32>
    %c6_936 = arith.constant 6 : index
    %1203 = memref.load %arg3[%c6_936] : memref<10xf32, #tpu.memory_space<smem>>
    %c2_937 = arith.constant 2 : index
    %c5_938 = arith.constant 5 : index
    %c1_939 = arith.constant 1 : index
    %c0_940 = arith.constant 0 : index
    %1204 = vector.load %arg6[%c2_937, %c5_938, %c1_939, %c0_940] : memref<4x16x10x128xf32, #tpu.memory_space<vmem>>, vector<1x1x1x128xf32>
    %1205 = vector.shape_cast %1204 : vector<1x1x1x128xf32> to vector<1x128xf32>
    %1206 = vector.broadcast %1203 : f32 to vector<1x128xf32>
    %1207 = arith.mulf %1206, %1205 : vector<1x128xf32>
    %1208 = arith.subf %1172, %1207 : vector<1x128xf32>
    %c30_941 = arith.constant 30 : index
    %1209 = memref.load %arg1[%c30_941] : memref<50xf32, #tpu.memory_space<smem>>
    %c2_942 = arith.constant 2 : index
    %c5_943 = arith.constant 5 : index
    %c0_944 = arith.constant 0 : index
    %c0_945 = arith.constant 0 : index
    %1210 = vector.load %arg6[%c2_942, %c5_943, %c0_944, %c0_945] : memref<4x16x10x128xf32, #tpu.memory_space<vmem>>, vector<1x1x8x128xf32>
    %1211 = vector.shape_cast %1210 : vector<1x1x8x128xf32> to vector<8x128xf32>
    %1212 = vector.broadcast %1209 : f32 to vector<8x128xf32>
    %1213 = arith.mulf %1212, %1211 : vector<8x128xf32>
    %1214 = arith.addf %1202, %1213 : vector<8x128xf32>
    %c31_946 = arith.constant 31 : index
    %1215 = memref.load %arg1[%c31_946] : memref<50xf32, #tpu.memory_space<smem>>
    %c3_947 = arith.constant 3 : index
    %c5_948 = arith.constant 5 : index
    %c0_949 = arith.constant 0 : index
    %c0_950 = arith.constant 0 : index
    %1216 = vector.load %arg6[%c3_947, %c5_948, %c0_949, %c0_950] : memref<4x16x10x128xf32, #tpu.memory_space<vmem>>, vector<1x1x8x128xf32>
    %1217 = vector.shape_cast %1216 : vector<1x1x8x128xf32> to vector<8x128xf32>
    %1218 = vector.broadcast %1215 : f32 to vector<8x128xf32>
    %1219 = arith.mulf %1218, %1217 : vector<8x128xf32>
    %1220 = arith.addf %1214, %1219 : vector<8x128xf32>
    %c32_951 = arith.constant 32 : index
    %1221 = memref.load %arg1[%c32_951] : memref<50xf32, #tpu.memory_space<smem>>
    %c2_952 = arith.constant 2 : index
    %c5_953 = arith.constant 5 : index
    %c1_954 = arith.constant 1 : index
    %c0_955 = arith.constant 0 : index
    %1222 = vector.load %arg6[%c2_952, %c5_953, %c1_954, %c0_955] : memref<4x16x10x128xf32, #tpu.memory_space<vmem>>, vector<1x1x8x128xf32>
    %1223 = vector.shape_cast %1222 : vector<1x1x8x128xf32> to vector<8x128xf32>
    %1224 = vector.broadcast %1221 : f32 to vector<8x128xf32>
    %1225 = arith.mulf %1224, %1223 : vector<8x128xf32>
    %1226 = arith.addf %1220, %1225 : vector<8x128xf32>
    %c33_956 = arith.constant 33 : index
    %1227 = memref.load %arg1[%c33_956] : memref<50xf32, #tpu.memory_space<smem>>
    %c3_957 = arith.constant 3 : index
    %c5_958 = arith.constant 5 : index
    %c1_959 = arith.constant 1 : index
    %c0_960 = arith.constant 0 : index
    %1228 = vector.load %arg6[%c3_957, %c5_958, %c1_959, %c0_960] : memref<4x16x10x128xf32, #tpu.memory_space<vmem>>, vector<1x1x8x128xf32>
    %1229 = vector.shape_cast %1228 : vector<1x1x8x128xf32> to vector<8x128xf32>
    %1230 = vector.broadcast %1227 : f32 to vector<8x128xf32>
    %1231 = arith.mulf %1230, %1229 : vector<8x128xf32>
    %1232 = arith.addf %1226, %1231 : vector<8x128xf32>
    %c34_961 = arith.constant 34 : index
    %1233 = memref.load %arg1[%c34_961] : memref<50xf32, #tpu.memory_space<smem>>
    %c2_962 = arith.constant 2 : index
    %c5_963 = arith.constant 5 : index
    %c2_964 = arith.constant 2 : index
    %c0_965 = arith.constant 0 : index
    %1234 = vector.load %arg6[%c2_962, %c5_963, %c2_964, %c0_965] : memref<4x16x10x128xf32, #tpu.memory_space<vmem>>, vector<1x1x8x128xf32>
    %1235 = vector.shape_cast %1234 : vector<1x1x8x128xf32> to vector<8x128xf32>
    %1236 = vector.broadcast %1233 : f32 to vector<8x128xf32>
    %1237 = arith.mulf %1236, %1235 : vector<8x128xf32>
    %1238 = arith.addf %1232, %1237 : vector<8x128xf32>
    %c7_966 = arith.constant 7 : index
    %1239 = memref.load %arg3[%c7_966] : memref<10xf32, #tpu.memory_space<smem>>
    %c2_967 = arith.constant 2 : index
    %c6_968 = arith.constant 6 : index
    %c1_969 = arith.constant 1 : index
    %c0_970 = arith.constant 0 : index
    %1240 = vector.load %arg6[%c2_967, %c6_968, %c1_969, %c0_970] : memref<4x16x10x128xf32, #tpu.memory_space<vmem>>, vector<1x1x1x128xf32>
    %1241 = vector.shape_cast %1240 : vector<1x1x1x128xf32> to vector<1x128xf32>
    %1242 = vector.broadcast %1239 : f32 to vector<1x128xf32>
    %1243 = arith.mulf %1242, %1241 : vector<1x128xf32>
    %1244 = arith.subf %1208, %1243 : vector<1x128xf32>
    %c35_971 = arith.constant 35 : index
    %1245 = memref.load %arg1[%c35_971] : memref<50xf32, #tpu.memory_space<smem>>
    %c2_972 = arith.constant 2 : index
    %c6_973 = arith.constant 6 : index
    %c0_974 = arith.constant 0 : index
    %c0_975 = arith.constant 0 : index
    %1246 = vector.load %arg6[%c2_972, %c6_973, %c0_974, %c0_975] : memref<4x16x10x128xf32, #tpu.memory_space<vmem>>, vector<1x1x8x128xf32>
    %1247 = vector.shape_cast %1246 : vector<1x1x8x128xf32> to vector<8x128xf32>
    %1248 = vector.broadcast %1245 : f32 to vector<8x128xf32>
    %1249 = arith.mulf %1248, %1247 : vector<8x128xf32>
    %1250 = arith.addf %1238, %1249 : vector<8x128xf32>
    %c36_976 = arith.constant 36 : index
    %1251 = memref.load %arg1[%c36_976] : memref<50xf32, #tpu.memory_space<smem>>
    %c3_977 = arith.constant 3 : index
    %c6_978 = arith.constant 6 : index
    %c0_979 = arith.constant 0 : index
    %c0_980 = arith.constant 0 : index
    %1252 = vector.load %arg6[%c3_977, %c6_978, %c0_979, %c0_980] : memref<4x16x10x128xf32, #tpu.memory_space<vmem>>, vector<1x1x8x128xf32>
    %1253 = vector.shape_cast %1252 : vector<1x1x8x128xf32> to vector<8x128xf32>
    %1254 = vector.broadcast %1251 : f32 to vector<8x128xf32>
    %1255 = arith.mulf %1254, %1253 : vector<8x128xf32>
    %1256 = arith.addf %1250, %1255 : vector<8x128xf32>
    %c37_981 = arith.constant 37 : index
    %1257 = memref.load %arg1[%c37_981] : memref<50xf32, #tpu.memory_space<smem>>
    %c2_982 = arith.constant 2 : index
    %c6_983 = arith.constant 6 : index
    %c1_984 = arith.constant 1 : index
    %c0_985 = arith.constant 0 : index
    %1258 = vector.load %arg6[%c2_982, %c6_983, %c1_984, %c0_985] : memref<4x16x10x128xf32, #tpu.memory_space<vmem>>, vector<1x1x8x128xf32>
    %1259 = vector.shape_cast %1258 : vector<1x1x8x128xf32> to vector<8x128xf32>
    %1260 = vector.broadcast %1257 : f32 to vector<8x128xf32>
    %1261 = arith.mulf %1260, %1259 : vector<8x128xf32>
    %1262 = arith.addf %1256, %1261 : vector<8x128xf32>
    %c38_986 = arith.constant 38 : index
    %1263 = memref.load %arg1[%c38_986] : memref<50xf32, #tpu.memory_space<smem>>
    %c3_987 = arith.constant 3 : index
    %c6_988 = arith.constant 6 : index
    %c1_989 = arith.constant 1 : index
    %c0_990 = arith.constant 0 : index
    %1264 = vector.load %arg6[%c3_987, %c6_988, %c1_989, %c0_990] : memref<4x16x10x128xf32, #tpu.memory_space<vmem>>, vector<1x1x8x128xf32>
    %1265 = vector.shape_cast %1264 : vector<1x1x8x128xf32> to vector<8x128xf32>
    %1266 = vector.broadcast %1263 : f32 to vector<8x128xf32>
    %1267 = arith.mulf %1266, %1265 : vector<8x128xf32>
    %1268 = arith.addf %1262, %1267 : vector<8x128xf32>
    %c39_991 = arith.constant 39 : index
    %1269 = memref.load %arg1[%c39_991] : memref<50xf32, #tpu.memory_space<smem>>
    %c2_992 = arith.constant 2 : index
    %c6_993 = arith.constant 6 : index
    %c2_994 = arith.constant 2 : index
    %c0_995 = arith.constant 0 : index
    %1270 = vector.load %arg6[%c2_992, %c6_993, %c2_994, %c0_995] : memref<4x16x10x128xf32, #tpu.memory_space<vmem>>, vector<1x1x8x128xf32>
    %1271 = vector.shape_cast %1270 : vector<1x1x8x128xf32> to vector<8x128xf32>
    %1272 = vector.broadcast %1269 : f32 to vector<8x128xf32>
    %1273 = arith.mulf %1272, %1271 : vector<8x128xf32>
    %1274 = arith.addf %1268, %1273 : vector<8x128xf32>
    %c8_996 = arith.constant 8 : index
    %1275 = memref.load %arg3[%c8_996] : memref<10xf32, #tpu.memory_space<smem>>
    %c2_997 = arith.constant 2 : index
    %c7_998 = arith.constant 7 : index
    %c1_999 = arith.constant 1 : index
    %c0_1000 = arith.constant 0 : index
    %1276 = vector.load %arg6[%c2_997, %c7_998, %c1_999, %c0_1000] : memref<4x16x10x128xf32, #tpu.memory_space<vmem>>, vector<1x1x1x128xf32>
    %1277 = vector.shape_cast %1276 : vector<1x1x1x128xf32> to vector<1x128xf32>
    %1278 = vector.broadcast %1275 : f32 to vector<1x128xf32>
    %1279 = arith.mulf %1278, %1277 : vector<1x128xf32>
    %1280 = arith.subf %1244, %1279 : vector<1x128xf32>
    %c40_1001 = arith.constant 40 : index
    %1281 = memref.load %arg1[%c40_1001] : memref<50xf32, #tpu.memory_space<smem>>
    %c2_1002 = arith.constant 2 : index
    %c7_1003 = arith.constant 7 : index
    %c0_1004 = arith.constant 0 : index
    %c0_1005 = arith.constant 0 : index
    %1282 = vector.load %arg6[%c2_1002, %c7_1003, %c0_1004, %c0_1005] : memref<4x16x10x128xf32, #tpu.memory_space<vmem>>, vector<1x1x8x128xf32>
    %1283 = vector.shape_cast %1282 : vector<1x1x8x128xf32> to vector<8x128xf32>
    %1284 = vector.broadcast %1281 : f32 to vector<8x128xf32>
    %1285 = arith.mulf %1284, %1283 : vector<8x128xf32>
    %1286 = arith.addf %1274, %1285 : vector<8x128xf32>
    %c41_1006 = arith.constant 41 : index
    %1287 = memref.load %arg1[%c41_1006] : memref<50xf32, #tpu.memory_space<smem>>
    %c3_1007 = arith.constant 3 : index
    %c7_1008 = arith.constant 7 : index
    %c0_1009 = arith.constant 0 : index
    %c0_1010 = arith.constant 0 : index
    %1288 = vector.load %arg6[%c3_1007, %c7_1008, %c0_1009, %c0_1010] : memref<4x16x10x128xf32, #tpu.memory_space<vmem>>, vector<1x1x8x128xf32>
    %1289 = vector.shape_cast %1288 : vector<1x1x8x128xf32> to vector<8x128xf32>
    %1290 = vector.broadcast %1287 : f32 to vector<8x128xf32>
    %1291 = arith.mulf %1290, %1289 : vector<8x128xf32>
    %1292 = arith.addf %1286, %1291 : vector<8x128xf32>
    %c42_1011 = arith.constant 42 : index
    %1293 = memref.load %arg1[%c42_1011] : memref<50xf32, #tpu.memory_space<smem>>
    %c2_1012 = arith.constant 2 : index
    %c7_1013 = arith.constant 7 : index
    %c1_1014 = arith.constant 1 : index
    %c0_1015 = arith.constant 0 : index
    %1294 = vector.load %arg6[%c2_1012, %c7_1013, %c1_1014, %c0_1015] : memref<4x16x10x128xf32, #tpu.memory_space<vmem>>, vector<1x1x8x128xf32>
    %1295 = vector.shape_cast %1294 : vector<1x1x8x128xf32> to vector<8x128xf32>
    %1296 = vector.broadcast %1293 : f32 to vector<8x128xf32>
    %1297 = arith.mulf %1296, %1295 : vector<8x128xf32>
    %1298 = arith.addf %1292, %1297 : vector<8x128xf32>
    %c43_1016 = arith.constant 43 : index
    %1299 = memref.load %arg1[%c43_1016] : memref<50xf32, #tpu.memory_space<smem>>
    %c3_1017 = arith.constant 3 : index
    %c7_1018 = arith.constant 7 : index
    %c1_1019 = arith.constant 1 : index
    %c0_1020 = arith.constant 0 : index
    %1300 = vector.load %arg6[%c3_1017, %c7_1018, %c1_1019, %c0_1020] : memref<4x16x10x128xf32, #tpu.memory_space<vmem>>, vector<1x1x8x128xf32>
    %1301 = vector.shape_cast %1300 : vector<1x1x8x128xf32> to vector<8x128xf32>
    %1302 = vector.broadcast %1299 : f32 to vector<8x128xf32>
    %1303 = arith.mulf %1302, %1301 : vector<8x128xf32>
    %1304 = arith.addf %1298, %1303 : vector<8x128xf32>
    %c44_1021 = arith.constant 44 : index
    %1305 = memref.load %arg1[%c44_1021] : memref<50xf32, #tpu.memory_space<smem>>
    %c2_1022 = arith.constant 2 : index
    %c7_1023 = arith.constant 7 : index
    %c2_1024 = arith.constant 2 : index
    %c0_1025 = arith.constant 0 : index
    %1306 = vector.load %arg6[%c2_1022, %c7_1023, %c2_1024, %c0_1025] : memref<4x16x10x128xf32, #tpu.memory_space<vmem>>, vector<1x1x8x128xf32>
    %1307 = vector.shape_cast %1306 : vector<1x1x8x128xf32> to vector<8x128xf32>
    %1308 = vector.broadcast %1305 : f32 to vector<8x128xf32>
    %1309 = arith.mulf %1308, %1307 : vector<8x128xf32>
    %1310 = arith.addf %1304, %1309 : vector<8x128xf32>
    %c9_1026 = arith.constant 9 : index
    %1311 = memref.load %arg3[%c9_1026] : memref<10xf32, #tpu.memory_space<smem>>
    %c2_1027 = arith.constant 2 : index
    %c8_1028 = arith.constant 8 : index
    %c1_1029 = arith.constant 1 : index
    %c0_1030 = arith.constant 0 : index
    %1312 = vector.load %arg6[%c2_1027, %c8_1028, %c1_1029, %c0_1030] : memref<4x16x10x128xf32, #tpu.memory_space<vmem>>, vector<1x1x1x128xf32>
    %1313 = vector.shape_cast %1312 : vector<1x1x1x128xf32> to vector<1x128xf32>
    %1314 = vector.broadcast %1311 : f32 to vector<1x128xf32>
    %1315 = arith.mulf %1314, %1313 : vector<1x128xf32>
    %1316 = arith.subf %1280, %1315 : vector<1x128xf32>
    %c45_1031 = arith.constant 45 : index
    %1317 = memref.load %arg1[%c45_1031] : memref<50xf32, #tpu.memory_space<smem>>
    %c2_1032 = arith.constant 2 : index
    %c8_1033 = arith.constant 8 : index
    %c0_1034 = arith.constant 0 : index
    %c0_1035 = arith.constant 0 : index
    %1318 = vector.load %arg6[%c2_1032, %c8_1033, %c0_1034, %c0_1035] : memref<4x16x10x128xf32, #tpu.memory_space<vmem>>, vector<1x1x8x128xf32>
    %1319 = vector.shape_cast %1318 : vector<1x1x8x128xf32> to vector<8x128xf32>
    %1320 = vector.broadcast %1317 : f32 to vector<8x128xf32>
    %1321 = arith.mulf %1320, %1319 : vector<8x128xf32>
    %1322 = arith.addf %1310, %1321 : vector<8x128xf32>
    %c46_1036 = arith.constant 46 : index
    %1323 = memref.load %arg1[%c46_1036] : memref<50xf32, #tpu.memory_space<smem>>
    %c3_1037 = arith.constant 3 : index
    %c8_1038 = arith.constant 8 : index
    %c0_1039 = arith.constant 0 : index
    %c0_1040 = arith.constant 0 : index
    %1324 = vector.load %arg6[%c3_1037, %c8_1038, %c0_1039, %c0_1040] : memref<4x16x10x128xf32, #tpu.memory_space<vmem>>, vector<1x1x8x128xf32>
    %1325 = vector.shape_cast %1324 : vector<1x1x8x128xf32> to vector<8x128xf32>
    %1326 = vector.broadcast %1323 : f32 to vector<8x128xf32>
    %1327 = arith.mulf %1326, %1325 : vector<8x128xf32>
    %1328 = arith.addf %1322, %1327 : vector<8x128xf32>
    %c47_1041 = arith.constant 47 : index
    %1329 = memref.load %arg1[%c47_1041] : memref<50xf32, #tpu.memory_space<smem>>
    %c2_1042 = arith.constant 2 : index
    %c8_1043 = arith.constant 8 : index
    %c1_1044 = arith.constant 1 : index
    %c0_1045 = arith.constant 0 : index
    %1330 = vector.load %arg6[%c2_1042, %c8_1043, %c1_1044, %c0_1045] : memref<4x16x10x128xf32, #tpu.memory_space<vmem>>, vector<1x1x8x128xf32>
    %1331 = vector.shape_cast %1330 : vector<1x1x8x128xf32> to vector<8x128xf32>
    %1332 = vector.broadcast %1329 : f32 to vector<8x128xf32>
    %1333 = arith.mulf %1332, %1331 : vector<8x128xf32>
    %1334 = arith.addf %1328, %1333 : vector<8x128xf32>
    %c48_1046 = arith.constant 48 : index
    %1335 = memref.load %arg1[%c48_1046] : memref<50xf32, #tpu.memory_space<smem>>
    %c3_1047 = arith.constant 3 : index
    %c8_1048 = arith.constant 8 : index
    %c1_1049 = arith.constant 1 : index
    %c0_1050 = arith.constant 0 : index
    %1336 = vector.load %arg6[%c3_1047, %c8_1048, %c1_1049, %c0_1050] : memref<4x16x10x128xf32, #tpu.memory_space<vmem>>, vector<1x1x8x128xf32>
    %1337 = vector.shape_cast %1336 : vector<1x1x8x128xf32> to vector<8x128xf32>
    %1338 = vector.broadcast %1335 : f32 to vector<8x128xf32>
    %1339 = arith.mulf %1338, %1337 : vector<8x128xf32>
    %1340 = arith.addf %1334, %1339 : vector<8x128xf32>
    %c49_1051 = arith.constant 49 : index
    %1341 = memref.load %arg1[%c49_1051] : memref<50xf32, #tpu.memory_space<smem>>
    %c2_1052 = arith.constant 2 : index
    %c8_1053 = arith.constant 8 : index
    %c2_1054 = arith.constant 2 : index
    %c0_1055 = arith.constant 0 : index
    %1342 = vector.load %arg6[%c2_1052, %c8_1053, %c2_1054, %c0_1055] : memref<4x16x10x128xf32, #tpu.memory_space<vmem>>, vector<1x1x8x128xf32>
    %1343 = vector.shape_cast %1342 : vector<1x1x8x128xf32> to vector<8x128xf32>
    %1344 = vector.broadcast %1341 : f32 to vector<8x128xf32>
    %1345 = arith.mulf %1344, %1343 : vector<8x128xf32>
    %1346 = arith.addf %1340, %1345 : vector<8x128xf32>
    %1347 = vector.broadcast %1316 : vector<1x128xf32> to vector<8x128xf32>
    %1348 = arith.addf %1346, %1347 : vector<8x128xf32>
    %1349 = arith.select %2, %1348, %1346 : vector<8x128xi1>, vector<8x128xf32>
    %cst_1056 = arith.constant 0.000000e+00 : f32
    %1350 = vector.broadcast %cst_1056 : f32 to vector<8x128xf32>
    %1351 = arith.maximumf %1349, %1350 : vector<8x128xf32>
    %c0_1057 = arith.constant 0 : index
    %c3_1058 = arith.constant 3 : index
    %c0_1059 = arith.constant 0 : index
    %c0_1060 = arith.constant 0 : index
    %1352 = vector.load %arg7[%c0_1057, %c3_1058, %c0_1059, %c0_1060] : memref<1x8x8x128xf32, #tpu.memory_space<vmem>>, vector<1x1x8x128xf32>
    %1353 = vector.shape_cast %1352 : vector<1x1x8x128xf32> to vector<8x128xf32>
    %1354 = vector.shape_cast %1351 : vector<8x128xf32> to vector<1x1x8x128xf32>
    tpu.vector_store %arg7[%c0_1057, %c3_1058, %c0_1059, %c0_1060], %1354 {strides = array<i32>} : memref<1x8x8x128xf32, #tpu.memory_space<vmem>>, vector<1x1x8x128xf32>,
    %c0_1061 = arith.constant 0 : index
    %1355 = memref.load %arg5[%c0_1061] : memref<4xf32, #tpu.memory_space<smem>>
    %c2_1062 = arith.constant 2 : index
    %1356 = memref.load %arg5[%c2_1062] : memref<4xf32, #tpu.memory_space<smem>>
    %c0_1063 = arith.constant 0 : index
    %1357 = memref.load %arg5[%c0_1063] : memref<4xf32, #tpu.memory_space<smem>>
    %1358 = arith.subf %1356, %1357 : f32
    %1359 = vector.broadcast %1355 : f32 to vector<8x128xf32>
    %1360 = vector.broadcast %1358 : f32 to vector<1x128xf32>
    %c0_1064 = arith.constant 0 : index
    %1361 = memref.load %arg3[%c0_1064] : memref<10xf32, #tpu.memory_space<smem>>
    %c0_1065 = arith.constant 0 : index
    %c6_1066 = arith.constant 6 : index
    %c1_1067 = arith.constant 1 : index
    %c0_1068 = arith.constant 0 : index
    %1362 = vector.load %arg6[%c0_1065, %c6_1066, %c1_1067, %c0_1068] : memref<4x16x10x128xf32, #tpu.memory_space<vmem>>, vector<1x1x1x128xf32>
    %1363 = vector.shape_cast %1362 : vector<1x1x1x128xf32> to vector<1x128xf32>
    %1364 = vector.broadcast %1361 : f32 to vector<1x128xf32>
    %1365 = arith.mulf %1364, %1363 : vector<1x128xf32>
    %1366 = arith.subf %1360, %1365 : vector<1x128xf32>
    %c0_1069 = arith.constant 0 : index
    %1367 = memref.load %arg1[%c0_1069] : memref<50xf32, #tpu.memory_space<smem>>
    %c0_1070 = arith.constant 0 : index
    %c6_1071 = arith.constant 6 : index
    %c0_1072 = arith.constant 0 : index
    %c0_1073 = arith.constant 0 : index
    %1368 = vector.load %arg6[%c0_1070, %c6_1071, %c0_1072, %c0_1073] : memref<4x16x10x128xf32, #tpu.memory_space<vmem>>, vector<1x1x8x128xf32>
    %1369 = vector.shape_cast %1368 : vector<1x1x8x128xf32> to vector<8x128xf32>
    %1370 = vector.broadcast %1367 : f32 to vector<8x128xf32>
    %1371 = arith.mulf %1370, %1369 : vector<8x128xf32>
    %1372 = arith.addf %1359, %1371 : vector<8x128xf32>
    %c1_1074 = arith.constant 1 : index
    %1373 = memref.load %arg1[%c1_1074] : memref<50xf32, #tpu.memory_space<smem>>
    %c1_1075 = arith.constant 1 : index
    %c6_1076 = arith.constant 6 : index
    %c0_1077 = arith.constant 0 : index
    %c0_1078 = arith.constant 0 : index
    %1374 = vector.load %arg6[%c1_1075, %c6_1076, %c0_1077, %c0_1078] : memref<4x16x10x128xf32, #tpu.memory_space<vmem>>, vector<1x1x8x128xf32>
    %1375 = vector.shape_cast %1374 : vector<1x1x8x128xf32> to vector<8x128xf32>
    %1376 = vector.broadcast %1373 : f32 to vector<8x128xf32>
    %1377 = arith.mulf %1376, %1375 : vector<8x128xf32>
    %1378 = arith.addf %1372, %1377 : vector<8x128xf32>
    %c2_1079 = arith.constant 2 : index
    %1379 = memref.load %arg1[%c2_1079] : memref<50xf32, #tpu.memory_space<smem>>
    %c0_1080 = arith.constant 0 : index
    %c6_1081 = arith.constant 6 : index
    %c1_1082 = arith.constant 1 : index
    %c0_1083 = arith.constant 0 : index
    %1380 = vector.load %arg6[%c0_1080, %c6_1081, %c1_1082, %c0_1083] : memref<4x16x10x128xf32, #tpu.memory_space<vmem>>, vector<1x1x8x128xf32>
    %1381 = vector.shape_cast %1380 : vector<1x1x8x128xf32> to vector<8x128xf32>
    %1382 = vector.broadcast %1379 : f32 to vector<8x128xf32>
    %1383 = arith.mulf %1382, %1381 : vector<8x128xf32>
    %1384 = arith.addf %1378, %1383 : vector<8x128xf32>
    %c3_1084 = arith.constant 3 : index
    %1385 = memref.load %arg1[%c3_1084] : memref<50xf32, #tpu.memory_space<smem>>
    %c1_1085 = arith.constant 1 : index
    %c6_1086 = arith.constant 6 : index
    %c1_1087 = arith.constant 1 : index
    %c0_1088 = arith.constant 0 : index
    %1386 = vector.load %arg6[%c1_1085, %c6_1086, %c1_1087, %c0_1088] : memref<4x16x10x128xf32, #tpu.memory_space<vmem>>, vector<1x1x8x128xf32>
    %1387 = vector.shape_cast %1386 : vector<1x1x8x128xf32> to vector<8x128xf32>
    %1388 = vector.broadcast %1385 : f32 to vector<8x128xf32>
    %1389 = arith.mulf %1388, %1387 : vector<8x128xf32>
    %1390 = arith.addf %1384, %1389 : vector<8x128xf32>
    %c4_1089 = arith.constant 4 : index
    %1391 = memref.load %arg1[%c4_1089] : memref<50xf32, #tpu.memory_space<smem>>
    %c0_1090 = arith.constant 0 : index
    %c6_1091 = arith.constant 6 : index
    %c2_1092 = arith.constant 2 : index
    %c0_1093 = arith.constant 0 : index
    %1392 = vector.load %arg6[%c0_1090, %c6_1091, %c2_1092, %c0_1093] : memref<4x16x10x128xf32, #tpu.memory_space<vmem>>, vector<1x1x8x128xf32>
    %1393 = vector.shape_cast %1392 : vector<1x1x8x128xf32> to vector<8x128xf32>
    %1394 = vector.broadcast %1391 : f32 to vector<8x128xf32>
    %1395 = arith.mulf %1394, %1393 : vector<8x128xf32>
    %1396 = arith.addf %1390, %1395 : vector<8x128xf32>
    %c1_1094 = arith.constant 1 : index
    %1397 = memref.load %arg3[%c1_1094] : memref<10xf32, #tpu.memory_space<smem>>
    %c0_1095 = arith.constant 0 : index
    %c7_1096 = arith.constant 7 : index
    %c1_1097 = arith.constant 1 : index
    %c0_1098 = arith.constant 0 : index
    %1398 = vector.load %arg6[%c0_1095, %c7_1096, %c1_1097, %c0_1098] : memref<4x16x10x128xf32, #tpu.memory_space<vmem>>, vector<1x1x1x128xf32>
    %1399 = vector.shape_cast %1398 : vector<1x1x1x128xf32> to vector<1x128xf32>
    %1400 = vector.broadcast %1397 : f32 to vector<1x128xf32>
    %1401 = arith.mulf %1400, %1399 : vector<1x128xf32>
    %1402 = arith.subf %1366, %1401 : vector<1x128xf32>
    %c5_1099 = arith.constant 5 : index
    %1403 = memref.load %arg1[%c5_1099] : memref<50xf32, #tpu.memory_space<smem>>
    %c0_1100 = arith.constant 0 : index
    %c7_1101 = arith.constant 7 : index
    %c0_1102 = arith.constant 0 : index
    %c0_1103 = arith.constant 0 : index
    %1404 = vector.load %arg6[%c0_1100, %c7_1101, %c0_1102, %c0_1103] : memref<4x16x10x128xf32, #tpu.memory_space<vmem>>, vector<1x1x8x128xf32>
    %1405 = vector.shape_cast %1404 : vector<1x1x8x128xf32> to vector<8x128xf32>
    %1406 = vector.broadcast %1403 : f32 to vector<8x128xf32>
    %1407 = arith.mulf %1406, %1405 : vector<8x128xf32>
    %1408 = arith.addf %1396, %1407 : vector<8x128xf32>
    %c6_1104 = arith.constant 6 : index
    %1409 = memref.load %arg1[%c6_1104] : memref<50xf32, #tpu.memory_space<smem>>
    %c1_1105 = arith.constant 1 : index
    %c7_1106 = arith.constant 7 : index
    %c0_1107 = arith.constant 0 : index
    %c0_1108 = arith.constant 0 : index
    %1410 = vector.load %arg6[%c1_1105, %c7_1106, %c0_1107, %c0_1108] : memref<4x16x10x128xf32, #tpu.memory_space<vmem>>, vector<1x1x8x128xf32>
    %1411 = vector.shape_cast %1410 : vector<1x1x8x128xf32> to vector<8x128xf32>
    %1412 = vector.broadcast %1409 : f32 to vector<8x128xf32>
    %1413 = arith.mulf %1412, %1411 : vector<8x128xf32>
    %1414 = arith.addf %1408, %1413 : vector<8x128xf32>
    %c7_1109 = arith.constant 7 : index
    %1415 = memref.load %arg1[%c7_1109] : memref<50xf32, #tpu.memory_space<smem>>
    %c0_1110 = arith.constant 0 : index
    %c7_1111 = arith.constant 7 : index
    %c1_1112 = arith.constant 1 : index
    %c0_1113 = arith.constant 0 : index
    %1416 = vector.load %arg6[%c0_1110, %c7_1111, %c1_1112, %c0_1113] : memref<4x16x10x128xf32, #tpu.memory_space<vmem>>, vector<1x1x8x128xf32>
    %1417 = vector.shape_cast %1416 : vector<1x1x8x128xf32> to vector<8x128xf32>
    %1418 = vector.broadcast %1415 : f32 to vector<8x128xf32>
    %1419 = arith.mulf %1418, %1417 : vector<8x128xf32>
    %1420 = arith.addf %1414, %1419 : vector<8x128xf32>
    %c8_1114 = arith.constant 8 : index
    %1421 = memref.load %arg1[%c8_1114] : memref<50xf32, #tpu.memory_space<smem>>
    %c1_1115 = arith.constant 1 : index
    %c7_1116 = arith.constant 7 : index
    %c1_1117 = arith.constant 1 : index
    %c0_1118 = arith.constant 0 : index
    %1422 = vector.load %arg6[%c1_1115, %c7_1116, %c1_1117, %c0_1118] : memref<4x16x10x128xf32, #tpu.memory_space<vmem>>, vector<1x1x8x128xf32>
    %1423 = vector.shape_cast %1422 : vector<1x1x8x128xf32> to vector<8x128xf32>
    %1424 = vector.broadcast %1421 : f32 to vector<8x128xf32>
    %1425 = arith.mulf %1424, %1423 : vector<8x128xf32>
    %1426 = arith.addf %1420, %1425 : vector<8x128xf32>
    %c9_1119 = arith.constant 9 : index
    %1427 = memref.load %arg1[%c9_1119] : memref<50xf32, #tpu.memory_space<smem>>
    %c0_1120 = arith.constant 0 : index
    %c7_1121 = arith.constant 7 : index
    %c2_1122 = arith.constant 2 : index
    %c0_1123 = arith.constant 0 : index
    %1428 = vector.load %arg6[%c0_1120, %c7_1121, %c2_1122, %c0_1123] : memref<4x16x10x128xf32, #tpu.memory_space<vmem>>, vector<1x1x8x128xf32>
    %1429 = vector.shape_cast %1428 : vector<1x1x8x128xf32> to vector<8x128xf32>
    %1430 = vector.broadcast %1427 : f32 to vector<8x128xf32>
    %1431 = arith.mulf %1430, %1429 : vector<8x128xf32>
    %1432 = arith.addf %1426, %1431 : vector<8x128xf32>
    %c2_1124 = arith.constant 2 : index
    %1433 = memref.load %arg3[%c2_1124] : memref<10xf32, #tpu.memory_space<smem>>
    %c0_1125 = arith.constant 0 : index
    %c8_1126 = arith.constant 8 : index
    %c1_1127 = arith.constant 1 : index
    %c0_1128 = arith.constant 0 : index
    %1434 = vector.load %arg6[%c0_1125, %c8_1126, %c1_1127, %c0_1128] : memref<4x16x10x128xf32, #tpu.memory_space<vmem>>, vector<1x1x1x128xf32>
    %1435 = vector.shape_cast %1434 : vector<1x1x1x128xf32> to vector<1x128xf32>
    %1436 = vector.broadcast %1433 : f32 to vector<1x128xf32>
    %1437 = arith.mulf %1436, %1435 : vector<1x128xf32>
    %1438 = arith.subf %1402, %1437 : vector<1x128xf32>
    %c10_1129 = arith.constant 10 : index
    %1439 = memref.load %arg1[%c10_1129] : memref<50xf32, #tpu.memory_space<smem>>
    %c0_1130 = arith.constant 0 : index
    %c8_1131 = arith.constant 8 : index
    %c0_1132 = arith.constant 0 : index
    %c0_1133 = arith.constant 0 : index
    %1440 = vector.load %arg6[%c0_1130, %c8_1131, %c0_1132, %c0_1133] : memref<4x16x10x128xf32, #tpu.memory_space<vmem>>, vector<1x1x8x128xf32>
    %1441 = vector.shape_cast %1440 : vector<1x1x8x128xf32> to vector<8x128xf32>
    %1442 = vector.broadcast %1439 : f32 to vector<8x128xf32>
    %1443 = arith.mulf %1442, %1441 : vector<8x128xf32>
    %1444 = arith.addf %1432, %1443 : vector<8x128xf32>
    %c11_1134 = arith.constant 11 : index
    %1445 = memref.load %arg1[%c11_1134] : memref<50xf32, #tpu.memory_space<smem>>
    %c1_1135 = arith.constant 1 : index
    %c8_1136 = arith.constant 8 : index
    %c0_1137 = arith.constant 0 : index
    %c0_1138 = arith.constant 0 : index
    %1446 = vector.load %arg6[%c1_1135, %c8_1136, %c0_1137, %c0_1138] : memref<4x16x10x128xf32, #tpu.memory_space<vmem>>, vector<1x1x8x128xf32>
    %1447 = vector.shape_cast %1446 : vector<1x1x8x128xf32> to vector<8x128xf32>
    %1448 = vector.broadcast %1445 : f32 to vector<8x128xf32>
    %1449 = arith.mulf %1448, %1447 : vector<8x128xf32>
    %1450 = arith.addf %1444, %1449 : vector<8x128xf32>
    %c12_1139 = arith.constant 12 : index
    %1451 = memref.load %arg1[%c12_1139] : memref<50xf32, #tpu.memory_space<smem>>
    %c0_1140 = arith.constant 0 : index
    %c8_1141 = arith.constant 8 : index
    %c1_1142 = arith.constant 1 : index
    %c0_1143 = arith.constant 0 : index
    %1452 = vector.load %arg6[%c0_1140, %c8_1141, %c1_1142, %c0_1143] : memref<4x16x10x128xf32, #tpu.memory_space<vmem>>, vector<1x1x8x128xf32>
    %1453 = vector.shape_cast %1452 : vector<1x1x8x128xf32> to vector<8x128xf32>
    %1454 = vector.broadcast %1451 : f32 to vector<8x128xf32>
    %1455 = arith.mulf %1454, %1453 : vector<8x128xf32>
    %1456 = arith.addf %1450, %1455 : vector<8x128xf32>
    %c13_1144 = arith.constant 13 : index
    %1457 = memref.load %arg1[%c13_1144] : memref<50xf32, #tpu.memory_space<smem>>
    %c1_1145 = arith.constant 1 : index
    %c8_1146 = arith.constant 8 : index
    %c1_1147 = arith.constant 1 : index
    %c0_1148 = arith.constant 0 : index
    %1458 = vector.load %arg6[%c1_1145, %c8_1146, %c1_1147, %c0_1148] : memref<4x16x10x128xf32, #tpu.memory_space<vmem>>, vector<1x1x8x128xf32>
    %1459 = vector.shape_cast %1458 : vector<1x1x8x128xf32> to vector<8x128xf32>
    %1460 = vector.broadcast %1457 : f32 to vector<8x128xf32>
    %1461 = arith.mulf %1460, %1459 : vector<8x128xf32>
    %1462 = arith.addf %1456, %1461 : vector<8x128xf32>
    %c14_1149 = arith.constant 14 : index
    %1463 = memref.load %arg1[%c14_1149] : memref<50xf32, #tpu.memory_space<smem>>
    %c0_1150 = arith.constant 0 : index
    %c8_1151 = arith.constant 8 : index
    %c2_1152 = arith.constant 2 : index
    %c0_1153 = arith.constant 0 : index
    %1464 = vector.load %arg6[%c0_1150, %c8_1151, %c2_1152, %c0_1153] : memref<4x16x10x128xf32, #tpu.memory_space<vmem>>, vector<1x1x8x128xf32>
    %1465 = vector.shape_cast %1464 : vector<1x1x8x128xf32> to vector<8x128xf32>
    %1466 = vector.broadcast %1463 : f32 to vector<8x128xf32>
    %1467 = arith.mulf %1466, %1465 : vector<8x128xf32>
    %1468 = arith.addf %1462, %1467 : vector<8x128xf32>
    %c3_1154 = arith.constant 3 : index
    %1469 = memref.load %arg3[%c3_1154] : memref<10xf32, #tpu.memory_space<smem>>
    %c0_1155 = arith.constant 0 : index
    %c9_1156 = arith.constant 9 : index
    %c1_1157 = arith.constant 1 : index
    %c0_1158 = arith.constant 0 : index
    %1470 = vector.load %arg6[%c0_1155, %c9_1156, %c1_1157, %c0_1158] : memref<4x16x10x128xf32, #tpu.memory_space<vmem>>, vector<1x1x1x128xf32>
    %1471 = vector.shape_cast %1470 : vector<1x1x1x128xf32> to vector<1x128xf32>
    %1472 = vector.broadcast %1469 : f32 to vector<1x128xf32>
    %1473 = arith.mulf %1472, %1471 : vector<1x128xf32>
    %1474 = arith.subf %1438, %1473 : vector<1x128xf32>
    %c15_1159 = arith.constant 15 : index
    %1475 = memref.load %arg1[%c15_1159] : memref<50xf32, #tpu.memory_space<smem>>
    %c0_1160 = arith.constant 0 : index
    %c9_1161 = arith.constant 9 : index
    %c0_1162 = arith.constant 0 : index
    %c0_1163 = arith.constant 0 : index
    %1476 = vector.load %arg6[%c0_1160, %c9_1161, %c0_1162, %c0_1163] : memref<4x16x10x128xf32, #tpu.memory_space<vmem>>, vector<1x1x8x128xf32>
    %1477 = vector.shape_cast %1476 : vector<1x1x8x128xf32> to vector<8x128xf32>
    %1478 = vector.broadcast %1475 : f32 to vector<8x128xf32>
    %1479 = arith.mulf %1478, %1477 : vector<8x128xf32>
    %1480 = arith.addf %1468, %1479 : vector<8x128xf32>
    %c16_1164 = arith.constant 16 : index
    %1481 = memref.load %arg1[%c16_1164] : memref<50xf32, #tpu.memory_space<smem>>
    %c1_1165 = arith.constant 1 : index
    %c9_1166 = arith.constant 9 : index
    %c0_1167 = arith.constant 0 : index
    %c0_1168 = arith.constant 0 : index
    %1482 = vector.load %arg6[%c1_1165, %c9_1166, %c0_1167, %c0_1168] : memref<4x16x10x128xf32, #tpu.memory_space<vmem>>, vector<1x1x8x128xf32>
    %1483 = vector.shape_cast %1482 : vector<1x1x8x128xf32> to vector<8x128xf32>
    %1484 = vector.broadcast %1481 : f32 to vector<8x128xf32>
    %1485 = arith.mulf %1484, %1483 : vector<8x128xf32>
    %1486 = arith.addf %1480, %1485 : vector<8x128xf32>
    %c17_1169 = arith.constant 17 : index
    %1487 = memref.load %arg1[%c17_1169] : memref<50xf32, #tpu.memory_space<smem>>
    %c0_1170 = arith.constant 0 : index
    %c9_1171 = arith.constant 9 : index
    %c1_1172 = arith.constant 1 : index
    %c0_1173 = arith.constant 0 : index
    %1488 = vector.load %arg6[%c0_1170, %c9_1171, %c1_1172, %c0_1173] : memref<4x16x10x128xf32, #tpu.memory_space<vmem>>, vector<1x1x8x128xf32>
    %1489 = vector.shape_cast %1488 : vector<1x1x8x128xf32> to vector<8x128xf32>
    %1490 = vector.broadcast %1487 : f32 to vector<8x128xf32>
    %1491 = arith.mulf %1490, %1489 : vector<8x128xf32>
    %1492 = arith.addf %1486, %1491 : vector<8x128xf32>
    %c18_1174 = arith.constant 18 : index
    %1493 = memref.load %arg1[%c18_1174] : memref<50xf32, #tpu.memory_space<smem>>
    %c1_1175 = arith.constant 1 : index
    %c9_1176 = arith.constant 9 : index
    %c1_1177 = arith.constant 1 : index
    %c0_1178 = arith.constant 0 : index
    %1494 = vector.load %arg6[%c1_1175, %c9_1176, %c1_1177, %c0_1178] : memref<4x16x10x128xf32, #tpu.memory_space<vmem>>, vector<1x1x8x128xf32>
    %1495 = vector.shape_cast %1494 : vector<1x1x8x128xf32> to vector<8x128xf32>
    %1496 = vector.broadcast %1493 : f32 to vector<8x128xf32>
    %1497 = arith.mulf %1496, %1495 : vector<8x128xf32>
    %1498 = arith.addf %1492, %1497 : vector<8x128xf32>
    %c19_1179 = arith.constant 19 : index
    %1499 = memref.load %arg1[%c19_1179] : memref<50xf32, #tpu.memory_space<smem>>
    %c0_1180 = arith.constant 0 : index
    %c9_1181 = arith.constant 9 : index
    %c2_1182 = arith.constant 2 : index
    %c0_1183 = arith.constant 0 : index
    %1500 = vector.load %arg6[%c0_1180, %c9_1181, %c2_1182, %c0_1183] : memref<4x16x10x128xf32, #tpu.memory_space<vmem>>, vector<1x1x8x128xf32>
    %1501 = vector.shape_cast %1500 : vector<1x1x8x128xf32> to vector<8x128xf32>
    %1502 = vector.broadcast %1499 : f32 to vector<8x128xf32>
    %1503 = arith.mulf %1502, %1501 : vector<8x128xf32>
    %1504 = arith.addf %1498, %1503 : vector<8x128xf32>
    %c4_1184 = arith.constant 4 : index
    %1505 = memref.load %arg3[%c4_1184] : memref<10xf32, #tpu.memory_space<smem>>
    %c0_1185 = arith.constant 0 : index
    %c10_1186 = arith.constant 10 : index
    %c1_1187 = arith.constant 1 : index
    %c0_1188 = arith.constant 0 : index
    %1506 = vector.load %arg6[%c0_1185, %c10_1186, %c1_1187, %c0_1188] : memref<4x16x10x128xf32, #tpu.memory_space<vmem>>, vector<1x1x1x128xf32>
    %1507 = vector.shape_cast %1506 : vector<1x1x1x128xf32> to vector<1x128xf32>
    %1508 = vector.broadcast %1505 : f32 to vector<1x128xf32>
    %1509 = arith.mulf %1508, %1507 : vector<1x128xf32>
    %1510 = arith.subf %1474, %1509 : vector<1x128xf32>
    %c20_1189 = arith.constant 20 : index
    %1511 = memref.load %arg1[%c20_1189] : memref<50xf32, #tpu.memory_space<smem>>
    %c0_1190 = arith.constant 0 : index
    %c10_1191 = arith.constant 10 : index
    %c0_1192 = arith.constant 0 : index
    %c0_1193 = arith.constant 0 : index
    %1512 = vector.load %arg6[%c0_1190, %c10_1191, %c0_1192, %c0_1193] : memref<4x16x10x128xf32, #tpu.memory_space<vmem>>, vector<1x1x8x128xf32>
    %1513 = vector.shape_cast %1512 : vector<1x1x8x128xf32> to vector<8x128xf32>
    %1514 = vector.broadcast %1511 : f32 to vector<8x128xf32>
    %1515 = arith.mulf %1514, %1513 : vector<8x128xf32>
    %1516 = arith.addf %1504, %1515 : vector<8x128xf32>
    %c21_1194 = arith.constant 21 : index
    %1517 = memref.load %arg1[%c21_1194] : memref<50xf32, #tpu.memory_space<smem>>
    %c1_1195 = arith.constant 1 : index
    %c10_1196 = arith.constant 10 : index
    %c0_1197 = arith.constant 0 : index
    %c0_1198 = arith.constant 0 : index
    %1518 = vector.load %arg6[%c1_1195, %c10_1196, %c0_1197, %c0_1198] : memref<4x16x10x128xf32, #tpu.memory_space<vmem>>, vector<1x1x8x128xf32>
    %1519 = vector.shape_cast %1518 : vector<1x1x8x128xf32> to vector<8x128xf32>
    %1520 = vector.broadcast %1517 : f32 to vector<8x128xf32>
    %1521 = arith.mulf %1520, %1519 : vector<8x128xf32>
    %1522 = arith.addf %1516, %1521 : vector<8x128xf32>
    %c22_1199 = arith.constant 22 : index
    %1523 = memref.load %arg1[%c22_1199] : memref<50xf32, #tpu.memory_space<smem>>
    %c0_1200 = arith.constant 0 : index
    %c10_1201 = arith.constant 10 : index
    %c1_1202 = arith.constant 1 : index
    %c0_1203 = arith.constant 0 : index
    %1524 = vector.load %arg6[%c0_1200, %c10_1201, %c1_1202, %c0_1203] : memref<4x16x10x128xf32, #tpu.memory_space<vmem>>, vector<1x1x8x128xf32>
    %1525 = vector.shape_cast %1524 : vector<1x1x8x128xf32> to vector<8x128xf32>
    %1526 = vector.broadcast %1523 : f32 to vector<8x128xf32>
    %1527 = arith.mulf %1526, %1525 : vector<8x128xf32>
    %1528 = arith.addf %1522, %1527 : vector<8x128xf32>
    %c23_1204 = arith.constant 23 : index
    %1529 = memref.load %arg1[%c23_1204] : memref<50xf32, #tpu.memory_space<smem>>
    %c1_1205 = arith.constant 1 : index
    %c10_1206 = arith.constant 10 : index
    %c1_1207 = arith.constant 1 : index
    %c0_1208 = arith.constant 0 : index
    %1530 = vector.load %arg6[%c1_1205, %c10_1206, %c1_1207, %c0_1208] : memref<4x16x10x128xf32, #tpu.memory_space<vmem>>, vector<1x1x8x128xf32>
    %1531 = vector.shape_cast %1530 : vector<1x1x8x128xf32> to vector<8x128xf32>
    %1532 = vector.broadcast %1529 : f32 to vector<8x128xf32>
    %1533 = arith.mulf %1532, %1531 : vector<8x128xf32>
    %1534 = arith.addf %1528, %1533 : vector<8x128xf32>
    %c24_1209 = arith.constant 24 : index
    %1535 = memref.load %arg1[%c24_1209] : memref<50xf32, #tpu.memory_space<smem>>
    %c0_1210 = arith.constant 0 : index
    %c10_1211 = arith.constant 10 : index
    %c2_1212 = arith.constant 2 : index
    %c0_1213 = arith.constant 0 : index
    %1536 = vector.load %arg6[%c0_1210, %c10_1211, %c2_1212, %c0_1213] : memref<4x16x10x128xf32, #tpu.memory_space<vmem>>, vector<1x1x8x128xf32>
    %1537 = vector.shape_cast %1536 : vector<1x1x8x128xf32> to vector<8x128xf32>
    %1538 = vector.broadcast %1535 : f32 to vector<8x128xf32>
    %1539 = arith.mulf %1538, %1537 : vector<8x128xf32>
    %1540 = arith.addf %1534, %1539 : vector<8x128xf32>
    %c5_1214 = arith.constant 5 : index
    %1541 = memref.load %arg3[%c5_1214] : memref<10xf32, #tpu.memory_space<smem>>
    %c2_1215 = arith.constant 2 : index
    %c6_1216 = arith.constant 6 : index
    %c1_1217 = arith.constant 1 : index
    %c0_1218 = arith.constant 0 : index
    %1542 = vector.load %arg6[%c2_1215, %c6_1216, %c1_1217, %c0_1218] : memref<4x16x10x128xf32, #tpu.memory_space<vmem>>, vector<1x1x1x128xf32>
    %1543 = vector.shape_cast %1542 : vector<1x1x1x128xf32> to vector<1x128xf32>
    %1544 = vector.broadcast %1541 : f32 to vector<1x128xf32>
    %1545 = arith.mulf %1544, %1543 : vector<1x128xf32>
    %1546 = arith.subf %1510, %1545 : vector<1x128xf32>
    %c25_1219 = arith.constant 25 : index
    %1547 = memref.load %arg1[%c25_1219] : memref<50xf32, #tpu.memory_space<smem>>
    %c2_1220 = arith.constant 2 : index
    %c6_1221 = arith.constant 6 : index
    %c0_1222 = arith.constant 0 : index
    %c0_1223 = arith.constant 0 : index
    %1548 = vector.load %arg6[%c2_1220, %c6_1221, %c0_1222, %c0_1223] : memref<4x16x10x128xf32, #tpu.memory_space<vmem>>, vector<1x1x8x128xf32>
    %1549 = vector.shape_cast %1548 : vector<1x1x8x128xf32> to vector<8x128xf32>
    %1550 = vector.broadcast %1547 : f32 to vector<8x128xf32>
    %1551 = arith.mulf %1550, %1549 : vector<8x128xf32>
    %1552 = arith.addf %1540, %1551 : vector<8x128xf32>
    %c26_1224 = arith.constant 26 : index
    %1553 = memref.load %arg1[%c26_1224] : memref<50xf32, #tpu.memory_space<smem>>
    %c3_1225 = arith.constant 3 : index
    %c6_1226 = arith.constant 6 : index
    %c0_1227 = arith.constant 0 : index
    %c0_1228 = arith.constant 0 : index
    %1554 = vector.load %arg6[%c3_1225, %c6_1226, %c0_1227, %c0_1228] : memref<4x16x10x128xf32, #tpu.memory_space<vmem>>, vector<1x1x8x128xf32>
    %1555 = vector.shape_cast %1554 : vector<1x1x8x128xf32> to vector<8x128xf32>
    %1556 = vector.broadcast %1553 : f32 to vector<8x128xf32>
    %1557 = arith.mulf %1556, %1555 : vector<8x128xf32>
    %1558 = arith.addf %1552, %1557 : vector<8x128xf32>
    %c27_1229 = arith.constant 27 : index
    %1559 = memref.load %arg1[%c27_1229] : memref<50xf32, #tpu.memory_space<smem>>
    %c2_1230 = arith.constant 2 : index
    %c6_1231 = arith.constant 6 : index
    %c1_1232 = arith.constant 1 : index
    %c0_1233 = arith.constant 0 : index
    %1560 = vector.load %arg6[%c2_1230, %c6_1231, %c1_1232, %c0_1233] : memref<4x16x10x128xf32, #tpu.memory_space<vmem>>, vector<1x1x8x128xf32>
    %1561 = vector.shape_cast %1560 : vector<1x1x8x128xf32> to vector<8x128xf32>
    %1562 = vector.broadcast %1559 : f32 to vector<8x128xf32>
    %1563 = arith.mulf %1562, %1561 : vector<8x128xf32>
    %1564 = arith.addf %1558, %1563 : vector<8x128xf32>
    %c28_1234 = arith.constant 28 : index
    %1565 = memref.load %arg1[%c28_1234] : memref<50xf32, #tpu.memory_space<smem>>
    %c3_1235 = arith.constant 3 : index
    %c6_1236 = arith.constant 6 : index
    %c1_1237 = arith.constant 1 : index
    %c0_1238 = arith.constant 0 : index
    %1566 = vector.load %arg6[%c3_1235, %c6_1236, %c1_1237, %c0_1238] : memref<4x16x10x128xf32, #tpu.memory_space<vmem>>, vector<1x1x8x128xf32>
    %1567 = vector.shape_cast %1566 : vector<1x1x8x128xf32> to vector<8x128xf32>
    %1568 = vector.broadcast %1565 : f32 to vector<8x128xf32>
    %1569 = arith.mulf %1568, %1567 : vector<8x128xf32>
    %1570 = arith.addf %1564, %1569 : vector<8x128xf32>
    %c29_1239 = arith.constant 29 : index
    %1571 = memref.load %arg1[%c29_1239] : memref<50xf32, #tpu.memory_space<smem>>
    %c2_1240 = arith.constant 2 : index
    %c6_1241 = arith.constant 6 : index
    %c2_1242 = arith.constant 2 : index
    %c0_1243 = arith.constant 0 : index
    %1572 = vector.load %arg6[%c2_1240, %c6_1241, %c2_1242, %c0_1243] : memref<4x16x10x128xf32, #tpu.memory_space<vmem>>, vector<1x1x8x128xf32>
    %1573 = vector.shape_cast %1572 : vector<1x1x8x128xf32> to vector<8x128xf32>
    %1574 = vector.broadcast %1571 : f32 to vector<8x128xf32>
    %1575 = arith.mulf %1574, %1573 : vector<8x128xf32>
    %1576 = arith.addf %1570, %1575 : vector<8x128xf32>
    %c6_1244 = arith.constant 6 : index
    %1577 = memref.load %arg3[%c6_1244] : memref<10xf32, #tpu.memory_space<smem>>
    %c2_1245 = arith.constant 2 : index
    %c7_1246 = arith.constant 7 : index
    %c1_1247 = arith.constant 1 : index
    %c0_1248 = arith.constant 0 : index
    %1578 = vector.load %arg6[%c2_1245, %c7_1246, %c1_1247, %c0_1248] : memref<4x16x10x128xf32, #tpu.memory_space<vmem>>, vector<1x1x1x128xf32>
    %1579 = vector.shape_cast %1578 : vector<1x1x1x128xf32> to vector<1x128xf32>
    %1580 = vector.broadcast %1577 : f32 to vector<1x128xf32>
    %1581 = arith.mulf %1580, %1579 : vector<1x128xf32>
    %1582 = arith.subf %1546, %1581 : vector<1x128xf32>
    %c30_1249 = arith.constant 30 : index
    %1583 = memref.load %arg1[%c30_1249] : memref<50xf32, #tpu.memory_space<smem>>
    %c2_1250 = arith.constant 2 : index
    %c7_1251 = arith.constant 7 : index
    %c0_1252 = arith.constant 0 : index
    %c0_1253 = arith.constant 0 : index
    %1584 = vector.load %arg6[%c2_1250, %c7_1251, %c0_1252, %c0_1253] : memref<4x16x10x128xf32, #tpu.memory_space<vmem>>, vector<1x1x8x128xf32>
    %1585 = vector.shape_cast %1584 : vector<1x1x8x128xf32> to vector<8x128xf32>
    %1586 = vector.broadcast %1583 : f32 to vector<8x128xf32>
    %1587 = arith.mulf %1586, %1585 : vector<8x128xf32>
    %1588 = arith.addf %1576, %1587 : vector<8x128xf32>
    %c31_1254 = arith.constant 31 : index
    %1589 = memref.load %arg1[%c31_1254] : memref<50xf32, #tpu.memory_space<smem>>
    %c3_1255 = arith.constant 3 : index
    %c7_1256 = arith.constant 7 : index
    %c0_1257 = arith.constant 0 : index
    %c0_1258 = arith.constant 0 : index
    %1590 = vector.load %arg6[%c3_1255, %c7_1256, %c0_1257, %c0_1258] : memref<4x16x10x128xf32, #tpu.memory_space<vmem>>, vector<1x1x8x128xf32>
    %1591 = vector.shape_cast %1590 : vector<1x1x8x128xf32> to vector<8x128xf32>
    %1592 = vector.broadcast %1589 : f32 to vector<8x128xf32>
    %1593 = arith.mulf %1592, %1591 : vector<8x128xf32>
    %1594 = arith.addf %1588, %1593 : vector<8x128xf32>
    %c32_1259 = arith.constant 32 : index
    %1595 = memref.load %arg1[%c32_1259] : memref<50xf32, #tpu.memory_space<smem>>
    %c2_1260 = arith.constant 2 : index
    %c7_1261 = arith.constant 7 : index
    %c1_1262 = arith.constant 1 : index
    %c0_1263 = arith.constant 0 : index
    %1596 = vector.load %arg6[%c2_1260, %c7_1261, %c1_1262, %c0_1263] : memref<4x16x10x128xf32, #tpu.memory_space<vmem>>, vector<1x1x8x128xf32>
    %1597 = vector.shape_cast %1596 : vector<1x1x8x128xf32> to vector<8x128xf32>
    %1598 = vector.broadcast %1595 : f32 to vector<8x128xf32>
    %1599 = arith.mulf %1598, %1597 : vector<8x128xf32>
    %1600 = arith.addf %1594, %1599 : vector<8x128xf32>
    %c33_1264 = arith.constant 33 : index
    %1601 = memref.load %arg1[%c33_1264] : memref<50xf32, #tpu.memory_space<smem>>
    %c3_1265 = arith.constant 3 : index
    %c7_1266 = arith.constant 7 : index
    %c1_1267 = arith.constant 1 : index
    %c0_1268 = arith.constant 0 : index
    %1602 = vector.load %arg6[%c3_1265, %c7_1266, %c1_1267, %c0_1268] : memref<4x16x10x128xf32, #tpu.memory_space<vmem>>, vector<1x1x8x128xf32>
    %1603 = vector.shape_cast %1602 : vector<1x1x8x128xf32> to vector<8x128xf32>
    %1604 = vector.broadcast %1601 : f32 to vector<8x128xf32>
    %1605 = arith.mulf %1604, %1603 : vector<8x128xf32>
    %1606 = arith.addf %1600, %1605 : vector<8x128xf32>
    %c34_1269 = arith.constant 34 : index
    %1607 = memref.load %arg1[%c34_1269] : memref<50xf32, #tpu.memory_space<smem>>
    %c2_1270 = arith.constant 2 : index
    %c7_1271 = arith.constant 7 : index
    %c2_1272 = arith.constant 2 : index
    %c0_1273 = arith.constant 0 : index
    %1608 = vector.load %arg6[%c2_1270, %c7_1271, %c2_1272, %c0_1273] : memref<4x16x10x128xf32, #tpu.memory_space<vmem>>, vector<1x1x8x128xf32>
    %1609 = vector.shape_cast %1608 : vector<1x1x8x128xf32> to vector<8x128xf32>
    %1610 = vector.broadcast %1607 : f32 to vector<8x128xf32>
    %1611 = arith.mulf %1610, %1609 : vector<8x128xf32>
    %1612 = arith.addf %1606, %1611 : vector<8x128xf32>
    %c7_1274 = arith.constant 7 : index
    %1613 = memref.load %arg3[%c7_1274] : memref<10xf32, #tpu.memory_space<smem>>
    %c2_1275 = arith.constant 2 : index
    %c8_1276 = arith.constant 8 : index
    %c1_1277 = arith.constant 1 : index
    %c0_1278 = arith.constant 0 : index
    %1614 = vector.load %arg6[%c2_1275, %c8_1276, %c1_1277, %c0_1278] : memref<4x16x10x128xf32, #tpu.memory_space<vmem>>, vector<1x1x1x128xf32>
    %1615 = vector.shape_cast %1614 : vector<1x1x1x128xf32> to vector<1x128xf32>
    %1616 = vector.broadcast %1613 : f32 to vector<1x128xf32>
    %1617 = arith.mulf %1616, %1615 : vector<1x128xf32>
    %1618 = arith.subf %1582, %1617 : vector<1x128xf32>
    %c35_1279 = arith.constant 35 : index
    %1619 = memref.load %arg1[%c35_1279] : memref<50xf32, #tpu.memory_space<smem>>
    %c2_1280 = arith.constant 2 : index
    %c8_1281 = arith.constant 8 : index
    %c0_1282 = arith.constant 0 : index
    %c0_1283 = arith.constant 0 : index
    %1620 = vector.load %arg6[%c2_1280, %c8_1281, %c0_1282, %c0_1283] : memref<4x16x10x128xf32, #tpu.memory_space<vmem>>, vector<1x1x8x128xf32>
    %1621 = vector.shape_cast %1620 : vector<1x1x8x128xf32> to vector<8x128xf32>
    %1622 = vector.broadcast %1619 : f32 to vector<8x128xf32>
    %1623 = arith.mulf %1622, %1621 : vector<8x128xf32>
    %1624 = arith.addf %1612, %1623 : vector<8x128xf32>
    %c36_1284 = arith.constant 36 : index
    %1625 = memref.load %arg1[%c36_1284] : memref<50xf32, #tpu.memory_space<smem>>
    %c3_1285 = arith.constant 3 : index
    %c8_1286 = arith.constant 8 : index
    %c0_1287 = arith.constant 0 : index
    %c0_1288 = arith.constant 0 : index
    %1626 = vector.load %arg6[%c3_1285, %c8_1286, %c0_1287, %c0_1288] : memref<4x16x10x128xf32, #tpu.memory_space<vmem>>, vector<1x1x8x128xf32>
    %1627 = vector.shape_cast %1626 : vector<1x1x8x128xf32> to vector<8x128xf32>
    %1628 = vector.broadcast %1625 : f32 to vector<8x128xf32>
    %1629 = arith.mulf %1628, %1627 : vector<8x128xf32>
    %1630 = arith.addf %1624, %1629 : vector<8x128xf32>
    %c37_1289 = arith.constant 37 : index
    %1631 = memref.load %arg1[%c37_1289] : memref<50xf32, #tpu.memory_space<smem>>
    %c2_1290 = arith.constant 2 : index
    %c8_1291 = arith.constant 8 : index
    %c1_1292 = arith.constant 1 : index
    %c0_1293 = arith.constant 0 : index
    %1632 = vector.load %arg6[%c2_1290, %c8_1291, %c1_1292, %c0_1293] : memref<4x16x10x128xf32, #tpu.memory_space<vmem>>, vector<1x1x8x128xf32>
    %1633 = vector.shape_cast %1632 : vector<1x1x8x128xf32> to vector<8x128xf32>
    %1634 = vector.broadcast %1631 : f32 to vector<8x128xf32>
    %1635 = arith.mulf %1634, %1633 : vector<8x128xf32>
    %1636 = arith.addf %1630, %1635 : vector<8x128xf32>
    %c38_1294 = arith.constant 38 : index
    %1637 = memref.load %arg1[%c38_1294] : memref<50xf32, #tpu.memory_space<smem>>
    %c3_1295 = arith.constant 3 : index
    %c8_1296 = arith.constant 8 : index
    %c1_1297 = arith.constant 1 : index
    %c0_1298 = arith.constant 0 : index
    %1638 = vector.load %arg6[%c3_1295, %c8_1296, %c1_1297, %c0_1298] : memref<4x16x10x128xf32, #tpu.memory_space<vmem>>, vector<1x1x8x128xf32>
    %1639 = vector.shape_cast %1638 : vector<1x1x8x128xf32> to vector<8x128xf32>
    %1640 = vector.broadcast %1637 : f32 to vector<8x128xf32>
    %1641 = arith.mulf %1640, %1639 : vector<8x128xf32>
    %1642 = arith.addf %1636, %1641 : vector<8x128xf32>
    %c39_1299 = arith.constant 39 : index
    %1643 = memref.load %arg1[%c39_1299] : memref<50xf32, #tpu.memory_space<smem>>
    %c2_1300 = arith.constant 2 : index
    %c8_1301 = arith.constant 8 : index
    %c2_1302 = arith.constant 2 : index
    %c0_1303 = arith.constant 0 : index
    %1644 = vector.load %arg6[%c2_1300, %c8_1301, %c2_1302, %c0_1303] : memref<4x16x10x128xf32, #tpu.memory_space<vmem>>, vector<1x1x8x128xf32>
    %1645 = vector.shape_cast %1644 : vector<1x1x8x128xf32> to vector<8x128xf32>
    %1646 = vector.broadcast %1643 : f32 to vector<8x128xf32>
    %1647 = arith.mulf %1646, %1645 : vector<8x128xf32>
    %1648 = arith.addf %1642, %1647 : vector<8x128xf32>
    %c8_1304 = arith.constant 8 : index
    %1649 = memref.load %arg3[%c8_1304] : memref<10xf32, #tpu.memory_space<smem>>
    %c2_1305 = arith.constant 2 : index
    %c9_1306 = arith.constant 9 : index
    %c1_1307 = arith.constant 1 : index
    %c0_1308 = arith.constant 0 : index
    %1650 = vector.load %arg6[%c2_1305, %c9_1306, %c1_1307, %c0_1308] : memref<4x16x10x128xf32, #tpu.memory_space<vmem>>, vector<1x1x1x128xf32>
    %1651 = vector.shape_cast %1650 : vector<1x1x1x128xf32> to vector<1x128xf32>
    %1652 = vector.broadcast %1649 : f32 to vector<1x128xf32>
    %1653 = arith.mulf %1652, %1651 : vector<1x128xf32>
    %1654 = arith.subf %1618, %1653 : vector<1x128xf32>
    %c40_1309 = arith.constant 40 : index
    %1655 = memref.load %arg1[%c40_1309] : memref<50xf32, #tpu.memory_space<smem>>
    %c2_1310 = arith.constant 2 : index
    %c9_1311 = arith.constant 9 : index
    %c0_1312 = arith.constant 0 : index
    %c0_1313 = arith.constant 0 : index
    %1656 = vector.load %arg6[%c2_1310, %c9_1311, %c0_1312, %c0_1313] : memref<4x16x10x128xf32, #tpu.memory_space<vmem>>, vector<1x1x8x128xf32>
    %1657 = vector.shape_cast %1656 : vector<1x1x8x128xf32> to vector<8x128xf32>
    %1658 = vector.broadcast %1655 : f32 to vector<8x128xf32>
    %1659 = arith.mulf %1658, %1657 : vector<8x128xf32>
    %1660 = arith.addf %1648, %1659 : vector<8x128xf32>
    %c41_1314 = arith.constant 41 : index
    %1661 = memref.load %arg1[%c41_1314] : memref<50xf32, #tpu.memory_space<smem>>
    %c3_1315 = arith.constant 3 : index
    %c9_1316 = arith.constant 9 : index
    %c0_1317 = arith.constant 0 : index
    %c0_1318 = arith.constant 0 : index
    %1662 = vector.load %arg6[%c3_1315, %c9_1316, %c0_1317, %c0_1318] : memref<4x16x10x128xf32, #tpu.memory_space<vmem>>, vector<1x1x8x128xf32>
    %1663 = vector.shape_cast %1662 : vector<1x1x8x128xf32> to vector<8x128xf32>
    %1664 = vector.broadcast %1661 : f32 to vector<8x128xf32>
    %1665 = arith.mulf %1664, %1663 : vector<8x128xf32>
    %1666 = arith.addf %1660, %1665 : vector<8x128xf32>
    %c42_1319 = arith.constant 42 : index
    %1667 = memref.load %arg1[%c42_1319] : memref<50xf32, #tpu.memory_space<smem>>
    %c2_1320 = arith.constant 2 : index
    %c9_1321 = arith.constant 9 : index
    %c1_1322 = arith.constant 1 : index
    %c0_1323 = arith.constant 0 : index
    %1668 = vector.load %arg6[%c2_1320, %c9_1321, %c1_1322, %c0_1323] : memref<4x16x10x128xf32, #tpu.memory_space<vmem>>, vector<1x1x8x128xf32>
    %1669 = vector.shape_cast %1668 : vector<1x1x8x128xf32> to vector<8x128xf32>
    %1670 = vector.broadcast %1667 : f32 to vector<8x128xf32>
    %1671 = arith.mulf %1670, %1669 : vector<8x128xf32>
    %1672 = arith.addf %1666, %1671 : vector<8x128xf32>
    %c43_1324 = arith.constant 43 : index
    %1673 = memref.load %arg1[%c43_1324] : memref<50xf32, #tpu.memory_space<smem>>
    %c3_1325 = arith.constant 3 : index
    %c9_1326 = arith.constant 9 : index
    %c1_1327 = arith.constant 1 : index
    %c0_1328 = arith.constant 0 : index
    %1674 = vector.load %arg6[%c3_1325, %c9_1326, %c1_1327, %c0_1328] : memref<4x16x10x128xf32, #tpu.memory_space<vmem>>, vector<1x1x8x128xf32>
    %1675 = vector.shape_cast %1674 : vector<1x1x8x128xf32> to vector<8x128xf32>
    %1676 = vector.broadcast %1673 : f32 to vector<8x128xf32>
    %1677 = arith.mulf %1676, %1675 : vector<8x128xf32>
    %1678 = arith.addf %1672, %1677 : vector<8x128xf32>
    %c44_1329 = arith.constant 44 : index
    %1679 = memref.load %arg1[%c44_1329] : memref<50xf32, #tpu.memory_space<smem>>
    %c2_1330 = arith.constant 2 : index
    %c9_1331 = arith.constant 9 : index
    %c2_1332 = arith.constant 2 : index
    %c0_1333 = arith.constant 0 : index
    %1680 = vector.load %arg6[%c2_1330, %c9_1331, %c2_1332, %c0_1333] : memref<4x16x10x128xf32, #tpu.memory_space<vmem>>, vector<1x1x8x128xf32>
    %1681 = vector.shape_cast %1680 : vector<1x1x8x128xf32> to vector<8x128xf32>
    %1682 = vector.broadcast %1679 : f32 to vector<8x128xf32>
    %1683 = arith.mulf %1682, %1681 : vector<8x128xf32>
    %1684 = arith.addf %1678, %1683 : vector<8x128xf32>
    %c9_1334 = arith.constant 9 : index
    %1685 = memref.load %arg3[%c9_1334] : memref<10xf32, #tpu.memory_space<smem>>
    %c2_1335 = arith.constant 2 : index
    %c10_1336 = arith.constant 10 : index
    %c1_1337 = arith.constant 1 : index
    %c0_1338 = arith.constant 0 : index
    %1686 = vector.load %arg6[%c2_1335, %c10_1336, %c1_1337, %c0_1338] : memref<4x16x10x128xf32, #tpu.memory_space<vmem>>, vector<1x1x1x128xf32>
    %1687 = vector.shape_cast %1686 : vector<1x1x1x128xf32> to vector<1x128xf32>
    %1688 = vector.broadcast %1685 : f32 to vector<1x128xf32>
    %1689 = arith.mulf %1688, %1687 : vector<1x128xf32>
    %1690 = arith.subf %1654, %1689 : vector<1x128xf32>
    %c45_1339 = arith.constant 45 : index
    %1691 = memref.load %arg1[%c45_1339] : memref<50xf32, #tpu.memory_space<smem>>
    %c2_1340 = arith.constant 2 : index
    %c10_1341 = arith.constant 10 : index
    %c0_1342 = arith.constant 0 : index
    %c0_1343 = arith.constant 0 : index
    %1692 = vector.load %arg6[%c2_1340, %c10_1341, %c0_1342, %c0_1343] : memref<4x16x10x128xf32, #tpu.memory_space<vmem>>, vector<1x1x8x128xf32>
    %1693 = vector.shape_cast %1692 : vector<1x1x8x128xf32> to vector<8x128xf32>
    %1694 = vector.broadcast %1691 : f32 to vector<8x128xf32>
    %1695 = arith.mulf %1694, %1693 : vector<8x128xf32>
    %1696 = arith.addf %1684, %1695 : vector<8x128xf32>
    %c46_1344 = arith.constant 46 : index
    %1697 = memref.load %arg1[%c46_1344] : memref<50xf32, #tpu.memory_space<smem>>
    %c3_1345 = arith.constant 3 : index
    %c10_1346 = arith.constant 10 : index
    %c0_1347 = arith.constant 0 : index
    %c0_1348 = arith.constant 0 : index
    %1698 = vector.load %arg6[%c3_1345, %c10_1346, %c0_1347, %c0_1348] : memref<4x16x10x128xf32, #tpu.memory_space<vmem>>, vector<1x1x8x128xf32>
    %1699 = vector.shape_cast %1698 : vector<1x1x8x128xf32> to vector<8x128xf32>
    %1700 = vector.broadcast %1697 : f32 to vector<8x128xf32>
    %1701 = arith.mulf %1700, %1699 : vector<8x128xf32>
    %1702 = arith.addf %1696, %1701 : vector<8x128xf32>
    %c47_1349 = arith.constant 47 : index
    %1703 = memref.load %arg1[%c47_1349] : memref<50xf32, #tpu.memory_space<smem>>
    %c2_1350 = arith.constant 2 : index
    %c10_1351 = arith.constant 10 : index
    %c1_1352 = arith.constant 1 : index
    %c0_1353 = arith.constant 0 : index
    %1704 = vector.load %arg6[%c2_1350, %c10_1351, %c1_1352, %c0_1353] : memref<4x16x10x128xf32, #tpu.memory_space<vmem>>, vector<1x1x8x128xf32>
    %1705 = vector.shape_cast %1704 : vector<1x1x8x128xf32> to vector<8x128xf32>
    %1706 = vector.broadcast %1703 : f32 to vector<8x128xf32>
    %1707 = arith.mulf %1706, %1705 : vector<8x128xf32>
    %1708 = arith.addf %1702, %1707 : vector<8x128xf32>
    %c48_1354 = arith.constant 48 : index
    %1709 = memref.load %arg1[%c48_1354] : memref<50xf32, #tpu.memory_space<smem>>
    %c3_1355 = arith.constant 3 : index
    %c10_1356 = arith.constant 10 : index
    %c1_1357 = arith.constant 1 : index
    %c0_1358 = arith.constant 0 : index
    %1710 = vector.load %arg6[%c3_1355, %c10_1356, %c1_1357, %c0_1358] : memref<4x16x10x128xf32, #tpu.memory_space<vmem>>, vector<1x1x8x128xf32>
    %1711 = vector.shape_cast %1710 : vector<1x1x8x128xf32> to vector<8x128xf32>
    %1712 = vector.broadcast %1709 : f32 to vector<8x128xf32>
    %1713 = arith.mulf %1712, %1711 : vector<8x128xf32>
    %1714 = arith.addf %1708, %1713 : vector<8x128xf32>
    %c49_1359 = arith.constant 49 : index
    %1715 = memref.load %arg1[%c49_1359] : memref<50xf32, #tpu.memory_space<smem>>
    %c2_1360 = arith.constant 2 : index
    %c10_1361 = arith.constant 10 : index
    %c2_1362 = arith.constant 2 : index
    %c0_1363 = arith.constant 0 : index
    %1716 = vector.load %arg6[%c2_1360, %c10_1361, %c2_1362, %c0_1363] : memref<4x16x10x128xf32, #tpu.memory_space<vmem>>, vector<1x1x8x128xf32>
    %1717 = vector.shape_cast %1716 : vector<1x1x8x128xf32> to vector<8x128xf32>
    %1718 = vector.broadcast %1715 : f32 to vector<8x128xf32>
    %1719 = arith.mulf %1718, %1717 : vector<8x128xf32>
    %1720 = arith.addf %1714, %1719 : vector<8x128xf32>
    %1721 = vector.broadcast %1690 : vector<1x128xf32> to vector<8x128xf32>
    %1722 = arith.addf %1720, %1721 : vector<8x128xf32>
    %1723 = arith.select %2, %1722, %1720 : vector<8x128xi1>, vector<8x128xf32>
    %cst_1364 = arith.constant 0.000000e+00 : f32
    %1724 = vector.broadcast %cst_1364 : f32 to vector<8x128xf32>
    %1725 = arith.maximumf %1723, %1724 : vector<8x128xf32>
    %c0_1365 = arith.constant 0 : index
    %c4_1366 = arith.constant 4 : index
    %c0_1367 = arith.constant 0 : index
    %c0_1368 = arith.constant 0 : index
    %1726 = vector.load %arg7[%c0_1365, %c4_1366, %c0_1367, %c0_1368] : memref<1x8x8x128xf32, #tpu.memory_space<vmem>>, vector<1x1x8x128xf32>
    %1727 = vector.shape_cast %1726 : vector<1x1x8x128xf32> to vector<8x128xf32>
    %1728 = vector.shape_cast %1725 : vector<8x128xf32> to vector<1x1x8x128xf32>
    tpu.vector_store %arg7[%c0_1365, %c4_1366, %c0_1367, %c0_1368], %1728 {strides = array<i32>} : memref<1x8x8x128xf32, #tpu.memory_space<vmem>>, vector<1x1x8x128xf32>,
    %c0_1369 = arith.constant 0 : index
    %1729 = memref.load %arg5[%c0_1369] : memref<4xf32, #tpu.memory_space<smem>>
    %c2_1370 = arith.constant 2 : index
    %1730 = memref.load %arg5[%c2_1370] : memref<4xf32, #tpu.memory_space<smem>>
    %c0_1371 = arith.constant 0 : index
    %1731 = memref.load %arg5[%c0_1371] : memref<4xf32, #tpu.memory_space<smem>>
    %1732 = arith.subf %1730, %1731 : f32
    %1733 = vector.broadcast %1729 : f32 to vector<8x128xf32>
    %1734 = vector.broadcast %1732 : f32 to vector<1x128xf32>
    %c0_1372 = arith.constant 0 : index
    %1735 = memref.load %arg3[%c0_1372] : memref<10xf32, #tpu.memory_space<smem>>
    %c0_1373 = arith.constant 0 : index
    %c8_1374 = arith.constant 8 : index
    %c1_1375 = arith.constant 1 : index
    %c0_1376 = arith.constant 0 : index
    %1736 = vector.load %arg6[%c0_1373, %c8_1374, %c1_1375, %c0_1376] : memref<4x16x10x128xf32, #tpu.memory_space<vmem>>, vector<1x1x1x128xf32>
    %1737 = vector.shape_cast %1736 : vector<1x1x1x128xf32> to vector<1x128xf32>
    %1738 = vector.broadcast %1735 : f32 to vector<1x128xf32>
    %1739 = arith.mulf %1738, %1737 : vector<1x128xf32>
    %1740 = arith.subf %1734, %1739 : vector<1x128xf32>
    %c0_1377 = arith.constant 0 : index
    %1741 = memref.load %arg1[%c0_1377] : memref<50xf32, #tpu.memory_space<smem>>
    %c0_1378 = arith.constant 0 : index
    %c8_1379 = arith.constant 8 : index
    %c0_1380 = arith.constant 0 : index
    %c0_1381 = arith.constant 0 : index
    %1742 = vector.load %arg6[%c0_1378, %c8_1379, %c0_1380, %c0_1381] : memref<4x16x10x128xf32, #tpu.memory_space<vmem>>, vector<1x1x8x128xf32>
    %1743 = vector.shape_cast %1742 : vector<1x1x8x128xf32> to vector<8x128xf32>
    %1744 = vector.broadcast %1741 : f32 to vector<8x128xf32>
    %1745 = arith.mulf %1744, %1743 : vector<8x128xf32>
    %1746 = arith.addf %1733, %1745 : vector<8x128xf32>
    %c1_1382 = arith.constant 1 : index
    %1747 = memref.load %arg1[%c1_1382] : memref<50xf32, #tpu.memory_space<smem>>
    %c1_1383 = arith.constant 1 : index
    %c8_1384 = arith.constant 8 : index
    %c0_1385 = arith.constant 0 : index
    %c0_1386 = arith.constant 0 : index
    %1748 = vector.load %arg6[%c1_1383, %c8_1384, %c0_1385, %c0_1386] : memref<4x16x10x128xf32, #tpu.memory_space<vmem>>, vector<1x1x8x128xf32>
    %1749 = vector.shape_cast %1748 : vector<1x1x8x128xf32> to vector<8x128xf32>
    %1750 = vector.broadcast %1747 : f32 to vector<8x128xf32>
    %1751 = arith.mulf %1750, %1749 : vector<8x128xf32>
    %1752 = arith.addf %1746, %1751 : vector<8x128xf32>
    %c2_1387 = arith.constant 2 : index
    %1753 = memref.load %arg1[%c2_1387] : memref<50xf32, #tpu.memory_space<smem>>
    %c0_1388 = arith.constant 0 : index
    %c8_1389 = arith.constant 8 : index
    %c1_1390 = arith.constant 1 : index
    %c0_1391 = arith.constant 0 : index
    %1754 = vector.load %arg6[%c0_1388, %c8_1389, %c1_1390, %c0_1391] : memref<4x16x10x128xf32, #tpu.memory_space<vmem>>, vector<1x1x8x128xf32>
    %1755 = vector.shape_cast %1754 : vector<1x1x8x128xf32> to vector<8x128xf32>
    %1756 = vector.broadcast %1753 : f32 to vector<8x128xf32>
    %1757 = arith.mulf %1756, %1755 : vector<8x128xf32>
    %1758 = arith.addf %1752, %1757 : vector<8x128xf32>
    %c3_1392 = arith.constant 3 : index
    %1759 = memref.load %arg1[%c3_1392] : memref<50xf32, #tpu.memory_space<smem>>
    %c1_1393 = arith.constant 1 : index
    %c8_1394 = arith.constant 8 : index
    %c1_1395 = arith.constant 1 : index
    %c0_1396 = arith.constant 0 : index
    %1760 = vector.load %arg6[%c1_1393, %c8_1394, %c1_1395, %c0_1396] : memref<4x16x10x128xf32, #tpu.memory_space<vmem>>, vector<1x1x8x128xf32>
    %1761 = vector.shape_cast %1760 : vector<1x1x8x128xf32> to vector<8x128xf32>
    %1762 = vector.broadcast %1759 : f32 to vector<8x128xf32>
    %1763 = arith.mulf %1762, %1761 : vector<8x128xf32>
    %1764 = arith.addf %1758, %1763 : vector<8x128xf32>
    %c4_1397 = arith.constant 4 : index
    %1765 = memref.load %arg1[%c4_1397] : memref<50xf32, #tpu.memory_space<smem>>
    %c0_1398 = arith.constant 0 : index
    %c8_1399 = arith.constant 8 : index
    %c2_1400 = arith.constant 2 : index
    %c0_1401 = arith.constant 0 : index
    %1766 = vector.load %arg6[%c0_1398, %c8_1399, %c2_1400, %c0_1401] : memref<4x16x10x128xf32, #tpu.memory_space<vmem>>, vector<1x1x8x128xf32>
    %1767 = vector.shape_cast %1766 : vector<1x1x8x128xf32> to vector<8x128xf32>
    %1768 = vector.broadcast %1765 : f32 to vector<8x128xf32>
    %1769 = arith.mulf %1768, %1767 : vector<8x128xf32>
    %1770 = arith.addf %1764, %1769 : vector<8x128xf32>
    %c1_1402 = arith.constant 1 : index
    %1771 = memref.load %arg3[%c1_1402] : memref<10xf32, #tpu.memory_space<smem>>
    %c0_1403 = arith.constant 0 : index
    %c9_1404 = arith.constant 9 : index
    %c1_1405 = arith.constant 1 : index
    %c0_1406 = arith.constant 0 : index
    %1772 = vector.load %arg6[%c0_1403, %c9_1404, %c1_1405, %c0_1406] : memref<4x16x10x128xf32, #tpu.memory_space<vmem>>, vector<1x1x1x128xf32>
    %1773 = vector.shape_cast %1772 : vector<1x1x1x128xf32> to vector<1x128xf32>
    %1774 = vector.broadcast %1771 : f32 to vector<1x128xf32>
    %1775 = arith.mulf %1774, %1773 : vector<1x128xf32>
    %1776 = arith.subf %1740, %1775 : vector<1x128xf32>
    %c5_1407 = arith.constant 5 : index
    %1777 = memref.load %arg1[%c5_1407] : memref<50xf32, #tpu.memory_space<smem>>
    %c0_1408 = arith.constant 0 : index
    %c9_1409 = arith.constant 9 : index
    %c0_1410 = arith.constant 0 : index
    %c0_1411 = arith.constant 0 : index
    %1778 = vector.load %arg6[%c0_1408, %c9_1409, %c0_1410, %c0_1411] : memref<4x16x10x128xf32, #tpu.memory_space<vmem>>, vector<1x1x8x128xf32>
    %1779 = vector.shape_cast %1778 : vector<1x1x8x128xf32> to vector<8x128xf32>
    %1780 = vector.broadcast %1777 : f32 to vector<8x128xf32>
    %1781 = arith.mulf %1780, %1779 : vector<8x128xf32>
    %1782 = arith.addf %1770, %1781 : vector<8x128xf32>
    %c6_1412 = arith.constant 6 : index
    %1783 = memref.load %arg1[%c6_1412] : memref<50xf32, #tpu.memory_space<smem>>
    %c1_1413 = arith.constant 1 : index
    %c9_1414 = arith.constant 9 : index
    %c0_1415 = arith.constant 0 : index
    %c0_1416 = arith.constant 0 : index
    %1784 = vector.load %arg6[%c1_1413, %c9_1414, %c0_1415, %c0_1416] : memref<4x16x10x128xf32, #tpu.memory_space<vmem>>, vector<1x1x8x128xf32>
    %1785 = vector.shape_cast %1784 : vector<1x1x8x128xf32> to vector<8x128xf32>
    %1786 = vector.broadcast %1783 : f32 to vector<8x128xf32>
    %1787 = arith.mulf %1786, %1785 : vector<8x128xf32>
    %1788 = arith.addf %1782, %1787 : vector<8x128xf32>
    %c7_1417 = arith.constant 7 : index
    %1789 = memref.load %arg1[%c7_1417] : memref<50xf32, #tpu.memory_space<smem>>
    %c0_1418 = arith.constant 0 : index
    %c9_1419 = arith.constant 9 : index
    %c1_1420 = arith.constant 1 : index
    %c0_1421 = arith.constant 0 : index
    %1790 = vector.load %arg6[%c0_1418, %c9_1419, %c1_1420, %c0_1421] : memref<4x16x10x128xf32, #tpu.memory_space<vmem>>, vector<1x1x8x128xf32>
    %1791 = vector.shape_cast %1790 : vector<1x1x8x128xf32> to vector<8x128xf32>
    %1792 = vector.broadcast %1789 : f32 to vector<8x128xf32>
    %1793 = arith.mulf %1792, %1791 : vector<8x128xf32>
    %1794 = arith.addf %1788, %1793 : vector<8x128xf32>
    %c8_1422 = arith.constant 8 : index
    %1795 = memref.load %arg1[%c8_1422] : memref<50xf32, #tpu.memory_space<smem>>
    %c1_1423 = arith.constant 1 : index
    %c9_1424 = arith.constant 9 : index
    %c1_1425 = arith.constant 1 : index
    %c0_1426 = arith.constant 0 : index
    %1796 = vector.load %arg6[%c1_1423, %c9_1424, %c1_1425, %c0_1426] : memref<4x16x10x128xf32, #tpu.memory_space<vmem>>, vector<1x1x8x128xf32>
    %1797 = vector.shape_cast %1796 : vector<1x1x8x128xf32> to vector<8x128xf32>
    %1798 = vector.broadcast %1795 : f32 to vector<8x128xf32>
    %1799 = arith.mulf %1798, %1797 : vector<8x128xf32>
    %1800 = arith.addf %1794, %1799 : vector<8x128xf32>
    %c9_1427 = arith.constant 9 : index
    %1801 = memref.load %arg1[%c9_1427] : memref<50xf32, #tpu.memory_space<smem>>
    %c0_1428 = arith.constant 0 : index
    %c9_1429 = arith.constant 9 : index
    %c2_1430 = arith.constant 2 : index
    %c0_1431 = arith.constant 0 : index
    %1802 = vector.load %arg6[%c0_1428, %c9_1429, %c2_1430, %c0_1431] : memref<4x16x10x128xf32, #tpu.memory_space<vmem>>, vector<1x1x8x128xf32>
    %1803 = vector.shape_cast %1802 : vector<1x1x8x128xf32> to vector<8x128xf32>
    %1804 = vector.broadcast %1801 : f32 to vector<8x128xf32>
    %1805 = arith.mulf %1804, %1803 : vector<8x128xf32>
    %1806 = arith.addf %1800, %1805 : vector<8x128xf32>
    %c2_1432 = arith.constant 2 : index
    %1807 = memref.load %arg3[%c2_1432] : memref<10xf32, #tpu.memory_space<smem>>
    %c0_1433 = arith.constant 0 : index
    %c10_1434 = arith.constant 10 : index
    %c1_1435 = arith.constant 1 : index
    %c0_1436 = arith.constant 0 : index
    %1808 = vector.load %arg6[%c0_1433, %c10_1434, %c1_1435, %c0_1436] : memref<4x16x10x128xf32, #tpu.memory_space<vmem>>, vector<1x1x1x128xf32>
    %1809 = vector.shape_cast %1808 : vector<1x1x1x128xf32> to vector<1x128xf32>
    %1810 = vector.broadcast %1807 : f32 to vector<1x128xf32>
    %1811 = arith.mulf %1810, %1809 : vector<1x128xf32>
    %1812 = arith.subf %1776, %1811 : vector<1x128xf32>
    %c10_1437 = arith.constant 10 : index
    %1813 = memref.load %arg1[%c10_1437] : memref<50xf32, #tpu.memory_space<smem>>
    %c0_1438 = arith.constant 0 : index
    %c10_1439 = arith.constant 10 : index
    %c0_1440 = arith.constant 0 : index
    %c0_1441 = arith.constant 0 : index
    %1814 = vector.load %arg6[%c0_1438, %c10_1439, %c0_1440, %c0_1441] : memref<4x16x10x128xf32, #tpu.memory_space<vmem>>, vector<1x1x8x128xf32>
    %1815 = vector.shape_cast %1814 : vector<1x1x8x128xf32> to vector<8x128xf32>
    %1816 = vector.broadcast %1813 : f32 to vector<8x128xf32>
    %1817 = arith.mulf %1816, %1815 : vector<8x128xf32>
    %1818 = arith.addf %1806, %1817 : vector<8x128xf32>
    %c11_1442 = arith.constant 11 : index
    %1819 = memref.load %arg1[%c11_1442] : memref<50xf32, #tpu.memory_space<smem>>
    %c1_1443 = arith.constant 1 : index
    %c10_1444 = arith.constant 10 : index
    %c0_1445 = arith.constant 0 : index
    %c0_1446 = arith.constant 0 : index
    %1820 = vector.load %arg6[%c1_1443, %c10_1444, %c0_1445, %c0_1446] : memref<4x16x10x128xf32, #tpu.memory_space<vmem>>, vector<1x1x8x128xf32>
    %1821 = vector.shape_cast %1820 : vector<1x1x8x128xf32> to vector<8x128xf32>
    %1822 = vector.broadcast %1819 : f32 to vector<8x128xf32>
    %1823 = arith.mulf %1822, %1821 : vector<8x128xf32>
    %1824 = arith.addf %1818, %1823 : vector<8x128xf32>
    %c12_1447 = arith.constant 12 : index
    %1825 = memref.load %arg1[%c12_1447] : memref<50xf32, #tpu.memory_space<smem>>
    %c0_1448 = arith.constant 0 : index
    %c10_1449 = arith.constant 10 : index
    %c1_1450 = arith.constant 1 : index
    %c0_1451 = arith.constant 0 : index
    %1826 = vector.load %arg6[%c0_1448, %c10_1449, %c1_1450, %c0_1451] : memref<4x16x10x128xf32, #tpu.memory_space<vmem>>, vector<1x1x8x128xf32>
    %1827 = vector.shape_cast %1826 : vector<1x1x8x128xf32> to vector<8x128xf32>
    %1828 = vector.broadcast %1825 : f32 to vector<8x128xf32>
    %1829 = arith.mulf %1828, %1827 : vector<8x128xf32>
    %1830 = arith.addf %1824, %1829 : vector<8x128xf32>
    %c13_1452 = arith.constant 13 : index
    %1831 = memref.load %arg1[%c13_1452] : memref<50xf32, #tpu.memory_space<smem>>
    %c1_1453 = arith.constant 1 : index
    %c10_1454 = arith.constant 10 : index
    %c1_1455 = arith.constant 1 : index
    %c0_1456 = arith.constant 0 : index
    %1832 = vector.load %arg6[%c1_1453, %c10_1454, %c1_1455, %c0_1456] : memref<4x16x10x128xf32, #tpu.memory_space<vmem>>, vector<1x1x8x128xf32>
    %1833 = vector.shape_cast %1832 : vector<1x1x8x128xf32> to vector<8x128xf32>
    %1834 = vector.broadcast %1831 : f32 to vector<8x128xf32>
    %1835 = arith.mulf %1834, %1833 : vector<8x128xf32>
    %1836 = arith.addf %1830, %1835 : vector<8x128xf32>
    %c14_1457 = arith.constant 14 : index
    %1837 = memref.load %arg1[%c14_1457] : memref<50xf32, #tpu.memory_space<smem>>
    %c0_1458 = arith.constant 0 : index
    %c10_1459 = arith.constant 10 : index
    %c2_1460 = arith.constant 2 : index
    %c0_1461 = arith.constant 0 : index
    %1838 = vector.load %arg6[%c0_1458, %c10_1459, %c2_1460, %c0_1461] : memref<4x16x10x128xf32, #tpu.memory_space<vmem>>, vector<1x1x8x128xf32>
    %1839 = vector.shape_cast %1838 : vector<1x1x8x128xf32> to vector<8x128xf32>
    %1840 = vector.broadcast %1837 : f32 to vector<8x128xf32>
    %1841 = arith.mulf %1840, %1839 : vector<8x128xf32>
    %1842 = arith.addf %1836, %1841 : vector<8x128xf32>
    %c3_1462 = arith.constant 3 : index
    %1843 = memref.load %arg3[%c3_1462] : memref<10xf32, #tpu.memory_space<smem>>
    %c0_1463 = arith.constant 0 : index
    %c11_1464 = arith.constant 11 : index
    %c1_1465 = arith.constant 1 : index
    %c0_1466 = arith.constant 0 : index
    %1844 = vector.load %arg6[%c0_1463, %c11_1464, %c1_1465, %c0_1466] : memref<4x16x10x128xf32, #tpu.memory_space<vmem>>, vector<1x1x1x128xf32>
    %1845 = vector.shape_cast %1844 : vector<1x1x1x128xf32> to vector<1x128xf32>
    %1846 = vector.broadcast %1843 : f32 to vector<1x128xf32>
    %1847 = arith.mulf %1846, %1845 : vector<1x128xf32>
    %1848 = arith.subf %1812, %1847 : vector<1x128xf32>
    %c15_1467 = arith.constant 15 : index
    %1849 = memref.load %arg1[%c15_1467] : memref<50xf32, #tpu.memory_space<smem>>
    %c0_1468 = arith.constant 0 : index
    %c11_1469 = arith.constant 11 : index
    %c0_1470 = arith.constant 0 : index
    %c0_1471 = arith.constant 0 : index
    %1850 = vector.load %arg6[%c0_1468, %c11_1469, %c0_1470, %c0_1471] : memref<4x16x10x128xf32, #tpu.memory_space<vmem>>, vector<1x1x8x128xf32>
    %1851 = vector.shape_cast %1850 : vector<1x1x8x128xf32> to vector<8x128xf32>
    %1852 = vector.broadcast %1849 : f32 to vector<8x128xf32>
    %1853 = arith.mulf %1852, %1851 : vector<8x128xf32>
    %1854 = arith.addf %1842, %1853 : vector<8x128xf32>
    %c16_1472 = arith.constant 16 : index
    %1855 = memref.load %arg1[%c16_1472] : memref<50xf32, #tpu.memory_space<smem>>
    %c1_1473 = arith.constant 1 : index
    %c11_1474 = arith.constant 11 : index
    %c0_1475 = arith.constant 0 : index
    %c0_1476 = arith.constant 0 : index
    %1856 = vector.load %arg6[%c1_1473, %c11_1474, %c0_1475, %c0_1476] : memref<4x16x10x128xf32, #tpu.memory_space<vmem>>, vector<1x1x8x128xf32>
    %1857 = vector.shape_cast %1856 : vector<1x1x8x128xf32> to vector<8x128xf32>
    %1858 = vector.broadcast %1855 : f32 to vector<8x128xf32>
    %1859 = arith.mulf %1858, %1857 : vector<8x128xf32>
    %1860 = arith.addf %1854, %1859 : vector<8x128xf32>
    %c17_1477 = arith.constant 17 : index
    %1861 = memref.load %arg1[%c17_1477] : memref<50xf32, #tpu.memory_space<smem>>
    %c0_1478 = arith.constant 0 : index
    %c11_1479 = arith.constant 11 : index
    %c1_1480 = arith.constant 1 : index
    %c0_1481 = arith.constant 0 : index
    %1862 = vector.load %arg6[%c0_1478, %c11_1479, %c1_1480, %c0_1481] : memref<4x16x10x128xf32, #tpu.memory_space<vmem>>, vector<1x1x8x128xf32>
    %1863 = vector.shape_cast %1862 : vector<1x1x8x128xf32> to vector<8x128xf32>
    %1864 = vector.broadcast %1861 : f32 to vector<8x128xf32>
    %1865 = arith.mulf %1864, %1863 : vector<8x128xf32>
    %1866 = arith.addf %1860, %1865 : vector<8x128xf32>
    %c18_1482 = arith.constant 18 : index
    %1867 = memref.load %arg1[%c18_1482] : memref<50xf32, #tpu.memory_space<smem>>
    %c1_1483 = arith.constant 1 : index
    %c11_1484 = arith.constant 11 : index
    %c1_1485 = arith.constant 1 : index
    %c0_1486 = arith.constant 0 : index
    %1868 = vector.load %arg6[%c1_1483, %c11_1484, %c1_1485, %c0_1486] : memref<4x16x10x128xf32, #tpu.memory_space<vmem>>, vector<1x1x8x128xf32>
    %1869 = vector.shape_cast %1868 : vector<1x1x8x128xf32> to vector<8x128xf32>
    %1870 = vector.broadcast %1867 : f32 to vector<8x128xf32>
    %1871 = arith.mulf %1870, %1869 : vector<8x128xf32>
    %1872 = arith.addf %1866, %1871 : vector<8x128xf32>
    %c19_1487 = arith.constant 19 : index
    %1873 = memref.load %arg1[%c19_1487] : memref<50xf32, #tpu.memory_space<smem>>
    %c0_1488 = arith.constant 0 : index
    %c11_1489 = arith.constant 11 : index
    %c2_1490 = arith.constant 2 : index
    %c0_1491 = arith.constant 0 : index
    %1874 = vector.load %arg6[%c0_1488, %c11_1489, %c2_1490, %c0_1491] : memref<4x16x10x128xf32, #tpu.memory_space<vmem>>, vector<1x1x8x128xf32>
    %1875 = vector.shape_cast %1874 : vector<1x1x8x128xf32> to vector<8x128xf32>
    %1876 = vector.broadcast %1873 : f32 to vector<8x128xf32>
    %1877 = arith.mulf %1876, %1875 : vector<8x128xf32>
    %1878 = arith.addf %1872, %1877 : vector<8x128xf32>
    %c4_1492 = arith.constant 4 : index
    %1879 = memref.load %arg3[%c4_1492] : memref<10xf32, #tpu.memory_space<smem>>
    %c0_1493 = arith.constant 0 : index
    %c12_1494 = arith.constant 12 : index
    %c1_1495 = arith.constant 1 : index
    %c0_1496 = arith.constant 0 : index
    %1880 = vector.load %arg6[%c0_1493, %c12_1494, %c1_1495, %c0_1496] : memref<4x16x10x128xf32, #tpu.memory_space<vmem>>, vector<1x1x1x128xf32>
    %1881 = vector.shape_cast %1880 : vector<1x1x1x128xf32> to vector<1x128xf32>
    %1882 = vector.broadcast %1879 : f32 to vector<1x128xf32>
    %1883 = arith.mulf %1882, %1881 : vector<1x128xf32>
    %1884 = arith.subf %1848, %1883 : vector<1x128xf32>
    %c20_1497 = arith.constant 20 : index
    %1885 = memref.load %arg1[%c20_1497] : memref<50xf32, #tpu.memory_space<smem>>
    %c0_1498 = arith.constant 0 : index
    %c12_1499 = arith.constant 12 : index
    %c0_1500 = arith.constant 0 : index
    %c0_1501 = arith.constant 0 : index
    %1886 = vector.load %arg6[%c0_1498, %c12_1499, %c0_1500, %c0_1501] : memref<4x16x10x128xf32, #tpu.memory_space<vmem>>, vector<1x1x8x128xf32>
    %1887 = vector.shape_cast %1886 : vector<1x1x8x128xf32> to vector<8x128xf32>
    %1888 = vector.broadcast %1885 : f32 to vector<8x128xf32>
    %1889 = arith.mulf %1888, %1887 : vector<8x128xf32>
    %1890 = arith.addf %1878, %1889 : vector<8x128xf32>
    %c21_1502 = arith.constant 21 : index
    %1891 = memref.load %arg1[%c21_1502] : memref<50xf32, #tpu.memory_space<smem>>
    %c1_1503 = arith.constant 1 : index
    %c12_1504 = arith.constant 12 : index
    %c0_1505 = arith.constant 0 : index
    %c0_1506 = arith.constant 0 : index
    %1892 = vector.load %arg6[%c1_1503, %c12_1504, %c0_1505, %c0_1506] : memref<4x16x10x128xf32, #tpu.memory_space<vmem>>, vector<1x1x8x128xf32>
    %1893 = vector.shape_cast %1892 : vector<1x1x8x128xf32> to vector<8x128xf32>
    %1894 = vector.broadcast %1891 : f32 to vector<8x128xf32>
    %1895 = arith.mulf %1894, %1893 : vector<8x128xf32>
    %1896 = arith.addf %1890, %1895 : vector<8x128xf32>
    %c22_1507 = arith.constant 22 : index
    %1897 = memref.load %arg1[%c22_1507] : memref<50xf32, #tpu.memory_space<smem>>
    %c0_1508 = arith.constant 0 : index
    %c12_1509 = arith.constant 12 : index
    %c1_1510 = arith.constant 1 : index
    %c0_1511 = arith.constant 0 : index
    %1898 = vector.load %arg6[%c0_1508, %c12_1509, %c1_1510, %c0_1511] : memref<4x16x10x128xf32, #tpu.memory_space<vmem>>, vector<1x1x8x128xf32>
    %1899 = vector.shape_cast %1898 : vector<1x1x8x128xf32> to vector<8x128xf32>
    %1900 = vector.broadcast %1897 : f32 to vector<8x128xf32>
    %1901 = arith.mulf %1900, %1899 : vector<8x128xf32>
    %1902 = arith.addf %1896, %1901 : vector<8x128xf32>
    %c23_1512 = arith.constant 23 : index
    %1903 = memref.load %arg1[%c23_1512] : memref<50xf32, #tpu.memory_space<smem>>
    %c1_1513 = arith.constant 1 : index
    %c12_1514 = arith.constant 12 : index
    %c1_1515 = arith.constant 1 : index
    %c0_1516 = arith.constant 0 : index
    %1904 = vector.load %arg6[%c1_1513, %c12_1514, %c1_1515, %c0_1516] : memref<4x16x10x128xf32, #tpu.memory_space<vmem>>, vector<1x1x8x128xf32>
    %1905 = vector.shape_cast %1904 : vector<1x1x8x128xf32> to vector<8x128xf32>
    %1906 = vector.broadcast %1903 : f32 to vector<8x128xf32>
    %1907 = arith.mulf %1906, %1905 : vector<8x128xf32>
    %1908 = arith.addf %1902, %1907 : vector<8x128xf32>
    %c24_1517 = arith.constant 24 : index
    %1909 = memref.load %arg1[%c24_1517] : memref<50xf32, #tpu.memory_space<smem>>
    %c0_1518 = arith.constant 0 : index
    %c12_1519 = arith.constant 12 : index
    %c2_1520 = arith.constant 2 : index
    %c0_1521 = arith.constant 0 : index
    %1910 = vector.load %arg6[%c0_1518, %c12_1519, %c2_1520, %c0_1521] : memref<4x16x10x128xf32, #tpu.memory_space<vmem>>, vector<1x1x8x128xf32>
    %1911 = vector.shape_cast %1910 : vector<1x1x8x128xf32> to vector<8x128xf32>
    %1912 = vector.broadcast %1909 : f32 to vector<8x128xf32>
    %1913 = arith.mulf %1912, %1911 : vector<8x128xf32>
    %1914 = arith.addf %1908, %1913 : vector<8x128xf32>
    %c5_1522 = arith.constant 5 : index
    %1915 = memref.load %arg3[%c5_1522] : memref<10xf32, #tpu.memory_space<smem>>
    %c2_1523 = arith.constant 2 : index
    %c8_1524 = arith.constant 8 : index
    %c1_1525 = arith.constant 1 : index
    %c0_1526 = arith.constant 0 : index
    %1916 = vector.load %arg6[%c2_1523, %c8_1524, %c1_1525, %c0_1526] : memref<4x16x10x128xf32, #tpu.memory_space<vmem>>, vector<1x1x1x128xf32>
    %1917 = vector.shape_cast %1916 : vector<1x1x1x128xf32> to vector<1x128xf32>
    %1918 = vector.broadcast %1915 : f32 to vector<1x128xf32>
    %1919 = arith.mulf %1918, %1917 : vector<1x128xf32>
    %1920 = arith.subf %1884, %1919 : vector<1x128xf32>
    %c25_1527 = arith.constant 25 : index
    %1921 = memref.load %arg1[%c25_1527] : memref<50xf32, #tpu.memory_space<smem>>
    %c2_1528 = arith.constant 2 : index
    %c8_1529 = arith.constant 8 : index
    %c0_1530 = arith.constant 0 : index
    %c0_1531 = arith.constant 0 : index
    %1922 = vector.load %arg6[%c2_1528, %c8_1529, %c0_1530, %c0_1531] : memref<4x16x10x128xf32, #tpu.memory_space<vmem>>, vector<1x1x8x128xf32>
    %1923 = vector.shape_cast %1922 : vector<1x1x8x128xf32> to vector<8x128xf32>
    %1924 = vector.broadcast %1921 : f32 to vector<8x128xf32>
    %1925 = arith.mulf %1924, %1923 : vector<8x128xf32>
    %1926 = arith.addf %1914, %1925 : vector<8x128xf32>
    %c26_1532 = arith.constant 26 : index
    %1927 = memref.load %arg1[%c26_1532] : memref<50xf32, #tpu.memory_space<smem>>
    %c3_1533 = arith.constant 3 : index
    %c8_1534 = arith.constant 8 : index
    %c0_1535 = arith.constant 0 : index
    %c0_1536 = arith.constant 0 : index
    %1928 = vector.load %arg6[%c3_1533, %c8_1534, %c0_1535, %c0_1536] : memref<4x16x10x128xf32, #tpu.memory_space<vmem>>, vector<1x1x8x128xf32>
    %1929 = vector.shape_cast %1928 : vector<1x1x8x128xf32> to vector<8x128xf32>
    %1930 = vector.broadcast %1927 : f32 to vector<8x128xf32>
    %1931 = arith.mulf %1930, %1929 : vector<8x128xf32>
    %1932 = arith.addf %1926, %1931 : vector<8x128xf32>
    %c27_1537 = arith.constant 27 : index
    %1933 = memref.load %arg1[%c27_1537] : memref<50xf32, #tpu.memory_space<smem>>
    %c2_1538 = arith.constant 2 : index
    %c8_1539 = arith.constant 8 : index
    %c1_1540 = arith.constant 1 : index
    %c0_1541 = arith.constant 0 : index
    %1934 = vector.load %arg6[%c2_1538, %c8_1539, %c1_1540, %c0_1541] : memref<4x16x10x128xf32, #tpu.memory_space<vmem>>, vector<1x1x8x128xf32>
    %1935 = vector.shape_cast %1934 : vector<1x1x8x128xf32> to vector<8x128xf32>
    %1936 = vector.broadcast %1933 : f32 to vector<8x128xf32>
    %1937 = arith.mulf %1936, %1935 : vector<8x128xf32>
    %1938 = arith.addf %1932, %1937 : vector<8x128xf32>
    %c28_1542 = arith.constant 28 : index
    %1939 = memref.load %arg1[%c28_1542] : memref<50xf32, #tpu.memory_space<smem>>
    %c3_1543 = arith.constant 3 : index
    %c8_1544 = arith.constant 8 : index
    %c1_1545 = arith.constant 1 : index
    %c0_1546 = arith.constant 0 : index
    %1940 = vector.load %arg6[%c3_1543, %c8_1544, %c1_1545, %c0_1546] : memref<4x16x10x128xf32, #tpu.memory_space<vmem>>, vector<1x1x8x128xf32>
    %1941 = vector.shape_cast %1940 : vector<1x1x8x128xf32> to vector<8x128xf32>
    %1942 = vector.broadcast %1939 : f32 to vector<8x128xf32>
    %1943 = arith.mulf %1942, %1941 : vector<8x128xf32>
    %1944 = arith.addf %1938, %1943 : vector<8x128xf32>
    %c29_1547 = arith.constant 29 : index
    %1945 = memref.load %arg1[%c29_1547] : memref<50xf32, #tpu.memory_space<smem>>
    %c2_1548 = arith.constant 2 : index
    %c8_1549 = arith.constant 8 : index
    %c2_1550 = arith.constant 2 : index
    %c0_1551 = arith.constant 0 : index
    %1946 = vector.load %arg6[%c2_1548, %c8_1549, %c2_1550, %c0_1551] : memref<4x16x10x128xf32, #tpu.memory_space<vmem>>, vector<1x1x8x128xf32>
    %1947 = vector.shape_cast %1946 : vector<1x1x8x128xf32> to vector<8x128xf32>
    %1948 = vector.broadcast %1945 : f32 to vector<8x128xf32>
    %1949 = arith.mulf %1948, %1947 : vector<8x128xf32>
    %1950 = arith.addf %1944, %1949 : vector<8x128xf32>
    %c6_1552 = arith.constant 6 : index
    %1951 = memref.load %arg3[%c6_1552] : memref<10xf32, #tpu.memory_space<smem>>
    %c2_1553 = arith.constant 2 : index
    %c9_1554 = arith.constant 9 : index
    %c1_1555 = arith.constant 1 : index
    %c0_1556 = arith.constant 0 : index
    %1952 = vector.load %arg6[%c2_1553, %c9_1554, %c1_1555, %c0_1556] : memref<4x16x10x128xf32, #tpu.memory_space<vmem>>, vector<1x1x1x128xf32>
    %1953 = vector.shape_cast %1952 : vector<1x1x1x128xf32> to vector<1x128xf32>
    %1954 = vector.broadcast %1951 : f32 to vector<1x128xf32>
    %1955 = arith.mulf %1954, %1953 : vector<1x128xf32>
    %1956 = arith.subf %1920, %1955 : vector<1x128xf32>
    %c30_1557 = arith.constant 30 : index
    %1957 = memref.load %arg1[%c30_1557] : memref<50xf32, #tpu.memory_space<smem>>
    %c2_1558 = arith.constant 2 : index
    %c9_1559 = arith.constant 9 : index
    %c0_1560 = arith.constant 0 : index
    %c0_1561 = arith.constant 0 : index
    %1958 = vector.load %arg6[%c2_1558, %c9_1559, %c0_1560, %c0_1561] : memref<4x16x10x128xf32, #tpu.memory_space<vmem>>, vector<1x1x8x128xf32>
    %1959 = vector.shape_cast %1958 : vector<1x1x8x128xf32> to vector<8x128xf32>
    %1960 = vector.broadcast %1957 : f32 to vector<8x128xf32>
    %1961 = arith.mulf %1960, %1959 : vector<8x128xf32>
    %1962 = arith.addf %1950, %1961 : vector<8x128xf32>
    %c31_1562 = arith.constant 31 : index
    %1963 = memref.load %arg1[%c31_1562] : memref<50xf32, #tpu.memory_space<smem>>
    %c3_1563 = arith.constant 3 : index
    %c9_1564 = arith.constant 9 : index
    %c0_1565 = arith.constant 0 : index
    %c0_1566 = arith.constant 0 : index
    %1964 = vector.load %arg6[%c3_1563, %c9_1564, %c0_1565, %c0_1566] : memref<4x16x10x128xf32, #tpu.memory_space<vmem>>, vector<1x1x8x128xf32>
    %1965 = vector.shape_cast %1964 : vector<1x1x8x128xf32> to vector<8x128xf32>
    %1966 = vector.broadcast %1963 : f32 to vector<8x128xf32>
    %1967 = arith.mulf %1966, %1965 : vector<8x128xf32>
    %1968 = arith.addf %1962, %1967 : vector<8x128xf32>
    %c32_1567 = arith.constant 32 : index
    %1969 = memref.load %arg1[%c32_1567] : memref<50xf32, #tpu.memory_space<smem>>
    %c2_1568 = arith.constant 2 : index
    %c9_1569 = arith.constant 9 : index
    %c1_1570 = arith.constant 1 : index
    %c0_1571 = arith.constant 0 : index
    %1970 = vector.load %arg6[%c2_1568, %c9_1569, %c1_1570, %c0_1571] : memref<4x16x10x128xf32, #tpu.memory_space<vmem>>, vector<1x1x8x128xf32>
    %1971 = vector.shape_cast %1970 : vector<1x1x8x128xf32> to vector<8x128xf32>
    %1972 = vector.broadcast %1969 : f32 to vector<8x128xf32>
    %1973 = arith.mulf %1972, %1971 : vector<8x128xf32>
    %1974 = arith.addf %1968, %1973 : vector<8x128xf32>
    %c33_1572 = arith.constant 33 : index
    %1975 = memref.load %arg1[%c33_1572] : memref<50xf32, #tpu.memory_space<smem>>
    %c3_1573 = arith.constant 3 : index
    %c9_1574 = arith.constant 9 : index
    %c1_1575 = arith.constant 1 : index
    %c0_1576 = arith.constant 0 : index
    %1976 = vector.load %arg6[%c3_1573, %c9_1574, %c1_1575, %c0_1576] : memref<4x16x10x128xf32, #tpu.memory_space<vmem>>, vector<1x1x8x128xf32>
    %1977 = vector.shape_cast %1976 : vector<1x1x8x128xf32> to vector<8x128xf32>
    %1978 = vector.broadcast %1975 : f32 to vector<8x128xf32>
    %1979 = arith.mulf %1978, %1977 : vector<8x128xf32>
    %1980 = arith.addf %1974, %1979 : vector<8x128xf32>
    %c34_1577 = arith.constant 34 : index
    %1981 = memref.load %arg1[%c34_1577] : memref<50xf32, #tpu.memory_space<smem>>
    %c2_1578 = arith.constant 2 : index
    %c9_1579 = arith.constant 9 : index
    %c2_1580 = arith.constant 2 : index
    %c0_1581 = arith.constant 0 : index
    %1982 = vector.load %arg6[%c2_1578, %c9_1579, %c2_1580, %c0_1581] : memref<4x16x10x128xf32, #tpu.memory_space<vmem>>, vector<1x1x8x128xf32>
    %1983 = vector.shape_cast %1982 : vector<1x1x8x128xf32> to vector<8x128xf32>
    %1984 = vector.broadcast %1981 : f32 to vector<8x128xf32>
    %1985 = arith.mulf %1984, %1983 : vector<8x128xf32>
    %1986 = arith.addf %1980, %1985 : vector<8x128xf32>
    %c7_1582 = arith.constant 7 : index
    %1987 = memref.load %arg3[%c7_1582] : memref<10xf32, #tpu.memory_space<smem>>
    %c2_1583 = arith.constant 2 : index
    %c10_1584 = arith.constant 10 : index
    %c1_1585 = arith.constant 1 : index
    %c0_1586 = arith.constant 0 : index
    %1988 = vector.load %arg6[%c2_1583, %c10_1584, %c1_1585, %c0_1586] : memref<4x16x10x128xf32, #tpu.memory_space<vmem>>, vector<1x1x1x128xf32>
    %1989 = vector.shape_cast %1988 : vector<1x1x1x128xf32> to vector<1x128xf32>
    %1990 = vector.broadcast %1987 : f32 to vector<1x128xf32>
    %1991 = arith.mulf %1990, %1989 : vector<1x128xf32>
    %1992 = arith.subf %1956, %1991 : vector<1x128xf32>
    %c35_1587 = arith.constant 35 : index
    %1993 = memref.load %arg1[%c35_1587] : memref<50xf32, #tpu.memory_space<smem>>
    %c2_1588 = arith.constant 2 : index
    %c10_1589 = arith.constant 10 : index
    %c0_1590 = arith.constant 0 : index
    %c0_1591 = arith.constant 0 : index
    %1994 = vector.load %arg6[%c2_1588, %c10_1589, %c0_1590, %c0_1591] : memref<4x16x10x128xf32, #tpu.memory_space<vmem>>, vector<1x1x8x128xf32>
    %1995 = vector.shape_cast %1994 : vector<1x1x8x128xf32> to vector<8x128xf32>
    %1996 = vector.broadcast %1993 : f32 to vector<8x128xf32>
    %1997 = arith.mulf %1996, %1995 : vector<8x128xf32>
    %1998 = arith.addf %1986, %1997 : vector<8x128xf32>
    %c36_1592 = arith.constant 36 : index
    %1999 = memref.load %arg1[%c36_1592] : memref<50xf32, #tpu.memory_space<smem>>
    %c3_1593 = arith.constant 3 : index
    %c10_1594 = arith.constant 10 : index
    %c0_1595 = arith.constant 0 : index
    %c0_1596 = arith.constant 0 : index
    %2000 = vector.load %arg6[%c3_1593, %c10_1594, %c0_1595, %c0_1596] : memref<4x16x10x128xf32, #tpu.memory_space<vmem>>, vector<1x1x8x128xf32>
    %2001 = vector.shape_cast %2000 : vector<1x1x8x128xf32> to vector<8x128xf32>
    %2002 = vector.broadcast %1999 : f32 to vector<8x128xf32>
    %2003 = arith.mulf %2002, %2001 : vector<8x128xf32>
    %2004 = arith.addf %1998, %2003 : vector<8x128xf32>
    %c37_1597 = arith.constant 37 : index
    %2005 = memref.load %arg1[%c37_1597] : memref<50xf32, #tpu.memory_space<smem>>
    %c2_1598 = arith.constant 2 : index
    %c10_1599 = arith.constant 10 : index
    %c1_1600 = arith.constant 1 : index
    %c0_1601 = arith.constant 0 : index
    %2006 = vector.load %arg6[%c2_1598, %c10_1599, %c1_1600, %c0_1601] : memref<4x16x10x128xf32, #tpu.memory_space<vmem>>, vector<1x1x8x128xf32>
    %2007 = vector.shape_cast %2006 : vector<1x1x8x128xf32> to vector<8x128xf32>
    %2008 = vector.broadcast %2005 : f32 to vector<8x128xf32>
    %2009 = arith.mulf %2008, %2007 : vector<8x128xf32>
    %2010 = arith.addf %2004, %2009 : vector<8x128xf32>
    %c38_1602 = arith.constant 38 : index
    %2011 = memref.load %arg1[%c38_1602] : memref<50xf32, #tpu.memory_space<smem>>
    %c3_1603 = arith.constant 3 : index
    %c10_1604 = arith.constant 10 : index
    %c1_1605 = arith.constant 1 : index
    %c0_1606 = arith.constant 0 : index
    %2012 = vector.load %arg6[%c3_1603, %c10_1604, %c1_1605, %c0_1606] : memref<4x16x10x128xf32, #tpu.memory_space<vmem>>, vector<1x1x8x128xf32>
    %2013 = vector.shape_cast %2012 : vector<1x1x8x128xf32> to vector<8x128xf32>
    %2014 = vector.broadcast %2011 : f32 to vector<8x128xf32>
    %2015 = arith.mulf %2014, %2013 : vector<8x128xf32>
    %2016 = arith.addf %2010, %2015 : vector<8x128xf32>
    %c39_1607 = arith.constant 39 : index
    %2017 = memref.load %arg1[%c39_1607] : memref<50xf32, #tpu.memory_space<smem>>
    %c2_1608 = arith.constant 2 : index
    %c10_1609 = arith.constant 10 : index
    %c2_1610 = arith.constant 2 : index
    %c0_1611 = arith.constant 0 : index
    %2018 = vector.load %arg6[%c2_1608, %c10_1609, %c2_1610, %c0_1611] : memref<4x16x10x128xf32, #tpu.memory_space<vmem>>, vector<1x1x8x128xf32>
    %2019 = vector.shape_cast %2018 : vector<1x1x8x128xf32> to vector<8x128xf32>
    %2020 = vector.broadcast %2017 : f32 to vector<8x128xf32>
    %2021 = arith.mulf %2020, %2019 : vector<8x128xf32>
    %2022 = arith.addf %2016, %2021 : vector<8x128xf32>
    %c8_1612 = arith.constant 8 : index
    %2023 = memref.load %arg3[%c8_1612] : memref<10xf32, #tpu.memory_space<smem>>
    %c2_1613 = arith.constant 2 : index
    %c11_1614 = arith.constant 11 : index
    %c1_1615 = arith.constant 1 : index
    %c0_1616 = arith.constant 0 : index
    %2024 = vector.load %arg6[%c2_1613, %c11_1614, %c1_1615, %c0_1616] : memref<4x16x10x128xf32, #tpu.memory_space<vmem>>, vector<1x1x1x128xf32>
    %2025 = vector.shape_cast %2024 : vector<1x1x1x128xf32> to vector<1x128xf32>
    %2026 = vector.broadcast %2023 : f32 to vector<1x128xf32>
    %2027 = arith.mulf %2026, %2025 : vector<1x128xf32>
    %2028 = arith.subf %1992, %2027 : vector<1x128xf32>
    %c40_1617 = arith.constant 40 : index
    %2029 = memref.load %arg1[%c40_1617] : memref<50xf32, #tpu.memory_space<smem>>
    %c2_1618 = arith.constant 2 : index
    %c11_1619 = arith.constant 11 : index
    %c0_1620 = arith.constant 0 : index
    %c0_1621 = arith.constant 0 : index
    %2030 = vector.load %arg6[%c2_1618, %c11_1619, %c0_1620, %c0_1621] : memref<4x16x10x128xf32, #tpu.memory_space<vmem>>, vector<1x1x8x128xf32>
    %2031 = vector.shape_cast %2030 : vector<1x1x8x128xf32> to vector<8x128xf32>
    %2032 = vector.broadcast %2029 : f32 to vector<8x128xf32>
    %2033 = arith.mulf %2032, %2031 : vector<8x128xf32>
    %2034 = arith.addf %2022, %2033 : vector<8x128xf32>
    %c41_1622 = arith.constant 41 : index
    %2035 = memref.load %arg1[%c41_1622] : memref<50xf32, #tpu.memory_space<smem>>
    %c3_1623 = arith.constant 3 : index
    %c11_1624 = arith.constant 11 : index
    %c0_1625 = arith.constant 0 : index
    %c0_1626 = arith.constant 0 : index
    %2036 = vector.load %arg6[%c3_1623, %c11_1624, %c0_1625, %c0_1626] : memref<4x16x10x128xf32, #tpu.memory_space<vmem>>, vector<1x1x8x128xf32>
    %2037 = vector.shape_cast %2036 : vector<1x1x8x128xf32> to vector<8x128xf32>
    %2038 = vector.broadcast %2035 : f32 to vector<8x128xf32>
    %2039 = arith.mulf %2038, %2037 : vector<8x128xf32>
    %2040 = arith.addf %2034, %2039 : vector<8x128xf32>
    %c42_1627 = arith.constant 42 : index
    %2041 = memref.load %arg1[%c42_1627] : memref<50xf32, #tpu.memory_space<smem>>
    %c2_1628 = arith.constant 2 : index
    %c11_1629 = arith.constant 11 : index
    %c1_1630 = arith.constant 1 : index
    %c0_1631 = arith.constant 0 : index
    %2042 = vector.load %arg6[%c2_1628, %c11_1629, %c1_1630, %c0_1631] : memref<4x16x10x128xf32, #tpu.memory_space<vmem>>, vector<1x1x8x128xf32>
    %2043 = vector.shape_cast %2042 : vector<1x1x8x128xf32> to vector<8x128xf32>
    %2044 = vector.broadcast %2041 : f32 to vector<8x128xf32>
    %2045 = arith.mulf %2044, %2043 : vector<8x128xf32>
    %2046 = arith.addf %2040, %2045 : vector<8x128xf32>
    %c43_1632 = arith.constant 43 : index
    %2047 = memref.load %arg1[%c43_1632] : memref<50xf32, #tpu.memory_space<smem>>
    %c3_1633 = arith.constant 3 : index
    %c11_1634 = arith.constant 11 : index
    %c1_1635 = arith.constant 1 : index
    %c0_1636 = arith.constant 0 : index
    %2048 = vector.load %arg6[%c3_1633, %c11_1634, %c1_1635, %c0_1636] : memref<4x16x10x128xf32, #tpu.memory_space<vmem>>, vector<1x1x8x128xf32>
    %2049 = vector.shape_cast %2048 : vector<1x1x8x128xf32> to vector<8x128xf32>
    %2050 = vector.broadcast %2047 : f32 to vector<8x128xf32>
    %2051 = arith.mulf %2050, %2049 : vector<8x128xf32>
    %2052 = arith.addf %2046, %2051 : vector<8x128xf32>
    %c44_1637 = arith.constant 44 : index
    %2053 = memref.load %arg1[%c44_1637] : memref<50xf32, #tpu.memory_space<smem>>
    %c2_1638 = arith.constant 2 : index
    %c11_1639 = arith.constant 11 : index
    %c2_1640 = arith.constant 2 : index
    %c0_1641 = arith.constant 0 : index
    %2054 = vector.load %arg6[%c2_1638, %c11_1639, %c2_1640, %c0_1641] : memref<4x16x10x128xf32, #tpu.memory_space<vmem>>, vector<1x1x8x128xf32>
    %2055 = vector.shape_cast %2054 : vector<1x1x8x128xf32> to vector<8x128xf32>
    %2056 = vector.broadcast %2053 : f32 to vector<8x128xf32>
    %2057 = arith.mulf %2056, %2055 : vector<8x128xf32>
    %2058 = arith.addf %2052, %2057 : vector<8x128xf32>
    %c9_1642 = arith.constant 9 : index
    %2059 = memref.load %arg3[%c9_1642] : memref<10xf32, #tpu.memory_space<smem>>
    %c2_1643 = arith.constant 2 : index
    %c12_1644 = arith.constant 12 : index
    %c1_1645 = arith.constant 1 : index
    %c0_1646 = arith.constant 0 : index
    %2060 = vector.load %arg6[%c2_1643, %c12_1644, %c1_1645, %c0_1646] : memref<4x16x10x128xf32, #tpu.memory_space<vmem>>, vector<1x1x1x128xf32>
    %2061 = vector.shape_cast %2060 : vector<1x1x1x128xf32> to vector<1x128xf32>
    %2062 = vector.broadcast %2059 : f32 to vector<1x128xf32>
    %2063 = arith.mulf %2062, %2061 : vector<1x128xf32>
    %2064 = arith.subf %2028, %2063 : vector<1x128xf32>
    %c45_1647 = arith.constant 45 : index
    %2065 = memref.load %arg1[%c45_1647] : memref<50xf32, #tpu.memory_space<smem>>
    %c2_1648 = arith.constant 2 : index
    %c12_1649 = arith.constant 12 : index
    %c0_1650 = arith.constant 0 : index
    %c0_1651 = arith.constant 0 : index
    %2066 = vector.load %arg6[%c2_1648, %c12_1649, %c0_1650, %c0_1651] : memref<4x16x10x128xf32, #tpu.memory_space<vmem>>, vector<1x1x8x128xf32>
    %2067 = vector.shape_cast %2066 : vector<1x1x8x128xf32> to vector<8x128xf32>
    %2068 = vector.broadcast %2065 : f32 to vector<8x128xf32>
    %2069 = arith.mulf %2068, %2067 : vector<8x128xf32>
    %2070 = arith.addf %2058, %2069 : vector<8x128xf32>
    %c46_1652 = arith.constant 46 : index
    %2071 = memref.load %arg1[%c46_1652] : memref<50xf32, #tpu.memory_space<smem>>
    %c3_1653 = arith.constant 3 : index
    %c12_1654 = arith.constant 12 : index
    %c0_1655 = arith.constant 0 : index
    %c0_1656 = arith.constant 0 : index
    %2072 = vector.load %arg6[%c3_1653, %c12_1654, %c0_1655, %c0_1656] : memref<4x16x10x128xf32, #tpu.memory_space<vmem>>, vector<1x1x8x128xf32>
    %2073 = vector.shape_cast %2072 : vector<1x1x8x128xf32> to vector<8x128xf32>
    %2074 = vector.broadcast %2071 : f32 to vector<8x128xf32>
    %2075 = arith.mulf %2074, %2073 : vector<8x128xf32>
    %2076 = arith.addf %2070, %2075 : vector<8x128xf32>
    %c47_1657 = arith.constant 47 : index
    %2077 = memref.load %arg1[%c47_1657] : memref<50xf32, #tpu.memory_space<smem>>
    %c2_1658 = arith.constant 2 : index
    %c12_1659 = arith.constant 12 : index
    %c1_1660 = arith.constant 1 : index
    %c0_1661 = arith.constant 0 : index
    %2078 = vector.load %arg6[%c2_1658, %c12_1659, %c1_1660, %c0_1661] : memref<4x16x10x128xf32, #tpu.memory_space<vmem>>, vector<1x1x8x128xf32>
    %2079 = vector.shape_cast %2078 : vector<1x1x8x128xf32> to vector<8x128xf32>
    %2080 = vector.broadcast %2077 : f32 to vector<8x128xf32>
    %2081 = arith.mulf %2080, %2079 : vector<8x128xf32>
    %2082 = arith.addf %2076, %2081 : vector<8x128xf32>
    %c48_1662 = arith.constant 48 : index
    %2083 = memref.load %arg1[%c48_1662] : memref<50xf32, #tpu.memory_space<smem>>
    %c3_1663 = arith.constant 3 : index
    %c12_1664 = arith.constant 12 : index
    %c1_1665 = arith.constant 1 : index
    %c0_1666 = arith.constant 0 : index
    %2084 = vector.load %arg6[%c3_1663, %c12_1664, %c1_1665, %c0_1666] : memref<4x16x10x128xf32, #tpu.memory_space<vmem>>, vector<1x1x8x128xf32>
    %2085 = vector.shape_cast %2084 : vector<1x1x8x128xf32> to vector<8x128xf32>
    %2086 = vector.broadcast %2083 : f32 to vector<8x128xf32>
    %2087 = arith.mulf %2086, %2085 : vector<8x128xf32>
    %2088 = arith.addf %2082, %2087 : vector<8x128xf32>
    %c49_1667 = arith.constant 49 : index
    %2089 = memref.load %arg1[%c49_1667] : memref<50xf32, #tpu.memory_space<smem>>
    %c2_1668 = arith.constant 2 : index
    %c12_1669 = arith.constant 12 : index
    %c2_1670 = arith.constant 2 : index
    %c0_1671 = arith.constant 0 : index
    %2090 = vector.load %arg6[%c2_1668, %c12_1669, %c2_1670, %c0_1671] : memref<4x16x10x128xf32, #tpu.memory_space<vmem>>, vector<1x1x8x128xf32>
    %2091 = vector.shape_cast %2090 : vector<1x1x8x128xf32> to vector<8x128xf32>
    %2092 = vector.broadcast %2089 : f32 to vector<8x128xf32>
    %2093 = arith.mulf %2092, %2091 : vector<8x128xf32>
    %2094 = arith.addf %2088, %2093 : vector<8x128xf32>
    %2095 = vector.broadcast %2064 : vector<1x128xf32> to vector<8x128xf32>
    %2096 = arith.addf %2094, %2095 : vector<8x128xf32>
    %2097 = arith.select %2, %2096, %2094 : vector<8x128xi1>, vector<8x128xf32>
    %cst_1672 = arith.constant 0.000000e+00 : f32
    %2098 = vector.broadcast %cst_1672 : f32 to vector<8x128xf32>
    %2099 = arith.maximumf %2097, %2098 : vector<8x128xf32>
    %c0_1673 = arith.constant 0 : index
    %c5_1674 = arith.constant 5 : index
    %c0_1675 = arith.constant 0 : index
    %c0_1676 = arith.constant 0 : index
    %2100 = vector.load %arg7[%c0_1673, %c5_1674, %c0_1675, %c0_1676] : memref<1x8x8x128xf32, #tpu.memory_space<vmem>>, vector<1x1x8x128xf32>
    %2101 = vector.shape_cast %2100 : vector<1x1x8x128xf32> to vector<8x128xf32>
    %2102 = vector.shape_cast %2099 : vector<8x128xf32> to vector<1x1x8x128xf32>
    tpu.vector_store %arg7[%c0_1673, %c5_1674, %c0_1675, %c0_1676], %2102 {strides = array<i32>} : memref<1x8x8x128xf32, #tpu.memory_space<vmem>>, vector<1x1x8x128xf32>,
    %c0_1677 = arith.constant 0 : index
    %2103 = memref.load %arg5[%c0_1677] : memref<4xf32, #tpu.memory_space<smem>>
    %c2_1678 = arith.constant 2 : index
    %2104 = memref.load %arg5[%c2_1678] : memref<4xf32, #tpu.memory_space<smem>>
    %c0_1679 = arith.constant 0 : index
    %2105 = memref.load %arg5[%c0_1679] : memref<4xf32, #tpu.memory_space<smem>>
    %2106 = arith.subf %2104, %2105 : f32
    %2107 = vector.broadcast %2103 : f32 to vector<8x128xf32>
    %2108 = vector.broadcast %2106 : f32 to vector<1x128xf32>
    %c0_1680 = arith.constant 0 : index
    %2109 = memref.load %arg3[%c0_1680] : memref<10xf32, #tpu.memory_space<smem>>
    %c0_1681 = arith.constant 0 : index
    %c10_1682 = arith.constant 10 : index
    %c1_1683 = arith.constant 1 : index
    %c0_1684 = arith.constant 0 : index
    %2110 = vector.load %arg6[%c0_1681, %c10_1682, %c1_1683, %c0_1684] : memref<4x16x10x128xf32, #tpu.memory_space<vmem>>, vector<1x1x1x128xf32>
    %2111 = vector.shape_cast %2110 : vector<1x1x1x128xf32> to vector<1x128xf32>
    %2112 = vector.broadcast %2109 : f32 to vector<1x128xf32>
    %2113 = arith.mulf %2112, %2111 : vector<1x128xf32>
    %2114 = arith.subf %2108, %2113 : vector<1x128xf32>
    %c0_1685 = arith.constant 0 : index
    %2115 = memref.load %arg1[%c0_1685] : memref<50xf32, #tpu.memory_space<smem>>
    %c0_1686 = arith.constant 0 : index
    %c10_1687 = arith.constant 10 : index
    %c0_1688 = arith.constant 0 : index
    %c0_1689 = arith.constant 0 : index
    %2116 = vector.load %arg6[%c0_1686, %c10_1687, %c0_1688, %c0_1689] : memref<4x16x10x128xf32, #tpu.memory_space<vmem>>, vector<1x1x8x128xf32>
    %2117 = vector.shape_cast %2116 : vector<1x1x8x128xf32> to vector<8x128xf32>
    %2118 = vector.broadcast %2115 : f32 to vector<8x128xf32>
    %2119 = arith.mulf %2118, %2117 : vector<8x128xf32>
    %2120 = arith.addf %2107, %2119 : vector<8x128xf32>
    %c1_1690 = arith.constant 1 : index
    %2121 = memref.load %arg1[%c1_1690] : memref<50xf32, #tpu.memory_space<smem>>
    %c1_1691 = arith.constant 1 : index
    %c10_1692 = arith.constant 10 : index
    %c0_1693 = arith.constant 0 : index
    %c0_1694 = arith.constant 0 : index
    %2122 = vector.load %arg6[%c1_1691, %c10_1692, %c0_1693, %c0_1694] : memref<4x16x10x128xf32, #tpu.memory_space<vmem>>, vector<1x1x8x128xf32>
    %2123 = vector.shape_cast %2122 : vector<1x1x8x128xf32> to vector<8x128xf32>
    %2124 = vector.broadcast %2121 : f32 to vector<8x128xf32>
    %2125 = arith.mulf %2124, %2123 : vector<8x128xf32>
    %2126 = arith.addf %2120, %2125 : vector<8x128xf32>
    %c2_1695 = arith.constant 2 : index
    %2127 = memref.load %arg1[%c2_1695] : memref<50xf32, #tpu.memory_space<smem>>
    %c0_1696 = arith.constant 0 : index
    %c10_1697 = arith.constant 10 : index
    %c1_1698 = arith.constant 1 : index
    %c0_1699 = arith.constant 0 : index
    %2128 = vector.load %arg6[%c0_1696, %c10_1697, %c1_1698, %c0_1699] : memref<4x16x10x128xf32, #tpu.memory_space<vmem>>, vector<1x1x8x128xf32>
    %2129 = vector.shape_cast %2128 : vector<1x1x8x128xf32> to vector<8x128xf32>
    %2130 = vector.broadcast %2127 : f32 to vector<8x128xf32>
    %2131 = arith.mulf %2130, %2129 : vector<8x128xf32>
    %2132 = arith.addf %2126, %2131 : vector<8x128xf32>
    %c3_1700 = arith.constant 3 : index
    %2133 = memref.load %arg1[%c3_1700] : memref<50xf32, #tpu.memory_space<smem>>
    %c1_1701 = arith.constant 1 : index
    %c10_1702 = arith.constant 10 : index
    %c1_1703 = arith.constant 1 : index
    %c0_1704 = arith.constant 0 : index
    %2134 = vector.load %arg6[%c1_1701, %c10_1702, %c1_1703, %c0_1704] : memref<4x16x10x128xf32, #tpu.memory_space<vmem>>, vector<1x1x8x128xf32>
    %2135 = vector.shape_cast %2134 : vector<1x1x8x128xf32> to vector<8x128xf32>
    %2136 = vector.broadcast %2133 : f32 to vector<8x128xf32>
    %2137 = arith.mulf %2136, %2135 : vector<8x128xf32>
    %2138 = arith.addf %2132, %2137 : vector<8x128xf32>
    %c4_1705 = arith.constant 4 : index
    %2139 = memref.load %arg1[%c4_1705] : memref<50xf32, #tpu.memory_space<smem>>
    %c0_1706 = arith.constant 0 : index
    %c10_1707 = arith.constant 10 : index
    %c2_1708 = arith.constant 2 : index
    %c0_1709 = arith.constant 0 : index
    %2140 = vector.load %arg6[%c0_1706, %c10_1707, %c2_1708, %c0_1709] : memref<4x16x10x128xf32, #tpu.memory_space<vmem>>, vector<1x1x8x128xf32>
    %2141 = vector.shape_cast %2140 : vector<1x1x8x128xf32> to vector<8x128xf32>
    %2142 = vector.broadcast %2139 : f32 to vector<8x128xf32>
    %2143 = arith.mulf %2142, %2141 : vector<8x128xf32>
    %2144 = arith.addf %2138, %2143 : vector<8x128xf32>
    %c1_1710 = arith.constant 1 : index
    %2145 = memref.load %arg3[%c1_1710] : memref<10xf32, #tpu.memory_space<smem>>
    %c0_1711 = arith.constant 0 : index
    %c11_1712 = arith.constant 11 : index
    %c1_1713 = arith.constant 1 : index
    %c0_1714 = arith.constant 0 : index
    %2146 = vector.load %arg6[%c0_1711, %c11_1712, %c1_1713, %c0_1714] : memref<4x16x10x128xf32, #tpu.memory_space<vmem>>, vector<1x1x1x128xf32>
    %2147 = vector.shape_cast %2146 : vector<1x1x1x128xf32> to vector<1x128xf32>
    %2148 = vector.broadcast %2145 : f32 to vector<1x128xf32>
    %2149 = arith.mulf %2148, %2147 : vector<1x128xf32>
    %2150 = arith.subf %2114, %2149 : vector<1x128xf32>
    %c5_1715 = arith.constant 5 : index
    %2151 = memref.load %arg1[%c5_1715] : memref<50xf32, #tpu.memory_space<smem>>
    %c0_1716 = arith.constant 0 : index
    %c11_1717 = arith.constant 11 : index
    %c0_1718 = arith.constant 0 : index
    %c0_1719 = arith.constant 0 : index
    %2152 = vector.load %arg6[%c0_1716, %c11_1717, %c0_1718, %c0_1719] : memref<4x16x10x128xf32, #tpu.memory_space<vmem>>, vector<1x1x8x128xf32>
    %2153 = vector.shape_cast %2152 : vector<1x1x8x128xf32> to vector<8x128xf32>
    %2154 = vector.broadcast %2151 : f32 to vector<8x128xf32>
    %2155 = arith.mulf %2154, %2153 : vector<8x128xf32>
    %2156 = arith.addf %2144, %2155 : vector<8x128xf32>
    %c6_1720 = arith.constant 6 : index
    %2157 = memref.load %arg1[%c6_1720] : memref<50xf32, #tpu.memory_space<smem>>
    %c1_1721 = arith.constant 1 : index
    %c11_1722 = arith.constant 11 : index
    %c0_1723 = arith.constant 0 : index
    %c0_1724 = arith.constant 0 : index
    %2158 = vector.load %arg6[%c1_1721, %c11_1722, %c0_1723, %c0_1724] : memref<4x16x10x128xf32, #tpu.memory_space<vmem>>, vector<1x1x8x128xf32>
    %2159 = vector.shape_cast %2158 : vector<1x1x8x128xf32> to vector<8x128xf32>
    %2160 = vector.broadcast %2157 : f32 to vector<8x128xf32>
    %2161 = arith.mulf %2160, %2159 : vector<8x128xf32>
    %2162 = arith.addf %2156, %2161 : vector<8x128xf32>
    %c7_1725 = arith.constant 7 : index
    %2163 = memref.load %arg1[%c7_1725] : memref<50xf32, #tpu.memory_space<smem>>
    %c0_1726 = arith.constant 0 : index
    %c11_1727 = arith.constant 11 : index
    %c1_1728 = arith.constant 1 : index
    %c0_1729 = arith.constant 0 : index
    %2164 = vector.load %arg6[%c0_1726, %c11_1727, %c1_1728, %c0_1729] : memref<4x16x10x128xf32, #tpu.memory_space<vmem>>, vector<1x1x8x128xf32>
    %2165 = vector.shape_cast %2164 : vector<1x1x8x128xf32> to vector<8x128xf32>
    %2166 = vector.broadcast %2163 : f32 to vector<8x128xf32>
    %2167 = arith.mulf %2166, %2165 : vector<8x128xf32>
    %2168 = arith.addf %2162, %2167 : vector<8x128xf32>
    %c8_1730 = arith.constant 8 : index
    %2169 = memref.load %arg1[%c8_1730] : memref<50xf32, #tpu.memory_space<smem>>
    %c1_1731 = arith.constant 1 : index
    %c11_1732 = arith.constant 11 : index
    %c1_1733 = arith.constant 1 : index
    %c0_1734 = arith.constant 0 : index
    %2170 = vector.load %arg6[%c1_1731, %c11_1732, %c1_1733, %c0_1734] : memref<4x16x10x128xf32, #tpu.memory_space<vmem>>, vector<1x1x8x128xf32>
    %2171 = vector.shape_cast %2170 : vector<1x1x8x128xf32> to vector<8x128xf32>
    %2172 = vector.broadcast %2169 : f32 to vector<8x128xf32>
    %2173 = arith.mulf %2172, %2171 : vector<8x128xf32>
    %2174 = arith.addf %2168, %2173 : vector<8x128xf32>
    %c9_1735 = arith.constant 9 : index
    %2175 = memref.load %arg1[%c9_1735] : memref<50xf32, #tpu.memory_space<smem>>
    %c0_1736 = arith.constant 0 : index
    %c11_1737 = arith.constant 11 : index
    %c2_1738 = arith.constant 2 : index
    %c0_1739 = arith.constant 0 : index
    %2176 = vector.load %arg6[%c0_1736, %c11_1737, %c2_1738, %c0_1739] : memref<4x16x10x128xf32, #tpu.memory_space<vmem>>, vector<1x1x8x128xf32>
    %2177 = vector.shape_cast %2176 : vector<1x1x8x128xf32> to vector<8x128xf32>
    %2178 = vector.broadcast %2175 : f32 to vector<8x128xf32>
    %2179 = arith.mulf %2178, %2177 : vector<8x128xf32>
    %2180 = arith.addf %2174, %2179 : vector<8x128xf32>
    %c2_1740 = arith.constant 2 : index
    %2181 = memref.load %arg3[%c2_1740] : memref<10xf32, #tpu.memory_space<smem>>
    %c0_1741 = arith.constant 0 : index
    %c12_1742 = arith.constant 12 : index
    %c1_1743 = arith.constant 1 : index
    %c0_1744 = arith.constant 0 : index
    %2182 = vector.load %arg6[%c0_1741, %c12_1742, %c1_1743, %c0_1744] : memref<4x16x10x128xf32, #tpu.memory_space<vmem>>, vector<1x1x1x128xf32>
    %2183 = vector.shape_cast %2182 : vector<1x1x1x128xf32> to vector<1x128xf32>
    %2184 = vector.broadcast %2181 : f32 to vector<1x128xf32>
    %2185 = arith.mulf %2184, %2183 : vector<1x128xf32>
    %2186 = arith.subf %2150, %2185 : vector<1x128xf32>
    %c10_1745 = arith.constant 10 : index
    %2187 = memref.load %arg1[%c10_1745] : memref<50xf32, #tpu.memory_space<smem>>
    %c0_1746 = arith.constant 0 : index
    %c12_1747 = arith.constant 12 : index
    %c0_1748 = arith.constant 0 : index
    %c0_1749 = arith.constant 0 : index
    %2188 = vector.load %arg6[%c0_1746, %c12_1747, %c0_1748, %c0_1749] : memref<4x16x10x128xf32, #tpu.memory_space<vmem>>, vector<1x1x8x128xf32>
    %2189 = vector.shape_cast %2188 : vector<1x1x8x128xf32> to vector<8x128xf32>
    %2190 = vector.broadcast %2187 : f32 to vector<8x128xf32>
    %2191 = arith.mulf %2190, %2189 : vector<8x128xf32>
    %2192 = arith.addf %2180, %2191 : vector<8x128xf32>
    %c11_1750 = arith.constant 11 : index
    %2193 = memref.load %arg1[%c11_1750] : memref<50xf32, #tpu.memory_space<smem>>
    %c1_1751 = arith.constant 1 : index
    %c12_1752 = arith.constant 12 : index
    %c0_1753 = arith.constant 0 : index
    %c0_1754 = arith.constant 0 : index
    %2194 = vector.load %arg6[%c1_1751, %c12_1752, %c0_1753, %c0_1754] : memref<4x16x10x128xf32, #tpu.memory_space<vmem>>, vector<1x1x8x128xf32>
    %2195 = vector.shape_cast %2194 : vector<1x1x8x128xf32> to vector<8x128xf32>
    %2196 = vector.broadcast %2193 : f32 to vector<8x128xf32>
    %2197 = arith.mulf %2196, %2195 : vector<8x128xf32>
    %2198 = arith.addf %2192, %2197 : vector<8x128xf32>
    %c12_1755 = arith.constant 12 : index
    %2199 = memref.load %arg1[%c12_1755] : memref<50xf32, #tpu.memory_space<smem>>
    %c0_1756 = arith.constant 0 : index
    %c12_1757 = arith.constant 12 : index
    %c1_1758 = arith.constant 1 : index
    %c0_1759 = arith.constant 0 : index
    %2200 = vector.load %arg6[%c0_1756, %c12_1757, %c1_1758, %c0_1759] : memref<4x16x10x128xf32, #tpu.memory_space<vmem>>, vector<1x1x8x128xf32>
    %2201 = vector.shape_cast %2200 : vector<1x1x8x128xf32> to vector<8x128xf32>
    %2202 = vector.broadcast %2199 : f32 to vector<8x128xf32>
    %2203 = arith.mulf %2202, %2201 : vector<8x128xf32>
    %2204 = arith.addf %2198, %2203 : vector<8x128xf32>
    %c13_1760 = arith.constant 13 : index
    %2205 = memref.load %arg1[%c13_1760] : memref<50xf32, #tpu.memory_space<smem>>
    %c1_1761 = arith.constant 1 : index
    %c12_1762 = arith.constant 12 : index
    %c1_1763 = arith.constant 1 : index
    %c0_1764 = arith.constant 0 : index
    %2206 = vector.load %arg6[%c1_1761, %c12_1762, %c1_1763, %c0_1764] : memref<4x16x10x128xf32, #tpu.memory_space<vmem>>, vector<1x1x8x128xf32>
    %2207 = vector.shape_cast %2206 : vector<1x1x8x128xf32> to vector<8x128xf32>
    %2208 = vector.broadcast %2205 : f32 to vector<8x128xf32>
    %2209 = arith.mulf %2208, %2207 : vector<8x128xf32>
    %2210 = arith.addf %2204, %2209 : vector<8x128xf32>
    %c14_1765 = arith.constant 14 : index
    %2211 = memref.load %arg1[%c14_1765] : memref<50xf32, #tpu.memory_space<smem>>
    %c0_1766 = arith.constant 0 : index
    %c12_1767 = arith.constant 12 : index
    %c2_1768 = arith.constant 2 : index
    %c0_1769 = arith.constant 0 : index
    %2212 = vector.load %arg6[%c0_1766, %c12_1767, %c2_1768, %c0_1769] : memref<4x16x10x128xf32, #tpu.memory_space<vmem>>, vector<1x1x8x128xf32>
    %2213 = vector.shape_cast %2212 : vector<1x1x8x128xf32> to vector<8x128xf32>
    %2214 = vector.broadcast %2211 : f32 to vector<8x128xf32>
    %2215 = arith.mulf %2214, %2213 : vector<8x128xf32>
    %2216 = arith.addf %2210, %2215 : vector<8x128xf32>
    %c3_1770 = arith.constant 3 : index
    %2217 = memref.load %arg3[%c3_1770] : memref<10xf32, #tpu.memory_space<smem>>
    %c0_1771 = arith.constant 0 : index
    %c13_1772 = arith.constant 13 : index
    %c1_1773 = arith.constant 1 : index
    %c0_1774 = arith.constant 0 : index
    %2218 = vector.load %arg6[%c0_1771, %c13_1772, %c1_1773, %c0_1774] : memref<4x16x10x128xf32, #tpu.memory_space<vmem>>, vector<1x1x1x128xf32>
    %2219 = vector.shape_cast %2218 : vector<1x1x1x128xf32> to vector<1x128xf32>
    %2220 = vector.broadcast %2217 : f32 to vector<1x128xf32>
    %2221 = arith.mulf %2220, %2219 : vector<1x128xf32>
    %2222 = arith.subf %2186, %2221 : vector<1x128xf32>
    %c15_1775 = arith.constant 15 : index
    %2223 = memref.load %arg1[%c15_1775] : memref<50xf32, #tpu.memory_space<smem>>
    %c0_1776 = arith.constant 0 : index
    %c13_1777 = arith.constant 13 : index
    %c0_1778 = arith.constant 0 : index
    %c0_1779 = arith.constant 0 : index
    %2224 = vector.load %arg6[%c0_1776, %c13_1777, %c0_1778, %c0_1779] : memref<4x16x10x128xf32, #tpu.memory_space<vmem>>, vector<1x1x8x128xf32>
    %2225 = vector.shape_cast %2224 : vector<1x1x8x128xf32> to vector<8x128xf32>
    %2226 = vector.broadcast %2223 : f32 to vector<8x128xf32>
    %2227 = arith.mulf %2226, %2225 : vector<8x128xf32>
    %2228 = arith.addf %2216, %2227 : vector<8x128xf32>
    %c16_1780 = arith.constant 16 : index
    %2229 = memref.load %arg1[%c16_1780] : memref<50xf32, #tpu.memory_space<smem>>
    %c1_1781 = arith.constant 1 : index
    %c13_1782 = arith.constant 13 : index
    %c0_1783 = arith.constant 0 : index
    %c0_1784 = arith.constant 0 : index
    %2230 = vector.load %arg6[%c1_1781, %c13_1782, %c0_1783, %c0_1784] : memref<4x16x10x128xf32, #tpu.memory_space<vmem>>, vector<1x1x8x128xf32>
    %2231 = vector.shape_cast %2230 : vector<1x1x8x128xf32> to vector<8x128xf32>
    %2232 = vector.broadcast %2229 : f32 to vector<8x128xf32>
    %2233 = arith.mulf %2232, %2231 : vector<8x128xf32>
    %2234 = arith.addf %2228, %2233 : vector<8x128xf32>
    %c17_1785 = arith.constant 17 : index
    %2235 = memref.load %arg1[%c17_1785] : memref<50xf32, #tpu.memory_space<smem>>
    %c0_1786 = arith.constant 0 : index
    %c13_1787 = arith.constant 13 : index
    %c1_1788 = arith.constant 1 : index
    %c0_1789 = arith.constant 0 : index
    %2236 = vector.load %arg6[%c0_1786, %c13_1787, %c1_1788, %c0_1789] : memref<4x16x10x128xf32, #tpu.memory_space<vmem>>, vector<1x1x8x128xf32>
    %2237 = vector.shape_cast %2236 : vector<1x1x8x128xf32> to vector<8x128xf32>
    %2238 = vector.broadcast %2235 : f32 to vector<8x128xf32>
    %2239 = arith.mulf %2238, %2237 : vector<8x128xf32>
    %2240 = arith.addf %2234, %2239 : vector<8x128xf32>
    %c18_1790 = arith.constant 18 : index
    %2241 = memref.load %arg1[%c18_1790] : memref<50xf32, #tpu.memory_space<smem>>
    %c1_1791 = arith.constant 1 : index
    %c13_1792 = arith.constant 13 : index
    %c1_1793 = arith.constant 1 : index
    %c0_1794 = arith.constant 0 : index
    %2242 = vector.load %arg6[%c1_1791, %c13_1792, %c1_1793, %c0_1794] : memref<4x16x10x128xf32, #tpu.memory_space<vmem>>, vector<1x1x8x128xf32>
    %2243 = vector.shape_cast %2242 : vector<1x1x8x128xf32> to vector<8x128xf32>
    %2244 = vector.broadcast %2241 : f32 to vector<8x128xf32>
    %2245 = arith.mulf %2244, %2243 : vector<8x128xf32>
    %2246 = arith.addf %2240, %2245 : vector<8x128xf32>
    %c19_1795 = arith.constant 19 : index
    %2247 = memref.load %arg1[%c19_1795] : memref<50xf32, #tpu.memory_space<smem>>
    %c0_1796 = arith.constant 0 : index
    %c13_1797 = arith.constant 13 : index
    %c2_1798 = arith.constant 2 : index
    %c0_1799 = arith.constant 0 : index
    %2248 = vector.load %arg6[%c0_1796, %c13_1797, %c2_1798, %c0_1799] : memref<4x16x10x128xf32, #tpu.memory_space<vmem>>, vector<1x1x8x128xf32>
    %2249 = vector.shape_cast %2248 : vector<1x1x8x128xf32> to vector<8x128xf32>
    %2250 = vector.broadcast %2247 : f32 to vector<8x128xf32>
    %2251 = arith.mulf %2250, %2249 : vector<8x128xf32>
    %2252 = arith.addf %2246, %2251 : vector<8x128xf32>
    %c4_1800 = arith.constant 4 : index
    %2253 = memref.load %arg3[%c4_1800] : memref<10xf32, #tpu.memory_space<smem>>
    %c0_1801 = arith.constant 0 : index
    %c14_1802 = arith.constant 14 : index
    %c1_1803 = arith.constant 1 : index
    %c0_1804 = arith.constant 0 : index
    %2254 = vector.load %arg6[%c0_1801, %c14_1802, %c1_1803, %c0_1804] : memref<4x16x10x128xf32, #tpu.memory_space<vmem>>, vector<1x1x1x128xf32>
    %2255 = vector.shape_cast %2254 : vector<1x1x1x128xf32> to vector<1x128xf32>
    %2256 = vector.broadcast %2253 : f32 to vector<1x128xf32>
    %2257 = arith.mulf %2256, %2255 : vector<1x128xf32>
    %2258 = arith.subf %2222, %2257 : vector<1x128xf32>
    %c20_1805 = arith.constant 20 : index
    %2259 = memref.load %arg1[%c20_1805] : memref<50xf32, #tpu.memory_space<smem>>
    %c0_1806 = arith.constant 0 : index
    %c14_1807 = arith.constant 14 : index
    %c0_1808 = arith.constant 0 : index
    %c0_1809 = arith.constant 0 : index
    %2260 = vector.load %arg6[%c0_1806, %c14_1807, %c0_1808, %c0_1809] : memref<4x16x10x128xf32, #tpu.memory_space<vmem>>, vector<1x1x8x128xf32>
    %2261 = vector.shape_cast %2260 : vector<1x1x8x128xf32> to vector<8x128xf32>
    %2262 = vector.broadcast %2259 : f32 to vector<8x128xf32>
    %2263 = arith.mulf %2262, %2261 : vector<8x128xf32>
    %2264 = arith.addf %2252, %2263 : vector<8x128xf32>
    %c21_1810 = arith.constant 21 : index
    %2265 = memref.load %arg1[%c21_1810] : memref<50xf32, #tpu.memory_space<smem>>
    %c1_1811 = arith.constant 1 : index
    %c14_1812 = arith.constant 14 : index
    %c0_1813 = arith.constant 0 : index
    %c0_1814 = arith.constant 0 : index
    %2266 = vector.load %arg6[%c1_1811, %c14_1812, %c0_1813, %c0_1814] : memref<4x16x10x128xf32, #tpu.memory_space<vmem>>, vector<1x1x8x128xf32>
    %2267 = vector.shape_cast %2266 : vector<1x1x8x128xf32> to vector<8x128xf32>
    %2268 = vector.broadcast %2265 : f32 to vector<8x128xf32>
    %2269 = arith.mulf %2268, %2267 : vector<8x128xf32>
    %2270 = arith.addf %2264, %2269 : vector<8x128xf32>
    %c22_1815 = arith.constant 22 : index
    %2271 = memref.load %arg1[%c22_1815] : memref<50xf32, #tpu.memory_space<smem>>
    %c0_1816 = arith.constant 0 : index
    %c14_1817 = arith.constant 14 : index
    %c1_1818 = arith.constant 1 : index
    %c0_1819 = arith.constant 0 : index
    %2272 = vector.load %arg6[%c0_1816, %c14_1817, %c1_1818, %c0_1819] : memref<4x16x10x128xf32, #tpu.memory_space<vmem>>, vector<1x1x8x128xf32>
    %2273 = vector.shape_cast %2272 : vector<1x1x8x128xf32> to vector<8x128xf32>
    %2274 = vector.broadcast %2271 : f32 to vector<8x128xf32>
    %2275 = arith.mulf %2274, %2273 : vector<8x128xf32>
    %2276 = arith.addf %2270, %2275 : vector<8x128xf32>
    %c23_1820 = arith.constant 23 : index
    %2277 = memref.load %arg1[%c23_1820] : memref<50xf32, #tpu.memory_space<smem>>
    %c1_1821 = arith.constant 1 : index
    %c14_1822 = arith.constant 14 : index
    %c1_1823 = arith.constant 1 : index
    %c0_1824 = arith.constant 0 : index
    %2278 = vector.load %arg6[%c1_1821, %c14_1822, %c1_1823, %c0_1824] : memref<4x16x10x128xf32, #tpu.memory_space<vmem>>, vector<1x1x8x128xf32>
    %2279 = vector.shape_cast %2278 : vector<1x1x8x128xf32> to vector<8x128xf32>
    %2280 = vector.broadcast %2277 : f32 to vector<8x128xf32>
    %2281 = arith.mulf %2280, %2279 : vector<8x128xf32>
    %2282 = arith.addf %2276, %2281 : vector<8x128xf32>
    %c24_1825 = arith.constant 24 : index
    %2283 = memref.load %arg1[%c24_1825] : memref<50xf32, #tpu.memory_space<smem>>
    %c0_1826 = arith.constant 0 : index
    %c14_1827 = arith.constant 14 : index
    %c2_1828 = arith.constant 2 : index
    %c0_1829 = arith.constant 0 : index
    %2284 = vector.load %arg6[%c0_1826, %c14_1827, %c2_1828, %c0_1829] : memref<4x16x10x128xf32, #tpu.memory_space<vmem>>, vector<1x1x8x128xf32>
    %2285 = vector.shape_cast %2284 : vector<1x1x8x128xf32> to vector<8x128xf32>
    %2286 = vector.broadcast %2283 : f32 to vector<8x128xf32>
    %2287 = arith.mulf %2286, %2285 : vector<8x128xf32>
    %2288 = arith.addf %2282, %2287 : vector<8x128xf32>
    %c5_1830 = arith.constant 5 : index
    %2289 = memref.load %arg3[%c5_1830] : memref<10xf32, #tpu.memory_space<smem>>
    %c2_1831 = arith.constant 2 : index
    %c10_1832 = arith.constant 10 : index
    %c1_1833 = arith.constant 1 : index
    %c0_1834 = arith.constant 0 : index
    %2290 = vector.load %arg6[%c2_1831, %c10_1832, %c1_1833, %c0_1834] : memref<4x16x10x128xf32, #tpu.memory_space<vmem>>, vector<1x1x1x128xf32>
    %2291 = vector.shape_cast %2290 : vector<1x1x1x128xf32> to vector<1x128xf32>
    %2292 = vector.broadcast %2289 : f32 to vector<1x128xf32>
    %2293 = arith.mulf %2292, %2291 : vector<1x128xf32>
    %2294 = arith.subf %2258, %2293 : vector<1x128xf32>
    %c25_1835 = arith.constant 25 : index
    %2295 = memref.load %arg1[%c25_1835] : memref<50xf32, #tpu.memory_space<smem>>
    %c2_1836 = arith.constant 2 : index
    %c10_1837 = arith.constant 10 : index
    %c0_1838 = arith.constant 0 : index
    %c0_1839 = arith.constant 0 : index
    %2296 = vector.load %arg6[%c2_1836, %c10_1837, %c0_1838, %c0_1839] : memref<4x16x10x128xf32, #tpu.memory_space<vmem>>, vector<1x1x8x128xf32>
    %2297 = vector.shape_cast %2296 : vector<1x1x8x128xf32> to vector<8x128xf32>
    %2298 = vector.broadcast %2295 : f32 to vector<8x128xf32>
    %2299 = arith.mulf %2298, %2297 : vector<8x128xf32>
    %2300 = arith.addf %2288, %2299 : vector<8x128xf32>
    %c26_1840 = arith.constant 26 : index
    %2301 = memref.load %arg1[%c26_1840] : memref<50xf32, #tpu.memory_space<smem>>
    %c3_1841 = arith.constant 3 : index
    %c10_1842 = arith.constant 10 : index
    %c0_1843 = arith.constant 0 : index
    %c0_1844 = arith.constant 0 : index
    %2302 = vector.load %arg6[%c3_1841, %c10_1842, %c0_1843, %c0_1844] : memref<4x16x10x128xf32, #tpu.memory_space<vmem>>, vector<1x1x8x128xf32>
    %2303 = vector.shape_cast %2302 : vector<1x1x8x128xf32> to vector<8x128xf32>
    %2304 = vector.broadcast %2301 : f32 to vector<8x128xf32>
    %2305 = arith.mulf %2304, %2303 : vector<8x128xf32>
    %2306 = arith.addf %2300, %2305 : vector<8x128xf32>
    %c27_1845 = arith.constant 27 : index
    %2307 = memref.load %arg1[%c27_1845] : memref<50xf32, #tpu.memory_space<smem>>
    %c2_1846 = arith.constant 2 : index
    %c10_1847 = arith.constant 10 : index
    %c1_1848 = arith.constant 1 : index
    %c0_1849 = arith.constant 0 : index
    %2308 = vector.load %arg6[%c2_1846, %c10_1847, %c1_1848, %c0_1849] : memref<4x16x10x128xf32, #tpu.memory_space<vmem>>, vector<1x1x8x128xf32>
    %2309 = vector.shape_cast %2308 : vector<1x1x8x128xf32> to vector<8x128xf32>
    %2310 = vector.broadcast %2307 : f32 to vector<8x128xf32>
    %2311 = arith.mulf %2310, %2309 : vector<8x128xf32>
    %2312 = arith.addf %2306, %2311 : vector<8x128xf32>
    %c28_1850 = arith.constant 28 : index
    %2313 = memref.load %arg1[%c28_1850] : memref<50xf32, #tpu.memory_space<smem>>
    %c3_1851 = arith.constant 3 : index
    %c10_1852 = arith.constant 10 : index
    %c1_1853 = arith.constant 1 : index
    %c0_1854 = arith.constant 0 : index
    %2314 = vector.load %arg6[%c3_1851, %c10_1852, %c1_1853, %c0_1854] : memref<4x16x10x128xf32, #tpu.memory_space<vmem>>, vector<1x1x8x128xf32>
    %2315 = vector.shape_cast %2314 : vector<1x1x8x128xf32> to vector<8x128xf32>
    %2316 = vector.broadcast %2313 : f32 to vector<8x128xf32>
    %2317 = arith.mulf %2316, %2315 : vector<8x128xf32>
    %2318 = arith.addf %2312, %2317 : vector<8x128xf32>
    %c29_1855 = arith.constant 29 : index
    %2319 = memref.load %arg1[%c29_1855] : memref<50xf32, #tpu.memory_space<smem>>
    %c2_1856 = arith.constant 2 : index
    %c10_1857 = arith.constant 10 : index
    %c2_1858 = arith.constant 2 : index
    %c0_1859 = arith.constant 0 : index
    %2320 = vector.load %arg6[%c2_1856, %c10_1857, %c2_1858, %c0_1859] : memref<4x16x10x128xf32, #tpu.memory_space<vmem>>, vector<1x1x8x128xf32>
    %2321 = vector.shape_cast %2320 : vector<1x1x8x128xf32> to vector<8x128xf32>
    %2322 = vector.broadcast %2319 : f32 to vector<8x128xf32>
    %2323 = arith.mulf %2322, %2321 : vector<8x128xf32>
    %2324 = arith.addf %2318, %2323 : vector<8x128xf32>
    %c6_1860 = arith.constant 6 : index
    %2325 = memref.load %arg3[%c6_1860] : memref<10xf32, #tpu.memory_space<smem>>
    %c2_1861 = arith.constant 2 : index
    %c11_1862 = arith.constant 11 : index
    %c1_1863 = arith.constant 1 : index
    %c0_1864 = arith.constant 0 : index
    %2326 = vector.load %arg6[%c2_1861, %c11_1862, %c1_1863, %c0_1864] : memref<4x16x10x128xf32, #tpu.memory_space<vmem>>, vector<1x1x1x128xf32>
    %2327 = vector.shape_cast %2326 : vector<1x1x1x128xf32> to vector<1x128xf32>
    %2328 = vector.broadcast %2325 : f32 to vector<1x128xf32>
    %2329 = arith.mulf %2328, %2327 : vector<1x128xf32>
    %2330 = arith.subf %2294, %2329 : vector<1x128xf32>
    %c30_1865 = arith.constant 30 : index
    %2331 = memref.load %arg1[%c30_1865] : memref<50xf32, #tpu.memory_space<smem>>
    %c2_1866 = arith.constant 2 : index
    %c11_1867 = arith.constant 11 : index
    %c0_1868 = arith.constant 0 : index
    %c0_1869 = arith.constant 0 : index
    %2332 = vector.load %arg6[%c2_1866, %c11_1867, %c0_1868, %c0_1869] : memref<4x16x10x128xf32, #tpu.memory_space<vmem>>, vector<1x1x8x128xf32>
    %2333 = vector.shape_cast %2332 : vector<1x1x8x128xf32> to vector<8x128xf32>
    %2334 = vector.broadcast %2331 : f32 to vector<8x128xf32>
    %2335 = arith.mulf %2334, %2333 : vector<8x128xf32>
    %2336 = arith.addf %2324, %2335 : vector<8x128xf32>
    %c31_1870 = arith.constant 31 : index
    %2337 = memref.load %arg1[%c31_1870] : memref<50xf32, #tpu.memory_space<smem>>
    %c3_1871 = arith.constant 3 : index
    %c11_1872 = arith.constant 11 : index
    %c0_1873 = arith.constant 0 : index
    %c0_1874 = arith.constant 0 : index
    %2338 = vector.load %arg6[%c3_1871, %c11_1872, %c0_1873, %c0_1874] : memref<4x16x10x128xf32, #tpu.memory_space<vmem>>, vector<1x1x8x128xf32>
    %2339 = vector.shape_cast %2338 : vector<1x1x8x128xf32> to vector<8x128xf32>
    %2340 = vector.broadcast %2337 : f32 to vector<8x128xf32>
    %2341 = arith.mulf %2340, %2339 : vector<8x128xf32>
    %2342 = arith.addf %2336, %2341 : vector<8x128xf32>
    %c32_1875 = arith.constant 32 : index
    %2343 = memref.load %arg1[%c32_1875] : memref<50xf32, #tpu.memory_space<smem>>
    %c2_1876 = arith.constant 2 : index
    %c11_1877 = arith.constant 11 : index
    %c1_1878 = arith.constant 1 : index
    %c0_1879 = arith.constant 0 : index
    %2344 = vector.load %arg6[%c2_1876, %c11_1877, %c1_1878, %c0_1879] : memref<4x16x10x128xf32, #tpu.memory_space<vmem>>, vector<1x1x8x128xf32>
    %2345 = vector.shape_cast %2344 : vector<1x1x8x128xf32> to vector<8x128xf32>
    %2346 = vector.broadcast %2343 : f32 to vector<8x128xf32>
    %2347 = arith.mulf %2346, %2345 : vector<8x128xf32>
    %2348 = arith.addf %2342, %2347 : vector<8x128xf32>
    %c33_1880 = arith.constant 33 : index
    %2349 = memref.load %arg1[%c33_1880] : memref<50xf32, #tpu.memory_space<smem>>
    %c3_1881 = arith.constant 3 : index
    %c11_1882 = arith.constant 11 : index
    %c1_1883 = arith.constant 1 : index
    %c0_1884 = arith.constant 0 : index
    %2350 = vector.load %arg6[%c3_1881, %c11_1882, %c1_1883, %c0_1884] : memref<4x16x10x128xf32, #tpu.memory_space<vmem>>, vector<1x1x8x128xf32>
    %2351 = vector.shape_cast %2350 : vector<1x1x8x128xf32> to vector<8x128xf32>
    %2352 = vector.broadcast %2349 : f32 to vector<8x128xf32>
    %2353 = arith.mulf %2352, %2351 : vector<8x128xf32>
    %2354 = arith.addf %2348, %2353 : vector<8x128xf32>
    %c34_1885 = arith.constant 34 : index
    %2355 = memref.load %arg1[%c34_1885] : memref<50xf32, #tpu.memory_space<smem>>
    %c2_1886 = arith.constant 2 : index
    %c11_1887 = arith.constant 11 : index
    %c2_1888 = arith.constant 2 : index
    %c0_1889 = arith.constant 0 : index
    %2356 = vector.load %arg6[%c2_1886, %c11_1887, %c2_1888, %c0_1889] : memref<4x16x10x128xf32, #tpu.memory_space<vmem>>, vector<1x1x8x128xf32>
    %2357 = vector.shape_cast %2356 : vector<1x1x8x128xf32> to vector<8x128xf32>
    %2358 = vector.broadcast %2355 : f32 to vector<8x128xf32>
    %2359 = arith.mulf %2358, %2357 : vector<8x128xf32>
    %2360 = arith.addf %2354, %2359 : vector<8x128xf32>
    %c7_1890 = arith.constant 7 : index
    %2361 = memref.load %arg3[%c7_1890] : memref<10xf32, #tpu.memory_space<smem>>
    %c2_1891 = arith.constant 2 : index
    %c12_1892 = arith.constant 12 : index
    %c1_1893 = arith.constant 1 : index
    %c0_1894 = arith.constant 0 : index
    %2362 = vector.load %arg6[%c2_1891, %c12_1892, %c1_1893, %c0_1894] : memref<4x16x10x128xf32, #tpu.memory_space<vmem>>, vector<1x1x1x128xf32>
    %2363 = vector.shape_cast %2362 : vector<1x1x1x128xf32> to vector<1x128xf32>
    %2364 = vector.broadcast %2361 : f32 to vector<1x128xf32>
    %2365 = arith.mulf %2364, %2363 : vector<1x128xf32>
    %2366 = arith.subf %2330, %2365 : vector<1x128xf32>
    %c35_1895 = arith.constant 35 : index
    %2367 = memref.load %arg1[%c35_1895] : memref<50xf32, #tpu.memory_space<smem>>
    %c2_1896 = arith.constant 2 : index
    %c12_1897 = arith.constant 12 : index
    %c0_1898 = arith.constant 0 : index
    %c0_1899 = arith.constant 0 : index
    %2368 = vector.load %arg6[%c2_1896, %c12_1897, %c0_1898, %c0_1899] : memref<4x16x10x128xf32, #tpu.memory_space<vmem>>, vector<1x1x8x128xf32>
    %2369 = vector.shape_cast %2368 : vector<1x1x8x128xf32> to vector<8x128xf32>
    %2370 = vector.broadcast %2367 : f32 to vector<8x128xf32>
    %2371 = arith.mulf %2370, %2369 : vector<8x128xf32>
    %2372 = arith.addf %2360, %2371 : vector<8x128xf32>
    %c36_1900 = arith.constant 36 : index
    %2373 = memref.load %arg1[%c36_1900] : memref<50xf32, #tpu.memory_space<smem>>
    %c3_1901 = arith.constant 3 : index
    %c12_1902 = arith.constant 12 : index
    %c0_1903 = arith.constant 0 : index
    %c0_1904 = arith.constant 0 : index
    %2374 = vector.load %arg6[%c3_1901, %c12_1902, %c0_1903, %c0_1904] : memref<4x16x10x128xf32, #tpu.memory_space<vmem>>, vector<1x1x8x128xf32>
    %2375 = vector.shape_cast %2374 : vector<1x1x8x128xf32> to vector<8x128xf32>
    %2376 = vector.broadcast %2373 : f32 to vector<8x128xf32>
    %2377 = arith.mulf %2376, %2375 : vector<8x128xf32>
    %2378 = arith.addf %2372, %2377 : vector<8x128xf32>
    %c37_1905 = arith.constant 37 : index
    %2379 = memref.load %arg1[%c37_1905] : memref<50xf32, #tpu.memory_space<smem>>
    %c2_1906 = arith.constant 2 : index
    %c12_1907 = arith.constant 12 : index
    %c1_1908 = arith.constant 1 : index
    %c0_1909 = arith.constant 0 : index
    %2380 = vector.load %arg6[%c2_1906, %c12_1907, %c1_1908, %c0_1909] : memref<4x16x10x128xf32, #tpu.memory_space<vmem>>, vector<1x1x8x128xf32>
    %2381 = vector.shape_cast %2380 : vector<1x1x8x128xf32> to vector<8x128xf32>
    %2382 = vector.broadcast %2379 : f32 to vector<8x128xf32>
    %2383 = arith.mulf %2382, %2381 : vector<8x128xf32>
    %2384 = arith.addf %2378, %2383 : vector<8x128xf32>
    %c38_1910 = arith.constant 38 : index
    %2385 = memref.load %arg1[%c38_1910] : memref<50xf32, #tpu.memory_space<smem>>
    %c3_1911 = arith.constant 3 : index
    %c12_1912 = arith.constant 12 : index
    %c1_1913 = arith.constant 1 : index
    %c0_1914 = arith.constant 0 : index
    %2386 = vector.load %arg6[%c3_1911, %c12_1912, %c1_1913, %c0_1914] : memref<4x16x10x128xf32, #tpu.memory_space<vmem>>, vector<1x1x8x128xf32>
    %2387 = vector.shape_cast %2386 : vector<1x1x8x128xf32> to vector<8x128xf32>
    %2388 = vector.broadcast %2385 : f32 to vector<8x128xf32>
    %2389 = arith.mulf %2388, %2387 : vector<8x128xf32>
    %2390 = arith.addf %2384, %2389 : vector<8x128xf32>
    %c39_1915 = arith.constant 39 : index
    %2391 = memref.load %arg1[%c39_1915] : memref<50xf32, #tpu.memory_space<smem>>
    %c2_1916 = arith.constant 2 : index
    %c12_1917 = arith.constant 12 : index
    %c2_1918 = arith.constant 2 : index
    %c0_1919 = arith.constant 0 : index
    %2392 = vector.load %arg6[%c2_1916, %c12_1917, %c2_1918, %c0_1919] : memref<4x16x10x128xf32, #tpu.memory_space<vmem>>, vector<1x1x8x128xf32>
    %2393 = vector.shape_cast %2392 : vector<1x1x8x128xf32> to vector<8x128xf32>
    %2394 = vector.broadcast %2391 : f32 to vector<8x128xf32>
    %2395 = arith.mulf %2394, %2393 : vector<8x128xf32>
    %2396 = arith.addf %2390, %2395 : vector<8x128xf32>
    %c8_1920 = arith.constant 8 : index
    %2397 = memref.load %arg3[%c8_1920] : memref<10xf32, #tpu.memory_space<smem>>
    %c2_1921 = arith.constant 2 : index
    %c13_1922 = arith.constant 13 : index
    %c1_1923 = arith.constant 1 : index
    %c0_1924 = arith.constant 0 : index
    %2398 = vector.load %arg6[%c2_1921, %c13_1922, %c1_1923, %c0_1924] : memref<4x16x10x128xf32, #tpu.memory_space<vmem>>, vector<1x1x1x128xf32>
    %2399 = vector.shape_cast %2398 : vector<1x1x1x128xf32> to vector<1x128xf32>
    %2400 = vector.broadcast %2397 : f32 to vector<1x128xf32>
    %2401 = arith.mulf %2400, %2399 : vector<1x128xf32>
    %2402 = arith.subf %2366, %2401 : vector<1x128xf32>
    %c40_1925 = arith.constant 40 : index
    %2403 = memref.load %arg1[%c40_1925] : memref<50xf32, #tpu.memory_space<smem>>
    %c2_1926 = arith.constant 2 : index
    %c13_1927 = arith.constant 13 : index
    %c0_1928 = arith.constant 0 : index
    %c0_1929 = arith.constant 0 : index
    %2404 = vector.load %arg6[%c2_1926, %c13_1927, %c0_1928, %c0_1929] : memref<4x16x10x128xf32, #tpu.memory_space<vmem>>, vector<1x1x8x128xf32>
    %2405 = vector.shape_cast %2404 : vector<1x1x8x128xf32> to vector<8x128xf32>
    %2406 = vector.broadcast %2403 : f32 to vector<8x128xf32>
    %2407 = arith.mulf %2406, %2405 : vector<8x128xf32>
    %2408 = arith.addf %2396, %2407 : vector<8x128xf32>
    %c41_1930 = arith.constant 41 : index
    %2409 = memref.load %arg1[%c41_1930] : memref<50xf32, #tpu.memory_space<smem>>
    %c3_1931 = arith.constant 3 : index
    %c13_1932 = arith.constant 13 : index
    %c0_1933 = arith.constant 0 : index
    %c0_1934 = arith.constant 0 : index
    %2410 = vector.load %arg6[%c3_1931, %c13_1932, %c0_1933, %c0_1934] : memref<4x16x10x128xf32, #tpu.memory_space<vmem>>, vector<1x1x8x128xf32>
    %2411 = vector.shape_cast %2410 : vector<1x1x8x128xf32> to vector<8x128xf32>
    %2412 = vector.broadcast %2409 : f32 to vector<8x128xf32>
    %2413 = arith.mulf %2412, %2411 : vector<8x128xf32>
    %2414 = arith.addf %2408, %2413 : vector<8x128xf32>
    %c42_1935 = arith.constant 42 : index
    %2415 = memref.load %arg1[%c42_1935] : memref<50xf32, #tpu.memory_space<smem>>
    %c2_1936 = arith.constant 2 : index
    %c13_1937 = arith.constant 13 : index
    %c1_1938 = arith.constant 1 : index
    %c0_1939 = arith.constant 0 : index
    %2416 = vector.load %arg6[%c2_1936, %c13_1937, %c1_1938, %c0_1939] : memref<4x16x10x128xf32, #tpu.memory_space<vmem>>, vector<1x1x8x128xf32>
    %2417 = vector.shape_cast %2416 : vector<1x1x8x128xf32> to vector<8x128xf32>
    %2418 = vector.broadcast %2415 : f32 to vector<8x128xf32>
    %2419 = arith.mulf %2418, %2417 : vector<8x128xf32>
    %2420 = arith.addf %2414, %2419 : vector<8x128xf32>
    %c43_1940 = arith.constant 43 : index
    %2421 = memref.load %arg1[%c43_1940] : memref<50xf32, #tpu.memory_space<smem>>
    %c3_1941 = arith.constant 3 : index
    %c13_1942 = arith.constant 13 : index
    %c1_1943 = arith.constant 1 : index
    %c0_1944 = arith.constant 0 : index
    %2422 = vector.load %arg6[%c3_1941, %c13_1942, %c1_1943, %c0_1944] : memref<4x16x10x128xf32, #tpu.memory_space<vmem>>, vector<1x1x8x128xf32>
    %2423 = vector.shape_cast %2422 : vector<1x1x8x128xf32> to vector<8x128xf32>
    %2424 = vector.broadcast %2421 : f32 to vector<8x128xf32>
    %2425 = arith.mulf %2424, %2423 : vector<8x128xf32>
    %2426 = arith.addf %2420, %2425 : vector<8x128xf32>
    %c44_1945 = arith.constant 44 : index
    %2427 = memref.load %arg1[%c44_1945] : memref<50xf32, #tpu.memory_space<smem>>
    %c2_1946 = arith.constant 2 : index
    %c13_1947 = arith.constant 13 : index
    %c2_1948 = arith.constant 2 : index
    %c0_1949 = arith.constant 0 : index
    %2428 = vector.load %arg6[%c2_1946, %c13_1947, %c2_1948, %c0_1949] : memref<4x16x10x128xf32, #tpu.memory_space<vmem>>, vector<1x1x8x128xf32>
    %2429 = vector.shape_cast %2428 : vector<1x1x8x128xf32> to vector<8x128xf32>
    %2430 = vector.broadcast %2427 : f32 to vector<8x128xf32>
    %2431 = arith.mulf %2430, %2429 : vector<8x128xf32>
    %2432 = arith.addf %2426, %2431 : vector<8x128xf32>
    %c9_1950 = arith.constant 9 : index
    %2433 = memref.load %arg3[%c9_1950] : memref<10xf32, #tpu.memory_space<smem>>
    %c2_1951 = arith.constant 2 : index
    %c14_1952 = arith.constant 14 : index
    %c1_1953 = arith.constant 1 : index
    %c0_1954 = arith.constant 0 : index
    %2434 = vector.load %arg6[%c2_1951, %c14_1952, %c1_1953, %c0_1954] : memref<4x16x10x128xf32, #tpu.memory_space<vmem>>, vector<1x1x1x128xf32>
    %2435 = vector.shape_cast %2434 : vector<1x1x1x128xf32> to vector<1x128xf32>
    %2436 = vector.broadcast %2433 : f32 to vector<1x128xf32>
    %2437 = arith.mulf %2436, %2435 : vector<1x128xf32>
    %2438 = arith.subf %2402, %2437 : vector<1x128xf32>
    %c45_1955 = arith.constant 45 : index
    %2439 = memref.load %arg1[%c45_1955] : memref<50xf32, #tpu.memory_space<smem>>
    %c2_1956 = arith.constant 2 : index
    %c14_1957 = arith.constant 14 : index
    %c0_1958 = arith.constant 0 : index
    %c0_1959 = arith.constant 0 : index
    %2440 = vector.load %arg6[%c2_1956, %c14_1957, %c0_1958, %c0_1959] : memref<4x16x10x128xf32, #tpu.memory_space<vmem>>, vector<1x1x8x128xf32>
    %2441 = vector.shape_cast %2440 : vector<1x1x8x128xf32> to vector<8x128xf32>
    %2442 = vector.broadcast %2439 : f32 to vector<8x128xf32>
    %2443 = arith.mulf %2442, %2441 : vector<8x128xf32>
    %2444 = arith.addf %2432, %2443 : vector<8x128xf32>
    %c46_1960 = arith.constant 46 : index
    %2445 = memref.load %arg1[%c46_1960] : memref<50xf32, #tpu.memory_space<smem>>
    %c3_1961 = arith.constant 3 : index
    %c14_1962 = arith.constant 14 : index
    %c0_1963 = arith.constant 0 : index
    %c0_1964 = arith.constant 0 : index
    %2446 = vector.load %arg6[%c3_1961, %c14_1962, %c0_1963, %c0_1964] : memref<4x16x10x128xf32, #tpu.memory_space<vmem>>, vector<1x1x8x128xf32>
    %2447 = vector.shape_cast %2446 : vector<1x1x8x128xf32> to vector<8x128xf32>
    %2448 = vector.broadcast %2445 : f32 to vector<8x128xf32>
    %2449 = arith.mulf %2448, %2447 : vector<8x128xf32>
    %2450 = arith.addf %2444, %2449 : vector<8x128xf32>
    %c47_1965 = arith.constant 47 : index
    %2451 = memref.load %arg1[%c47_1965] : memref<50xf32, #tpu.memory_space<smem>>
    %c2_1966 = arith.constant 2 : index
    %c14_1967 = arith.constant 14 : index
    %c1_1968 = arith.constant 1 : index
    %c0_1969 = arith.constant 0 : index
    %2452 = vector.load %arg6[%c2_1966, %c14_1967, %c1_1968, %c0_1969] : memref<4x16x10x128xf32, #tpu.memory_space<vmem>>, vector<1x1x8x128xf32>
    %2453 = vector.shape_cast %2452 : vector<1x1x8x128xf32> to vector<8x128xf32>
    %2454 = vector.broadcast %2451 : f32 to vector<8x128xf32>
    %2455 = arith.mulf %2454, %2453 : vector<8x128xf32>
    %2456 = arith.addf %2450, %2455 : vector<8x128xf32>
    %c48_1970 = arith.constant 48 : index
    %2457 = memref.load %arg1[%c48_1970] : memref<50xf32, #tpu.memory_space<smem>>
    %c3_1971 = arith.constant 3 : index
    %c14_1972 = arith.constant 14 : index
    %c1_1973 = arith.constant 1 : index
    %c0_1974 = arith.constant 0 : index
    %2458 = vector.load %arg6[%c3_1971, %c14_1972, %c1_1973, %c0_1974] : memref<4x16x10x128xf32, #tpu.memory_space<vmem>>, vector<1x1x8x128xf32>
    %2459 = vector.shape_cast %2458 : vector<1x1x8x128xf32> to vector<8x128xf32>
    %2460 = vector.broadcast %2457 : f32 to vector<8x128xf32>
    %2461 = arith.mulf %2460, %2459 : vector<8x128xf32>
    %2462 = arith.addf %2456, %2461 : vector<8x128xf32>
    %c49_1975 = arith.constant 49 : index
    %2463 = memref.load %arg1[%c49_1975] : memref<50xf32, #tpu.memory_space<smem>>
    %c2_1976 = arith.constant 2 : index
    %c14_1977 = arith.constant 14 : index
    %c2_1978 = arith.constant 2 : index
    %c0_1979 = arith.constant 0 : index
    %2464 = vector.load %arg6[%c2_1976, %c14_1977, %c2_1978, %c0_1979] : memref<4x16x10x128xf32, #tpu.memory_space<vmem>>, vector<1x1x8x128xf32>
    %2465 = vector.shape_cast %2464 : vector<1x1x8x128xf32> to vector<8x128xf32>
    %2466 = vector.broadcast %2463 : f32 to vector<8x128xf32>
    %2467 = arith.mulf %2466, %2465 : vector<8x128xf32>
    %2468 = arith.addf %2462, %2467 : vector<8x128xf32>
    %2469 = vector.broadcast %2438 : vector<1x128xf32> to vector<8x128xf32>
    %2470 = arith.addf %2468, %2469 : vector<8x128xf32>
    %2471 = arith.select %2, %2470, %2468 : vector<8x128xi1>, vector<8x128xf32>
    %cst_1980 = arith.constant 0.000000e+00 : f32
    %2472 = vector.broadcast %cst_1980 : f32 to vector<8x128xf32>
    %2473 = arith.maximumf %2471, %2472 : vector<8x128xf32>
    %c0_1981 = arith.constant 0 : index
    %c6_1982 = arith.constant 6 : index
    %c0_1983 = arith.constant 0 : index
    %c0_1984 = arith.constant 0 : index
    %2474 = vector.load %arg7[%c0_1981, %c6_1982, %c0_1983, %c0_1984] : memref<1x8x8x128xf32, #tpu.memory_space<vmem>>, vector<1x1x8x128xf32>
    %2475 = vector.shape_cast %2474 : vector<1x1x8x128xf32> to vector<8x128xf32>
    %2476 = vector.shape_cast %2473 : vector<8x128xf32> to vector<1x1x8x128xf32>
    tpu.vector_store %arg7[%c0_1981, %c6_1982, %c0_1983, %c0_1984], %2476 {strides = array<i32>} : memref<1x8x8x128xf32, #tpu.memory_space<vmem>>, vector<1x1x8x128xf32>,
    %c0_1985 = arith.constant 0 : index
    %2477 = memref.load %arg5[%c0_1985] : memref<4xf32, #tpu.memory_space<smem>>
    %c2_1986 = arith.constant 2 : index
    %2478 = memref.load %arg5[%c2_1986] : memref<4xf32, #tpu.memory_space<smem>>
    %c0_1987 = arith.constant 0 : index
    %2479 = memref.load %arg5[%c0_1987] : memref<4xf32, #tpu.memory_space<smem>>
    %2480 = arith.subf %2478, %2479 : f32
    %2481 = vector.broadcast %2477 : f32 to vector<8x128xf32>
    %2482 = vector.broadcast %2480 : f32 to vector<1x128xf32>
    %c0_1988 = arith.constant 0 : index
    %2483 = memref.load %arg3[%c0_1988] : memref<10xf32, #tpu.memory_space<smem>>
    %c0_1989 = arith.constant 0 : index
    %c12_1990 = arith.constant 12 : index
    %c1_1991 = arith.constant 1 : index
    %c0_1992 = arith.constant 0 : index
    %2484 = vector.load %arg6[%c0_1989, %c12_1990, %c1_1991, %c0_1992] : memref<4x16x10x128xf32, #tpu.memory_space<vmem>>, vector<1x1x1x128xf32>
    %2485 = vector.shape_cast %2484 : vector<1x1x1x128xf32> to vector<1x128xf32>
    %2486 = vector.broadcast %2483 : f32 to vector<1x128xf32>
    %2487 = arith.mulf %2486, %2485 : vector<1x128xf32>
    %2488 = arith.subf %2482, %2487 : vector<1x128xf32>
    %c0_1993 = arith.constant 0 : index
    %2489 = memref.load %arg1[%c0_1993] : memref<50xf32, #tpu.memory_space<smem>>
    %c0_1994 = arith.constant 0 : index
    %c12_1995 = arith.constant 12 : index
    %c0_1996 = arith.constant 0 : index
    %c0_1997 = arith.constant 0 : index
    %2490 = vector.load %arg6[%c0_1994, %c12_1995, %c0_1996, %c0_1997] : memref<4x16x10x128xf32, #tpu.memory_space<vmem>>, vector<1x1x8x128xf32>
    %2491 = vector.shape_cast %2490 : vector<1x1x8x128xf32> to vector<8x128xf32>
    %2492 = vector.broadcast %2489 : f32 to vector<8x128xf32>
    %2493 = arith.mulf %2492, %2491 : vector<8x128xf32>
    %2494 = arith.addf %2481, %2493 : vector<8x128xf32>
    %c1_1998 = arith.constant 1 : index
    %2495 = memref.load %arg1[%c1_1998] : memref<50xf32, #tpu.memory_space<smem>>
    %c1_1999 = arith.constant 1 : index
    %c12_2000 = arith.constant 12 : index
    %c0_2001 = arith.constant 0 : index
    %c0_2002 = arith.constant 0 : index
    %2496 = vector.load %arg6[%c1_1999, %c12_2000, %c0_2001, %c0_2002] : memref<4x16x10x128xf32, #tpu.memory_space<vmem>>, vector<1x1x8x128xf32>
    %2497 = vector.shape_cast %2496 : vector<1x1x8x128xf32> to vector<8x128xf32>
    %2498 = vector.broadcast %2495 : f32 to vector<8x128xf32>
    %2499 = arith.mulf %2498, %2497 : vector<8x128xf32>
    %2500 = arith.addf %2494, %2499 : vector<8x128xf32>
    %c2_2003 = arith.constant 2 : index
    %2501 = memref.load %arg1[%c2_2003] : memref<50xf32, #tpu.memory_space<smem>>
    %c0_2004 = arith.constant 0 : index
    %c12_2005 = arith.constant 12 : index
    %c1_2006 = arith.constant 1 : index
    %c0_2007 = arith.constant 0 : index
    %2502 = vector.load %arg6[%c0_2004, %c12_2005, %c1_2006, %c0_2007] : memref<4x16x10x128xf32, #tpu.memory_space<vmem>>, vector<1x1x8x128xf32>
    %2503 = vector.shape_cast %2502 : vector<1x1x8x128xf32> to vector<8x128xf32>
    %2504 = vector.broadcast %2501 : f32 to vector<8x128xf32>
    %2505 = arith.mulf %2504, %2503 : vector<8x128xf32>
    %2506 = arith.addf %2500, %2505 : vector<8x128xf32>
    %c3_2008 = arith.constant 3 : index
    %2507 = memref.load %arg1[%c3_2008] : memref<50xf32, #tpu.memory_space<smem>>
    %c1_2009 = arith.constant 1 : index
    %c12_2010 = arith.constant 12 : index
    %c1_2011 = arith.constant 1 : index
    %c0_2012 = arith.constant 0 : index
    %2508 = vector.load %arg6[%c1_2009, %c12_2010, %c1_2011, %c0_2012] : memref<4x16x10x128xf32, #tpu.memory_space<vmem>>, vector<1x1x8x128xf32>
    %2509 = vector.shape_cast %2508 : vector<1x1x8x128xf32> to vector<8x128xf32>
    %2510 = vector.broadcast %2507 : f32 to vector<8x128xf32>
    %2511 = arith.mulf %2510, %2509 : vector<8x128xf32>
    %2512 = arith.addf %2506, %2511 : vector<8x128xf32>
    %c4_2013 = arith.constant 4 : index
    %2513 = memref.load %arg1[%c4_2013] : memref<50xf32, #tpu.memory_space<smem>>
    %c0_2014 = arith.constant 0 : index
    %c12_2015 = arith.constant 12 : index
    %c2_2016 = arith.constant 2 : index
    %c0_2017 = arith.constant 0 : index
    %2514 = vector.load %arg6[%c0_2014, %c12_2015, %c2_2016, %c0_2017] : memref<4x16x10x128xf32, #tpu.memory_space<vmem>>, vector<1x1x8x128xf32>
    %2515 = vector.shape_cast %2514 : vector<1x1x8x128xf32> to vector<8x128xf32>
    %2516 = vector.broadcast %2513 : f32 to vector<8x128xf32>
    %2517 = arith.mulf %2516, %2515 : vector<8x128xf32>
    %2518 = arith.addf %2512, %2517 : vector<8x128xf32>
    %c1_2018 = arith.constant 1 : index
    %2519 = memref.load %arg3[%c1_2018] : memref<10xf32, #tpu.memory_space<smem>>
    %c0_2019 = arith.constant 0 : index
    %c13_2020 = arith.constant 13 : index
    %c1_2021 = arith.constant 1 : index
    %c0_2022 = arith.constant 0 : index
    %2520 = vector.load %arg6[%c0_2019, %c13_2020, %c1_2021, %c0_2022] : memref<4x16x10x128xf32, #tpu.memory_space<vmem>>, vector<1x1x1x128xf32>
    %2521 = vector.shape_cast %2520 : vector<1x1x1x128xf32> to vector<1x128xf32>
    %2522 = vector.broadcast %2519 : f32 to vector<1x128xf32>
    %2523 = arith.mulf %2522, %2521 : vector<1x128xf32>
    %2524 = arith.subf %2488, %2523 : vector<1x128xf32>
    %c5_2023 = arith.constant 5 : index
    %2525 = memref.load %arg1[%c5_2023] : memref<50xf32, #tpu.memory_space<smem>>
    %c0_2024 = arith.constant 0 : index
    %c13_2025 = arith.constant 13 : index
    %c0_2026 = arith.constant 0 : index
    %c0_2027 = arith.constant 0 : index
    %2526 = vector.load %arg6[%c0_2024, %c13_2025, %c0_2026, %c0_2027] : memref<4x16x10x128xf32, #tpu.memory_space<vmem>>, vector<1x1x8x128xf32>
    %2527 = vector.shape_cast %2526 : vector<1x1x8x128xf32> to vector<8x128xf32>
    %2528 = vector.broadcast %2525 : f32 to vector<8x128xf32>
    %2529 = arith.mulf %2528, %2527 : vector<8x128xf32>
    %2530 = arith.addf %2518, %2529 : vector<8x128xf32>
    %c6_2028 = arith.constant 6 : index
    %2531 = memref.load %arg1[%c6_2028] : memref<50xf32, #tpu.memory_space<smem>>
    %c1_2029 = arith.constant 1 : index
    %c13_2030 = arith.constant 13 : index
    %c0_2031 = arith.constant 0 : index
    %c0_2032 = arith.constant 0 : index
    %2532 = vector.load %arg6[%c1_2029, %c13_2030, %c0_2031, %c0_2032] : memref<4x16x10x128xf32, #tpu.memory_space<vmem>>, vector<1x1x8x128xf32>
    %2533 = vector.shape_cast %2532 : vector<1x1x8x128xf32> to vector<8x128xf32>
    %2534 = vector.broadcast %2531 : f32 to vector<8x128xf32>
    %2535 = arith.mulf %2534, %2533 : vector<8x128xf32>
    %2536 = arith.addf %2530, %2535 : vector<8x128xf32>
    %c7_2033 = arith.constant 7 : index
    %2537 = memref.load %arg1[%c7_2033] : memref<50xf32, #tpu.memory_space<smem>>
    %c0_2034 = arith.constant 0 : index
    %c13_2035 = arith.constant 13 : index
    %c1_2036 = arith.constant 1 : index
    %c0_2037 = arith.constant 0 : index
    %2538 = vector.load %arg6[%c0_2034, %c13_2035, %c1_2036, %c0_2037] : memref<4x16x10x128xf32, #tpu.memory_space<vmem>>, vector<1x1x8x128xf32>
    %2539 = vector.shape_cast %2538 : vector<1x1x8x128xf32> to vector<8x128xf32>
    %2540 = vector.broadcast %2537 : f32 to vector<8x128xf32>
    %2541 = arith.mulf %2540, %2539 : vector<8x128xf32>
    %2542 = arith.addf %2536, %2541 : vector<8x128xf32>
    %c8_2038 = arith.constant 8 : index
    %2543 = memref.load %arg1[%c8_2038] : memref<50xf32, #tpu.memory_space<smem>>
    %c1_2039 = arith.constant 1 : index
    %c13_2040 = arith.constant 13 : index
    %c1_2041 = arith.constant 1 : index
    %c0_2042 = arith.constant 0 : index
    %2544 = vector.load %arg6[%c1_2039, %c13_2040, %c1_2041, %c0_2042] : memref<4x16x10x128xf32, #tpu.memory_space<vmem>>, vector<1x1x8x128xf32>
    %2545 = vector.shape_cast %2544 : vector<1x1x8x128xf32> to vector<8x128xf32>
    %2546 = vector.broadcast %2543 : f32 to vector<8x128xf32>
    %2547 = arith.mulf %2546, %2545 : vector<8x128xf32>
    %2548 = arith.addf %2542, %2547 : vector<8x128xf32>
    %c9_2043 = arith.constant 9 : index
    %2549 = memref.load %arg1[%c9_2043] : memref<50xf32, #tpu.memory_space<smem>>
    %c0_2044 = arith.constant 0 : index
    %c13_2045 = arith.constant 13 : index
    %c2_2046 = arith.constant 2 : index
    %c0_2047 = arith.constant 0 : index
    %2550 = vector.load %arg6[%c0_2044, %c13_2045, %c2_2046, %c0_2047] : memref<4x16x10x128xf32, #tpu.memory_space<vmem>>, vector<1x1x8x128xf32>
    %2551 = vector.shape_cast %2550 : vector<1x1x8x128xf32> to vector<8x128xf32>
    %2552 = vector.broadcast %2549 : f32 to vector<8x128xf32>
    %2553 = arith.mulf %2552, %2551 : vector<8x128xf32>
    %2554 = arith.addf %2548, %2553 : vector<8x128xf32>
    %c2_2048 = arith.constant 2 : index
    %2555 = memref.load %arg3[%c2_2048] : memref<10xf32, #tpu.memory_space<smem>>
    %c0_2049 = arith.constant 0 : index
    %c14_2050 = arith.constant 14 : index
    %c1_2051 = arith.constant 1 : index
    %c0_2052 = arith.constant 0 : index
    %2556 = vector.load %arg6[%c0_2049, %c14_2050, %c1_2051, %c0_2052] : memref<4x16x10x128xf32, #tpu.memory_space<vmem>>, vector<1x1x1x128xf32>
    %2557 = vector.shape_cast %2556 : vector<1x1x1x128xf32> to vector<1x128xf32>
    %2558 = vector.broadcast %2555 : f32 to vector<1x128xf32>
    %2559 = arith.mulf %2558, %2557 : vector<1x128xf32>
    %2560 = arith.subf %2524, %2559 : vector<1x128xf32>
    %c10_2053 = arith.constant 10 : index
    %2561 = memref.load %arg1[%c10_2053] : memref<50xf32, #tpu.memory_space<smem>>
    %c0_2054 = arith.constant 0 : index
    %c14_2055 = arith.constant 14 : index
    %c0_2056 = arith.constant 0 : index
    %c0_2057 = arith.constant 0 : index
    %2562 = vector.load %arg6[%c0_2054, %c14_2055, %c0_2056, %c0_2057] : memref<4x16x10x128xf32, #tpu.memory_space<vmem>>, vector<1x1x8x128xf32>
    %2563 = vector.shape_cast %2562 : vector<1x1x8x128xf32> to vector<8x128xf32>
    %2564 = vector.broadcast %2561 : f32 to vector<8x128xf32>
    %2565 = arith.mulf %2564, %2563 : vector<8x128xf32>
    %2566 = arith.addf %2554, %2565 : vector<8x128xf32>
    %c11_2058 = arith.constant 11 : index
    %2567 = memref.load %arg1[%c11_2058] : memref<50xf32, #tpu.memory_space<smem>>
    %c1_2059 = arith.constant 1 : index
    %c14_2060 = arith.constant 14 : index
    %c0_2061 = arith.constant 0 : index
    %c0_2062 = arith.constant 0 : index
    %2568 = vector.load %arg6[%c1_2059, %c14_2060, %c0_2061, %c0_2062] : memref<4x16x10x128xf32, #tpu.memory_space<vmem>>, vector<1x1x8x128xf32>
    %2569 = vector.shape_cast %2568 : vector<1x1x8x128xf32> to vector<8x128xf32>
    %2570 = vector.broadcast %2567 : f32 to vector<8x128xf32>
    %2571 = arith.mulf %2570, %2569 : vector<8x128xf32>
    %2572 = arith.addf %2566, %2571 : vector<8x128xf32>
    %c12_2063 = arith.constant 12 : index
    %2573 = memref.load %arg1[%c12_2063] : memref<50xf32, #tpu.memory_space<smem>>
    %c0_2064 = arith.constant 0 : index
    %c14_2065 = arith.constant 14 : index
    %c1_2066 = arith.constant 1 : index
    %c0_2067 = arith.constant 0 : index
    %2574 = vector.load %arg6[%c0_2064, %c14_2065, %c1_2066, %c0_2067] : memref<4x16x10x128xf32, #tpu.memory_space<vmem>>, vector<1x1x8x128xf32>
    %2575 = vector.shape_cast %2574 : vector<1x1x8x128xf32> to vector<8x128xf32>
    %2576 = vector.broadcast %2573 : f32 to vector<8x128xf32>
    %2577 = arith.mulf %2576, %2575 : vector<8x128xf32>
    %2578 = arith.addf %2572, %2577 : vector<8x128xf32>
    %c13_2068 = arith.constant 13 : index
    %2579 = memref.load %arg1[%c13_2068] : memref<50xf32, #tpu.memory_space<smem>>
    %c1_2069 = arith.constant 1 : index
    %c14_2070 = arith.constant 14 : index
    %c1_2071 = arith.constant 1 : index
    %c0_2072 = arith.constant 0 : index
    %2580 = vector.load %arg6[%c1_2069, %c14_2070, %c1_2071, %c0_2072] : memref<4x16x10x128xf32, #tpu.memory_space<vmem>>, vector<1x1x8x128xf32>
    %2581 = vector.shape_cast %2580 : vector<1x1x8x128xf32> to vector<8x128xf32>
    %2582 = vector.broadcast %2579 : f32 to vector<8x128xf32>
    %2583 = arith.mulf %2582, %2581 : vector<8x128xf32>
    %2584 = arith.addf %2578, %2583 : vector<8x128xf32>
    %c14_2073 = arith.constant 14 : index
    %2585 = memref.load %arg1[%c14_2073] : memref<50xf32, #tpu.memory_space<smem>>
    %c0_2074 = arith.constant 0 : index
    %c14_2075 = arith.constant 14 : index
    %c2_2076 = arith.constant 2 : index
    %c0_2077 = arith.constant 0 : index
    %2586 = vector.load %arg6[%c0_2074, %c14_2075, %c2_2076, %c0_2077] : memref<4x16x10x128xf32, #tpu.memory_space<vmem>>, vector<1x1x8x128xf32>
    %2587 = vector.shape_cast %2586 : vector<1x1x8x128xf32> to vector<8x128xf32>
    %2588 = vector.broadcast %2585 : f32 to vector<8x128xf32>
    %2589 = arith.mulf %2588, %2587 : vector<8x128xf32>
    %2590 = arith.addf %2584, %2589 : vector<8x128xf32>
    %c3_2078 = arith.constant 3 : index
    %2591 = memref.load %arg3[%c3_2078] : memref<10xf32, #tpu.memory_space<smem>>
    %c0_2079 = arith.constant 0 : index
    %c15_2080 = arith.constant 15 : index
    %c1_2081 = arith.constant 1 : index
    %c0_2082 = arith.constant 0 : index
    %2592 = vector.load %arg6[%c0_2079, %c15_2080, %c1_2081, %c0_2082] : memref<4x16x10x128xf32, #tpu.memory_space<vmem>>, vector<1x1x1x128xf32>
    %2593 = vector.shape_cast %2592 : vector<1x1x1x128xf32> to vector<1x128xf32>
    %2594 = vector.broadcast %2591 : f32 to vector<1x128xf32>
    %2595 = arith.mulf %2594, %2593 : vector<1x128xf32>
    %2596 = arith.subf %2560, %2595 : vector<1x128xf32>
    %c15_2083 = arith.constant 15 : index
    %2597 = memref.load %arg1[%c15_2083] : memref<50xf32, #tpu.memory_space<smem>>
    %c0_2084 = arith.constant 0 : index
    %c15_2085 = arith.constant 15 : index
    %c0_2086 = arith.constant 0 : index
    %c0_2087 = arith.constant 0 : index
    %2598 = vector.load %arg6[%c0_2084, %c15_2085, %c0_2086, %c0_2087] : memref<4x16x10x128xf32, #tpu.memory_space<vmem>>, vector<1x1x8x128xf32>
    %2599 = vector.shape_cast %2598 : vector<1x1x8x128xf32> to vector<8x128xf32>
    %2600 = vector.broadcast %2597 : f32 to vector<8x128xf32>
    %2601 = arith.mulf %2600, %2599 : vector<8x128xf32>
    %2602 = arith.addf %2590, %2601 : vector<8x128xf32>
    %c16_2088 = arith.constant 16 : index
    %2603 = memref.load %arg1[%c16_2088] : memref<50xf32, #tpu.memory_space<smem>>
    %c1_2089 = arith.constant 1 : index
    %c15_2090 = arith.constant 15 : index
    %c0_2091 = arith.constant 0 : index
    %c0_2092 = arith.constant 0 : index
    %2604 = vector.load %arg6[%c1_2089, %c15_2090, %c0_2091, %c0_2092] : memref<4x16x10x128xf32, #tpu.memory_space<vmem>>, vector<1x1x8x128xf32>
    %2605 = vector.shape_cast %2604 : vector<1x1x8x128xf32> to vector<8x128xf32>
    %2606 = vector.broadcast %2603 : f32 to vector<8x128xf32>
    %2607 = arith.mulf %2606, %2605 : vector<8x128xf32>
    %2608 = arith.addf %2602, %2607 : vector<8x128xf32>
    %c17_2093 = arith.constant 17 : index
    %2609 = memref.load %arg1[%c17_2093] : memref<50xf32, #tpu.memory_space<smem>>
    %c0_2094 = arith.constant 0 : index
    %c15_2095 = arith.constant 15 : index
    %c1_2096 = arith.constant 1 : index
    %c0_2097 = arith.constant 0 : index
    %2610 = vector.load %arg6[%c0_2094, %c15_2095, %c1_2096, %c0_2097] : memref<4x16x10x128xf32, #tpu.memory_space<vmem>>, vector<1x1x8x128xf32>
    %2611 = vector.shape_cast %2610 : vector<1x1x8x128xf32> to vector<8x128xf32>
    %2612 = vector.broadcast %2609 : f32 to vector<8x128xf32>
    %2613 = arith.mulf %2612, %2611 : vector<8x128xf32>
    %2614 = arith.addf %2608, %2613 : vector<8x128xf32>
    %c18_2098 = arith.constant 18 : index
    %2615 = memref.load %arg1[%c18_2098] : memref<50xf32, #tpu.memory_space<smem>>
    %c1_2099 = arith.constant 1 : index
    %c15_2100 = arith.constant 15 : index
    %c1_2101 = arith.constant 1 : index
    %c0_2102 = arith.constant 0 : index
    %2616 = vector.load %arg6[%c1_2099, %c15_2100, %c1_2101, %c0_2102] : memref<4x16x10x128xf32, #tpu.memory_space<vmem>>, vector<1x1x8x128xf32>
    %2617 = vector.shape_cast %2616 : vector<1x1x8x128xf32> to vector<8x128xf32>
    %2618 = vector.broadcast %2615 : f32 to vector<8x128xf32>
    %2619 = arith.mulf %2618, %2617 : vector<8x128xf32>
    %2620 = arith.addf %2614, %2619 : vector<8x128xf32>
    %c19_2103 = arith.constant 19 : index
    %2621 = memref.load %arg1[%c19_2103] : memref<50xf32, #tpu.memory_space<smem>>
    %c0_2104 = arith.constant 0 : index
    %c15_2105 = arith.constant 15 : index
    %c2_2106 = arith.constant 2 : index
    %c0_2107 = arith.constant 0 : index
    %2622 = vector.load %arg6[%c0_2104, %c15_2105, %c2_2106, %c0_2107] : memref<4x16x10x128xf32, #tpu.memory_space<vmem>>, vector<1x1x8x128xf32>
    %2623 = vector.shape_cast %2622 : vector<1x1x8x128xf32> to vector<8x128xf32>
    %2624 = vector.broadcast %2621 : f32 to vector<8x128xf32>
    %2625 = arith.mulf %2624, %2623 : vector<8x128xf32>
    %2626 = arith.addf %2620, %2625 : vector<8x128xf32>
    %c5_2108 = arith.constant 5 : index
    %2627 = memref.load %arg3[%c5_2108] : memref<10xf32, #tpu.memory_space<smem>>
    %c2_2109 = arith.constant 2 : index
    %c12_2110 = arith.constant 12 : index
    %c1_2111 = arith.constant 1 : index
    %c0_2112 = arith.constant 0 : index
    %2628 = vector.load %arg6[%c2_2109, %c12_2110, %c1_2111, %c0_2112] : memref<4x16x10x128xf32, #tpu.memory_space<vmem>>, vector<1x1x1x128xf32>
    %2629 = vector.shape_cast %2628 : vector<1x1x1x128xf32> to vector<1x128xf32>
    %2630 = vector.broadcast %2627 : f32 to vector<1x128xf32>
    %2631 = arith.mulf %2630, %2629 : vector<1x128xf32>
    %2632 = arith.subf %2596, %2631 : vector<1x128xf32>
    %c25_2113 = arith.constant 25 : index
    %2633 = memref.load %arg1[%c25_2113] : memref<50xf32, #tpu.memory_space<smem>>
    %c2_2114 = arith.constant 2 : index
    %c12_2115 = arith.constant 12 : index
    %c0_2116 = arith.constant 0 : index
    %c0_2117 = arith.constant 0 : index
    %2634 = vector.load %arg6[%c2_2114, %c12_2115, %c0_2116, %c0_2117] : memref<4x16x10x128xf32, #tpu.memory_space<vmem>>, vector<1x1x8x128xf32>
    %2635 = vector.shape_cast %2634 : vector<1x1x8x128xf32> to vector<8x128xf32>
    %2636 = vector.broadcast %2633 : f32 to vector<8x128xf32>
    %2637 = arith.mulf %2636, %2635 : vector<8x128xf32>
    %2638 = arith.addf %2626, %2637 : vector<8x128xf32>
    %c26_2118 = arith.constant 26 : index
    %2639 = memref.load %arg1[%c26_2118] : memref<50xf32, #tpu.memory_space<smem>>
    %c3_2119 = arith.constant 3 : index
    %c12_2120 = arith.constant 12 : index
    %c0_2121 = arith.constant 0 : index
    %c0_2122 = arith.constant 0 : index
    %2640 = vector.load %arg6[%c3_2119, %c12_2120, %c0_2121, %c0_2122] : memref<4x16x10x128xf32, #tpu.memory_space<vmem>>, vector<1x1x8x128xf32>
    %2641 = vector.shape_cast %2640 : vector<1x1x8x128xf32> to vector<8x128xf32>
    %2642 = vector.broadcast %2639 : f32 to vector<8x128xf32>
    %2643 = arith.mulf %2642, %2641 : vector<8x128xf32>
    %2644 = arith.addf %2638, %2643 : vector<8x128xf32>
    %c27_2123 = arith.constant 27 : index
    %2645 = memref.load %arg1[%c27_2123] : memref<50xf32, #tpu.memory_space<smem>>
    %c2_2124 = arith.constant 2 : index
    %c12_2125 = arith.constant 12 : index
    %c1_2126 = arith.constant 1 : index
    %c0_2127 = arith.constant 0 : index
    %2646 = vector.load %arg6[%c2_2124, %c12_2125, %c1_2126, %c0_2127] : memref<4x16x10x128xf32, #tpu.memory_space<vmem>>, vector<1x1x8x128xf32>
    %2647 = vector.shape_cast %2646 : vector<1x1x8x128xf32> to vector<8x128xf32>
    %2648 = vector.broadcast %2645 : f32 to vector<8x128xf32>
    %2649 = arith.mulf %2648, %2647 : vector<8x128xf32>
    %2650 = arith.addf %2644, %2649 : vector<8x128xf32>
    %c28_2128 = arith.constant 28 : index
    %2651 = memref.load %arg1[%c28_2128] : memref<50xf32, #tpu.memory_space<smem>>
    %c3_2129 = arith.constant 3 : index
    %c12_2130 = arith.constant 12 : index
    %c1_2131 = arith.constant 1 : index
    %c0_2132 = arith.constant 0 : index
    %2652 = vector.load %arg6[%c3_2129, %c12_2130, %c1_2131, %c0_2132] : memref<4x16x10x128xf32, #tpu.memory_space<vmem>>, vector<1x1x8x128xf32>
    %2653 = vector.shape_cast %2652 : vector<1x1x8x128xf32> to vector<8x128xf32>
    %2654 = vector.broadcast %2651 : f32 to vector<8x128xf32>
    %2655 = arith.mulf %2654, %2653 : vector<8x128xf32>
    %2656 = arith.addf %2650, %2655 : vector<8x128xf32>
    %c29_2133 = arith.constant 29 : index
    %2657 = memref.load %arg1[%c29_2133] : memref<50xf32, #tpu.memory_space<smem>>
    %c2_2134 = arith.constant 2 : index
    %c12_2135 = arith.constant 12 : index
    %c2_2136 = arith.constant 2 : index
    %c0_2137 = arith.constant 0 : index
    %2658 = vector.load %arg6[%c2_2134, %c12_2135, %c2_2136, %c0_2137] : memref<4x16x10x128xf32, #tpu.memory_space<vmem>>, vector<1x1x8x128xf32>
    %2659 = vector.shape_cast %2658 : vector<1x1x8x128xf32> to vector<8x128xf32>
    %2660 = vector.broadcast %2657 : f32 to vector<8x128xf32>
    %2661 = arith.mulf %2660, %2659 : vector<8x128xf32>
    %2662 = arith.addf %2656, %2661 : vector<8x128xf32>
    %c6_2138 = arith.constant 6 : index
    %2663 = memref.load %arg3[%c6_2138] : memref<10xf32, #tpu.memory_space<smem>>
    %c2_2139 = arith.constant 2 : index
    %c13_2140 = arith.constant 13 : index
    %c1_2141 = arith.constant 1 : index
    %c0_2142 = arith.constant 0 : index
    %2664 = vector.load %arg6[%c2_2139, %c13_2140, %c1_2141, %c0_2142] : memref<4x16x10x128xf32, #tpu.memory_space<vmem>>, vector<1x1x1x128xf32>
    %2665 = vector.shape_cast %2664 : vector<1x1x1x128xf32> to vector<1x128xf32>
    %2666 = vector.broadcast %2663 : f32 to vector<1x128xf32>
    %2667 = arith.mulf %2666, %2665 : vector<1x128xf32>
    %2668 = arith.subf %2632, %2667 : vector<1x128xf32>
    %c30_2143 = arith.constant 30 : index
    %2669 = memref.load %arg1[%c30_2143] : memref<50xf32, #tpu.memory_space<smem>>
    %c2_2144 = arith.constant 2 : index
    %c13_2145 = arith.constant 13 : index
    %c0_2146 = arith.constant 0 : index
    %c0_2147 = arith.constant 0 : index
    %2670 = vector.load %arg6[%c2_2144, %c13_2145, %c0_2146, %c0_2147] : memref<4x16x10x128xf32, #tpu.memory_space<vmem>>, vector<1x1x8x128xf32>
    %2671 = vector.shape_cast %2670 : vector<1x1x8x128xf32> to vector<8x128xf32>
    %2672 = vector.broadcast %2669 : f32 to vector<8x128xf32>
    %2673 = arith.mulf %2672, %2671 : vector<8x128xf32>
    %2674 = arith.addf %2662, %2673 : vector<8x128xf32>
    %c31_2148 = arith.constant 31 : index
    %2675 = memref.load %arg1[%c31_2148] : memref<50xf32, #tpu.memory_space<smem>>
    %c3_2149 = arith.constant 3 : index
    %c13_2150 = arith.constant 13 : index
    %c0_2151 = arith.constant 0 : index
    %c0_2152 = arith.constant 0 : index
    %2676 = vector.load %arg6[%c3_2149, %c13_2150, %c0_2151, %c0_2152] : memref<4x16x10x128xf32, #tpu.memory_space<vmem>>, vector<1x1x8x128xf32>
    %2677 = vector.shape_cast %2676 : vector<1x1x8x128xf32> to vector<8x128xf32>
    %2678 = vector.broadcast %2675 : f32 to vector<8x128xf32>
    %2679 = arith.mulf %2678, %2677 : vector<8x128xf32>
    %2680 = arith.addf %2674, %2679 : vector<8x128xf32>
    %c32_2153 = arith.constant 32 : index
    %2681 = memref.load %arg1[%c32_2153] : memref<50xf32, #tpu.memory_space<smem>>
    %c2_2154 = arith.constant 2 : index
    %c13_2155 = arith.constant 13 : index
    %c1_2156 = arith.constant 1 : index
    %c0_2157 = arith.constant 0 : index
    %2682 = vector.load %arg6[%c2_2154, %c13_2155, %c1_2156, %c0_2157] : memref<4x16x10x128xf32, #tpu.memory_space<vmem>>, vector<1x1x8x128xf32>
    %2683 = vector.shape_cast %2682 : vector<1x1x8x128xf32> to vector<8x128xf32>
    %2684 = vector.broadcast %2681 : f32 to vector<8x128xf32>
    %2685 = arith.mulf %2684, %2683 : vector<8x128xf32>
    %2686 = arith.addf %2680, %2685 : vector<8x128xf32>
    %c33_2158 = arith.constant 33 : index
    %2687 = memref.load %arg1[%c33_2158] : memref<50xf32, #tpu.memory_space<smem>>
    %c3_2159 = arith.constant 3 : index
    %c13_2160 = arith.constant 13 : index
    %c1_2161 = arith.constant 1 : index
    %c0_2162 = arith.constant 0 : index
    %2688 = vector.load %arg6[%c3_2159, %c13_2160, %c1_2161, %c0_2162] : memref<4x16x10x128xf32, #tpu.memory_space<vmem>>, vector<1x1x8x128xf32>
    %2689 = vector.shape_cast %2688 : vector<1x1x8x128xf32> to vector<8x128xf32>
    %2690 = vector.broadcast %2687 : f32 to vector<8x128xf32>
    %2691 = arith.mulf %2690, %2689 : vector<8x128xf32>
    %2692 = arith.addf %2686, %2691 : vector<8x128xf32>
    %c34_2163 = arith.constant 34 : index
    %2693 = memref.load %arg1[%c34_2163] : memref<50xf32, #tpu.memory_space<smem>>
    %c2_2164 = arith.constant 2 : index
    %c13_2165 = arith.constant 13 : index
    %c2_2166 = arith.constant 2 : index
    %c0_2167 = arith.constant 0 : index
    %2694 = vector.load %arg6[%c2_2164, %c13_2165, %c2_2166, %c0_2167] : memref<4x16x10x128xf32, #tpu.memory_space<vmem>>, vector<1x1x8x128xf32>
    %2695 = vector.shape_cast %2694 : vector<1x1x8x128xf32> to vector<8x128xf32>
    %2696 = vector.broadcast %2693 : f32 to vector<8x128xf32>
    %2697 = arith.mulf %2696, %2695 : vector<8x128xf32>
    %2698 = arith.addf %2692, %2697 : vector<8x128xf32>
    %c7_2168 = arith.constant 7 : index
    %2699 = memref.load %arg3[%c7_2168] : memref<10xf32, #tpu.memory_space<smem>>
    %c2_2169 = arith.constant 2 : index
    %c14_2170 = arith.constant 14 : index
    %c1_2171 = arith.constant 1 : index
    %c0_2172 = arith.constant 0 : index
    %2700 = vector.load %arg6[%c2_2169, %c14_2170, %c1_2171, %c0_2172] : memref<4x16x10x128xf32, #tpu.memory_space<vmem>>, vector<1x1x1x128xf32>
    %2701 = vector.shape_cast %2700 : vector<1x1x1x128xf32> to vector<1x128xf32>
    %2702 = vector.broadcast %2699 : f32 to vector<1x128xf32>
    %2703 = arith.mulf %2702, %2701 : vector<1x128xf32>
    %2704 = arith.subf %2668, %2703 : vector<1x128xf32>
    %c35_2173 = arith.constant 35 : index
    %2705 = memref.load %arg1[%c35_2173] : memref<50xf32, #tpu.memory_space<smem>>
    %c2_2174 = arith.constant 2 : index
    %c14_2175 = arith.constant 14 : index
    %c0_2176 = arith.constant 0 : index
    %c0_2177 = arith.constant 0 : index
    %2706 = vector.load %arg6[%c2_2174, %c14_2175, %c0_2176, %c0_2177] : memref<4x16x10x128xf32, #tpu.memory_space<vmem>>, vector<1x1x8x128xf32>
    %2707 = vector.shape_cast %2706 : vector<1x1x8x128xf32> to vector<8x128xf32>
    %2708 = vector.broadcast %2705 : f32 to vector<8x128xf32>
    %2709 = arith.mulf %2708, %2707 : vector<8x128xf32>
    %2710 = arith.addf %2698, %2709 : vector<8x128xf32>
    %c36_2178 = arith.constant 36 : index
    %2711 = memref.load %arg1[%c36_2178] : memref<50xf32, #tpu.memory_space<smem>>
    %c3_2179 = arith.constant 3 : index
    %c14_2180 = arith.constant 14 : index
    %c0_2181 = arith.constant 0 : index
    %c0_2182 = arith.constant 0 : index
    %2712 = vector.load %arg6[%c3_2179, %c14_2180, %c0_2181, %c0_2182] : memref<4x16x10x128xf32, #tpu.memory_space<vmem>>, vector<1x1x8x128xf32>
    %2713 = vector.shape_cast %2712 : vector<1x1x8x128xf32> to vector<8x128xf32>
    %2714 = vector.broadcast %2711 : f32 to vector<8x128xf32>
    %2715 = arith.mulf %2714, %2713 : vector<8x128xf32>
    %2716 = arith.addf %2710, %2715 : vector<8x128xf32>
    %c37_2183 = arith.constant 37 : index
    %2717 = memref.load %arg1[%c37_2183] : memref<50xf32, #tpu.memory_space<smem>>
    %c2_2184 = arith.constant 2 : index
    %c14_2185 = arith.constant 14 : index
    %c1_2186 = arith.constant 1 : index
    %c0_2187 = arith.constant 0 : index
    %2718 = vector.load %arg6[%c2_2184, %c14_2185, %c1_2186, %c0_2187] : memref<4x16x10x128xf32, #tpu.memory_space<vmem>>, vector<1x1x8x128xf32>
    %2719 = vector.shape_cast %2718 : vector<1x1x8x128xf32> to vector<8x128xf32>
    %2720 = vector.broadcast %2717 : f32 to vector<8x128xf32>
    %2721 = arith.mulf %2720, %2719 : vector<8x128xf32>
    %2722 = arith.addf %2716, %2721 : vector<8x128xf32>
    %c38_2188 = arith.constant 38 : index
    %2723 = memref.load %arg1[%c38_2188] : memref<50xf32, #tpu.memory_space<smem>>
    %c3_2189 = arith.constant 3 : index
    %c14_2190 = arith.constant 14 : index
    %c1_2191 = arith.constant 1 : index
    %c0_2192 = arith.constant 0 : index
    %2724 = vector.load %arg6[%c3_2189, %c14_2190, %c1_2191, %c0_2192] : memref<4x16x10x128xf32, #tpu.memory_space<vmem>>, vector<1x1x8x128xf32>
    %2725 = vector.shape_cast %2724 : vector<1x1x8x128xf32> to vector<8x128xf32>
    %2726 = vector.broadcast %2723 : f32 to vector<8x128xf32>
    %2727 = arith.mulf %2726, %2725 : vector<8x128xf32>
    %2728 = arith.addf %2722, %2727 : vector<8x128xf32>
    %c39_2193 = arith.constant 39 : index
    %2729 = memref.load %arg1[%c39_2193] : memref<50xf32, #tpu.memory_space<smem>>
    %c2_2194 = arith.constant 2 : index
    %c14_2195 = arith.constant 14 : index
    %c2_2196 = arith.constant 2 : index
    %c0_2197 = arith.constant 0 : index
    %2730 = vector.load %arg6[%c2_2194, %c14_2195, %c2_2196, %c0_2197] : memref<4x16x10x128xf32, #tpu.memory_space<vmem>>, vector<1x1x8x128xf32>
    %2731 = vector.shape_cast %2730 : vector<1x1x8x128xf32> to vector<8x128xf32>
    %2732 = vector.broadcast %2729 : f32 to vector<8x128xf32>
    %2733 = arith.mulf %2732, %2731 : vector<8x128xf32>
    %2734 = arith.addf %2728, %2733 : vector<8x128xf32>
    %c8_2198 = arith.constant 8 : index
    %2735 = memref.load %arg3[%c8_2198] : memref<10xf32, #tpu.memory_space<smem>>
    %c2_2199 = arith.constant 2 : index
    %c15_2200 = arith.constant 15 : index
    %c1_2201 = arith.constant 1 : index
    %c0_2202 = arith.constant 0 : index
    %2736 = vector.load %arg6[%c2_2199, %c15_2200, %c1_2201, %c0_2202] : memref<4x16x10x128xf32, #tpu.memory_space<vmem>>, vector<1x1x1x128xf32>
    %2737 = vector.shape_cast %2736 : vector<1x1x1x128xf32> to vector<1x128xf32>
    %2738 = vector.broadcast %2735 : f32 to vector<1x128xf32>
    %2739 = arith.mulf %2738, %2737 : vector<1x128xf32>
    %2740 = arith.subf %2704, %2739 : vector<1x128xf32>
    %c40_2203 = arith.constant 40 : index
    %2741 = memref.load %arg1[%c40_2203] : memref<50xf32, #tpu.memory_space<smem>>
    %c2_2204 = arith.constant 2 : index
    %c15_2205 = arith.constant 15 : index
    %c0_2206 = arith.constant 0 : index
    %c0_2207 = arith.constant 0 : index
    %2742 = vector.load %arg6[%c2_2204, %c15_2205, %c0_2206, %c0_2207] : memref<4x16x10x128xf32, #tpu.memory_space<vmem>>, vector<1x1x8x128xf32>
    %2743 = vector.shape_cast %2742 : vector<1x1x8x128xf32> to vector<8x128xf32>
    %2744 = vector.broadcast %2741 : f32 to vector<8x128xf32>
    %2745 = arith.mulf %2744, %2743 : vector<8x128xf32>
    %2746 = arith.addf %2734, %2745 : vector<8x128xf32>
    %c41_2208 = arith.constant 41 : index
    %2747 = memref.load %arg1[%c41_2208] : memref<50xf32, #tpu.memory_space<smem>>
    %c3_2209 = arith.constant 3 : index
    %c15_2210 = arith.constant 15 : index
    %c0_2211 = arith.constant 0 : index
    %c0_2212 = arith.constant 0 : index
    %2748 = vector.load %arg6[%c3_2209, %c15_2210, %c0_2211, %c0_2212] : memref<4x16x10x128xf32, #tpu.memory_space<vmem>>, vector<1x1x8x128xf32>
    %2749 = vector.shape_cast %2748 : vector<1x1x8x128xf32> to vector<8x128xf32>
    %2750 = vector.broadcast %2747 : f32 to vector<8x128xf32>
    %2751 = arith.mulf %2750, %2749 : vector<8x128xf32>
    %2752 = arith.addf %2746, %2751 : vector<8x128xf32>
    %c42_2213 = arith.constant 42 : index
    %2753 = memref.load %arg1[%c42_2213] : memref<50xf32, #tpu.memory_space<smem>>
    %c2_2214 = arith.constant 2 : index
    %c15_2215 = arith.constant 15 : index
    %c1_2216 = arith.constant 1 : index
    %c0_2217 = arith.constant 0 : index
    %2754 = vector.load %arg6[%c2_2214, %c15_2215, %c1_2216, %c0_2217] : memref<4x16x10x128xf32, #tpu.memory_space<vmem>>, vector<1x1x8x128xf32>
    %2755 = vector.shape_cast %2754 : vector<1x1x8x128xf32> to vector<8x128xf32>
    %2756 = vector.broadcast %2753 : f32 to vector<8x128xf32>
    %2757 = arith.mulf %2756, %2755 : vector<8x128xf32>
    %2758 = arith.addf %2752, %2757 : vector<8x128xf32>
    %c43_2218 = arith.constant 43 : index
    %2759 = memref.load %arg1[%c43_2218] : memref<50xf32, #tpu.memory_space<smem>>
    %c3_2219 = arith.constant 3 : index
    %c15_2220 = arith.constant 15 : index
    %c1_2221 = arith.constant 1 : index
    %c0_2222 = arith.constant 0 : index
    %2760 = vector.load %arg6[%c3_2219, %c15_2220, %c1_2221, %c0_2222] : memref<4x16x10x128xf32, #tpu.memory_space<vmem>>, vector<1x1x8x128xf32>
    %2761 = vector.shape_cast %2760 : vector<1x1x8x128xf32> to vector<8x128xf32>
    %2762 = vector.broadcast %2759 : f32 to vector<8x128xf32>
    %2763 = arith.mulf %2762, %2761 : vector<8x128xf32>
    %2764 = arith.addf %2758, %2763 : vector<8x128xf32>
    %c44_2223 = arith.constant 44 : index
    %2765 = memref.load %arg1[%c44_2223] : memref<50xf32, #tpu.memory_space<smem>>
    %c2_2224 = arith.constant 2 : index
    %c15_2225 = arith.constant 15 : index
    %c2_2226 = arith.constant 2 : index
    %c0_2227 = arith.constant 0 : index
    %2766 = vector.load %arg6[%c2_2224, %c15_2225, %c2_2226, %c0_2227] : memref<4x16x10x128xf32, #tpu.memory_space<vmem>>, vector<1x1x8x128xf32>
    %2767 = vector.shape_cast %2766 : vector<1x1x8x128xf32> to vector<8x128xf32>
    %2768 = vector.broadcast %2765 : f32 to vector<8x128xf32>
    %2769 = arith.mulf %2768, %2767 : vector<8x128xf32>
    %2770 = arith.addf %2764, %2769 : vector<8x128xf32>
    %2771 = vector.broadcast %2740 : vector<1x128xf32> to vector<8x128xf32>
    %2772 = arith.addf %2770, %2771 : vector<8x128xf32>
    %2773 = arith.select %2, %2772, %2770 : vector<8x128xi1>, vector<8x128xf32>
    %cst_2228 = arith.constant 0.000000e+00 : f32
    %2774 = vector.broadcast %cst_2228 : f32 to vector<8x128xf32>
    %2775 = arith.maximumf %2773, %2774 : vector<8x128xf32>
    %c0_2229 = arith.constant 0 : index
    %c7_2230 = arith.constant 7 : index
    %c0_2231 = arith.constant 0 : index
    %c0_2232 = arith.constant 0 : index
    %2776 = vector.load %arg7[%c0_2229, %c7_2230, %c0_2231, %c0_2232] : memref<1x8x8x128xf32, #tpu.memory_space<vmem>>, vector<1x1x8x128xf32>
    %2777 = vector.shape_cast %2776 : vector<1x1x8x128xf32> to vector<8x128xf32>
    %2778 = vector.shape_cast %2775 : vector<8x128xf32> to vector<1x1x8x128xf32>
    tpu.vector_store %arg7[%c0_2229, %c7_2230, %c0_2231, %c0_2232], %2778 {strides = array<i32>} : memref<1x8x8x128xf32, #tpu.memory_space<vmem>>, vector<1x1x8x128xf32>,
    return
  }
  func.func @transform_0(%arg0: i32) -> i32 {
    %c0_i32 = arith.constant 0 : i32
    %c0_i32_0 = arith.constant 0 : i32
    return %c0_i32 : i32
  }
  func.func @transform_1(%arg0: i32) -> i32 {
    %c0_i32 = arith.constant 0 : i32
    %c0_i32_0 = arith.constant 0 : i32
    return %c0_i32 : i32
  }
  func.func @transform_2(%arg0: i32) -> i32 {
    %c0_i32 = arith.constant 0 : i32
    %c0_i32_0 = arith.constant 0 : i32
    return %c0_i32 : i32
  }
  func.func @transform_3(%arg0: i32) -> i32 {
    %c0_i32 = arith.constant 0 : i32
    %c0_i32_0 = arith.constant 0 : i32
    return %c0_i32 : i32
  }
  func.func @transform_4(%arg0: i32) -> i32 {
    %c0_i32 = arith.constant 0 : i32
    %c0_i32_0 = arith.constant 0 : i32
    return %c0_i32 : i32
  }
  func.func @transform_5(%arg0: i32) -> (i32, i32, i32, i32) {
    %c0_i32 = arith.constant 0 : i32
    %c0_i32_0 = arith.constant 0 : i32
    %c0_i32_1 = arith.constant 0 : i32
    %c0_i32_2 = arith.constant 0 : i32
    return %c0_i32, %c0_i32_0, %c0_i32_1, %arg0 : i32, i32, i32, i32
  }
  func.func @transform_6(%arg0: i32) -> (i32, i32, i32, i32) {
    %c0_i32 = arith.constant 0 : i32
    %c0_i32_0 = arith.constant 0 : i32
    %c0_i32_1 = arith.constant 0 : i32
    %c0_i32_2 = arith.constant 0 : i32
    return %c0_i32, %c0_i32_0, %c0_i32_1, %arg0 : i32, i32, i32, i32
  }
}

</mosaic_0001>

<bundles_post_ra>
// kernel: dummy_forward.1
= control target key start
LH: loop header
LB: loop body
LE: loop exit
PB: predicated region body
PF: predicated region fallthrough
CT: control target
= control target key end

     0   :  { %s6384_s0 = inlined_call_operand.vmem [shape: f32[50], index: 0, kind: input, shape index: {}]   ;;  %s6385_s1 = inlined_call_operand.vmem [shape: f32[50], index: 1, kind: input, shape index: {}]   ;;  %s6386_s2 = inlined_call_operand.vmem [shape: f32[10], index: 2, kind: input, shape index: {}]   ;;  %s6387_s3 = inlined_call_operand.vmem [shape: f32[10], index: 3, kind: input, shape index: {}]   ;;  %s6388_s4 = inlined_call_operand.vmem [shape: f32[4], index: 4, kind: input, shape index: {}]   ;;  %s6389_s5 = inlined_call_operand.vmem [shape: f32[4,16,10,128], index: 5, kind: input, shape index: {}]   ;;  %s6390_s6 = inlined_call_operand.vmem [shape: f32[1,8,8,128], index: 6, kind: output, shape index: {}]  }
   0x1   :  { %6534 = sst [smem:[#allocation46_spill]] %s6390_s6 }
   0x2   :  { %11 = vsyncpa [#allocation3], 0 }
   0x3   :  { %12 = vsyncpa [#allocation5], 0  ;;  %s30_s23 = sshll.u32 %s6385_s1, 4  ;;  %s31_s23 = int_to_ptr.vmem [resolvable:$true] %s30_s23 }
   0x4   :  { %13 = vsyncpa [#allocation8], 0  ;;  %s50_s26 = sshll.u32 %s6387_s3, 4  ;;  %s3373_s27 = scalar_lea.vmem %s31_s23, 16  ;;  %s51_s26 = int_to_ptr.vmem [resolvable:$true] %s50_s26 }
   0x5   :  { %p3374_p0 = scmp.ne.s32.totalorder %s31_s23, %s3373_s27  ;;  %p3378_p1 = scmp.lt.s32.totalorder %s31_s23, %s31_s23 }
   0x6   :  { %p3379_p2 = scmp.lt.s32.totalorder %s3373_s27, %s3373_s27 }
   0x8   :  { %p3380_p3 = por %p3379_p2, %p3378_p1 }
   0xa   :  { %p3381_p4 = pnand %p3380_p3, %p3374_p0 }
   0xc   :  { %3384 = shalt.err (!%p3381_p4)
}
   0xd   :  { %s3439_s28 = smov [#allocation4]   ;;  %s3385_s29 = scalar_lea.vmem %s51_s26, 16 }
   0xe   :  { %33 = dma.vmem_to_smem %s31_s23, 16, %s3439_s28, [#allocation5]  }
   0xf   :  { %p3386_p5 = scmp.ne.s32.totalorder %s51_s26, %s3385_s29  ;;  %p3390_p6 = scmp.lt.s32.totalorder %s51_s26, %s51_s26 }
  0x10   :  { %p3391_p7 = scmp.lt.s32.totalorder %s3385_s29, %s3385_s29 }
  0x12   :  { %p3392_p8 = por %p3391_p7, %p3390_p6 }
  0x14   :  { %p3393_p9 = pnand %p3392_p8, %p3386_p5 }
  0x16   :  { %3396 = shalt.err (!%p3393_p9)
}
  0x17   :  { %s3440_s1 = smov [#allocation7]   ;;  %s20_s7 = sshll.u32 %s6384_s0, 4  ;;  %s21_s7 = int_to_ptr.vmem [resolvable:$true] %s20_s7 }
  0x18   :  { %53 = dma.vmem_to_smem %s51_s26, 16, %s3440_s1, [#allocation8]  }
  0x19   :  { %s40_s10 = sshll.u32 %s6386_s2, 4  ;;  %s3397_s11 = scalar_lea.vmem %s21_s7, 16  ;;  %s41_s10 = int_to_ptr.vmem [resolvable:$true] %s40_s10 }
  0x1a   :  { %p3398_p10 = scmp.ne.s32.totalorder %s21_s7, %s3397_s11  ;;  %p3402_p11 = scmp.lt.s32.totalorder %s21_s7, %s21_s7 }
  0x1b   :  { %p3403_p12 = scmp.lt.s32.totalorder %s3397_s11, %s3397_s11 }
  0x1d   :  { %p3404_p13 = por %p3403_p12, %p3402_p11 }
  0x1f   :  { %p3405_p0 = pnand %p3404_p13, %p3398_p10 }
  0x21   :  { %3408 = shalt.err (!%p3405_p0)
}
  0x22   :  { %s3441_s12 = smov [#allocation2]   ;;  %s3409_s13 = scalar_lea.vmem %s41_s10, 16 }
  0x23   :  { %23 = dma.vmem_to_smem %s21_s7, 16, %s3441_s12, [#allocation3]  }
  0x24   :  { %p3410_p1 = scmp.ne.s32.totalorder %s41_s10, %s3409_s13  ;;  %p3414_p2 = scmp.lt.s32.totalorder %s41_s10, %s41_s10 }
  0x25   :  { %p3415_p3 = scmp.lt.s32.totalorder %s3409_s13, %s3409_s13 }
  0x27   :  { %p3416_p4 = por %p3415_p3, %p3414_p2 }
  0x29   :  { %p3417_p5 = pnand %p3416_p4, %p3410_p1 }
  0x2b   :  { %3420 = shalt.err (!%p3417_p5)
}
  0x2c   :  { %s3442_s0 = smov [#allocation6]   ;;  %s60_s15 = sshll.u32 %s6388_s4, 4  ;;  %s61_s15 = int_to_ptr.vmem [resolvable:$true] %s60_s15 }
  0x2d   :  { %43 = dma.vmem_to_smem %s41_s10, 16, %s3442_s0, [#allocation5]  }
  0x2e   :  { %s3421_s16 = scalar_lea.vmem %s61_s15, 16  ;;  %p3426_p7 = scmp.lt.s32.totalorder %s61_s15, %s61_s15 }
  0x2f   :  { %p3422_p6 = scmp.ne.s32.totalorder %s61_s15, %s3421_s16  ;;  %p3427_p8 = scmp.lt.s32.totalorder %s3421_s16, %s3421_s16 }
  0x31   :  { %p3428_p9 = por %p3427_p8, %p3426_p7 }
  0x33   :  { %p3429_p10 = pnand %p3428_p9, %p3422_p6 }
  0x35   :  { %3432 = shalt.err (!%p3429_p10)
}
  0x36   :  { %s3443_s17 = smov [#allocation9]  }
  0x37   :  { %63 = dma.vmem_to_smem %s61_s15, 16, %s3443_s17, [#allocation8]  }
  0x38   :  { %3433 = dma.done.wait [#allocation3], 16  }
  0x39   :  { %3434 = vsyncadd [#allocation3], 4294967280 }
  0x3a   :  { %3435 = dma.done.wait [#allocation5], 32  }
  0x3b   :  { %3436 = vsyncadd [#allocation5], 4294967264 }
  0x3c   :  { %3437 = dma.done.wait [#allocation8], 32  }
  0x3d   :  { %3438 = vsyncadd [#allocation8], 4294967264 }
  0x3e   :  { %81 = sfence }
  0x3f   :  { %s3494_s18 = sld [smem:[#allocation9 + $0x1]]  ;;  %v3500_v1 = vld [vmem:[%s6389_s5] sm:$0xff]  ;;  %v3536_v20 = vld [vmem:[%s6389_s5 + $0x10] sm:$0xff] }
  0x40   :  { %s2489_s4 = sld [smem:[#allocation4 + $0xa]]  ;;  %v3506_v4 = vld [vmem:[%s6389_s5 + $0x100] sm:$0xff]  ;;  %v3546_v24 = vld [vmem:[%s6389_s5 + $0x110] sm:$0xff] }
  0x41   :  { %s2490_s19 = sld [smem:[#allocation4 + $0xb]]  ;;  %v3512_v7 = vld [vmem:[%s6389_s5 + $0x1] sm:$0xff]  ;;  %v3554_v28 = vld [vmem:[%s6389_s5 + $0x11] sm:$0xff] }
  0x42   :  { %s2492_s20 = sld [smem:[#allocation4 + $0xc]]  ;;  %v3518_v12 = vld [vmem:[%s6389_s5 + $0x101] sm:$0xff]  ;;  %v3565_v32 = vld [vmem:[%s6389_s5 + $0x111] sm:$0xff] }
  0x43   :  { %s2493_s21 = sld [smem:[#allocation4 + $0xd]]  ;;  %v3526_v16 = vld [vmem:[%s6389_s5 + $0x2] sm:$0xff]  ;;  %v3576_v36 = vld [vmem:[%s6389_s5 + $0x12] sm:$0xff]  ;;  %v91_v40 = vld [vmem:[%s6389_s5 + $0x1] sm:$0x1] }
  0x44   :  { %s2495_s22 = sld [smem:[#allocation4 + $0xe]]  ;;  %v3591_v42 = vld [vmem:[%s6389_s5 + $0x20] sm:$0xff]  ;;  %v2497_v49 = vld [vmem:[%s6389_s5 + $0x11] sm:$0x1] }
  0x45   :  { %v88_v0 = vstv %s3494_s18  ;;  %s2498_s27 = sld [smem:[#allocation4 + $0xf]]  ;;  %v3602_v46 = vld [vmem:[%s6389_s5 + $0x120] sm:$0xff] }
  0x46   :  { %v97_v2 = vstv %s2489_s4  ;;  %s2500_s1 = sld [smem:[#allocation4 + $0x10]]  ;;  %v3617_v54 = vld [vmem:[%s6389_s5 + $0x21] sm:$0xff] }
  0x47   :  { %v98_v3 = vmul.f32 %v97_v2, %v3500_v1  ;;  %v103_v5 = vstv %s2490_s19  ;;  %s2502_s3 = sld [smem:[#allocation4 + $0x11]]  ;;  %v3628_v58 = vld [vmem:[%s6389_s5 + $0x121] sm:$0xff] }
  0x48   :  { %v104_v6 = vmul.f32 %v3506_v4, %v103_v5  ;;  %v108_v8 = vstv %s2492_s20  ;;  %s3520_s8 = sld [smem:[#allocation4 + $0x12]] }
  0x49   :  { %v99_v9 = vadd.f32 %v98_v3, %v88_v0  ;;  %v109_v10 = vmul.f32 %v108_v8, %v3512_v7  ;;  %v113_v11 = vstv %s2493_s21  ;;  %s3528_s11 = sld [smem:[#allocation4 + $0x13]]  ;;  %v2509_v0 = vld [vmem:[%s6389_s5 + $0x21] sm:$0x1]  ;;  %v3643_v3 = vld [vmem:[%s6389_s5 + $0x22] sm:$0xff] }
  0x4a   :  { %v114_v14 = vmul.f32 %v3518_v12, %v113_v11  ;;  %v118_v15 = vstv %s2495_s22  ;;  %s3530_s12 = sld [smem:[#allocation9 + $0x3]] }
  0x4b   :  { %v105_v13 = vadd.f32 %v104_v6, %v99_v9  ;;  %v119_v18 = vmul.f32 %v118_v15, %v3526_v16  ;;  %v129_v19 = vstv %s2498_s27  ;;  %s3538_s2 = sld [smem:[#allocation4 + $0x14]]  ;;  %v3654_v9 = vld [vmem:[%s6389_s5 + $0x200] sm:$0xff] }
  0x4c   :  { %v135_v21 = vstv %s2500_s1  ;;  %s3540_s14 = sld [smem:[#allocation7 + $0x2]]  ;;  %v130_v23 = vmul.f32 %v3536_v20, %v129_v19  ;;  %v3669_v19 = vld [vmem:[%s6389_s5 + $0x300] sm:$0xff] }
  0x4d   :  { %v110_v17 = vadd.f32 %v109_v10, %v105_v13  ;;  %v140_v25 = vstv %s2502_s3  ;;  %s3548_s17 = sld [smem:[#allocation4 + $0x15]]  ;;  %v136_v27 = vmul.f32 %v3546_v24, %v135_v21 }
  0x4e   :  { %v145_v29 = vstv %s3520_s8  ;;  %s3557_s20 = sld [smem:[#allocation4 + $0x16]]  ;;  %v141_v31 = vmul.f32 %v3554_v28, %v140_v25 }
  0x4f   :  { %v115_v22 = vadd.f32 %v114_v14, %v110_v17  ;;  %s3559_s21 = sld [smem:[#allocation7 + $0x3]]  ;;  %v150_v33 = vstv %s3528_s11  ;;  %v146_v35 = vmul.f32 %v3565_v32, %v145_v29  ;;  %v2521_v17 = vld [vmem:[%s6389_s5 + $0x201] sm:$0x1] }
  0x50   :  { %s3568_s24 = sld [smem:[#allocation4 + $0x17]]  ;;  %v151_v39 = vmul.f32 %v3576_v36, %v150_v33 }
  0x51   :  { %v120_v26 = vadd.f32 %v119_v18, %v115_v22  ;;  %s87_s25 = ssub.f32 %s3530_s12, %s3494_s18  ;;  %v161_v37 = vstv %s3538_s2 }
  0x52   :  { %s3579_s28 = sld [smem:[#allocation4 + $0x18]]  ;;  %v92_v41 = vstv %s3540_s14  ;;  %v162_v45 = vmul.f32 %v3591_v42, %v161_v37 }
  0x53   :  { %v131_v30 = vadd.f32 %v130_v23, %v120_v26  ;;  %s3582_s29 = sld [smem:[#allocation7 + $0x4]]  ;;  %v167_v43 = vstv %s3548_s17  ;;  %v93_v48 = vmul.f32 %v92_v41, %v91_v40  ;;  %v89_v52 = vstv %s87_s25 }
  0x54   :  { %s3594_s7 = sld [smem:[#allocation4 + $0x23]]  ;;  %v172_v47 = vstv %s3557_s20  ;;  %v168_v51 = vmul.f32 %v3602_v46, %v167_v43  ;;  %v82_v26 = vlaneseq }
  0x55   :  { %v137_v34 = vadd.f32 %v136_v27, %v131_v30  ;;  %s3597_s8 = sld [smem:[#allocation7 + $0x7]]  ;;  %v124_v53 = vstv %s3559_s21  ;;  %v173_v57 = vmul.f32 %v3617_v54, %v172_v47  ;;  %v94_v60 = vsub.f32 %v89_v52, %v93_v48  ;;  %v3681_v27 = vld [vmem:[%s6389_s5 + $0x201] sm:$0xff] }
  0x56   :  { %s3605_s11 = sld [smem:[#allocation4 + $0x24]]  ;;  %v177_v55 = vstv %s3568_s24  ;;  %v125_v61 = vmul.f32 %v2497_v49, %v124_v53 }
  0x57   :  { %v142_v38 = vadd.f32 %v141_v31, %v137_v34  ;;  %s3611_s0 = sld [smem:[#allocation4 + $0x25]]  ;;  %v178_v63 = vmul.f32 %v3628_v58, %v177_v55  ;;  %v3689_v34 = vld [vmem:[%s6389_s5 + $0x301] sm:$0xff] }
  0x58   :  { %s3620_s15 = sld [smem:[#allocation4 + $0x26]]  ;;  %v182_v59 = vstv %s3579_s28  ;;  %v126_v11 = vsub.f32 %v94_v60, %v125_v61 }
  0x59   :  { %v147_v44 = vadd.f32 %v146_v35, %v142_v38  ;;  %s3623_s16 = sld [smem:[#allocation4 + $0x27]]  ;;  %v156_v2 = vstv %s3582_s29  ;;  %v183_v8 = vmul.f32 %v3643_v3, %v182_v59 }
  0x5a   :  { %s3631_s19 = sld [smem:[#allocation7 + $0x8]]  ;;  %v193_v5 = vstv %s3594_s7  ;;  %v157_v13 = vmul.f32 %v2509_v0, %v156_v2 }
  0x5b   :  { %v152_v50 = vadd.f32 %v151_v39, %v147_v44  ;;  %s3634_s20 = sld [smem:[#allocation4 + $0x28]]  ;;  %v194_v15 = vmul.f32 %v3654_v9, %v193_v5  ;;  %v188_v18 = vstv %s3597_s8  ;;  %v2533_v39 = vld [vmem:[%s6389_s5 + $0x211] sm:$0x1]  ;;  %v3708_v44 = vld [vmem:[%s6389_s5 + $0x202] sm:$0xff] }
  0x5c   :  { %s3646_s25 = sld [smem:[#allocation4 + $0x29]]  ;;  %v199_v10 = vstv %s3605_s11  ;;  %v158_v29 = vsub.f32 %v126_v11, %v157_v13  ;;  %v189_v30 = vmul.f32 %v2521_v17, %v188_v18 }
  0x5d   :  { %v163_v56 = vadd.f32 %v162_v45, %v152_v50  ;;  %s3649_s26 = sld [smem:[#allocation4 + $0x2a]]  ;;  %v204_v21 = vstv %s3611_s0  ;;  %v200_v23 = vmul.f32 %v3669_v19, %v199_v10  ;;  %v3712_v45 = vshrl.u32 %v82_v26, 7  ;;  %v3720_v50 = vld [vmem:[%s6389_s5 + $0x210] sm:$0xff] }
  0x5e   :  { %s3657_s29 = sld [smem:[#allocation4 + $0x2b]]  ;;  %v209_v25 = vstv %s3620_s15  ;;  %v205_v33 = vmul.f32 %v3681_v27, %v204_v21  ;;  %v3714_v47 = vsub.f32 %v158_v29, %v189_v30  ;;  %v3756_v10 = vld [vmem:[%s6389_s5 + $0x311] sm:$0xff] }
  0x5f   :  { %v169_v62 = vadd.f32 %v168_v51, %v163_v56  ;;  %s3660_s1 = sld [smem:[#allocation4 + $0x2c]]  ;;  %v210_v35 = vmul.f32 %v3689_v34, %v209_v25  ;;  %v214_v37 = vstv %s3623_s16  ;;  %v3725_v51 = vld [vmem:[%s6389_s5 + $0x310] sm:$0xff]  ;;  %vm84_vm0 = vcmp.eq.s32.totalorder %v3712_v45, 0 }
  0x60   :  { %s3672_s9 = sld [smem:[#allocation7 + $0x9]]  ;;  %v220_v40 = vstv %s3631_s19  ;;  %v215_v49 = vmul.f32 %v3708_v44, %v214_v37 }
  0x61   :  { %v174_v6 = vadd.f32 %v173_v57, %v169_v62  ;;  %s3676_s10 = sld [smem:[#allocation9]]  ;;  %v225_v41 = vstv %s3634_s20  ;;  %v3729_v52 = vmul.f32 %v2533_v39, %v220_v40  ;;  %v3744_v62 = vld [vmem:[%s6389_s5 + $0x211] sm:$0xff] }
  0x62   :  { %s3683_s12 = sld [smem:[#allocation4 + $0x2d]]  ;;  %v231_v43 = vstv %s3646_s25  ;;  %v226_v53 = vmul.f32 %v3720_v50, %v225_v41  ;;  %v2545_v41 = vld [vmem:[%s6389_s5 + $0x221] sm:$0x1] }
  0x63   :  { %v179_v14 = vadd.f32 %v178_v63, %v174_v6  ;;  %s3691_s2 = sld [smem:[#allocation2]]  ;;  %v232_v55 = vmul.f32 %v3725_v51, %v231_v43  ;;  %v236_v56 = vstv %s3649_s26 }
  0x64   :  { %s3695_s14 = sld [smem:[#allocation2 + $0x1]]  ;;  %v241_v59 = vstv %s3657_s29 }
  0x65   :  { %v184_v22 = vadd.f32 %v183_v8, %v179_v14  ;;  %s3703_s4 = sld [smem:[#allocation2 + $0x2]]  ;;  %v246_v63 = vstv %s3660_s1  ;;  %v237_v8 = vmul.f32 %v3744_v62, %v236_v56  ;;  %v3766_v14 = vld [vmem:[%s6389_s5 + $0x212] sm:$0xff] }
  0x66   :  { %s3710_s16 = sld [smem:[#allocation2 + $0x3]]  ;;  %v247_v21 = vmul.f32 %v3766_v14, %v246_v63 }
  0x67   :  { %v195_v31 = vadd.f32 %v194_v15, %v184_v22  ;;  %s3727_s25 = sld [smem:[#allocation4 + $0x2e]]  ;;  %v292_v60 = vstv %s3676_s10 }
  0x68   :  { %s3734_s27 = sld [smem:[#allocation2 + $0x4]]  ;;  %v257_v37 = vstv %s3683_s12 }
  0x69   :  { %v201_v38 = vadd.f32 %v200_v23, %v195_v31  ;;  %s3737_s28 = sld [smem:[#allocation4 + $0x2f]]  ;;  %v301_v61 = vstv %s3691_s2  ;;  %v252_v31 = vstv %s3672_s9 }
  0x6a   :  { %v302_v0 = vmul.f32 %v301_v61, %v3500_v1  ;;  %v306_v2 = vstv %s3695_s14  ;;  %s3749_s26 = sld [smem:[#allocation2 + $0x5]]  ;;  %v624_v5 = vmul.f32 %v3591_v42, %v301_v61  ;;  %v242_v1 = vmul.f32 %v3756_v10, %v241_v59 }
  0x6b   :  { %v206_v48 = vadd.f32 %v205_v33, %v201_v38  ;;  %v307_v11 = vmul.f32 %v3506_v4, %v306_v2  ;;  %v311_v13 = vstv %s3703_s4  ;;  %s3760_s1 = sld [smem:[#allocation2 + $0x6]]  ;;  %v629_v23 = vmul.f32 %v3602_v46, %v306_v2 }
  0x6c   :  { %v303_v15 = vadd.f32 %v302_v0, %v292_v60  ;;  %v312_v17 = vmul.f32 %v311_v13, %v3512_v7  ;;  %v316_v18 = vstv %s3710_s16  ;;  %s3770_s8 = sld [smem:[#allocation2 + $0x7]]  ;;  %v625_v22 = vadd.f32 %v624_v5, %v292_v60 }
  0x6d   :  { %v211_v57 = vadd.f32 %v210_v35, %v206_v48  ;;  %s3773_s13 = sld [smem:[#allocation2 + $0x8]]  ;;  %v317_v26 = vmul.f32 %v3518_v12, %v316_v18  ;;  %v634_v29 = vmul.f32 %v3617_v54, %v311_v13  ;;  %v639_v35 = vmul.f32 %v3628_v58, %v316_v18 }
  0x6e   :  { %s3776_s0 = sld [smem:[#allocation4 + $0x30]]  ;;  %v308_v25 = vadd.f32 %v307_v11, %v303_v15  ;;  %v321_v7 = vstv %s3734_s27  ;;  %v630_v33 = vadd.f32 %v629_v23, %v625_v22  ;;  %v253_v0 = vmul.f32 %v2545_v41, %v252_v31  ;;  %v3843_v23 = vld [vmem:[%s6389_s5 + $0x130] sm:$0xff] }
  0x6f   :  { %v216_v6 = vadd.f32 %v215_v49, %v211_v57  ;;  %s3782_s2 = sld [smem:[#allocation2 + $0x9]]  ;;  %v322_v39 = vmul.f32 %v321_v7, %v3526_v16  ;;  %v644_v49 = vmul.f32 %v3643_v3, %v321_v7  ;;  %v3802_v16 = vld [vmem:[%s6389_s5 + $0x220] sm:$0xff]  ;;  %v3858_v31 = vld [vmem:[%s6389_s5 + $0x31] sm:$0xff] }
  0x70   :  { %s3786_s14 = sld [smem:[#allocation4 + $0x31]]  ;;  %v313_v38 = vadd.f32 %v312_v17, %v308_v25  ;;  %v331_v40 = vstv %s3749_s26  ;;  %v635_v48 = vadd.f32 %v634_v29, %v630_v33  ;;  %v258_v60 = vmul.f32 %v3802_v16, %v257_v37  ;;  %v3849_v7 = vld [vmem:[%s6389_s5 + $0x321] sm:$0xff] }
  0x71   :  { %v227_v4 = vadd.f32 %v226_v53, %v216_v6  ;;  %v336_v43 = vstv %s3760_s1  ;;  %s3794_s9 = sld [smem:[#allocation2 + $0xa]]  ;;  %v222_v53 = vsub.f32 %v3714_v47, %v3729_v52  ;;  %v332_v57 = vmul.f32 %v3536_v20, %v331_v40  ;;  %v3813_v47 = vld [vmem:[%s6389_s5 + $0x320] sm:$0xff]  ;;  %v3820_v20 = vld [vmem:[%s6389_s5 + $0x30] sm:$0xff] }
  0x72   :  { %v318_v56 = vadd.f32 %v317_v26, %v313_v38  ;;  %v341_v61 = vstv %s3770_s8  ;;  %s3808_s21 = sld [smem:[#allocation2 + $0xb]]  ;;  %v640_v63 = vadd.f32 %v639_v35, %v635_v48  ;;  %v268_v52 = vstv %s3737_s28 }
  0x73   :  { %v233_v30 = vadd.f32 %v232_v55, %v227_v4  ;;  %v263_v55 = vstv %s3727_s25  ;;  %v337_v5 = vmul.f32 %v3546_v24, %v336_v43  ;;  %v346_v11 = vstv %s3773_s13  ;;  %s3824_s23 = sld [smem:[#allocation2 + $0xc]] }
  0x74   :  { %v323_v2 = vadd.f32 %v322_v39, %v318_v56  ;;  %v645_v13 = vadd.f32 %v644_v49, %v640_v63  ;;  %v273_v15 = vstv %s3776_s0  ;;  %v3833_v24 = vsub.s32 0, %v3712_v45  ;;  %s3838_s27 = sld [smem:[#allocation2 + $0xd]]  ;;  %v3867_v39 = vld [vmem:[%s6389_s5 + $0x222] sm:$0xff] }
  0x75   :  { %v238_v12 = vadd.f32 %v237_v8, %v233_v30  ;;  %v264_v8 = vmul.f32 %v3813_v47, %v263_v55  ;;  %v342_v18 = vmul.f32 %v3554_v28, %v341_v61  ;;  %v351_v22 = vstv %s3782_s2  ;;  %s3852_s29 = sld [smem:[#allocation9 + $0x2]] }
  0x76   :  { %v333_v17 = vadd.f32 %v332_v57, %v323_v2  ;;  %v654_v25 = vmul.f32 %v3820_v20, %v331_v40  ;;  %v254_v26 = vsub.f32 %v222_v53, %v253_v0  ;;  %v278_v28 = vstv %s3786_s14  ;;  %s3862_s7 = sld [smem:[#allocation2 + $0xe]] }
  0x77   :  { %v243_v59 = vadd.f32 %v242_v1, %v238_v12  ;;  %v3829_v1 = vld [vmem:[%s6389_s5 + $0x221] sm:$0xff]  ;;  %v347_v30 = vmul.f32 %v3565_v32, %v346_v11  ;;  %v274_v35 = vmul.f32 %v3849_v7, %v273_v15  ;;  %v361_v37 = vstv %s3794_s9  ;;  %s3869_s13 = sld [smem:[#allocation6]]  ;;  %v3875_v12 = vld [vmem:[%s6389_s5 + $0x131] sm:$0xff] }
  0x78   :  { %v338_v29 = vadd.f32 %v337_v5, %v333_v17  ;;  %v655_v38 = vadd.f32 %v654_v25, %v645_v13  ;;  %v352_v40 = vmul.f32 %v3576_v36, %v351_v22  ;;  %v659_v41 = vmul.f32 %v3843_v23, %v336_v43  ;;  %s3880_s14 = sld [smem:[#allocation2 + $0xf]]  ;;  %v3891_v43 = vld [vmem:[%s6389_s5 + $0x32] sm:$0xff] }
  0x79   :  { %v248_v6 = vadd.f32 %v247_v21, %v243_v59  ;;  %v269_v21 = vmul.f32 %v3829_v1, %v268_v52  ;;  %v279_v49 = vmul.f32 %v3867_v39, %v278_v28  ;;  %v366_v53 = vstv %s3808_s21  ;;  %s3886_s15 = sld [smem:[#allocation2 + $0x10]] }
  0x7a   :  { %v343_v32 = vadd.f32 %v342_v18, %v338_v29  ;;  %v664_v55 = vmul.f32 %v3858_v31, %v341_v61  ;;  %v362_v57 = vmul.f32 %v3591_v42, %v361_v37  ;;  %v660_v36 = vadd.f32 %v659_v41, %v655_v38  ;;  %s3894_s12 = sld [smem:[#allocation6 + $0x1]] }
  0x7b   :  { %v259_v4 = vadd.f32 %v258_v60, %v248_v6  ;;  %v284_v60 = vrot.slane %v254_v26, %v3833_v24  ;;  %v371_v63 = vstv %s3824_s23  ;;  %v669_v61 = vmul.f32 %v3875_v12, %v346_v11  ;;  %s3898_s4 = sld [smem:[#allocation2 + $0x11]] }
  0x7c   :  { %v348_v56 = vadd.f32 %v347_v30, %v343_v32  ;;  %v367_v0 = vmul.f32 %v3602_v46, %v366_v53  ;;  %v376_v2 = vstv %s3838_s27  ;;  %v665_v5 = vadd.f32 %v664_v55, %v660_v36  ;;  %s291_s21 = ssub.f32 %s3852_s29, %s3676_s10  ;;  %v3962_v36 = vld [vmem:[%s6389_s5 + $0x141] sm:$0xff] }
  0x7d   :  { %v265_v33 = vadd.f32 %v264_v8, %v259_v4  ;;  %v372_v8 = vmul.f32 %v3617_v54, %v371_v63  ;;  %v674_v11 = vmul.f32 %v3891_v43, %v351_v22  ;;  %v381_v15 = vstv %s3862_s7  ;;  %s3906_s22 = sld [smem:[#allocation2 + $0x12]]  ;;  %v295_v54 = vld [vmem:[%s6389_s5 + $0x1] sm:$0x1] }
  0x7e   :  { %v353_v42 = vadd.f32 %v352_v40, %v348_v56  ;;  %v670_v46 = vadd.f32 %v669_v61, %v665_v5  ;;  %s3908_s16 = sld [smem:[#allocation6 + $0x2]]  ;;  %v377_v18 = vmul.f32 %v3628_v58, %v376_v2  ;;  %v392_v22 = vstv %s3880_s14  ;;  %v3924_v58 = vld [vmem:[%s6389_s5 + $0x40] sm:$0xff] }
  0x7f   :  { %v270_v48 = vadd.f32 %v269_v21, %v265_v33  ;;  %v296_v21 = vstv %s3869_s13  ;;  %s3918_s20 = sld [smem:[#allocation2 + $0x13]]  ;;  %v382_v29 = vmul.f32 %v3643_v3, %v381_v15  ;;  %v398_v30 = vstv %s3886_s15  ;;  %v3943_v40 = vld [vmem:[%s6389_s5 + $0x140] sm:$0xff] }
  0x80   :  { %v363_v6 = vadd.f32 %v362_v57, %v353_v42  ;;  %v675_v25 = vadd.f32 %v674_v11, %v670_v46  ;;  %s3927_s25 = sld [smem:[#allocation2 + $0x14]]  ;;  %v684_v33 = vmul.f32 %v3924_v58, %v361_v37  ;;  %v297_v38 = vmul.f32 %v296_v21, %v295_v54  ;;  %v2564_v37 = vld [vmem:[%s6389_s5 + $0x11] sm:$0x1] }
  0x81   :  { %v275_v59 = vadd.f32 %v274_v35, %v270_v48  ;;  %v3933_v35 = vstv %s291_s21  ;;  %s3937_s3 = sld [smem:[#allocation6 + $0x3]]  ;;  %v393_v32 = vmul.f32 %v3820_v20, %v392_v22  ;;  %v326_v41 = vstv %s3894_s12  ;;  %v3992_v46 = vld [vmem:[%s6389_s5 + $0x50] sm:$0xff] }
  0x82   :  { %v368_v17 = vadd.f32 %v367_v0, %v363_v6  ;;  %v403_v48 = vstv %s3898_s4  ;;  %s3950_s1 = sld [smem:[#allocation2 + $0x15]]  ;;  %v685_v20 = vadd.f32 %v684_v33, %v675_v25  ;;  %v689_v55 = vmul.f32 %v3943_v40, %v366_v53 }
  0x83   :  { %v280_v52 = vadd.f32 %v279_v49, %v275_v59  ;;  %v3955_v49 = vld [vmem:[%s6389_s5 + $0x41] sm:$0xff]  ;;  %v399_v57 = vmul.f32 %v3843_v23, %v398_v30  ;;  %s3966_s2 = sld [smem:[#allocation2 + $0x16]]  ;;  %v699_v42 = vmul.f32 %v3962_v36, %v376_v2  ;;  %v298_v53 = vsub.f32 %v3933_v35, %v297_v38 }
  0x84   :  { %v373_v28 = vadd.f32 %v372_v8, %v368_v17  ;;  %v694_v59 = vmul.f32 %v3955_v49, %v371_v63  ;;  %v690_v61 = vadd.f32 %v689_v55, %v685_v20  ;;  %v327_v0 = vmul.f32 %v2564_v37, %v326_v41  ;;  %s3973_s14 = sld [smem:[#allocation6 + $0x4]]  ;;  %v3978_v63 = vld [vmem:[%s6389_s5 + $0x42] sm:$0xff]  ;;  %v2576_v2 = vld [vmem:[%s6389_s5 + $0x21] sm:$0x1]  ;;  %v4027_v20 = vld [vmem:[%s6389_s5 + $0x51] sm:$0xff] }
  0x85   :  { %v285_v13 = vadd.f32 %v284_v60, %v280_v52  ;;  %v408_v60 = vstv %s3906_s22  ;;  %v404_v23 = vmul.f32 %v3858_v31, %v403_v48  ;;  %v356_v5 = vstv %s3908_s16  ;;  %s3985_s21 = sld [smem:[#allocation2 + $0x17]] }
  0x86   :  { %v378_v3 = vadd.f32 %v377_v18, %v373_v28  ;;  %v413_v6 = vstv %s3918_s20  ;;  %v695_v8 = vadd.f32 %v694_v59, %v690_v61  ;;  %v704_v11 = vmul.f32 %v3978_v63, %v381_v15  ;;  %s3995_s19 = sld [smem:[#allocation2 + $0x18]]  ;;  %v2673_v18 = vld [vmem:[%s6389_s5 + $0x21] sm:$0x1]  ;;  %v4009_v28 = vld [vmem:[%s6389_s5 + $0x150] sm:$0xff] }
  0x87   :  { %v286_v4 = vsel %vm84_vm0, %v285_v13, %v280_v52  ;;  %v409_v13 = vmul.f32 %v3875_v12, %v408_v60  ;;  %v424_v17 = vstv %s3927_s25  ;;  %v715_v15 = vmul.f32 %v3992_v46, %v392_v22  ;;  %s4004_s24 = sld [smem:[#allocation6 + $0x5]] }
  0x88   :  { %v287_v26 = vmax.f32 %v286_v4, 0.0  ;;  %v383_v56 = vadd.f32 %v382_v29, %v378_v3  ;;  %v700_v4 = vadd.f32 %v699_v42, %v695_v8  ;;  %v328_v54 = vsub.f32 %v298_v53, %v327_v0  ;;  %v2588_v29 = vld [vmem:[%s6389_s5 + $0x31] sm:$0x1]  ;;  %s4016_s26 = sld [smem:[#allocation2 + $0x19]]  ;;  %v2600_v0 = vld [vmem:[%s6389_s5 + $0x41] sm:$0x1] }
  0x89   :  { %v357_v25 = vmul.f32 %v2576_v2, %v356_v5  ;;  %v387_v22 = vstv %s3937_s3  ;;  %v430_v33 = vstv %s3950_s1  ;;  %v721_v3 = vmul.f32 %v4009_v28, %v398_v30  ;;  %s4020_s29 = sld [smem:[#allocation2 + $0x1a]]  ;;  %v2684_v30 = vld [vmem:[%s6389_s5 + $0x31] sm:$0x1] }
  0x8a   :  { %288 = vst [vmem:[%s6390_s6] sm:$0xff] %v287_v26  ;;  %v394_v52 = vadd.f32 %v393_v32, %v383_v56  ;;  %v414_v26 = vmul.f32 %v3891_v43, %v413_v6  ;;  %v705_v38 = vadd.f32 %v704_v11, %v700_v4  ;;  %v425_v32 = vmul.f32 %v3924_v58, %v424_v17  ;;  %s4030_s1 = sld [smem:[#allocation2 + $0x1b]]  ;;  %v4044_v53 = vld [vmem:[%s6389_s5 + $0x151] sm:$0xff] }
  0x8b   :  { %v619_v37 = vmul.f32 %v2673_v18, %v296_v21  ;;  %v435_v55 = vstv %s3966_s2  ;;  %v358_v59 = vsub.f32 %v328_v54, %v357_v25  ;;  %v388_v61 = vmul.f32 %v2588_v29, %v387_v22  ;;  %s4039_s13 = sld [smem:[#allocation2 + $0x1c]]  ;;  %v4063_v18 = vld [vmem:[%s6389_s5 + $0x52] sm:$0xff]  ;;  %v2612_v29 = vld [vmem:[%s6389_s5 + $0x201] sm:$0x1] }
  0x8c   :  { %v400_v31 = vadd.f32 %v399_v57, %v394_v52  ;;  %v716_v56 = vadd.f32 %v715_v15, %v705_v38  ;;  %v726_v57 = vmul.f32 %v4027_v20, %v403_v48  ;;  %v431_v42 = vmul.f32 %v3943_v40, %v430_v33  ;;  %s4051_s9 = sld [smem:[#allocation2 + $0x1d]] }
  0x8d   :  { %v419_v48 = vstv %s3973_s14  ;;  %v440_v52 = vstv %s3985_s21  ;;  %v731_v2 = vmul.f32 %v4044_v53, %v408_v60  ;;  %v436_v11 = vmul.f32 %v3955_v49, %v435_v55  ;;  %s4055_s4 = sld [smem:[#allocation6 + $0x6]]  ;;  %v2696_v60 = vld [vmem:[%s6389_s5 + $0x41] sm:$0x1] }
  0x8e   :  { %v405_v12 = vadd.f32 %v404_v23, %v400_v31  ;;  %v722_v23 = vadd.f32 %v721_v3, %v716_v56  ;;  %v620_v31 = vsub.f32 %v3933_v35, %v619_v37  ;;  %v445_v4 = vstv %s3995_s19  ;;  %s4066_s21 = sld [smem:[#allocation2 + $0x1e]] }
  0x8f   :  { %v736_v54 = vmul.f32 %v4063_v18, %v413_v6  ;;  %v389_v25 = vsub.f32 %v358_v59, %v388_v61  ;;  %v420_v35 = vmul.f32 %v2600_v0, %v419_v48  ;;  %s4075_s12 = sld [smem:[#allocation2 + $0x1f]]  ;;  %v450_v6 = vstv %s4004_s24 }
  0x90   :  { %v410_v43 = vadd.f32 %v409_v13, %v405_v12  ;;  %v649_v13 = vmul.f32 %v2684_v30, %v326_v41  ;;  %v727_v15 = vadd.f32 %v726_v57, %v722_v23  ;;  %v441_v12 = vmul.f32 %v3962_v36, %v440_v52  ;;  %s4087_s18 = sld [smem:[#allocation2 + $0x20]]  ;;  %v4098_v57 = vld [vmem:[%s6389_s5 + $0x160] sm:$0xff] }
  0x91   :  { %v455_v38 = vstv %s4016_s26  ;;  %v446_v37 = vmul.f32 %v3978_v63, %v445_v4  ;;  %s4091_s30 = sld [smem:[#allocation2 + $0x21]]  ;;  %v679_v56 = vmul.f32 %v2696_v60, %v356_v5  ;;  %v460_v59 = vstv %s4020_s29  ;;  %v4112_v5 = vld [vmem:[%s6389_s5 + $0x61] sm:$0xff] }
  0x92   :  { %v415_v21 = vadd.f32 %v414_v26, %v410_v43  ;;  %v4080_v26 = vld [vmem:[%s6389_s5 + $0x60] sm:$0xff]  ;;  %v732_v3 = vadd.f32 %v731_v2, %v727_v15  ;;  %v650_v30 = vsub.f32 %v620_v31, %v649_v13  ;;  %s4101_s26 = sld [smem:[#allocation6 + $0x7]]  ;;  %v451_v0 = vmul.f32 %v2612_v29, %v450_v6  ;;  %v2624_v13 = vld [vmem:[%s6389_s5 + $0x211] sm:$0x1] }
  0x93   :  { %v747_v43 = vmul.f32 %v4080_v26, %v424_v17  ;;  %v753_v17 = vmul.f32 %v4098_v57, %v430_v33  ;;  %v456_v23 = vmul.f32 %v3654_v9, %v455_v38  ;;  %s4107_s16 = sld [smem:[#allocation2 + $0x22]]  ;;  %v465_v2 = vstv %s4030_s1  ;;  %v2708_v33 = vld [vmem:[%s6389_s5 + $0x51] sm:$0x1] }
  0x94   :  { %v426_v8 = vadd.f32 %v425_v32, %v415_v21  ;;  %v737_v61 = vadd.f32 %v736_v54, %v732_v3  ;;  %v421_v21 = vsub.f32 %v389_v25, %v420_v35  ;;  %s4115_s29 = sld [smem:[#allocation2 + $0x23]]  ;;  %v461_v9 = vmul.f32 %v3669_v19, %v460_v59  ;;  %v4131_v54 = vld [vmem:[%s6389_s5 + $0x161] sm:$0xff] }
  0x95   :  { %v480_v60 = vstv %s4055_s4  ;;  %s4126_s1 = sld [smem:[#allocation2 + $0x24]]  ;;  %v680_v15 = vsub.f32 %v650_v30, %v679_v56  ;;  %v475_v25 = vstv %s4051_s9  ;;  %v763_v35 = vmul.f32 %v4131_v54, %v440_v52 }
  0x96   :  { %v432_v41 = vadd.f32 %v431_v42, %v426_v8  ;;  %v748_v8 = vadd.f32 %v747_v43, %v737_v61  ;;  %s4135_s20 = sld [smem:[#allocation2 + $0x25]]  ;;  %v466_v29 = vmul.f32 %v3681_v27, %v465_v2  ;;  %v710_v3 = vmul.f32 %v2708_v33, %v387_v22  ;;  %v4146_v43 = vld [vmem:[%s6389_s5 + $0x62] sm:$0xff] }
  0x97   :  { %s4139_s19 = sld [smem:[#allocation6 + $0x8]]  ;;  %v768_v27 = vmul.f32 %v4146_v43, %v445_v4  ;;  %v476_v22 = vmul.f32 %v3708_v44, %v475_v25  ;;  %v490_v61 = vstv %s4075_s12 }
  0x98   :  { %v437_v32 = vadd.f32 %v436_v11, %v432_v41  ;;  %v758_v11 = vmul.f32 %v4112_v5, %v435_v55  ;;  %v470_v55 = vstv %s4039_s13  ;;  %v754_v19 = vadd.f32 %v753_v17, %v748_v8  ;;  %s4151_s27 = sld [smem:[#allocation2 + $0x26]] }
  0x99   :  { %v452_v41 = vsub.f32 %v421_v21, %v451_v0  ;;  %v471_v56 = vmul.f32 %v3689_v34, %v470_v55  ;;  %s4159_s3 = sld [smem:[#allocation2 + $0x27]]  ;;  %v495_v17 = vstv %s4087_s18  ;;  %v2636_v21 = vld [vmem:[%s6389_s5 + $0x221] sm:$0x1]  ;;  %v778_v34 = vmul.f32 %v3802_v16, %v455_v38 }
  0x9a   :  { %v442_v42 = vadd.f32 %v441_v12, %v437_v32  ;;  %v481_v32 = vmul.f32 %v2624_v13, %v480_v60  ;;  %v759_v52 = vadd.f32 %v758_v11, %v754_v19  ;;  %s4166_s11 = sld [smem:[#allocation2 + $0x28]]  ;;  %v4175_v33 = vsub.f32 %v680_v15, %v710_v3  ;;  %v2720_v38 = vld [vmem:[%s6389_s5 + $0x61] sm:$0x1] }
  0x9b   :  { %s4173_s8 = sld [smem:[#allocation2 + $0x29]]  ;;  %v505_v11 = vstv %s4107_s16  ;;  %v491_v13 = vmul.f32 %v3725_v51, %v490_v61  ;;  %v496_v15 = vmul.f32 %v3744_v62, %v495_v17  ;;  %v2648_v62 = vld [vmem:[%s6389_s5 + $0x231] sm:$0x1] }
  0x9c   :  { %v447_v31 = vadd.f32 %v446_v37, %v442_v42  ;;  %v485_v37 = vstv %s4066_s21  ;;  %v510_v42 = vstv %s4101_s26  ;;  %v764_v4 = vadd.f32 %v763_v35, %v759_v52  ;;  %s4178_s0 = sld [smem:[#allocation2 + $0x2a]] }
  0x9d   :  { %v486_v44 = vmul.f32 %v3720_v50, %v485_v37  ;;  %v482_v8 = vsub.f32 %v452_v41, %v481_v32  ;;  %v783_v50 = vmul.f32 %v3813_v47, %v460_v59  ;;  %v511_v19 = vmul.f32 %v2636_v21, %v510_v42  ;;  %s4192_s17 = sld [smem:[#allocation2 + $0x2b]] }
  0x9e   :  { %v457_v12 = vadd.f32 %v456_v23, %v447_v31  ;;  %v500_v23 = vstv %s4091_s30  ;;  %v769_v31 = vadd.f32 %v768_v27, %v764_v4  ;;  %v515_v41 = vstv %s4115_s29  ;;  %s4198_s22 = sld [smem:[#allocation2 + $0x2c]] }
  0x9f   :  { %v501_v35 = vmul.f32 %v3756_v10, %v500_v23  ;;  %v6393_v3 = vstv %s4139_s19  ;;  %v4210_v10 = vmul.f32 %v2720_v38, %v419_v48  ;;  %s4212_s25 = sld [smem:[#allocation9]]  ;;  %v520_v32 = vstv %s4126_s1  ;;  %v2652_v38 = vld [vmem:[%s6389_s5 + $0x330] sm:$0xff] }
  0xa0   :  { %v462_v30 = vadd.f32 %v461_v9, %v457_v12  ;;  %v779_v59 = vadd.f32 %v778_v34, %v769_v31  ;;  %v788_v12 = vmul.f32 %v3829_v1, %v465_v2  ;;  %v525_v52 = vstv %s4135_s20  ;;  %s4217_s13 = sld [smem:[#allocation2]] }
  0xa1   :  { %v516_v48 = vmul.f32 %v3802_v16, %v515_v41  ;;  %s4228_s7 = sld [smem:[#allocation2 + $0x1]]  ;;  %v4233_v21 = vmul.f32 %v2648_v62, %v6393_v3  ;;  %v798_v34 = vmul.f32 %v3867_v39, %v475_v25  ;;  %v552_v31 = vstv %s4173_s8 }
  0xa2   :  { %v467_v0 = vadd.f32 %v466_v29, %v462_v30  ;;  %v506_v29 = vmul.f32 %v3766_v14, %v505_v11  ;;  %v784_v2 = vadd.f32 %v783_v50, %v779_v59  ;;  %v793_v14 = vmul.f32 %v3849_v7, %v470_v55  ;;  %s4238_s2 = sld [smem:[#allocation2 + $0x2]]  ;;  %v2656_v59 = vld [vmem:[%s6389_s5 + $0x331] sm:$0xff] }
  0xa3   :  { %v4219_v30 = vsub.f32 %v482_v8, %v511_v19  ;;  %v535_v55 = vstv %s4159_s3  ;;  %v546_v8 = vstv %s4166_s11  ;;  %s4252_s9 = sld [smem:[#allocation6 + $0x9]]  ;;  %v6394_v25 = vstv %s4178_s0  ;;  %v2654_v19 = vld [vmem:[%s6389_s5 + $0x231] sm:$0xff] }
  0xa4   :  { %v472_v9 = vadd.f32 %v471_v56, %v467_v0  ;;  %v530_v56 = vstv %s4151_s27  ;;  %v789_v4 = vadd.f32 %v788_v12, %v784_v2  ;;  %v521_v0 = vmul.f32 %v3813_v47, %v520_v32  ;;  %s4258_s23 = sld [smem:[#allocation2 + $0x3]] }
  0xa5   :  { %s4278_s10 = sld [smem:[#allocation2 + $0x4]]  ;;  %v4295_v2 = vmul.f32 %v2652_v38, %v552_v31 }
  0xa6   :  { %v477_v51 = vadd.f32 %v476_v22, %v472_v9  ;;  %v2650_v22 = vld [vmem:[%s6389_s5 + $0x230] sm:$0xff]  ;;  %v794_v50 = vadd.f32 %v793_v14, %v789_v4  ;;  %s4289_s6 = sld [smem:[#allocation2 + $0x2d]]  ;;  %v4299_v14 = vmul.f32 %v2654_v19, %v6394_v25  ;;  %v567_v4 = vstv %s4198_s22 }
  0xa7   :  { %v808_v9 = vmul.f32 %v2650_v22, %v485_v37  ;;  %v743_v37 = vsub.f32 %v4175_v33, %v4210_v10  ;;  %s4302_s21 = sld [smem:[#allocation2 + $0x5]] }
  0xa8   :  { %v487_v27 = vadd.f32 %v486_v44, %v477_v51  ;;  %v4246_v44 = vmul.f32 %v3829_v1, %v525_v52  ;;  %v4263_v1 = vmul.f32 %v3849_v7, %v530_v56  ;;  %v543_v7 = vsub.f32 %v4219_v30, %v4233_v21  ;;  %s4308_s12 = sld [smem:[#allocation2 + $0x2e]] }
  0xa9   :  { %v799_v12 = vadd.f32 %v798_v34, %v794_v50  ;;  %v813_v51 = vmul.f32 %v2652_v38, %v490_v61  ;;  %v818_v34 = vmul.f32 %v2654_v19, %v495_v17  ;;  %v823_v38 = vmul.f32 %v2656_v59, %v500_v23  ;;  %s4318_s28 = sld [smem:[#allocation2 + $0x6]] }
  0xaa   :  { %v492_v16 = vadd.f32 %v491_v13, %v487_v27  ;;  %6535 = sst [smem:[#allocation13_spill]] %s4258_s23  ;;  %v4268_v13 = vmul.f32 %v3867_v39, %v535_v55  ;;  %v4284_v39 = vmul.f32 %v2650_v22, %v546_v8  ;;  %v562_v27 = vstv %s4192_s17  ;;  %v2658_v22 = vld [vmem:[%s6389_s5 + $0x232] sm:$0xff] }
  0xab   :  { %6536 = sst [smem:[#allocation14_spill]] %s4278_s10  ;;  %v936_v50 = vstv %s4212_s25  ;;  %v828_v23 = vmul.f32 %v2658_v22, %v505_v11 }
  0xac   :  { %v497_v47 = vadd.f32 %v496_v15, %v492_v16  ;;  %v2732_v15 = vld [vmem:[%s6389_s5 + $0x221] sm:$0x1]  ;;  %s4331_s24 = sld [smem:[#allocation2 + $0x7]] }
  0xad   :  { %v773_v61 = vmul.f32 %v2732_v15, %v450_v6  ;;  %v950_v6 = vstv %s4228_s7  ;;  %v2660_v15 = vld [vmem:[%s6389_s5 + $0x241] sm:$0x1]  ;;  %s4336_s15 = sld [smem:[#allocation2 + $0x2f]] }
  0xae   :  { %v502_v62 = vadd.f32 %v501_v35, %v497_v47  ;;  %v809_v35 = vadd.f32 %v808_v9, %v799_v12  ;;  %v945_v47 = vstv %s4217_s13  ;;  %v955_v9 = vstv %s4238_s2  ;;  %s4358_s18 = sld [smem:[#allocation2 + $0x8]] }
  0xaf   :  { %6537 = sst [smem:[#allocation15_spill]] %s4318_s28  ;;  %v946_v25 = vmul.f32 %v3924_v58, %v945_v47  ;;  %v951_v19 = vmul.f32 %v3943_v40, %v950_v6  ;;  %v956_v11 = vmul.f32 %v3955_v49, %v955_v9  ;;  %v960_v12 = vstv %s4258_s23 }
  0xb0   :  { %v507_v16 = vadd.f32 %v506_v29, %v502_v62  ;;  %v814_v3 = vadd.f32 %v813_v51, %v809_v35  ;;  %v573_v29 = vstv %s4252_s9  ;;  %v4346_v51 = vmul.f32 %v2656_v59, %v562_v27  ;;  %s4360_s30 = sld [smem:[#allocation2 + $0x30]] }
  0xb1   :  { %v4350_v62 = vmul.f32 %v2658_v22, %v567_v4  ;;  %v961_v22 = vmul.f32 %v3962_v36, %v960_v12  ;;  %s4378_s29 = sld [smem:[#allocation2 + $0x9]] }
  0xb2   :  { %v517_v17 = vadd.f32 %v516_v48, %v507_v16  ;;  %v819_v58 = vadd.f32 %v818_v34, %v814_v3  ;;  %v947_v48 = vadd.f32 %v946_v25, %v936_v50  ;;  %v4355_v3 = vld [vmem:[%s6389_s5 + $0x240] sm:$0xff]  ;;  %v965_v25 = vstv %s4278_s10  ;;  %s4399_s1 = sld [smem:[#allocation2 + $0xa]] }
  0xb3   :  { %v574_v34 = vmul.f32 %v2660_v15, %v573_v29  ;;  %v578_v16 = vstv %s4289_s6  ;;  %s4427_s10 = sld [smem:[#allocation2 + $0xb]] }
  0xb4   :  { %v522_v40 = vadd.f32 %v521_v0, %v517_v17  ;;  %v824_v49 = vadd.f32 %v823_v38, %v819_v58  ;;  %v838_v0 = vmul.f32 %v4355_v3, %v515_v41  ;;  %v952_v59 = vadd.f32 %v951_v19, %v947_v48  ;;  %v4375_v17 = vld [vmem:[%s6389_s5 + $0x340] sm:$0xff]  ;;  %s4449_s27 = sld [smem:[#allocation2 + $0xc]] }
  0xb5   :  { %v975_v38 = vstv %s4302_s21  ;;  %v843_v19 = vmul.f32 %v4375_v17, %v520_v32  ;;  %v584_v58 = vstv %s4308_s12  ;;  %v4391_v48 = vld [vmem:[%s6389_s5 + $0x241] sm:$0xff]  ;;  %v980_v32 = vstv %s4318_s28  ;;  %s4451_s20 = sld [smem:[#allocation2 + $0x31]] }
  0xb6   :  { %v527_v35 = vadd.f32 %v4246_v44, %v522_v40  ;;  %v829_v41 = vadd.f32 %v828_v23, %v824_v49  ;;  %v957_v36 = vadd.f32 %v956_v11, %v952_v59  ;;  %v966_v44 = vmul.f32 %v3978_v63, %v965_v25  ;;  %v2744_v63 = vld [vmem:[%s6389_s5 + $0x231] sm:$0x1]  ;;  %v4444_v59 = vld [vmem:[%s6389_s5 + $0x242] sm:$0xff]  ;;  %s4471_s3 = sld [smem:[#allocation2 + $0xd]] }
  0xb7   :  { %v4396_v23 = vsub.f32 %v743_v37, %v773_v61  ;;  %v848_v11 = vmul.f32 %v4391_v48, %v525_v52  ;;  %v976_v33 = vmul.f32 %v3992_v46, %v975_v38  ;;  %v4414_v37 = vsub.f32 %v543_v7, %v574_v34  ;;  %v4424_v52 = vld [vmem:[%s6389_s5 + $0x341] sm:$0xff]  ;;  %s4489_s11 = sld [smem:[#allocation2 + $0xe]] }
  0xb8   :  { %v532_v15 = vadd.f32 %v4263_v1, %v527_v35  ;;  %v839_v1 = vadd.f32 %v838_v0, %v829_v41  ;;  %v962_v40 = vadd.f32 %v961_v22, %v957_v36  ;;  %v4419_v61 = vmul.f32 %v4355_v3, %v578_v16  ;;  %s4497_s26 = sld [smem:[#allocation9 + $0x2]] }
  0xb9   :  { %v985_v49 = vstv %s4331_s24  ;;  %v853_v30 = vmul.f32 %v4424_v52, %v530_v56  ;;  %v4439_v0 = vmul.f32 %v4375_v17, %v584_v58  ;;  %v803_v56 = vmul.f32 %v2744_v63, %v480_v60  ;;  %s4515_s28 = sld [smem:[#allocation2 + $0xf]] }
  0xba   :  { %v537_v10 = vadd.f32 %v4268_v13, %v532_v15  ;;  %v844_v46 = vadd.f32 %v843_v19, %v839_v1  ;;  %v967_v21 = vadd.f32 %v966_v44, %v962_v40  ;;  %v981_v13 = vmul.f32 %v4009_v28, %v980_v32  ;;  %v2756_v28 = vld [vmem:[%s6389_s5 + $0x241] sm:$0x1]  ;;  %v4468_v44 = vld [vmem:[%s6389_s5 + $0x250] sm:$0xff]  ;;  %s4520_s14 = sld [smem:[#allocation6]] }
  0xbb   :  { %v990_v22 = vstv %s4358_s18  ;;  %v858_v35 = vmul.f32 %v4444_v59, %v535_v55  ;;  %v986_v60 = vmul.f32 %v4027_v20, %v985_v49  ;;  %v589_v19 = vstv %s4336_s15  ;;  %s4555_s23 = sld [smem:[#allocation2 + $0x11]] }
  0xbc   :  { %v548_v7 = vadd.f32 %v4284_v39, %v537_v10  ;;  %v849_v39 = vadd.f32 %v848_v11, %v844_v46  ;;  %v977_v34 = vadd.f32 %v976_v33, %v967_v21  ;;  %v594_v36 = vstv %s4360_s30  ;;  %v4486_v33 = vld [vmem:[%s6389_s5 + $0x350] sm:$0xff]  ;;  %s4574_s22 = sld [smem:[#allocation2 + $0x12]] }
  0xbd   :  { %v995_v15 = vstv %s4378_s29  ;;  %v869_v63 = vmul.f32 %v4468_v44, %v546_v8  ;;  %v804_v11 = vsub.f32 %v4396_v23, %v803_v56  ;;  %v833_v40 = vmul.f32 %v2756_v28, %v510_v42  ;;  %s4594_s6 = sld [smem:[#allocation2 + $0x13]] }
  0xbe   :  { %v554_v41 = vadd.f32 %v4295_v2, %v548_v7  ;;  %v854_v55 = vadd.f32 %v853_v30, %v849_v39  ;;  %v982_v20 = vadd.f32 %v981_v13, %v977_v34  ;;  %v991_v2 = vmul.f32 %v4044_v53, %v990_v22  ;;  %v2768_v53 = vld [vmem:[%s6389_s5 + $0x251] sm:$0x1]  ;;  %s935_s9 = ssub.f32 %s4497_s26, %s4212_s25 }
  0xbf   :  { %v1005_v8 = vstv %s4399_s1  ;;  %v996_v23 = vmul.f32 %v4063_v18, %v995_v15  ;;  %v590_v30 = vmul.f32 %v4391_v48, %v589_v19  ;;  %v595_v21 = vmul.f32 %v4424_v52, %v594_v36  ;;  %6538 = sst [smem:[#allocation16_spill]] %s4515_s28 }
  0xc0   :  { %v559_v1 = vadd.f32 %v4299_v14, %v554_v41  ;;  %v859_v10 = vadd.f32 %v858_v35, %v854_v55  ;;  %v875_v14 = vmul.f32 %v4486_v33, %v552_v31  ;;  %v987_v42 = vadd.f32 %v986_v60, %v982_v20  ;;  %v4512_v31 = vld [vmem:[%s6389_s5 + $0x251] sm:$0xff]  ;;  %s4605_s12 = sld [smem:[#allocation6 + $0x2]] }
  0xc1   :  { %v1010_v13 = vstv %s4427_s10  ;;  %v6539_v7 = vstv %s4178_s0  ;;  %v1006_v28 = vmul.f32 %v4080_v26, %v1005_v8  ;;  %v834_v35 = vsub.f32 %v804_v11, %v833_v40  ;;  %v4531_v41 = vld [vmem:[%s6389_s5 + $0x351] sm:$0xff]  ;;  %s4534_s0 = sld [smem:[#allocation2 + $0x10]] }
  0xc2   :  { %v564_v46 = vadd.f32 %v4346_v51, %v559_v1  ;;  %v870_v18 = vadd.f32 %v869_v63, %v859_v10  ;;  %v880_v51 = vmul.f32 %v4512_v31, %v6539_v7  ;;  %v992_v56 = vadd.f32 %v991_v2, %v987_v42  ;;  %6542 = sst [smem:[#allocation18_spill]] %s4555_s23  ;;  %v4571_v7 = vld [vmem:[%s6389_s5 + $0x260] sm:$0xff] }
  0xc3   :  { %v6540_v34 = vstv %s4139_s19  ;;  %v1015_v55 = vstv %s4449_s27  ;;  %v885_v20 = vmul.f32 %v4531_v41, %v562_v27  ;;  %v1011_v1 = vmul.f32 %v4098_v57, %v1010_v13  ;;  %v4552_v27 = vld [vmem:[%s6389_s5 + $0x252] sm:$0xff]  ;;  %6544 = sst [smem:[#allocation20_spill]] %s4574_s22 }
  0xc4   :  { %v569_v39 = vadd.f32 %v4350_v62, %v564_v46  ;;  %v864_v60 = vmul.f32 %v2768_v53, %v6540_v34  ;;  %v876_v63 = vadd.f32 %v875_v14, %v870_v18  ;;  %v2780_v62 = vld [vmem:[%s6389_s5 + $0x261] sm:$0x1]  ;;  %v997_v2 = vadd.f32 %v996_v23, %v992_v56  ;;  %6545 = sst [smem:[#allocation21_spill]] %s4594_s6 }
  0xc5   :  { %v599_v40 = vstv %s4451_s20  ;;  %v605_v10 = vrot.slane %v4414_v37, %v3833_v24  ;;  %v6401_v53 = vstv %s4471_s3  ;;  %s4560_s20 = sld [smem:[#allocation6 + $0x1]]  ;;  %v1016_v37 = vmul.f32 %v4112_v5, %v1015_v55 }
  0xc6   :  { %v580_v11 = vadd.f32 %v4419_v61, %v569_v39  ;;  %v881_v14 = vadd.f32 %v880_v51, %v876_v63  ;;  %v890_v61 = vmul.f32 %v4552_v27, %v567_v4  ;;  %v1007_v42 = vadd.f32 %v1006_v28, %v997_v2  ;;  %v4599_v63 = vld [vmem:[%s6389_s5 + $0x261] sm:$0xff]  ;;  %6546 = sst [smem:[#allocation22_spill]] %s4605_s12 }
  0xc7   :  { %6541 = sst [smem:[#allocation17_spill]] %s4534_s0  ;;  %v865_v46 = vsub.f32 %v834_v35, %v864_v60  ;;  %v896_v18 = vmul.f32 %v2780_v62, %v573_v29  ;;  %v6400_v51 = vstv %s4489_s11  ;;  %v901_v56 = vmul.f32 %v4571_v7, %v578_v16 }
  0xc8   :  { %v586_v23 = vadd.f32 %v4439_v0, %v580_v11  ;;  %v886_v4 = vadd.f32 %v885_v20, %v881_v14  ;;  %v4582_v0 = vld [vmem:[%s6389_s5 + $0x360] sm:$0xff]  ;;  %v1012_v29 = vadd.f32 %v1011_v1, %v1007_v42  ;;  %v1021_v28 = vmul.f32 %v4131_v54, %v6401_v53  ;;  %s4624_s26 = sld [smem:[#allocation2 + $0x14]]  ;;  %v4679_v53 = vld [vmem:[%s6389_s5 + $0x171] sm:$0xff] }
  0xc9   :  { %v600_v35 = vmul.f32 %v4444_v59, %v599_v40  ;;  %v907_v34 = vmul.f32 %v4582_v0, %v584_v58  ;;  %v6398_v16 = vstv %s4515_s28  ;;  %v940_v20 = vstv %s4520_s14  ;;  %v4616_v14 = vld [vmem:[%s6389_s5 + $0x361] sm:$0xff]  ;;  %s4642_s30 = sld [smem:[#allocation2 + $0x15]] }
  0xca   :  { %v591_v39 = vadd.f32 %v590_v30, %v586_v23  ;;  %v891_v60 = vadd.f32 %v890_v61, %v886_v4  ;;  %v2793_v30 = vld [vmem:[%s6389_s5 + $0x41] sm:$0x1]  ;;  %v1017_v58 = vadd.f32 %v1016_v37, %v1012_v29  ;;  %v1026_v62 = vmul.f32 %v4146_v43, %v6400_v51  ;;  %v4621_v61 = vld [vmem:[%s6389_s5 + $0x70] sm:$0xff]  ;;  %s4653_s4 = sld [smem:[#allocation6 + $0x3]] }
  0xcb   :  { %6543 = sst [smem:[#allocation19_spill]] %s4560_s20  ;;  %v897_v1 = vsub.f32 %v865_v46, %v896_v18  ;;  %v912_v11 = vmul.f32 %v4599_v63, %v589_v19  ;;  %v6399_v42 = vstv %s4534_s0  ;;  %v1037_v23 = vmul.f32 %v4621_v61, %v6398_v16  ;;  %v4639_v29 = vld [vmem:[%s6389_s5 + $0x170] sm:$0xff] }
  0xcc   :  { %v596_v2 = vadd.f32 %v595_v21, %v591_v39  ;;  %v902_v37 = vadd.f32 %v901_v56, %v891_v60  ;;  %v917_v21 = vmul.f32 %v4616_v14, %v594_v36  ;;  %v1022_v19 = vadd.f32 %v1021_v28, %v1017_v58  ;;  %v4647_v28 = vld [vmem:[%s6389_s5 + $0x262] sm:$0xff]  ;;  %v2804_v39 = vld [vmem:[%s6389_s5 + $0x51] sm:$0x1]  ;;  %s4665_s8 = sld [smem:[#allocation2 + $0x16]] }
  0xcd   :  { %v4632_v18 = vstv %s935_s9  ;;  %v941_v4 = vmul.f32 %v2793_v30, %v940_v20  ;;  %v1047_v56 = vstv %s4555_s23  ;;  %v1043_v30 = vmul.f32 %v4639_v29, %v6399_v42  ;;  %s4682_s9 = sld [smem:[#allocation2 + $0x17]] }
  0xce   :  { %6547 = sst [smem:[#allocation23_spill]] %s4624_s26  ;;  %v601_v46 = vadd.f32 %v600_v35, %v596_v2  ;;  %v908_v36 = vadd.f32 %v907_v34, %v902_v37  ;;  %v6406_v35 = vstv %s4560_s20  ;;  %v1027_v60 = vadd.f32 %v1026_v62, %v1022_v19  ;;  %v4662_v2 = vld [vmem:[%s6389_s5 + $0x71] sm:$0xff] }
  0xcf   :  { %6548 = sst [smem:[#allocation24_spill]] %s4642_s30  ;;  %v922_v34 = vmul.f32 %v4647_v28, %v599_v40  ;;  %v1052_v37 = vstv %s4574_s22  ;;  %v927_v19 = vrot.slane %v897_v1, %v3833_v24  ;;  %v942_v42 = vsub.f32 %v4632_v18, %v941_v4  ;;  %v2816_v4 = vld [vmem:[%s6389_s5 + $0x61] sm:$0x1] }
  0xd0   :  { %6549 = sst [smem:[#allocation25_spill]] %s4653_s4  ;;  %v606_v58 = vadd.f32 %v605_v10, %v601_v46  ;;  %v913_v62 = vadd.f32 %v912_v11, %v908_v36  ;;  %v1038_v16 = vadd.f32 %v1037_v23, %v1027_v60  ;;  %v1048_v10 = vmul.f32 %v4662_v2, %v1047_v56  ;;  %v4694_v60 = vld [vmem:[%s6389_s5 + $0x72] sm:$0xff] }
  0xd1   :  { %v971_v51 = vmul.f32 %v2804_v39, %v6406_v35  ;;  %v6410_v11 = vstv %s4594_s6  ;;  %v6408_v39 = vstv %s4605_s12  ;;  %s4697_s20 = sld [smem:[#allocation2 + $0x18]]  ;;  %v6413_v35 = vstv %s4642_s30 }
  0xd2   :  { %6550 = sst [smem:[#allocation26_spill]] %s4665_s8  ;;  %v607_v40 = vsel %vm84_vm0, %v606_v58, %v601_v46  ;;  %v918_v23 = vadd.f32 %v917_v21, %v913_v62  ;;  %v1044_v36 = vadd.f32 %v1043_v30, %v1038_v16  ;;  %v1053_v46 = vmul.f32 %v4679_v53, %v1052_v37 }
  0xd3   :  { %v608_v1 = vmax.f32 %v607_v40, 0.0  ;;  %v6409_v58 = vstv %s4624_s26  ;;  %s6551_s0 = sld [smem:[#allocation46_spill]]  ;;  %v1058_v30 = vmul.f32 %v4694_v60, %v6410_v11  ;;  %v972_v62 = vsub.f32 %v942_v42, %v971_v51  ;;  %v4710_v40 = vld [vmem:[%s6389_s5 + $0x80] sm:$0xff]  ;;  %v2828_v51 = vld [vmem:[%s6389_s5 + $0x71] sm:$0x1] }
  0xd4   :  { %v923_v16 = vadd.f32 %v922_v34, %v918_v23  ;;  %v1049_v21 = vadd.f32 %v1048_v10, %v1044_v36  ;;  %s4705_s15 = sld [smem:[#allocation6 + $0x4]]  ;;  %v1001_v34 = vmul.f32 %v2816_v4, %v6408_v39  ;;  %v1069_v23 = vmul.f32 %v4710_v40, %v6409_v58  ;;  %v4727_v36 = vld [vmem:[%s6389_s5 + $0x180] sm:$0xff] }
  0xd5   :  { %s4713_s17 = sld [smem:[#allocation2 + $0x19]]  ;;  %v6418_v42 = vstv %s4653_s4  ;;  %v4742_v58 = vld [vmem:[%s6389_s5 + $0x81] sm:$0xff]  ;;  %v6419_v11 = vstv %s4682_s9 }
  0xd6   :  { %v1054_v10 = vadd.f32 %v1053_v46, %v1049_v21  ;;  %s4730_s12 = sld [smem:[#allocation2 + $0x1a]]  ;;  %v1075_v21 = vmul.f32 %v4727_v36, %v6413_v35  ;;  %v4763_v35 = vld [vmem:[%s6389_s5 + $0x181] sm:$0xff] }
  0xd7   :  { %s4737_s23 = sld [smem:[#allocation6 + $0x5]] }
  0xd8   :  { %v1059_v4 = vadd.f32 %v1058_v30, %v1054_v10  ;;  %s4745_s19 = sld [smem:[#allocation2 + $0x1b]]  ;;  %v1002_v30 = vsub.f32 %v972_v62, %v1001_v34  ;;  %v1273_v62 = vmul.f32 %v4098_v57, %v950_v6 }
  0xd9   :  { %2671 = vst [vmem:[%s6551_s0 + $0x8] sm:$0xff] %v608_v1  ;;  %v928_v1 = vadd.f32 %v927_v19, %v923_v16  ;;  %v6420_v19 = vstv %s4665_s8  ;;  %s4755_s30 = sld [smem:[#allocation2 + $0x1c]] }
  0xda   :  { %6552 = sst [smem:[#allocation27_spill]] %s4705_s15  ;;  %v1070_v10 = vadd.f32 %v1069_v23, %v1059_v4  ;;  %v1063_v34 = vstv %s4705_s15  ;;  %v1278_v4 = vmul.f32 %v4112_v5, %v955_v9  ;;  %v1288_v5 = vmul.f32 %v4146_v43, %v965_v25 }
  0xdb   :  { %v929_v46 = vsel %vm84_vm0, %v928_v1, %v923_v16  ;;  %v1268_v16 = vmul.f32 %v4080_v26, %v945_v47  ;;  %v1032_v1 = vmul.f32 %v2828_v51, %v6418_v42  ;;  %v1089_v26 = vstv %s4697_s20  ;;  %s4766_s4 = sld [smem:[#allocation2 + $0x1d]] }
  0xdc   :  { %v930_v39 = vmax.f32 %v929_v46, 0.0  ;;  %v1080_v46 = vmul.f32 %v4742_v58, %v6420_v19  ;;  %v1076_v23 = vadd.f32 %v1075_v21, %v1070_v10  ;;  %v1085_v51 = vmul.f32 %v4763_v35, %v6419_v11  ;;  %s4780_s22 = sld [smem:[#allocation6 + $0x6]] }
  0xdd   :  { %v1269_v47 = vadd.f32 %v1268_v16, %v936_v50  ;;  %v4785_v50 = vld [vmem:[%s6389_s5 + $0x82] sm:$0xff]  ;;  %v1099_v57 = vstv %s4713_s17  ;;  %s4788_s7 = sld [smem:[#allocation2 + $0x1e]]  ;;  %v1033_v21 = vsub.f32 %v1002_v30, %v1032_v1  ;;  %v1283_v42 = vmul.f32 %v4131_v54, %v960_v12  ;;  %v2852_v54 = vld [vmem:[%s6389_s5 + $0x241] sm:$0x1] }
  0xde   :  { %2791 = vst [vmem:[%s6551_s0 + $0x10] sm:$0xff] %v930_v39  ;;  %v2840_v39 = vld [vmem:[%s6389_s5 + $0x81] sm:$0x1]  ;;  %v1081_v16 = vadd.f32 %v1080_v46, %v1076_v23  ;;  %v1090_v10 = vmul.f32 %v4785_v50, %v1089_v26  ;;  %s4796_s28 = sld [smem:[#allocation2 + $0x1f]]  ;;  %v1104_v19 = vstv %s4730_s12  ;;  %v1100_v30 = vmul.f32 %v4355_v3, %v1099_v57 }
  0xdf   :  { %v1274_v6 = vadd.f32 %v1273_v62, %v1269_v47  ;;  %v1064_v11 = vmul.f32 %v2840_v39, %v1063_v34  ;;  %s4804_s2 = sld [smem:[#allocation2 + $0x20]]  ;;  %v1094_v12 = vstv %s4737_s23  ;;  %v1109_v1 = vstv %s4745_s19 }
  0xe0   :  { %v1086_v9 = vadd.f32 %v1085_v51, %v1081_v16  ;;  %s4812_s6 = sld [smem:[#allocation2 + $0x21]]  ;;  %v1105_v46 = vmul.f32 %v4375_v17, %v1104_v19  ;;  %v1114_v62 = vstv %s4755_s30  ;;  %v1298_v23 = vmul.f32 %v4621_v61, %v975_v38 }
  0xe1   :  { %6553 = sst [smem:[#allocation28_spill]] %s4766_s4  ;;  %v1279_v47 = vadd.f32 %v1278_v4, %v1274_v6  ;;  %v1065_v3 = vsub.f32 %v1033_v21, %v1064_v11  ;;  %v1110_v17 = vmul.f32 %v4391_v48, %v1109_v1  ;;  %v1303_v11 = vmul.f32 %v4639_v29, %v980_v32  ;;  %v2864_v4 = vld [vmem:[%s6389_s5 + $0x251] sm:$0x1] }
  0xe2   :  { %6556 = sst [smem:[#allocation13_spill]] %s4780_s22  ;;  %v1091_v25 = vadd.f32 %v1090_v10, %v1086_v9  ;;  %v1119_v6 = vstv %s4766_s4  ;;  %v1124_v38 = vstv %s4780_s22  ;;  %v1308_v48 = vmul.f32 %v4662_v2, %v985_v49 }
  0xe3   :  { %s4819_s26 = sld [smem:[#allocation2 + $0x22]]  ;;  %v1284_v43 = vadd.f32 %v1283_v42, %v1279_v47  ;;  %v1095_v42 = vmul.f32 %v2852_v54, %v1094_v12  ;;  %v1115_v32 = vmul.f32 %v4424_v52, %v1114_v62  ;;  %v1129_v29 = vstv %s4788_s7 }
  0xe4   :  { %6557 = sst [smem:[#allocation14_spill]] %s4796_s28  ;;  %v1101_v51 = vadd.f32 %v1100_v30, %v1091_v25  ;;  %v1313_v10 = vmul.f32 %v4679_v53, %v990_v22  ;;  %v1120_v49 = vmul.f32 %v4444_v59, %v1119_v6  ;;  %v1125_v52 = vmul.f32 %v2864_v4, %v1124_v38  ;;  %v2913_v4 = vld [vmem:[%s6389_s5 + $0x61] sm:$0x1] }
  0xe5   :  { %6558 = sst [smem:[#allocation29_spill]] %s4804_s2  ;;  %v1289_v39 = vadd.f32 %v1288_v5, %v1284_v43  ;;  %v1096_v47 = vsub.f32 %v1065_v3, %v1095_v42  ;;  %v1134_v2 = vstv %s4796_s28  ;;  %v1139_v9 = vstv %s4804_s2  ;;  %v2876_v43 = vld [vmem:[%s6389_s5 + $0x261] sm:$0x1] }
  0xe6   :  { %s4824_s16 = sld [smem:[#allocation6 + $0x7]]  ;;  %v1106_v21 = vadd.f32 %v1105_v46, %v1101_v51  ;;  %v1318_v22 = vmul.f32 %v4694_v60, %v995_v15  ;;  %v1130_v59 = vmul.f32 %v4468_v44, %v1129_v29  ;;  %v6454_v54 = vstv %s4812_s6 }
  0xe7   :  { %s4827_s8 = sld [smem:[#allocation2 + $0x23]]  ;;  %v1299_v61 = vadd.f32 %v1298_v23, %v1289_v39  ;;  %v1328_v60 = vmul.f32 %v4710_v40, %v1005_v8  ;;  %v1126_v46 = vsub.f32 %v1096_v47, %v1125_v52  ;;  %v1135_v3 = vmul.f32 %v4486_v33, %v1134_v2 }
  0xe8   :  { %s4837_s13 = sld [smem:[#allocation2 + $0x24]]  ;;  %v1111_v5 = vadd.f32 %v1110_v17, %v1106_v21  ;;  %v1140_v39 = vmul.f32 %v4512_v31, %v1139_v9  ;;  %v1333_v51 = vmul.f32 %v4727_v36, %v1010_v13  ;;  %v1145_v33 = vmul.f32 %v4531_v41, %v6454_v54 }
  0xe9   :  { %s4847_s21 = sld [smem:[#allocation2 + $0x25]]  ;;  %v1304_v16 = vadd.f32 %v1303_v11, %v1299_v61  ;;  %v6453_v23 = vstv %s4819_s26  ;;  %v1338_v41 = vmul.f32 %v4742_v58, %v1015_v55  ;;  %v4940_v55 = vmul.f32 %v2913_v4, %v940_v20 }
  0xea   :  { %s4855_s25 = sld [smem:[#allocation2 + $0x26]]  ;;  %v1116_v53 = vadd.f32 %v1115_v32, %v1111_v5  ;;  %v6572_v52 = vstv %s4471_s3 }
  0xeb   :  { %s4858_s0 = sld [smem:[#allocation6 + $0x8]]  ;;  %v1309_v30 = vadd.f32 %v1308_v48, %v1304_v16  ;;  %v2888_v48 = vld [vmem:[%s6389_s5 + $0x271] sm:$0x1]  ;;  %v1150_v16 = vmul.f32 %v4552_v27, %v6453_v23  ;;  %v1343_v27 = vmul.f32 %v4763_v35, %v6572_v52 }
  0xec   :  { %6560 = sst [smem:[#allocation15_spill]] %s4824_s16  ;;  %v6449_v25 = vstv %s4824_s16  ;;  %v1121_v44 = vadd.f32 %v1120_v49, %v1116_v53  ;;  %v4999_v52 = vld [vmem:[%s6389_s5 + $0x370] sm:$0xff] }
  0xed   :  { %6561 = sst [smem:[#allocation30_spill]] %s4827_s8  ;;  %v1314_v15 = vadd.f32 %v1313_v10, %v1309_v30  ;;  %v6452_v42 = vstv %s4827_s8  ;;  %v1155_v31 = vmul.f32 %v2876_v43, %v6449_v25 }
  0xee   :  { %6562 = sst [smem:[#allocation31_spill]] %s4837_s13  ;;  %v1131_v17 = vadd.f32 %v1130_v59, %v1121_v44  ;;  %v6448_v11 = vstv %s4837_s13  ;;  %v1160_v10 = vmul.f32 %v4571_v7, %v6452_v42 }
  0xef   :  { %6563 = sst [smem:[#allocation32_spill]] %s4847_s21  ;;  %v1319_v8 = vadd.f32 %v1318_v22, %v1314_v15  ;;  %v6447_v61 = vstv %s4847_s21  ;;  %v1165_v5 = vmul.f32 %v4582_v0, %v6448_v11  ;;  %v4947_v22 = vsub.f32 %v1126_v46, %v1155_v31 }
  0xf0   :  { %6564 = sst [smem:[#allocation33_spill]] %s4855_s25  ;;  %v1136_v32 = vadd.f32 %v1135_v3, %v1131_v17  ;;  %v6443_v47 = vstv %s4855_s25  ;;  %v1170_v53 = vmul.f32 %v4599_v63, %v6447_v61 }
  0xf1   :  { %6565 = sst [smem:[#allocation34_spill]] %s4858_s0  ;;  %v6438_v13 = vstv %s4858_s0  ;;  %v1329_v21 = vadd.f32 %v1328_v60, %v1319_v8  ;;  %v4961_v20 = vmul.f32 %v4616_v14, %v6443_v47  ;;  %v6576_v60 = vstv %s4489_s11  ;;  %v5075_v47 = vld [vmem:[%s6389_s5 + $0x191] sm:$0xff] }
  0xf2   :  { %s4868_s24 = sld [smem:[#allocation2 + $0x27]]  ;;  %v1141_v30 = vadd.f32 %v1140_v39, %v1136_v32  ;;  %v4954_v59 = vmul.f32 %v2888_v48, %v6438_v13  ;;  %v1348_v44 = vmul.f32 %v4785_v50, %v6576_v60  ;;  %v5033_v60 = vld [vmem:[%s6389_s5 + $0x272] sm:$0xff]  ;;  %v1375_v11 = vmul.f32 %v5075_v47, %v1052_v37 }
  0xf3   :  { %s4872_s15 = sld [smem:[#allocation2 + $0x28]]  ;;  %v1334_v49 = vadd.f32 %v1333_v51, %v1329_v21  ;;  %v4975_v51 = vld [vmem:[%s6389_s5 + $0x90] sm:$0xff] }
  0xf4   :  { %s4880_s18 = sld [smem:[#allocation2 + $0x29]]  ;;  %v1146_v46 = vadd.f32 %v1145_v33, %v1141_v30  ;;  %v1187_v32 = vsub.f32 %v4947_v22, %v4954_v59  ;;  %v5287_v59 = vld [vmem:[%s6389_s5 + $0x282] sm:$0xff] }
  0xf5   :  { %s4887_s29 = sld [smem:[#allocation2 + $0x2a]]  ;;  %v1339_v15 = vadd.f32 %v1338_v41, %v1334_v49  ;;  %v4994_v49 = vld [vmem:[%s6389_s5 + $0x270] sm:$0xff] }
  0xf6   :  { %s4898_s4 = sld [smem:[#allocation2 + $0x2b]]  ;;  %v1151_v33 = vadd.f32 %v1150_v16, %v1146_v46  ;;  %v1264_v16 = vsub.f32 %v4632_v18, %v4940_v55  ;;  %v5023_v18 = vld [vmem:[%s6389_s5 + $0x271] sm:$0xff] }
  0xf7   :  { %s4902_s22 = sld [smem:[#allocation2 + $0x2c]]  ;;  %v1344_v4 = vadd.f32 %v1343_v27, %v1339_v15  ;;  %v5008_v27 = vld [vmem:[%s6389_s5 + $0x190] sm:$0xff] }
  0xf8   :  { %6566 = sst [smem:[#allocation35_spill]] %s4868_s24  ;;  %v6439_v43 = vstv %s4868_s24  ;;  %v5028_v55 = vld [vmem:[%s6389_s5 + $0x371] sm:$0xff] }
  0xf9   :  { %6567 = sst [smem:[#allocation36_spill]] %s4872_s15  ;;  %v6437_v3 = vstv %s4872_s15  ;;  %v1180_v41 = vmul.f32 %v4647_v28, %v6439_v43  ;;  %v1349_v46 = vadd.f32 %v1348_v44, %v1344_v4 }
  0xfa   :  { %6568 = sst [smem:[#allocation37_spill]] %s4880_s18  ;;  %v6435_v39 = vstv %s4880_s18  ;;  %v5013_v30 = vmul.f32 %v4994_v49, %v6437_v3  ;;  %v1161_v3 = vadd.f32 %v1160_v10, %v1151_v33  ;;  %v5060_v10 = vld [vmem:[%s6389_s5 + $0x91] sm:$0xff] }
  0xfb   :  { %6569 = sst [smem:[#allocation38_spill]] %s4887_s29  ;;  %v6442_v8 = vstv %s4887_s29  ;;  %v5018_v15 = vmul.f32 %v4999_v52, %v6435_v39  ;;  %v1370_v33 = vmul.f32 %v5060_v10, %v1047_v56 }
  0xfc   :  { %6570 = sst [smem:[#allocation39_spill]] %s4898_s4  ;;  %v6440_v17 = vstv %s4898_s4  ;;  %v5043_v13 = vmul.f32 %v5023_v18, %v6442_v8  ;;  %v2924_v8 = vld [vmem:[%s6389_s5 + $0x71] sm:$0x1] }
  0xfd   :  { %6571 = sst [smem:[#allocation40_spill]] %s4902_s22  ;;  %v6441_v31 = vstv %s4902_s22  ;;  %v5048_v43 = vmul.f32 %v5028_v55, %v6440_v17 }
  0xfe   :  { %s4924_s16 = sld [smem:[#allocation9]]  ;;  %v5053_v44 = vmul.f32 %v5033_v60, %v6441_v31  ;;  %v1166_v31 = vadd.f32 %v1165_v5, %v1161_v3  ;;  %v2900_v5 = vld [vmem:[%s6389_s5 + $0x281] sm:$0x1] }
  0xff   :  { %s4933_s28 = sld [smem:[#allocation2]] }
 0x100   :  { %s4945_s27 = sld [smem:[#allocation2 + $0x1]] }
 0x101   :  { %s6574_s14 = sld [smem:[#allocation16_spill]] }
 0x102   :  { %s4956_s2 = sld [smem:[#allocation2 + $0x2]] }
 0x103   :  { %s4964_s3 = sld [smem:[#allocation6 + $0x9]] }
 0x104   :  { %s4977_s0 = sld [smem:[#allocation2 + $0x3]] }
 0x105   :  { %s6579_s11 = sld [smem:[#allocation17_spill]]  ;;  %v6450_v17 = vstv %s4933_s28 }
 0x106   :  { %6573 = sst [smem:[#allocation41_spill]] %s4945_s27  ;;  %v1590_v56 = vmul.f32 %v4710_v40, %v6450_v17  ;;  %v1171_v40 = vadd.f32 %v1170_v53, %v1166_v31  ;;  %v5099_v17 = vld [vmem:[%s6389_s5 + $0x92] sm:$0xff] }
 0x107   :  { %v6578_v48 = vstv %s6574_s14  ;;  %s4984_s25 = sld [smem:[#allocation2 + $0x4]] }
 0x108   :  { %6575 = sst [smem:[#allocation16_spill]] %s4956_s2  ;;  %v1359_v21 = vmul.f32 %v4975_v51, %v6578_v48  ;;  %v1176_v54 = vadd.f32 %v4961_v20, %v1171_v40  ;;  %v2936_v20 = vld [vmem:[%s6389_s5 + $0x81] sm:$0x1] }
 0x109   :  { %s5001_s13 = sld [smem:[#allocation2 + $0x2d]]  ;;  %v6467_v3 = vstv %s4964_s3 }
 0x10a   :  { %6577 = sst [smem:[#allocation42_spill]] %s4977_s0  ;;  %v1360_v4 = vadd.f32 %v1359_v21, %v1349_v46  ;;  %v6451_v21 = vstv %s4945_s27  ;;  %v6456_v46 = vstv %s4956_s2 }
 0x10b   :  { %v6582_v48 = vstv %s6579_s11  ;;  %s5038_s18 = sld [smem:[#allocation2 + $0x5]]  ;;  %v1595_v25 = vmul.f32 %v4727_v36, %v6451_v21  ;;  %v1600_v37 = vmul.f32 %v4742_v58, %v6456_v46  ;;  %v6459_v36 = vstv %s4977_s0  ;;  %v5123_v58 = vld [vmem:[%s6389_s5 + $0xa0] sm:$0xff] }
 0x10c   :  { %v1365_v39 = vmul.f32 %v5008_v27, %v6582_v48  ;;  %s5055_s15 = sld [smem:[#allocation2 + $0x2e]]  ;;  %v6460_v48 = vstv %s4924_s16  ;;  %v1181_v46 = vadd.f32 %v1180_v41, %v1176_v54 }
 0x10d   :  { %6580 = sst [smem:[#allocation17_spill]] %s4984_s25  ;;  %v6464_v23 = vstv %s4984_s25 }
 0x10e   :  { %s5067_s14 = sld [smem:[#allocation2 + $0x6]]  ;;  %v1366_v61 = vadd.f32 %v1365_v39, %v1360_v4  ;;  %v1591_v39 = vadd.f32 %v1590_v56, %v6460_v48  ;;  %v5118_v56 = vmul.f32 %v2900_v5, %v6467_v3  ;;  %v1192_v48 = vadd.f32 %v5013_v30, %v1181_v46 }
 0x10f   :  { %s6585_s1 = sld [smem:[#allocation19_spill]] }
 0x110   :  { %s6586_s22 = sld [smem:[#allocation21_spill]]  ;;  %v1371_v42 = vadd.f32 %v1370_v33, %v1366_v61  ;;  %v1605_v61 = vmul.f32 %v4763_v35, %v6459_v36  ;;  %v6466_v33 = vstv %s5001_s13  ;;  %v5144_v35 = vld [vmem:[%s6389_s5 + $0x1a0] sm:$0xff] }
 0x111   :  { %6583 = sst [smem:[#allocation18_spill]] %s5038_s18 }
 0x112   :  { %s5092_s8 = sld [smem:[#allocation2 + $0x7]]  ;;  %v1376_v40 = vadd.f32 %v1375_v11, %v1371_v42  ;;  %v1610_v42 = vmul.f32 %v4785_v50, %v6464_v23 }
 0x113   :  { %s5094_s24 = sld [smem:[#allocation2 + $0x2f]] }
 0x114   :  { %s6587_s4 = sld [smem:[#allocation23_spill]]  ;;  %v1624_v41 = vstv %s5067_s14 }
 0x115   :  { %v6588_v4 = vstv %s6585_s1  ;;  %s5113_s10 = sld [smem:[#allocation2 + $0x8]] }
 0x116   :  { %v1293_v21 = vmul.f32 %v2924_v8, %v6588_v4  ;;  %v6589_v53 = vstv %s6586_s22  ;;  %v1596_v8 = vadd.f32 %v1595_v25, %v1591_v39  ;;  %s6590_s22 = sld [smem:[#allocation24_spill]]  ;;  %v6465_v25 = vstv %s5055_s15 }
 0x117   :  { %v1380_v31 = vmul.f32 %v5099_v17, %v6589_v53  ;;  %v6463_v53 = vstv %s5038_s18  ;;  %s6592_s2 = sld [smem:[#allocation22_spill]] }
 0x118   :  { %s5136_s21 = sld [smem:[#allocation2 + $0x9]]  ;;  %v1601_v39 = vadd.f32 %v1600_v37, %v1596_v8  ;;  %v1294_v11 = vsub.f32 %v1264_v16, %v1293_v21  ;;  %v5159_v37 = vld [vmem:[%s6389_s5 + $0x280] sm:$0xff]  ;;  %v1620_v30 = vmul.f32 %v4975_v51, %v6463_v53  ;;  %v6601_v53 = vstv %s4682_s9 }
 0x119   :  { %s5139_s11 = sld [smem:[#allocation2 + $0x30]]  ;;  %v5168_v21 = vld [vmem:[%s6389_s5 + $0xa1] sm:$0xff]  ;;  %v1223_v46 = vmul.f32 %v5159_v37, %v6466_v33 }
 0x11a   :  { %v6591_v4 = vstv %s6587_s4  ;;  %s6594_s4 = sld [smem:[#allocation26_spill]] }
 0x11b   :  { %v1391_v5 = vmul.f32 %v5123_v58, %v6591_v4  ;;  %v1381_v4 = vadd.f32 %v1380_v31, %v1376_v40  ;;  %s5153_s1 = sld [smem:[#allocation2 + $0xa]]  ;;  %v5179_v31 = vld [vmem:[%s6389_s5 + $0x380] sm:$0xff] }
 0x11c   :  { %v6595_v36 = vstv %s6590_s22  ;;  %s5161_s29 = sld [smem:[#allocation2 + $0x31]]  ;;  %v1229_v51 = vmul.f32 %v5179_v31, %v6465_v25  ;;  %v6468_v25 = vstv %s5113_s10 }
 0x11d   :  { %v1397_v54 = vmul.f32 %v5144_v35, %v6595_v36  ;;  %v6597_v50 = vstv %s6592_s2  ;;  %v1606_v36 = vadd.f32 %v1605_v61, %v1601_v39  ;;  %v1392_v8 = vadd.f32 %v1391_v5, %v1381_v4  ;;  %s5185_s25 = sld [smem:[#allocation2 + $0xb]]  ;;  %v2948_v39 = vld [vmem:[%s6389_s5 + $0x91] sm:$0x1]  ;;  %v5197_v5 = vld [vmem:[%s6389_s5 + $0x1a1] sm:$0xff] }
 0x11e   :  { %6593 = sst [smem:[#allocation20_spill]] %s5136_s21  ;;  %v1323_v16 = vmul.f32 %v2936_v20, %v6597_v50  ;;  %v1629_v50 = vstv %s5092_s8  ;;  %v1198_v61 = vadd.f32 %v5018_v15, %v1192_v48  ;;  %v1233_v15 = vstv %s5094_s24 }
 0x11f   :  { %s6600_s18 = sld [smem:[#allocation25_spill]]  ;;  %v1611_v4 = vadd.f32 %v1610_v42, %v1606_v36  ;;  %v1398_v48 = vadd.f32 %v1397_v54, %v1392_v8  ;;  %v1407_v23 = vmul.f32 %v5197_v5, %v6601_v53  ;;  %v5213_v42 = vld [vmem:[%s6389_s5 + $0xa2] sm:$0xff]  ;;  %v1630_v54 = vmul.f32 %v5060_v10, %v1629_v50 }
 0x120   :  { %v6598_v20 = vstv %s6594_s4  ;;  %s5207_s4 = sld [smem:[#allocation2 + $0xc]]  ;;  %v1203_v33 = vadd.f32 %v5043_v13, %v1198_v61  ;;  %v1324_v3 = vsub.f32 %v1294_v11, %v1323_v16  ;;  %v5221_v53 = vld [vmem:[%s6389_s5 + $0x281] sm:$0xff]  ;;  %v1412_v11 = vmul.f32 %v5213_v42, %v1089_v26 }
 0x121   :  { %6596 = sst [smem:[#allocation19_spill]] %s5153_s1  ;;  %v1402_v40 = vmul.f32 %v5168_v21, %v6598_v20  ;;  %v1625_v20 = vmul.f32 %v5008_v27, %v1624_v41  ;;  %v1621_v27 = vadd.f32 %v1620_v30, %v1611_v4  ;;  %v1639_v16 = vstv %s5136_s21  ;;  %v2960_v26 = vld [vmem:[%s6389_s5 + $0xa1] sm:$0x1] }
 0x122   :  { %s5229_s27 = sld [smem:[#allocation2 + $0xd]]  ;;  %v1208_v30 = vadd.f32 %v5048_v43, %v1203_v33  ;;  %v1234_v10 = vmul.f32 %v5221_v53, %v1233_v15  ;;  %v1238_v4 = vstv %s5139_s11  ;;  %v1649_v43 = vstv %s5153_s1 }
 0x123   :  { %6599 = sst [smem:[#allocation21_spill]] %s5185_s25  ;;  %v1403_v13 = vadd.f32 %v1402_v40, %v1398_v48  ;;  %v1626_v61 = vadd.f32 %v1625_v20, %v1621_v27  ;;  %v1422_v48 = vmul.f32 %v4571_v7, %v1099_v57  ;;  %v1243_v20 = vstv %s5161_s29 }
 0x124   :  { %s5246_s22 = sld [smem:[#allocation2 + $0xe]]  ;;  %v1213_v33 = vadd.f32 %v5053_v44, %v1208_v30  ;;  %v1654_v7 = vstv %s5185_s25 }
 0x125   :  { %v6603_v36 = vstv %s6600_s18  ;;  %v1408_v40 = vadd.f32 %v1407_v23, %v1403_v13  ;;  %v1631_v27 = vadd.f32 %v1630_v54, %v1626_v61  ;;  %v1427_v23 = vmul.f32 %v4582_v0, %v1104_v19  ;;  %s5257_s17 = sld [smem:[#allocation2 + $0xf]]  ;;  %v5273_v19 = vld [vmem:[%s6389_s5 + $0x381] sm:$0xff] }
 0x126   :  { %6602 = sst [smem:[#allocation23_spill]] %s5207_s4  ;;  %v1354_v8 = vmul.f32 %v2948_v39, %v6603_v36  ;;  %v1635_v39 = vmul.f32 %v5075_v47, %v6468_v25  ;;  %v1640_v47 = vmul.f32 %v5099_v17, %v1639_v16  ;;  %v1224_v57 = vadd.f32 %v1223_v46, %v1213_v33 }
 0x127   :  { %v1413_v25 = vadd.f32 %v1412_v11, %v1408_v40  ;;  %v1386_v13 = vmul.f32 %v2960_v26, %v1063_v34  ;;  %s5261_s9 = sld [smem:[#allocation9 + $0x2]]  ;;  %v1650_v17 = vmul.f32 %v5123_v58, %v1649_v43  ;;  %v1219_v0 = vsub.f32 %v1187_v32, %v5118_v56  ;;  %v2972_v32 = vld [vmem:[%s6389_s5 + $0x261] sm:$0x1] }
 0x128   :  { %6604 = sst [smem:[#allocation24_spill]] %s5229_s27  ;;  %v1355_v36 = vsub.f32 %v1324_v3, %v1354_v8  ;;  %v1636_v44 = vadd.f32 %v1635_v39, %v1631_v27  ;;  %v1432_v3 = vmul.f32 %v4599_v63, %v1109_v1  ;;  %v6504_v46 = vstv %s5207_s4 }
 0x129   :  { %v1423_v34 = vadd.f32 %v1422_v48, %v1413_v25  ;;  %s5279_s18 = sld [smem:[#allocation2 + $0x10]]  ;;  %v1230_v54 = vadd.f32 %v1229_v51, %v1224_v57  ;;  %v1239_v22 = vmul.f32 %v5273_v19, %v1238_v4  ;;  %v1655_v1 = vmul.f32 %v5144_v35, %v1654_v7 }
 0x12a   :  { %6606 = sst [smem:[#allocation22_spill]] %s5246_s22  ;;  %v1641_v63 = vadd.f32 %v1640_v47, %v1636_v44  ;;  %v1244_v56 = vmul.f32 %v5287_v59, %v1243_v20  ;;  %v1437_v51 = vmul.f32 %v4616_v14, %v1114_v62  ;;  %v6499_v8 = vstv %s5229_s27  ;;  %v5345_v44 = vld [vmem:[%s6389_s5 + $0xb0] sm:$0xff] }
 0x12b   :  { %6607 = sst [smem:[#allocation26_spill]] %s5257_s17  ;;  %v1428_v25 = vadd.f32 %v1427_v23, %v1423_v34  ;;  %v1235_v11 = vadd.f32 %v1234_v10, %v1230_v54  ;;  %v1387_v30 = vsub.f32 %v1355_v36, %v1386_v13  ;;  %v1660_v39 = vmul.f32 %v5168_v21, %v6504_v46  ;;  %v2984_v36 = vld [vmem:[%s6389_s5 + $0x271] sm:$0x1]  ;;  %v3033_v34 = vld [vmem:[%s6389_s5 + $0x81] sm:$0x1] }
 0x12c   :  { %s5292_s1 = sld [smem:[#allocation6]]  ;;  %v1651_v61 = vadd.f32 %v1650_v17, %v1641_v63  ;;  %v1417_v26 = vmul.f32 %v2972_v32, %v1094_v12  ;;  %v1442_v14 = vmul.f32 %v4647_v28, %v1119_v6  ;;  %v6497_v62 = vstv %s5246_s22  ;;  %v5369_v63 = vld [vmem:[%s6389_s5 + $0x1b0] sm:$0xff] }
 0x12d   :  { %s5304_s20 = sld [smem:[#allocation2 + $0x11]]  ;;  %v1433_v40 = vadd.f32 %v1432_v3, %v1428_v25  ;;  %v1240_v48 = vadd.f32 %v1239_v22, %v1235_v11  ;;  %v1249_v10 = vrot.slane %v1219_v0, %v3833_v24  ;;  %v1665_v12 = vmul.f32 %v5197_v5, %v6499_v8 }
 0x12e   :  { %s5315_s30 = sld [smem:[#allocation2 + $0x12]]  ;;  %v1656_v33 = vadd.f32 %v1655_v1, %v1651_v61  ;;  %v1452_v47 = vmul.f32 %v4994_v49, %v1129_v29  ;;  %v6496_v28 = vstv %s5257_s17  ;;  %v1670_v57 = vmul.f32 %v5213_v42, %v6497_v62  ;;  %v5387_v61 = vld [vmem:[%s6389_s5 + $0xb1] sm:$0xff] }
 0x12f   :  { %6608 = sst [smem:[#allocation25_spill]] %s5279_s18  ;;  %v1438_v27 = vadd.f32 %v1437_v51, %v1433_v40  ;;  %v1245_v6 = vadd.f32 %v1244_v56, %v1240_v48  ;;  %v5337_v13 = vsub.f32 %v1387_v30, %v1417_v26  ;;  %v1457_v49 = vmul.f32 %v4999_v52, %v1134_v2  ;;  %v3044_v26 = vld [vmem:[%s6389_s5 + $0x91] sm:$0x1] }
 0x130   :  { %s5318_s12 = sld [smem:[#allocation6 + $0x1]]  ;;  %v1661_v23 = vadd.f32 %v1660_v39, %v1656_v33  ;;  %v6495_v17 = vstv %s5279_s18  ;;  %v1681_v52 = vmul.f32 %v5345_v44, %v6496_v28  ;;  %v5361_v54 = vmul.f32 %v2984_v36, %v1124_v38 }
 0x131   :  { %s5327_s23 = sld [smem:[#allocation2 + $0x13]]  ;;  %v1443_v29 = vadd.f32 %v1442_v14, %v1438_v27  ;;  %v1250_v0 = vadd.f32 %v1249_v10, %v1245_v6  ;;  %v1462_v32 = vmul.f32 %v5023_v18, %v1139_v9  ;;  %v6620_v56 = vstv %s4812_s6  ;;  %v2996_v27 = vld [vmem:[%s6389_s5 + $0x281] sm:$0x1] }
 0x132   :  { %6610 = sst [smem:[#allocation27_spill]] %s5292_s1  ;;  %v6486_v3 = vstv %s5292_s1  ;;  %v1666_v2 = vadd.f32 %v1665_v12, %v1661_v23  ;;  %v1467_v25 = vmul.f32 %v5028_v55, %v6620_v56  ;;  %v1687_v9 = vmul.f32 %v5369_v63, %v6495_v17 }
 0x133   :  { %6611 = sst [smem:[#allocation28_spill]] %s5304_s20  ;;  %v1453_v22 = vadd.f32 %v1452_v47, %v1443_v29  ;;  %v6494_v1 = vstv %s5304_s20  ;;  %v1251_v38 = vsel %vm84_vm0, %v1250_v0, %v1245_v6  ;;  %v1585_v30 = vmul.f32 %v3033_v34, %v6486_v3  ;;  %v5418_v47 = vld [vmem:[%s6389_s5 + $0x1b1] sm:$0xff] }
 0x134   :  { %6612 = sst [smem:[#allocation43_spill]] %s5315_s30  ;;  %v1671_v51 = vadd.f32 %v1670_v57, %v1666_v2  ;;  %v1252_v18 = vmax.f32 %v1251_v38, 0.0  ;;  %v6493_v39 = vstv %s5315_s30  ;;  %v1692_v48 = vmul.f32 %v5387_v61, %v6494_v1 }
 0x135   :  { %s5348_s0 = sld [smem:[#allocation2 + $0x14]]  ;;  %v1458_v11 = vadd.f32 %v1457_v49, %v1453_v22  ;;  %v6626_v33 = vstv %s4819_s26  ;;  %v1448_v36 = vsub.f32 %v5337_v13, %v5361_v54  ;;  %v1697_v29 = vmul.f32 %v5418_v47, %v6493_v39  ;;  %v5439_v13 = vld [vmem:[%s6389_s5 + $0xb2] sm:$0xff]  ;;  %v3056_v22 = vld [vmem:[%s6389_s5 + $0xa1] sm:$0x1] }
 0x136   :  { %6614 = sst [smem:[#allocation14_spill]] %s5318_s12  ;;  %v6485_v40 = vstv %s5318_s12  ;;  %v1682_v14 = vadd.f32 %v1681_v52, %v1671_v51  ;;  %v1472_v12 = vmul.f32 %v5033_v60, %v6626_v33 }
 0x137   :  { %6615 = sst [smem:[#allocation44_spill]] %s5327_s23  ;;  %v1463_v10 = vadd.f32 %v1462_v32, %v1458_v11  ;;  %v6492_v6 = vstv %s5327_s23  ;;  %v1615_v34 = vmul.f32 %v3044_v26, %v6485_v40 }
 0x138   :  { %s5354_s2 = sld [smem:[#allocation6 + $0x2]]  ;;  %v1688_v57 = vadd.f32 %v1687_v9, %v1682_v14  ;;  %v1702_v56 = vmul.f32 %v5439_v13, %v6492_v6 }
 0x139   :  { %s5372_s7 = sld [smem:[#allocation2 + $0x15]]  ;;  %v1468_v49 = vadd.f32 %v1467_v25, %v1463_v10 }
 0x13a   :  { %s6621_s19 = sld [smem:[#allocation30_spill]]  ;;  %v1693_v38 = vadd.f32 %v1692_v48, %v1688_v57 }
 0x13b   :  { %6618 = sst [smem:[#allocation13_spill]] %s5348_s0  ;;  %v6488_v2 = vstv %s5348_s0  ;;  %v1473_v25 = vadd.f32 %v1472_v12, %v1468_v49  ;;  %v3008_v12 = vld [vmem:[%s6389_s5 + $0x291] sm:$0x1] }
 0x13c   :  { %s5390_s6 = sld [smem:[#allocation2 + $0x16]] }
 0x13d   :  { %s6623_s21 = ssub.f32 %s5261_s9, %s4924_s16 }
 0x13e   :  { %6619 = sst [smem:[#allocation29_spill]] %s5354_s2  ;;  %v6483_v32 = vstv %s5354_s2 }
 0x13f   :  { %v5395_v55 = vstv %s6623_s21  ;;  %s5401_s1 = sld [smem:[#allocation6 + $0x3]]  ;;  %v6487_v26 = vstv %s5372_s7 }
 0x140   :  { %s6625_s17 = sld [smem:[#allocation46_spill]]  ;;  %v6628_v23 = vstv %s6621_s19  ;;  %v1586_v0 = vsub.f32 %v5395_v55, %v1585_v30  ;;  %v5464_v30 = vld [vmem:[%s6389_s5 + $0xc0] sm:$0xff] }
 0x141   :  { %s6627_s21 = sld [smem:[#allocation15_spill]]  ;;  %v1482_v60 = vmul.f32 %v5159_v37, %v6628_v23  ;;  %v1713_v23 = vmul.f32 %v5464_v30, %v6488_v2  ;;  %v5544_v2 = vld [vmem:[%s6389_s5 + $0x391] sm:$0xff] }
 0x142   :  { %6622 = sst [smem:[#allocation30_spill]] %s5390_s6  ;;  %v1616_v49 = vsub.f32 %v1586_v0, %v1615_v34 }
 0x143   :  { %s5421_s20 = sld [smem:[#allocation2 + $0x17]]  ;;  %v1483_v57 = vadd.f32 %v1482_v60, %v1473_v25  ;;  %v3068_v60 = vld [vmem:[%s6389_s5 + $0xb1] sm:$0x1] }
 0x144   :  { %s6629_s26 = sld [smem:[#allocation31_spill]] }
 0x145   :  { %6624 = sst [smem:[#allocation45_spill]] %s5401_s1  ;;  %v6490_v0 = vstv %s5401_s1 }
 0x146   :  { %2911 = vst [vmem:[%s6625_s17 + $0x18] sm:$0xff] %v1252_v18  ;;  %s6630_s4 = sld [smem:[#allocation32_spill]] }
 0x147   :  { %s5431_s22 = sld [smem:[#allocation6 + $0x4]]  ;;  %v6634_v52 = vstv %s6627_s21 }
 0x148   :  { %s6632_s27 = sld [smem:[#allocation33_spill]]  ;;  %v1477_v54 = vmul.f32 %v2996_v27, %v6634_v52  ;;  %v1698_v27 = vadd.f32 %v1697_v29, %v1693_v38  ;;  %v1645_v52 = vmul.f32 %v3056_v22, %v6483_v32  ;;  %v5494_v38 = vld [vmem:[%s6389_s5 + $0x290] sm:$0xff] }
 0x149   :  { %s6633_s19 = sld [smem:[#allocation35_spill]]  ;;  %v5515_v32 = vld [vmem:[%s6389_s5 + $0x390] sm:$0xff] }
 0x14a   :  { %s5442_s25 = sld [smem:[#allocation2 + $0x18]]  ;;  %v6635_v51 = vstv %s6629_s26  ;;  %v5489_v29 = vsub.f32 %v1448_v36, %v1477_v54  ;;  %v1703_v34 = vadd.f32 %v1702_v56, %v1698_v27  ;;  %v5520_v56 = vld [vmem:[%s6389_s5 + $0x291] sm:$0xff] }
 0x14b   :  { %s5453_s9 = sld [smem:[#allocation2 + $0x19]]  ;;  %v1487_v9 = vmul.f32 %v5179_v31, %v6635_v51  ;;  %v5486_v51 = vld [vmem:[%s6389_s5 + $0x1c0] sm:$0xff] }
 0x14c   :  { %v6636_v18 = vstv %s6630_s4  ;;  %s6639_s26 = sld [smem:[#allocation34_spill]]  ;;  %v1719_v22 = vmul.f32 %v5486_v51, %v6487_v26  ;;  %v1714_v40 = vadd.f32 %v1713_v23, %v1703_v34  ;;  %v1676_v23 = vmul.f32 %v3068_v60, %v6490_v0  ;;  %v5554_v34 = vld [vmem:[%s6389_s5 + $0x1c1] sm:$0xff] }
 0x14d   :  { %6631 = sst [smem:[#allocation15_spill]] %s5431_s22  ;;  %v1492_v11 = vmul.f32 %v5221_v53, %v6636_v18  ;;  %v6491_v18 = vstv %s5390_s6  ;;  %v1488_v36 = vadd.f32 %v1487_v9, %v1483_v57  ;;  %v5525_v9 = vld [vmem:[%s6389_s5 + $0xc1] sm:$0xff] }
 0x14e   :  { %v6637_v14 = vstv %s6632_s27  ;;  %s6640_s4 = sld [smem:[#allocation36_spill]]  ;;  %v1724_v3 = vmul.f32 %v5525_v9, %v6491_v18  ;;  %v1720_v60 = vadd.f32 %v1719_v22, %v1714_v40  ;;  %v5583_v40 = vld [vmem:[%s6389_s5 + $0xc2] sm:$0xff] }
 0x14f   :  { %v1497_v48 = vmul.f32 %v5273_v19, %v6637_v14  ;;  %v6638_v10 = vstv %s6633_s19  ;;  %s5479_s21 = sld [smem:[#allocation2 + $0x1a]]  ;;  %v1493_v26 = vadd.f32 %v1492_v11, %v1488_v36  ;;  %v5560_v36 = vld [vmem:[%s6389_s5 + $0x292] sm:$0xff] }
 0x150   :  { %v1502_v33 = vmul.f32 %v5287_v59, %v6638_v10  ;;  %s6641_s18 = sld [smem:[#allocation37_spill]]  ;;  %v6503_v11 = vstv %s5442_s25 }
 0x151   :  { %s6642_s12 = sld [smem:[#allocation38_spill]]  ;;  %v6502_v18 = vstv %s5453_s9  ;;  %v1498_v6 = vadd.f32 %v1497_v48, %v1493_v26  ;;  %v6654_v26 = vstv %s4964_s3 }
 0x152   :  { %s5503_s27 = sld [smem:[#allocation2 + $0x1b]]  ;;  %v6643_v54 = vstv %s6639_s26  ;;  %v1744_v8 = vmul.f32 %v5159_v37, %v6502_v18 }
 0x153   :  { %v5507_v25 = vmul.f32 %v3008_v12, %v6643_v54  ;;  %v6498_v12 = vstv %s5421_s20  ;;  %s5528_s26 = sld [smem:[#allocation6 + $0x5]] }
 0x154   :  { %v6644_v14 = vstv %s6640_s4  ;;  %s5539_s4 = sld [smem:[#allocation2 + $0x1c]]  ;;  %v1729_v0 = vmul.f32 %v5554_v34, %v6498_v12 }
 0x155   :  { %v1513_v10 = vmul.f32 %v5494_v38, %v6644_v14  ;;  %s6648_s17 = sld [smem:[#allocation39_spill]]  ;;  %v1509_v39 = vsub.f32 %v5489_v29, %v5507_v25  ;;  %v1725_v29 = vadd.f32 %v1724_v3, %v1720_v60  ;;  %v6501_v22 = vstv %s5479_s21  ;;  %v5603_v3 = vld [vmem:[%s6389_s5 + $0x2a0] sm:$0xff] }
 0x156   :  { %v6646_v27 = vstv %s6641_s18  ;;  %s5570_s23 = sld [smem:[#allocation2 + $0x1d]] }
 0x157   :  { %v1519_v57 = vmul.f32 %v5515_v32, %v6646_v27  ;;  %v6647_v54 = vstv %s6642_s12  ;;  %s6649_s12 = sld [smem:[#allocation40_spill]]  ;;  %v3020_v27 = vld [vmem:[%s6389_s5 + $0x2a1] sm:$0x1] }
 0x158   :  { %v1524_v14 = vmul.f32 %v5520_v56, %v6647_v54  ;;  %v1646_v54 = vsub.f32 %v1616_v49, %v1645_v52  ;;  %v3080_v49 = vld [vmem:[%s6389_s5 + $0xc1] sm:$0x1]  ;;  %v6500_v52 = vstv %s5431_s22  ;;  %s6652_s30 = sld [smem:[#allocation41_spill]]  ;;  %v1540_v48 = vmul.f32 %v3020_v27, %v6654_v26 }
 0x159   :  { %6645 = sst [smem:[#allocation31_spill]] %s5528_s26  ;;  %v1708_v12 = vmul.f32 %v3080_v49, %v6500_v52  ;;  %v1730_v27 = vadd.f32 %v1729_v0, %v1725_v29  ;;  %v1753_v60 = vstv %s5503_s27  ;;  %v6659_v49 = vstv %s5001_s13  ;;  %v5624_v29 = vld [vmem:[%s6389_s5 + $0x3a0] sm:$0xff] }
 0x15a   :  { %s5585_s2 = sld [smem:[#allocation6 + $0x6]]  ;;  %v1677_v25 = vsub.f32 %v1646_v54, %v1676_v23  ;;  %v1545_v26 = vmul.f32 %v5603_v3, %v6659_v49  ;;  %v1738_v52 = vstv %s5528_s26  ;;  %v1749_v0 = vmul.f32 %v5179_v31, %v6501_v22 }
 0x15b   :  { %v6650_v1 = vstv %s6648_s17  ;;  %s5593_s17 = sld [smem:[#allocation2 + $0x1e]]  ;;  %v6664_v22 = vstv %s5055_s15 }
 0x15c   :  { %v1529_v17 = vmul.f32 %v5544_v2, %v6650_v1  ;;  %v1734_v1 = vmul.f32 %v5583_v40, %v6503_v11  ;;  %s6655_s19 = sld [smem:[#allocation16_spill]]  ;;  %v1551_v18 = vmul.f32 %v5624_v29, %v6664_v22  ;;  %v1763_v46 = vstv %s5570_s23 }
 0x15d   :  { %v6651_v28 = vstv %s6649_s12  ;;  %s5606_s18 = sld [smem:[#allocation2 + $0x1f]] }
 0x15e   :  { %v1534_v62 = vmul.f32 %v5560_v36, %v6651_v28  ;;  %v1503_v28 = vadd.f32 %v1502_v33, %v1498_v6  ;;  %v6657_v6 = vstv %s4933_s28  ;;  %v6658_v54 = vstv %s6652_s30  ;;  %s6660_s28 = sld [smem:[#allocation42_spill]] }
 0x15f   :  { %v1912_v33 = vmul.f32 %v5123_v58, %v6657_v6  ;;  %v1917_v23 = vmul.f32 %v5144_v35, %v6658_v54  ;;  %v1735_v58 = vadd.f32 %v1734_v1, %v1730_v27  ;;  %v3092_v35 = vld [vmem:[%s6389_s5 + $0x281] sm:$0x1]  ;;  %s5630_s13 = sld [smem:[#allocation2 + $0x20]]  ;;  %v1709_v1 = vsub.f32 %v1677_v25, %v1708_v12 }
 0x160   :  { %6653 = sst [smem:[#allocation32_spill]] %s5585_s2  ;;  %v1514_v37 = vadd.f32 %v1513_v10, %v1503_v28  ;;  %v1758_v10 = vstv %s5539_s4  ;;  %v6662_v28 = vstv %s4924_s16  ;;  %v1754_v27 = vmul.f32 %v5221_v53, %v1753_v60 }
 0x161   :  { %v1913_v6 = vadd.f32 %v1912_v33, %v6662_v28  ;;  %s5643_s12 = sld [smem:[#allocation2 + $0x21]]  ;;  %v1745_v11 = vadd.f32 %v1744_v8, %v1735_v58  ;;  %v1739_v22 = vmul.f32 %v3092_v35, %v1738_v52  ;;  %v1759_v53 = vmul.f32 %v5273_v19, %v1758_v10  ;;  %v5660_v8 = vld [vmem:[%s6389_s5 + $0x2a1] sm:$0xff] }
 0x162   :  { %v6663_v31 = vstv %s6655_s19  ;;  %v1520_v49 = vadd.f32 %v1519_v57, %v1514_v37  ;;  %s6666_s6 = sld [smem:[#allocation17_spill]]  ;;  %v6533_v12 = vstv %s5585_s2  ;;  %v5671_v35 = vsub.f32 %v1509_v39, %v1540_v48 }
 0x163   :  { %6656 = sst [smem:[#allocation33_spill]] %s5606_s18  ;;  %v1922_v54 = vmul.f32 %v5168_v21, %v6663_v31  ;;  %v1918_v33 = vadd.f32 %v1917_v23, %v1913_v6  ;;  %v1750_v25 = vadd.f32 %v1749_v0, %v1745_v11  ;;  %v3104_v23 = vld [vmem:[%s6389_s5 + $0x291] sm:$0x1]  ;;  %v1556_v11 = vmul.f32 %v5660_v8, %v1233_v15 }
 0x164   :  { %s5646_s16 = sld [smem:[#allocation6 + $0x7]]  ;;  %v6668_v28 = vstv %s6660_s28  ;;  %v1525_v57 = vadd.f32 %v1524_v14, %v1520_v49  ;;  %v1764_v0 = vmul.f32 %v5287_v59, %v1763_v46  ;;  %v1778_v31 = vstv %s5606_s18  ;;  %v5697_v49 = vld [vmem:[%s6389_s5 + $0x3a1] sm:$0xff] }
 0x165   :  { %6661 = sst [smem:[#allocation35_spill]] %s5630_s13  ;;  %v1927_v21 = vmul.f32 %v5197_v5, %v6668_v28  ;;  %v1773_v5 = vstv %s5593_s17  ;;  %v1923_v14 = vadd.f32 %v1922_v54, %v1918_v33  ;;  %v1755_v6 = vadd.f32 %v1754_v27, %v1750_v25 }
 0x166   :  { %s6669_s0 = sld [smem:[#allocation18_spill]]  ;;  %v1530_v58 = vadd.f32 %v1529_v17, %v1525_v57  ;;  %v1740_v54 = vsub.f32 %v1709_v1, %v1739_v22  ;;  %v1769_v15 = vmul.f32 %v3104_v23, %v6533_v12  ;;  %v1774_v59 = vmul.f32 %v5494_v38, %v1773_v5  ;;  %v5717_v57 = vld [vmem:[%s6389_s5 + $0x2a2] sm:$0xff] }
 0x167   :  { %6665 = sst [smem:[#allocation34_spill]] %s5643_s12  ;;  %v1760_v27 = vadd.f32 %v1759_v53, %v1755_v6  ;;  %v1783_v33 = vstv %s5630_s13  ;;  %v1561_v1 = vmul.f32 %v5697_v49, %v1238_v4  ;;  %v1779_v28 = vmul.f32 %v5515_v32, %v1778_v31 }
 0x168   :  { %s5666_s3 = sld [smem:[#allocation2 + $0x22]]  ;;  %v6671_v37 = vstv %s6666_s6  ;;  %v1535_v48 = vadd.f32 %v1534_v62, %v1530_v58  ;;  %v1952_v32 = vmul.f32 %v5387_v61, %v1629_v50  ;;  %v1566_v53 = vmul.f32 %v5717_v57, %v1243_v20 }
 0x169   :  { %v1932_v19 = vmul.f32 %v5213_v42, %v6671_v37  ;;  %s5679_s15 = sld [smem:[#allocation2 + $0x23]]  ;;  %v1928_v42 = vadd.f32 %v1927_v21, %v1923_v14  ;;  %v1788_v21 = vstv %s5643_s12  ;;  %v1765_v22 = vadd.f32 %v1764_v0, %v1760_v27 }
 0x16a   :  { %6667 = sst [smem:[#allocation36_spill]] %s5646_s16  ;;  %v1546_v38 = vadd.f32 %v1545_v26, %v1535_v48  ;;  %v6526_v4 = vstv %s5646_s16  ;;  %v1770_v25 = vsub.f32 %v1740_v54, %v1769_v15  ;;  %v1784_v23 = vmul.f32 %v5520_v56, %v1783_v33  ;;  %v3128_v15 = vld [vmem:[%s6389_s5 + $0x2b1] sm:$0x1] }
 0x16b   :  { %s5682_s19 = sld [smem:[#allocation2 + $0x24]]  ;;  %v1933_v62 = vadd.f32 %v1932_v19, %v1928_v42  ;;  %v1775_v14 = vadd.f32 %v1774_v59, %v1765_v22  ;;  %v6681_v58 = vstv %s5113_s10  ;;  %v1789_v20 = vmul.f32 %v5544_v2, %v1788_v21 }
 0x16c   :  { %v6674_v17 = vstv %s6669_s0  ;;  %s5692_s24 = sld [smem:[#allocation2 + $0x25]]  ;;  %v1552_v26 = vadd.f32 %v1551_v18, %v1546_v38  ;;  %v1957_v50 = vmul.f32 %v5418_v47, %v6681_v58 }
 0x16d   :  { %v1942_v39 = vmul.f32 %v5345_v44, %v6674_v17  ;;  %s5700_s0 = sld [smem:[#allocation2 + $0x26]]  ;;  %v1947_v44 = vmul.f32 %v5369_v63, %v1624_v41  ;;  %v3116_v41 = vld [vmem:[%s6389_s5 + $0x2a1] sm:$0x1]  ;;  %v1780_v0 = vadd.f32 %v1779_v28, %v1775_v14  ;;  %v1962_v17 = vmul.f32 %v5439_v13, %v1639_v16 }
 0x16e   :  { %6670 = sst [smem:[#allocation37_spill]] %s5666_s3  ;;  %v1793_v37 = vstv %s5666_s3  ;;  %v1557_v61 = vadd.f32 %v1556_v11, %v1552_v26  ;;  %v1799_v18 = vmul.f32 %v3116_v41, %v6526_v4  ;;  %v1571_v11 = vrot.slane %v5671_v35, %v3833_v24 }
 0x16f   :  { %6672 = sst [smem:[#allocation38_spill]] %s5679_s15  ;;  %v1943_v63 = vadd.f32 %v1942_v39, %v1933_v62  ;;  %v1803_v56 = vstv %s5679_s15  ;;  %v1794_v2 = vmul.f32 %v5560_v36, %v1793_v37  ;;  %v1785_v39 = vadd.f32 %v1784_v23, %v1780_v0 }
 0x170   :  { %s5712_s28 = sld [smem:[#allocation6 + $0x8]]  ;;  %v1562_v47 = vadd.f32 %v1561_v1, %v1557_v61  ;;  %v1972_v16 = vmul.f32 %v5464_v30, %v1649_v43  ;;  %v1804_v35 = vmul.f32 %v5603_v3, %v1803_v56  ;;  %v5779_v62 = vsub.f32 %v1770_v25, %v1799_v18  ;;  %v5815_v18 = vld [vmem:[%s6389_s5 + $0xd0] sm:$0xff] }
 0x171   :  { %6673 = sst [smem:[#allocation39_spill]] %s5682_s19  ;;  %v1948_v19 = vadd.f32 %v1947_v44, %v1943_v63  ;;  %v1808_v6 = vstv %s5682_s19  ;;  %v1790_v27 = vadd.f32 %v1789_v20, %v1785_v39  ;;  %v1977_v44 = vmul.f32 %v5486_v51, %v1654_v7  ;;  %v5846_v39 = vld [vmem:[%s6389_s5 + $0x2b1] sm:$0xff] }
 0x172   :  { %6675 = sst [smem:[#allocation40_spill]] %s5692_s24  ;;  %v1813_v48 = vstv %s5692_s24  ;;  %v1567_v13 = vadd.f32 %v1566_v53, %v1562_v47  ;;  %v1809_v36 = vmul.f32 %v5624_v29, %v1808_v6 }
 0x173   :  { %6676 = sst [smem:[#allocation41_spill]] %s5700_s0  ;;  %v1953_v42 = vadd.f32 %v1952_v32, %v1948_v19  ;;  %v1814_v1 = vmul.f32 %v5660_v8, %v1813_v48  ;;  %v1818_v28 = vstv %s5700_s0  ;;  %v1795_v41 = vadd.f32 %v1794_v2, %v1790_v27  ;;  %v5841_v2 = vld [vmem:[%s6389_s5 + $0x3b0] sm:$0xff] }
 0x174   :  { %s5723_s11 = sld [smem:[#allocation2 + $0x27]]  ;;  %v1572_v38 = vadd.f32 %v1571_v11, %v1567_v13  ;;  %v1819_v0 = vmul.f32 %v5697_v49, %v1818_v28 }
 0x175   :  { %s5734_s6 = sld [smem:[#allocation2 + $0x28]]  ;;  %v1958_v54 = vadd.f32 %v1957_v50, %v1953_v42  ;;  %v1805_v58 = vadd.f32 %v1804_v35, %v1795_v41  ;;  %v5854_v35 = vld [vmem:[%s6389_s5 + $0x1d0] sm:$0xff] }
 0x176   :  { %6677 = sst [smem:[#allocation16_spill]] %s5712_s28  ;;  %v6522_v59 = vstv %s5712_s28  ;;  %v1573_v53 = vsel %vm84_vm0, %v1572_v38, %v1567_v13 }
 0x177   :  { %s5737_s30 = sld [smem:[#allocation2 + $0x29]]  ;;  %v1963_v43 = vadd.f32 %v1962_v17, %v1958_v54  ;;  %v5795_v63 = vmul.f32 %v3128_v15, %v6522_v59  ;;  %v1574_v19 = vmax.f32 %v1573_v53, 0.0  ;;  %v5828_v17 = vld [vmem:[%s6389_s5 + $0x2b0] sm:$0xff]  ;;  %v1810_v47 = vadd.f32 %v1809_v36, %v1805_v58 }
 0x178   :  { %s5748_s29 = sld [smem:[#allocation2 + $0x2a]]  ;;  %v5884_v58 = vld [vmem:[%s6389_s5 + $0xd1] sm:$0xff] }
 0x179   :  { %s5759_s14 = sld [smem:[#allocation2 + $0x2b]]  ;;  %v1973_v32 = vadd.f32 %v1972_v16, %v1963_v43  ;;  %v1831_v36 = vsub.f32 %v5779_v62, %v5795_v63  ;;  %v1815_v38 = vadd.f32 %v1814_v1, %v1810_v47 }
 0x17a   :  { %6678 = sst [smem:[#allocation42_spill]] %s5723_s11  ;;  %v1823_v22 = vstv %s5723_s11 }
 0x17b   :  { %6680 = sst [smem:[#allocation17_spill]] %s5734_s6  ;;  %v6532_v25 = vstv %s5734_s6  ;;  %v1978_v50 = vadd.f32 %v1977_v44, %v1973_v32  ;;  %v1824_v42 = vmul.f32 %v5717_v57, %v1823_v22 }
 0x17c   :  { %s5762_s16 = sld [smem:[#allocation2 + $0x2c]]  ;;  %v1835_v11 = vmul.f32 %v5828_v17, %v6532_v25 }
 0x17d   :  { %s6685_s22 = sld [smem:[#allocation23_spill]]  ;;  %v6527_v23 = vstv %s5737_s30 }
 0x17e   :  { %s5777_s3 = sld [smem:[#allocation9]]  ;;  %v6525_v14 = vstv %s5748_s29  ;;  %v1841_v15 = vmul.f32 %v5841_v2, %v6527_v23 }
 0x17f   :  { %6684 = sst [smem:[#allocation18_spill]] %s5759_s14  ;;  %v1846_v27 = vmul.f32 %v5846_v39, %v6525_v14 }
 0x180   :  { %s5784_s8 = sld [smem:[#allocation2]] }
 0x181   :  { %s6686_s26 = sld [smem:[#allocation24_spill]] }
 0x182   :  { %s5791_s2 = sld [smem:[#allocation2 + $0x1]] }
 0x183   :  { %v6687_v26 = vstv %s6685_s22  ;;  %s5800_s10 = sld [smem:[#allocation2 + $0x2]] }
 0x184   :  { %v1982_v7 = vmul.f32 %v5525_v9, %v6687_v26  ;;  %s5807_s24 = sld [smem:[#allocation2 + $0x3]]  ;;  %v2224_v32 = vstv %s5777_s3 }
 0x185   :  { %s6688_s28 = sld [smem:[#allocation22_spill]] }
 0x186   :  { %s5817_s15 = sld [smem:[#allocation2 + $0x4]]  ;;  %v1983_v54 = vadd.f32 %v1982_v7, %v1978_v50  ;;  %v2233_v26 = vstv %s5784_s8  ;;  %v6523_v7 = vstv %s5759_s14 }
 0x187   :  { %v6689_v61 = vstv %s6686_s26  ;;  %s6690_s26 = sld [smem:[#allocation26_spill]]  ;;  %v2234_v1 = vmul.f32 %v5464_v30, %v2233_v26 }
 0x188   :  { %v1987_v20 = vmul.f32 %v5554_v34, %v6689_v61  ;;  %s5830_s13 = sld [smem:[#allocation6 + $0x9]]  ;;  %v2238_v50 = vstv %s5791_s2  ;;  %v1820_v61 = vadd.f32 %v1819_v0, %v1815_v38 }
 0x189   :  { %s6691_s18 = sld [smem:[#allocation46_spill]]  ;;  %v2239_v47 = vmul.f32 %v5486_v51, %v2238_v50  ;;  %v2235_v30 = vadd.f32 %v2234_v1, %v2224_v32  ;;  %v5905_v51 = vld [vmem:[%s6389_s5 + $0x3b1] sm:$0xff] }
 0x18a   :  { %s6693_s19 = sld [smem:[#allocation25_spill]]  ;;  %v1988_v41 = vadd.f32 %v1987_v20, %v1983_v54  ;;  %v2243_v54 = vstv %s5800_s10  ;;  %v2248_v0 = vstv %s5807_s24  ;;  %v5922_v32 = vld [vmem:[%s6389_s5 + $0xd2] sm:$0xff] }
 0x18b   :  { %v6692_v16 = vstv %s6688_s28  ;;  %s5866_s0 = sld [smem:[#allocation2 + $0x2d]]  ;;  %v2244_v26 = vmul.f32 %v5525_v9, %v2243_v54  ;;  %v1851_v9 = vmul.f32 %v5905_v51, %v6523_v7  ;;  %v2249_v1 = vmul.f32 %v5554_v34, %v2248_v0  ;;  %v3140_v54 = vld [vmem:[%s6389_s5 + $0x2c1] sm:$0x1] }
 0x18c   :  { %v1992_v13 = vmul.f32 %v5583_v40, %v6692_v16  ;;  %s5873_s28 = sld [smem:[#allocation2 + $0x6]]  ;;  %v6524_v16 = vstv %s5762_s16  ;;  %v2253_v50 = vstv %s5817_s15  ;;  %v5948_v0 = vld [vmem:[%s6389_s5 + $0xe0] sm:$0xff] }
 0x18d   :  { %v6694_v43 = vstv %s6690_s26  ;;  %s5876_s11 = sld [smem:[#allocation2 + $0x2e]] }
 0x18e   :  { %v2003_v44 = vmul.f32 %v5815_v18, %v6694_v43  ;;  %s6696_s26 = sld [smem:[#allocation28_spill]]  ;;  %v1993_v20 = vadd.f32 %v1992_v13, %v1988_v41  ;;  %v5898_v43 = vld [vmem:[%s6389_s5 + $0x1d1] sm:$0xff]  ;;  %v1825_v13 = vadd.f32 %v1824_v42, %v1820_v61  ;;  %v6528_v42 = vstv %s5830_s13 }
 0x18f   :  { %3031 = vst [vmem:[%s6691_s18 + $0x20] sm:$0xff] %v1574_v19  ;;  %s5856_s18 = sld [smem:[#allocation2 + $0x5]]  ;;  %v1862_v4 = vmul.f32 %v3140_v54, %v6528_v42 }
 0x190   :  { %v6695_v53 = vstv %s6693_s19  ;;  %s5890_s8 = sld [smem:[#allocation2 + $0x7]]  ;;  %v2004_v38 = vadd.f32 %v2003_v44, %v1993_v20  ;;  %v2240_v44 = vadd.f32 %v2239_v47, %v2235_v30  ;;  %v1836_v61 = vadd.f32 %v1835_v11, %v1825_v13  ;;  %v5928_v20 = vld [vmem:[%s6389_s5 + $0x2b2] sm:$0xff] }
 0x191   :  { %v2009_v19 = vmul.f32 %v5854_v35, %v6695_v53  ;;  %s5893_s12 = sld [smem:[#allocation2 + $0x2f]]  ;;  %v1856_v34 = vmul.f32 %v5928_v20, %v6524_v16  ;;  %v6530_v11 = vstv %s5866_s0  ;;  %v2254_v13 = vmul.f32 %v5583_v40, %v2253_v50 }
 0x192   :  { %s6697_s1 = sld [smem:[#allocation43_spill]]  ;;  %v2268_v14 = vstv %s5873_s28 }
 0x193   :  { %s5911_s10 = sld [smem:[#allocation2 + $0x8]]  ;;  %v6529_v23 = vstv %s5876_s11 }
 0x194   :  { %v6698_v41 = vstv %s6696_s26  ;;  %s5917_s24 = sld [smem:[#allocation2 + $0x30]] }
 0x195   :  { %v2014_v53 = vmul.f32 %v5884_v58, %v6698_v41  ;;  %s6699_s26 = sld [smem:[#allocation44_spill]]  ;;  %v2010_v41 = vadd.f32 %v2009_v19, %v2004_v38  ;;  %v2263_v30 = vstv %s5856_s18  ;;  %v2245_v19 = vadd.f32 %v2244_v26, %v2240_v44  ;;  %v5963_v26 = vld [vmem:[%s6389_s5 + $0x1e0] sm:$0xff] }
 0x196   :  { %s5937_s19 = sld [smem:[#allocation2 + $0x9]]  ;;  %v2264_v40 = vmul.f32 %v5815_v18, %v2263_v30  ;;  %v2273_v54 = vstv %s5890_s8  ;;  %v2269_v30 = vmul.f32 %v5854_v35, %v2268_v14  ;;  %v3208_v35 = vld [vmem:[%s6389_s5 + $0x1e1] sm:$0xff] }
 0x197   :  { %s5943_s22 = sld [smem:[#allocation2 + $0x31]]  ;;  %v2015_v38 = vadd.f32 %v2014_v53, %v2010_v41  ;;  %v2250_v44 = vadd.f32 %v2249_v1, %v2245_v19  ;;  %v6531_v18 = vstv %s5893_s12  ;;  %v5988_v19 = vld [vmem:[%s6389_s5 + $0x3c0] sm:$0xff] }
 0x198   :  { %v6700_v59 = vstv %s6697_s1  ;;  %s6701_s14 = sld [smem:[#allocation13_spill]] }
 0x199   :  { %v2019_v47 = vmul.f32 %v5898_v43, %v6700_v59  ;;  %v1842_v59 = vadd.f32 %v1841_v15, %v1836_v61  ;;  %s5955_s18 = sld [smem:[#allocation2 + $0xa]]  ;;  %v2255_v41 = vadd.f32 %v2254_v13, %v2250_v44  ;;  %v2278_v42 = vstv %s5911_s10 }
 0x19a   :  { %s5975_s28 = sld [smem:[#allocation2 + $0xb]]  ;;  %v1873_v13 = vmul.f32 %v5988_v19, %v6529_v23  ;;  %v1882_v14 = vstv %s5917_s24  ;;  %v2274_v44 = vmul.f32 %v5884_v58, %v2273_v54  ;;  %v3210_v58 = vld [vmem:[%s6389_s5 + $0xe2] sm:$0xff]  ;;  %v2279_v54 = vmul.f32 %v5898_v43, %v2278_v42 }
 0x19b   :  { %v6702_v7 = vstv %s6699_s26  ;;  %v1847_v15 = vadd.f32 %v1846_v27, %v1842_v59  ;;  %v2020_v53 = vadd.f32 %v2019_v47, %v2015_v38  ;;  %v3206_v27 = vld [vmem:[%s6389_s5 + $0xe1] sm:$0xff]  ;;  %s6704_s6 = sld [smem:[#allocation30_spill]]  ;;  %v6705_v38 = vstv %s5372_s7 }
 0x19c   :  { %v2024_v16 = vmul.f32 %v5922_v32, %v6702_v7  ;;  %v5969_v7 = vld [vmem:[%s6389_s5 + $0x2c0] sm:$0xff]  ;;  %s5994_s8 = sld [smem:[#allocation2 + $0xc]] }
 0x19d   :  { %v1867_v1 = vmul.f32 %v5969_v7, %v6530_v11  ;;  %v1852_v47 = vadd.f32 %v1851_v9, %v1847_v15  ;;  %v2265_v9 = vadd.f32 %v2264_v40, %v2255_v41  ;;  %v6007_v15 = vld [vmem:[%s6389_s5 + $0x2c1] sm:$0xff]  ;;  %v2283_v11 = vstv %s5937_s19  ;;  %s6012_s10 = sld [smem:[#allocation2 + $0xd]] }
 0x19e   :  { %v6703_v50 = vstv %s6701_s14  ;;  %v2025_v59 = vadd.f32 %v2024_v16, %v2020_v53  ;;  %v1878_v40 = vmul.f32 %v6007_v15, %v6531_v18  ;;  %v1887_v41 = vstv %s5943_s22  ;;  %s6030_s19 = sld [smem:[#allocation2 + $0xe]] }
 0x19f   :  { %v2035_v61 = vmul.f32 %v5948_v0, %v6703_v50  ;;  %v2041_v50 = vmul.f32 %v5963_v26, %v6705_v38  ;;  %v1857_v16 = vadd.f32 %v1856_v34, %v1852_v47  ;;  %v2270_v34 = vadd.f32 %v2269_v30, %v2265_v9  ;;  %v6025_v47 = vld [vmem:[%s6389_s5 + $0x3c1] sm:$0xff]  ;;  %s6104_s7 = sld [smem:[#allocation9 + $0x2]] }
 0x1a0   :  { %v2293_v25 = vstv %s5955_s18  ;;  %v1863_v30 = vsub.f32 %v1831_v36, %v1862_v4  ;;  %v1883_v43 = vmul.f32 %v6025_v47, %v1882_v14  ;;  %v2298_v12 = vstv %s5975_s28  ;;  %s6709_s18 = sld [smem:[#allocation27_spill]] }
 0x1a1   :  { %v2036_v53 = vadd.f32 %v2035_v61, %v2025_v59  ;;  %v6706_v38 = vstv %s6704_s6  ;;  %v1868_v61 = vadd.f32 %v1867_v1, %v1857_v16  ;;  %v2275_v42 = vadd.f32 %v2274_v44, %v2270_v34  ;;  %s6076_s28 = sld [smem:[#allocation2 + $0x12]] }
 0x1a2   :  { %v2046_v23 = vmul.f32 %v3206_v27, %v6706_v38  ;;  %v6707_v38 = vstv %s5421_s20  ;;  %v2284_v1 = vmul.f32 %v5922_v32, %v2283_v11  ;;  %s6047_s20 = sld [smem:[#allocation2 + $0xf]]  ;;  %v2294_v63 = vmul.f32 %v5948_v0, %v2293_v25  ;;  %v3153_v32 = vld [vmem:[%s6389_s5 + $0xa1] sm:$0x1] }
 0x1a3   :  { %v2042_v59 = vadd.f32 %v2041_v50, %v2036_v53  ;;  %v2051_v18 = vmul.f32 %v3208_v35, %v6707_v38  ;;  %v1874_v9 = vadd.f32 %v1873_v13, %v1868_v61  ;;  %v6042_v50 = vld [vmem:[%s6389_s5 + $0x2c2] sm:$0xff]  ;;  %v6708_v53 = vstv %s5442_s25  ;;  %s6060_s25 = sld [smem:[#allocation2 + $0x10]] }
 0x1a4   :  { %v2056_v38 = vmul.f32 %v3210_v58, %v6708_v53  ;;  %v1888_v4 = vmul.f32 %v6042_v50, %v1887_v41  ;;  %v2280_v62 = vadd.f32 %v2279_v54, %v2275_v42  ;;  %v6710_v11 = vstv %s5453_s9  ;;  %s6068_s9 = sld [smem:[#allocation2 + $0x11]] }
 0x1a5   :  { %v2047_v16 = vadd.f32 %v2046_v23, %v2042_v59  ;;  %v1879_v36 = vadd.f32 %v1878_v40, %v1874_v9  ;;  %v2066_v13 = vmul.f32 %v5603_v3, %v6710_v11  ;;  %v2303_v44 = vstv %s5994_s8  ;;  %s6088_s6 = sld [smem:[#allocation2 + $0x13]] }
 0x1a6   :  { %v1893_v34 = vrot.slane %v1863_v30, %v3833_v24  ;;  %v2285_v54 = vadd.f32 %v2284_v1, %v2280_v62  ;;  %v2299_v61 = vmul.f32 %v5963_v26, %v2298_v12  ;;  %v6711_v40 = vstv %s5479_s21  ;;  %v3164_v1 = vld [vmem:[%s6389_s5 + $0xb1] sm:$0x1]  ;;  %s6121_s26 = sld [smem:[#allocation6]] }
 0x1a7   :  { %v2052_v23 = vadd.f32 %v2051_v18, %v2047_v16  ;;  %v1884_v25 = vadd.f32 %v1883_v43, %v1879_v36  ;;  %v2071_v59 = vmul.f32 %v5624_v29, %v6711_v40  ;;  %v2308_v18 = vstv %s6012_s10  ;;  %s6713_s10 = sld [smem:[#allocation14_spill]] }
 0x1a8   :  { %v6712_v3 = vstv %s6709_s18  ;;  %v2295_v9 = vadd.f32 %v2294_v63, %v2285_v54  ;;  %v2304_v16 = vmul.f32 %v3206_v27, %v2303_v44  ;;  %v2076_v30 = vmul.f32 %v5660_v8, %v1753_v60  ;;  %v3310_v60 = vld [vmem:[%s6389_s5 + $0xf0] sm:$0xff]  ;;  %s6716_s18 = sld [smem:[#allocation29_spill]] }
 0x1a9   :  { %v2057_v0 = vadd.f32 %v2056_v38, %v2052_v23  ;;  %v1907_v42 = vmul.f32 %v3153_v32, %v6712_v3  ;;  %v1889_v53 = vadd.f32 %v1888_v4, %v1884_v25  ;;  %v2313_v12 = vstv %s6030_s19  ;;  %s6100_s19 = sld [smem:[#allocation2 + $0x19]]  ;;  %v3314_v54 = vld [vmem:[%s6389_s5 + $0xf1] sm:$0xff] }
 0x1aa   :  { %v2300_v26 = vadd.f32 %v2299_v61, %v2295_v9  ;;  %v2309_v29 = vmul.f32 %v3208_v35, %v2308_v18  ;;  %v2081_v27 = vmul.f32 %v5697_v49, %v1758_v10  ;;  %v2324_v8 = vstv %s6047_s20  ;;  %v3312_v49 = vld [vmem:[%s6389_s5 + $0x1f0] sm:$0xff]  ;;  %s6130_s15 = sld [smem:[#allocation2 + $0x1b]] }
 0x1ab   :  { %v2067_v11 = vadd.f32 %v2066_v13, %v2057_v0  ;;  %v1894_v43 = vadd.f32 %v1893_v34, %v1889_v53  ;;  %v1908_v4 = vsub.f32 %v5395_v55, %v1907_v42  ;;  %v2314_v62 = vmul.f32 %v3210_v58, %v2313_v12  ;;  %s6721_s20 = sld [smem:[#allocation45_spill]] }
 0x1ac   :  { %v2305_v35 = vadd.f32 %v2304_v16, %v2300_v26  ;;  %v2086_v10 = vmul.f32 %v5717_v57, %v1763_v46  ;;  %v2330_v32 = vstv %s6060_s25  ;;  %v2325_v44 = vmul.f32 %v3310_v60, %v2324_v8  ;;  %v3176_v46 = vld [vmem:[%s6389_s5 + $0xc1] sm:$0x1]  ;;  %s6116_s25 = sld [smem:[#allocation2 + $0x1a]] }
 0x1ad   :  { %v2072_v38 = vadd.f32 %v2071_v59, %v2067_v11  ;;  %v1895_v63 = vsel %vm84_vm0, %v1894_v43, %v1889_v53  ;;  %v6714_v55 = vstv %s6713_s10  ;;  %v2096_v34 = vmul.f32 %v5828_v17, %v1773_v5  ;;  %s6717_s10 = sld [smem:[#allocation46_spill]]  ;;  %v3316_v17 = vld [vmem:[%s6389_s5 + $0x1f1] sm:$0xff]  ;;  %v3200_v8 = vld [vmem:[%s6389_s5 + $0xe1] sm:$0x1] }
 0x1ae   :  { %v1896_v23 = vmax.f32 %v1895_v63, 0.0  ;;  %v1937_v13 = vmul.f32 %v3164_v1, %v6714_v55  ;;  %v2310_v58 = vadd.f32 %v2309_v29, %v2305_v35  ;;  %v2335_v61 = vstv %s6068_s9  ;;  %v3318_v11 = vld [vmem:[%s6389_s5 + $0xf2] sm:$0xff]  ;;  %s6144_s14 = sld [smem:[#allocation2 + $0x1c]] }
 0x1af   :  { %v2077_v36 = vadd.f32 %v2076_v30, %v2072_v38  ;;  %v2331_v0 = vmul.f32 %v3312_v49, %v2330_v32  ;;  %v2101_v5 = vmul.f32 %v5841_v2, %v1778_v31  ;;  %v2340_v59 = vstv %s6076_s28  ;;  %v3188_v31 = vld [vmem:[%s6389_s5 + $0xd1] sm:$0x1]  ;;  %s6146_s21 = sld [smem:[#allocation6 + $0x1]] }
 0x1b0   :  { %v2315_v25 = vadd.f32 %v2314_v62, %v2310_v58  ;;  %v1938_v18 = vsub.f32 %v1908_v4, %v1937_v13  ;;  %v6720_v3 = vstv %s6716_s18  ;;  %v2336_v16 = vmul.f32 %v3314_v54, %v2335_v61  ;;  %s6152_s27 = sld [smem:[#allocation2 + $0x1d]] }
 0x1b1   :  { %v2082_v57 = vadd.f32 %v2081_v27, %v2077_v36  ;;  %v1967_v42 = vmul.f32 %v3176_v46, %v6720_v3  ;;  %v2106_v53 = vmul.f32 %v5846_v39, %v1783_v33  ;;  %v2345_v30 = vstv %s6088_s6  ;;  %s2223_s6 = ssub.f32 %s6104_s7, %s5777_s3  ;;  %v3250_v3 = vld [vmem:[%s6389_s5 + $0x2d0] sm:$0xff] }
 0x1b2   :  { %v2326_v9 = vadd.f32 %v2325_v44, %v2315_v25  ;;  %v2341_v26 = vmul.f32 %v3316_v17, %v2340_v59  ;;  %v2111_v43 = vmul.f32 %v5905_v51, %v1788_v21  ;;  %v2355_v1 = vstv %s6100_s19  ;;  %s6725_s23 = sld [smem:[#allocation15_spill]] }
 0x1b3   :  { %3151 = vst [vmem:[%s6717_s10 + $0x28] sm:$0xff] %v1896_v23  ;;  %v2087_v40 = vadd.f32 %v2086_v10, %v2082_v57  ;;  %v1968_v33 = vsub.f32 %v1938_v18, %v1967_v42  ;;  %v6724_v39 = vstv %s6721_s20  ;;  %v2346_v60 = vmul.f32 %v3318_v11, %v2345_v30  ;;  %s6165_s19 = sld [smem:[#allocation2 + $0x1e]]  ;;  %v3273_v10 = vld [vmem:[%s6389_s5 + $0xc1] sm:$0x1] }
 0x1b4   :  { %v2332_v12 = vadd.f32 %v2331_v0, %v2326_v9  ;;  %v1998_v38 = vmul.f32 %v3188_v31, %v6724_v39  ;;  %v2116_v21 = vmul.f32 %v5928_v20, %v1793_v37  ;;  %v2360_v51 = vstv %s6116_s25  ;;  %s6167_s20 = sld [smem:[#allocation6 + $0x2]] }
 0x1b5   :  { %v2097_v2 = vadd.f32 %v2096_v34, %v2087_v40  ;;  %v2356_v62 = vmul.f32 %v5969_v7, %v2355_v1  ;;  %v2126_v36 = vmul.f32 %v5969_v7, %v1803_v56  ;;  %v2228_v37 = vstv %s6121_s26  ;;  %s6178_s25 = sld [smem:[#allocation2 + $0x1f]]  ;;  %v3212_v56 = vld [vmem:[%s6389_s5 + $0x2a1] sm:$0x1] }
 0x1b6   :  { %v2337_v27 = vadd.f32 %v2336_v16, %v2332_v12  ;;  %v2365_v20 = vstv %s6130_s15  ;;  %v1999_v49 = vsub.f32 %v1968_v33, %v1998_v38  ;;  %v2361_v13 = vmul.f32 %v5988_v19, %v2360_v51  ;;  %s6190_s15 = sld [smem:[#allocation2 + $0x20]]  ;;  %v3254_v38 = vld [vmem:[%s6389_s5 + $0x2d1] sm:$0xff] }
 0x1b7   :  { %v2102_v29 = vadd.f32 %v2101_v5, %v2097_v2  ;;  %v2131_v58 = vmul.f32 %v5988_v19, %v1808_v6  ;;  %v2370_v44 = vstv %s6144_s14  ;;  %v2136_v46 = vmul.f32 %v6007_v15, %v1813_v48  ;;  %s6195_s4 = sld [smem:[#allocation6 + $0x3]]  ;;  %v3284_v6 = vld [vmem:[%s6389_s5 + $0xd1] sm:$0x1] }
 0x1b8   :  { %v2342_v35 = vadd.f32 %v2341_v26, %v2337_v27  ;;  %v6728_v32 = vstv %s6725_s23  ;;  %v2229_v57 = vmul.f32 %v3273_v10, %v2228_v37  ;;  %v2366_v54 = vmul.f32 %v6007_v15, %v2365_v20  ;;  %s6206_s14 = sld [smem:[#allocation2 + $0x21]]  ;;  %v3224_v15 = vld [vmem:[%s6389_s5 + $0x2b1] sm:$0x1] }
 0x1b9   :  { %v2107_v4 = vadd.f32 %v2106_v53, %v2102_v29  ;;  %v2030_v23 = vmul.f32 %v3200_v8, %v6728_v32  ;;  %v2225_v25 = vstv %s2223_s6  ;;  %v2258_v19 = vstv %s6146_s21  ;;  %s6732_s21 = sld [smem:[#allocation32_spill]]  ;;  %v3296_v53 = vld [vmem:[%s6389_s5 + $0xe1] sm:$0x1] }
 0x1ba   :  { %v2347_v55 = vadd.f32 %v2346_v60, %v2342_v35  ;;  %v2375_v0 = vstv %s6152_s27  ;;  %v2061_v40 = vmul.f32 %v3212_v56, %v1738_v52  ;;  %v2371_v17 = vmul.f32 %v6025_v47, %v2370_v44  ;;  %s6221_s27 = sld [smem:[#allocation2 + $0x22]]  ;;  %v3258_v44 = vld [vmem:[%s6389_s5 + $0x2d2] sm:$0xff] }
 0x1bb   :  { %v2112_v63 = vadd.f32 %v2111_v43, %v2107_v4  ;;  %v2031_v48 = vsub.f32 %v1999_v49, %v2030_v23  ;;  %v2141_v18 = vmul.f32 %v6025_v47, %v1818_v28  ;;  %v2385_v42 = vstv %s6165_s19  ;;  %s6223_s6 = sld [smem:[#allocation6 + $0x5]]  ;;  %v3252_v47 = vld [vmem:[%s6389_s5 + $0x3d0] sm:$0xff] }
 0x1bc   :  { %v2357_v34 = vadd.f32 %v2356_v62, %v2347_v55  ;;  %v2230_v52 = vsub.f32 %v2225_v25, %v2229_v57  ;;  %v2259_v9 = vmul.f32 %v3284_v6, %v2258_v19  ;;  %s6733_s18 = sld [smem:[#allocation17_spill]]  ;;  %v2376_v31 = vmul.f32 %v6042_v50, %v2375_v0  ;;  %v3262_v0 = vld [vmem:[%s6389_s5 + $0x2e0] sm:$0xff] }
 0x1bd   :  { %v2117_v7 = vadd.f32 %v2116_v21, %v2112_v63  ;;  %v2146_v28 = vmul.f32 %v6042_v50, %v1823_v22  ;;  %v2288_v11 = vstv %s6167_s20  ;;  %v2390_v30 = vstv %s6178_s25  ;;  %s6237_s23 = sld [smem:[#allocation2 + $0x23]]  ;;  %v3236_v22 = vld [vmem:[%s6389_s5 + $0x2c1] sm:$0x1]  ;;  %v3256_v63 = vld [vmem:[%s6389_s5 + $0x3d1] sm:$0xff] }
 0x1be   :  { %v2362_v5 = vadd.f32 %v2361_v13, %v2357_v34  ;;  %v2062_v12 = vsub.f32 %v2031_v48, %v2061_v40  ;;  %v2386_v1 = vmul.f32 %v3250_v3, %v2385_v42  ;;  %s6736_s25 = sld [smem:[#allocation36_spill]]  ;;  %v2395_v27 = vstv %s6190_s15  ;;  %v3248_v13 = vld [vmem:[%s6389_s5 + $0x2d1] sm:$0x1]  ;;  %v3320_v48 = vld [vmem:[%s6389_s5 + $0x2c1] sm:$0x1] }
 0x1bf   :  { %v2127_v61 = vadd.f32 %v2126_v36, %v2117_v7  ;;  %v6734_v26 = vstv %s6732_s21  ;;  %s6250_s2 = sld [smem:[#allocation2 + $0x24]]  ;;  %v2260_v60 = vsub.f32 %v2230_v52, %v2259_v9  ;;  %v2289_v8 = vmul.f32 %v3296_v53, %v2288_v11  ;;  %v3308_v36 = vld [vmem:[%s6389_s5 + $0xf1] sm:$0x1] }
 0x1c0   :  { %v2367_v16 = vadd.f32 %v2366_v54, %v2362_v5  ;;  %v2091_v29 = vmul.f32 %v3224_v15, %v6734_v26  ;;  %s6252_s3 = sld [smem:[#allocation6 + $0x6]]  ;;  %v2391_v21 = vmul.f32 %v3252_v47, %v2390_v30  ;;  %v6737_v35 = vstv %s5737_s30 }
 0x1c1   :  { %v2132_v59 = vadd.f32 %v2131_v58, %v2127_v61  ;;  %v2163_v62 = vmul.f32 %v3252_v47, %v6737_v35  ;;  %v2319_v10 = vstv %s6195_s4  ;;  %v2400_v37 = vstv %s6206_s14  ;;  %s6264_s15 = sld [smem:[#allocation2 + $0x25]] }
 0x1c2   :  { %v2372_v43 = vadd.f32 %v2371_v17, %v2367_v16  ;;  %v6735_v33 = vstv %s6733_s18  ;;  %v2092_v20 = vsub.f32 %v2062_v12, %v2091_v29  ;;  %s6739_s26 = sld [smem:[#allocation18_spill]]  ;;  %v2396_v55 = vmul.f32 %v3254_v38, %v2395_v27  ;;  %v3264_v16 = vld [vmem:[%s6389_s5 + $0x3e0] sm:$0xff] }
 0x1c3   :  { %v2137_v2 = vadd.f32 %v2136_v46, %v2132_v59  ;;  %v2157_v39 = vmul.f32 %v3250_v3, %v6735_v33  ;;  %v6740_v7 = vstv %s5748_s29  ;;  %s6741_s14 = sld [smem:[#allocation16_spill]]  ;;  %v2405_v46 = vstv %s6221_s27  ;;  %v3266_v29 = vld [vmem:[%s6389_s5 + $0x2e1] sm:$0xff] }
 0x1c4   :  { %v2377_v4 = vadd.f32 %v2376_v31, %v2372_v43  ;;  %v6738_v49 = vstv %s6736_s25  ;;  %v2168_v58 = vmul.f32 %v3254_v38, %v6740_v7  ;;  %s6277_s9 = sld [smem:[#allocation2 + $0x26]]  ;;  %v2290_v57 = vsub.f32 %v2260_v60, %v2289_v8  ;;  %v3332_v43 = vld [vmem:[%s6389_s5 + $0x2d1] sm:$0x1] }
 0x1c5   :  { %v2142_v50 = vadd.f32 %v2141_v18, %v2137_v2  ;;  %v2121_v32 = vmul.f32 %v3236_v22, %v6738_v49  ;;  %v2320_v34 = vmul.f32 %v3308_v36, %v2319_v10  ;;  %v2401_v61 = vmul.f32 %v3256_v63, %v2400_v37  ;;  %s6279_s1 = sld [smem:[#allocation6 + $0x7]]  ;;  %v3260_v2 = vld [vmem:[%s6389_s5 + $0x2e1] sm:$0x1]  ;;  %v3270_v49 = vld [vmem:[%s6389_s5 + $0x2e2] sm:$0xff] }
 0x1c6   :  { %v2387_v23 = vadd.f32 %v2386_v1, %v2377_v4  ;;  %v2350_v40 = vstv %s6223_s6  ;;  %v2415_v5 = vstv %s6237_s23  ;;  %s6291_s27 = sld [smem:[#allocation2 + $0x27]]  ;;  %v2406_v3 = vmul.f32 %v3258_v44, %v2405_v46  ;;  %v3358_v46 = vld [vmem:[%s6389_s5 + $0x2f0] sm:$0xff] }
 0x1c7   :  { %v2147_v51 = vadd.f32 %v2146_v28, %v2142_v50  ;;  %v2122_v17 = vsub.f32 %v2092_v20, %v2121_v32  ;;  %v6744_v52 = vstv %s5762_s16  ;;  %v2420_v31 = vstv %s6250_s2  ;;  %s6301_s6 = sld [smem:[#allocation2 + $0x28]]  ;;  %v3344_v32 = vld [vmem:[%s6389_s5 + $0x2e1] sm:$0x1] }
 0x1c8   :  { %v2392_v54 = vadd.f32 %v2391_v21, %v2387_v23  ;;  %v6742_v6 = vstv %s6739_s26  ;;  %v2178_v9 = vmul.f32 %v3258_v44, %v6744_v52  ;;  %v2321_v28 = vsub.f32 %v2290_v57, %v2320_v34  ;;  %s6306_s16 = sld [smem:[#allocation6 + $0x8]]  ;;  %v3268_v21 = vld [vmem:[%s6389_s5 + $0x3e1] sm:$0xff] }
 0x1c9   :  { %v2158_v56 = vadd.f32 %v2157_v39, %v2147_v51  ;;  %v2173_v19 = vmul.f32 %v3256_v63, %v6742_v6  ;;  %v6743_v15 = vstv %s6741_s14  ;;  %v2351_v47 = vmul.f32 %v3320_v48, %v2350_v40  ;;  %s6318_s19 = sld [smem:[#allocation2 + $0x29]]  ;;  %v3360_v48 = vld [vmem:[%s6389_s5 + $0x3f0] sm:$0xff] }
 0x1ca   :  { %v2152_v59 = vmul.f32 %v3248_v13, %v6743_v15  ;;  %v2397_v18 = vadd.f32 %v2396_v55, %v2392_v54  ;;  %v2416_v11 = vmul.f32 %v3262_v0, %v2415_v5  ;;  %v6745_v12 = vstv %s5866_s0  ;;  %s6340_s14 = sld [smem:[#allocation2 + $0x2b]] }
 0x1cb   :  { %v2164_v25 = vadd.f32 %v2163_v62, %v2158_v56  ;;  %v2189_v26 = vmul.f32 %v3262_v0, %v6745_v12  ;;  %v2380_v1 = vstv %s6252_s3  ;;  %v2425_v22 = vstv %s6264_s15  ;;  %s6328_s3 = sld [smem:[#allocation2 + $0x2a]]  ;;  %v3356_v0 = vld [vmem:[%s6389_s5 + $0x2f1] sm:$0x1] }
 0x1cc   :  { %v2402_v53 = vadd.f32 %v2401_v61, %v2397_v18  ;;  %v2153_v50 = vsub.f32 %v2122_v17, %v2152_v59  ;;  %v2421_v39 = vmul.f32 %v3264_v16, %v2420_v31  ;;  %v6746_v27 = vstv %s5830_s13  ;;  %s6348_s29 = sld [smem:[#allocation2 + $0x2c]]  ;;  %v3364_v31 = vld [vmem:[%s6389_s5 + $0x3f1] sm:$0xff] }
 0x1cd   :  { %v2169_v42 = vadd.f32 %v2168_v58, %v2164_v25  ;;  %v2184_v60 = vmul.f32 %v3260_v2, %v6746_v27  ;;  %v6747_v8 = vstv %s5876_s11  ;;  %v2430_v51 = vstv %s6277_s9 }
 0x1ce   :  { %v2407_v33 = vadd.f32 %v2406_v3, %v2402_v53  ;;  %v2195_v4 = vmul.f32 %v3264_v16, %v6747_v8  ;;  %v2352_v35 = vsub.f32 %v2321_v28, %v2351_v47  ;;  %v2381_v62 = vmul.f32 %v3332_v43, %v2380_v1 }
 0x1cf   :  { %v2174_v30 = vadd.f32 %v2173_v19, %v2169_v42  ;;  %v2426_v36 = vmul.f32 %v3266_v29, %v2425_v22  ;;  %v6748_v37 = vstv %s5893_s12  ;;  %v2410_v23 = vstv %s6279_s1 }
 0x1d0   :  { %v2417_v63 = vadd.f32 %v2416_v11, %v2407_v33  ;;  %v2200_v20 = vmul.f32 %v3266_v29, %v6748_v37  ;;  %v2435_v55 = vstv %s6291_s27  ;;  %v2431_v56 = vmul.f32 %v3268_v21, %v2430_v51  ;;  %v3366_v11 = vld [vmem:[%s6389_s5 + $0x2f2] sm:$0xff] }
 0x1d1   :  { %v2179_v38 = vadd.f32 %v2178_v9, %v2174_v30  ;;  %v2185_v7 = vsub.f32 %v2153_v50, %v2184_v60  ;;  %v2205_v44 = vmul.f32 %v3268_v21, %v1882_v14  ;;  %v2446_v57 = vstv %s6301_s6 }
 0x1d2   :  { %v2422_v13 = vadd.f32 %v2421_v39, %v2417_v63  ;;  %v2382_v34 = vsub.f32 %v2352_v35, %v2381_v62  ;;  %v2411_v54 = vmul.f32 %v3344_v32, %v2410_v23  ;;  %v2436_v25 = vmul.f32 %v3270_v49, %v2435_v55 }
 0x1d3   :  { %v2190_v10 = vadd.f32 %v2189_v26, %v2179_v38  ;;  %v2210_v19 = vmul.f32 %v3270_v49, %v1887_v41  ;;  %v2441_v14 = vstv %s6306_s16  ;;  %v2452_v40 = vstv %s6318_s19  ;;  %v3362_v41 = vld [vmem:[%s6389_s5 + $0x2f1] sm:$0xff] }
 0x1d4   :  { %v2427_v61 = vadd.f32 %v2426_v36, %v2422_v13  ;;  %v2447_v17 = vmul.f32 %v3358_v46, %v2446_v57  ;;  %v2215_v59 = vrot.slane %v2185_v7, %v3833_v24  ;;  %v2457_v18 = vstv %s6328_s3 }
 0x1d5   :  { %v2196_v58 = vadd.f32 %v2195_v4, %v2190_v10  ;;  %v2412_v3 = vsub.f32 %v2382_v34, %v2411_v54  ;;  %v2442_v52 = vmul.f32 %v3356_v0, %v2441_v14  ;;  %v2453_v9 = vmul.f32 %v3360_v48, %v2452_v40 }
 0x1d6   :  { %v2432_v5 = vadd.f32 %v2431_v56, %v2427_v61  ;;  %v2462_v2 = vstv %s6340_s14  ;;  %v2458_v47 = vmul.f32 %v3362_v41, %v2457_v18  ;;  %v2467_v30 = vstv %s6348_s29 }
 0x1d7   :  { %v2201_v6 = vadd.f32 %v2200_v20, %v2196_v58  ;;  %v2443_v12 = vsub.f32 %v2412_v3, %v2442_v52  ;;  %v2463_v29 = vmul.f32 %v3364_v31, %v2462_v2  ;;  %v2468_v50 = vmul.f32 %v3366_v11, %v2467_v30 }
 0x1d8   :  { %v2437_v42 = vadd.f32 %v2436_v25, %v2432_v5 }
 0x1d9   :  { %v2206_v15 = vadd.f32 %v2205_v44, %v2201_v6  ;;  %v2473_v39 = vrot.slane %v2443_v12, %v3833_v24 }
 0x1da   :  { %v2448_v28 = vadd.f32 %v2447_v17, %v2437_v42 }
 0x1db   :  { %v2211_v16 = vadd.f32 %v2210_v19, %v2206_v15 }
 0x1dc   :  { %v2454_v26 = vadd.f32 %v2453_v9, %v2448_v28 }
 0x1dd   :  { %v2216_v53 = vadd.f32 %v2215_v59, %v2211_v16 }
 0x1de   :  { %v2459_v22 = vadd.f32 %v2458_v47, %v2454_v26 }
 0x1df   :  { %v2217_v43 = vsel %vm84_vm0, %v2216_v53, %v2211_v16 }
 0x1e0   :  { %v2218_v1 = vmax.f32 %v2217_v43, 0.0  ;;  %v2464_v33 = vadd.f32 %v2463_v29, %v2459_v22 }
 0x1e2   :  { %3271 = vst [vmem:[%s6717_s10 + $0x30] sm:$0xff] %v2218_v1  ;;  %v2469_v38 = vadd.f32 %v2468_v50, %v2464_v33 }
 0x1e4   :  { %v2474_v27 = vadd.f32 %v2473_v39, %v2469_v38 }
 0x1e6   :  { %v2475_v60 = vsel %vm84_vm0, %v2474_v27, %v2469_v38 }
 0x1e7   :  { %v2476_v8 = vmax.f32 %v2475_v60, 0.0 }
 0x1e9   :  { %3367 = vst [vmem:[%s6717_s10 + $0x38] sm:$0xff] %v2476_v8 }
 0x1ea   :  { %2483 = vsyncpa [#allocation3], 1 }
 0x1eb   :  { %2484 = vsyncpa [#allocation5], 1 }
 0x1ec   :  { %2485 = vsyncpa [#allocation8], 1 }

</bundles_post_ra>
